<compile_context>
chip_gen: v7x
topology: tpu7x:2x2x1
jax: 0.10.0
libtpu: 0.0.40
codegen_flags: <defaults>
</compile_context>

<pallas_src>
import functools

import jax
import jax.numpy as jnp
from jax.experimental import pallas as pl
from jax.experimental.pallas import tpu as pltpu

C_PAD = 128        # output-channel padding = one full lane width (lane-dense vst)
LATENT_PAD = 128   # latent head padded to one lane width


# ----------------------------------------------------------------------------
# Pallas kernels
# ----------------------------------------------------------------------------
def _mm_bias_act_kernel(act, x_ref, w_ref, b_ref, o_ref):
    # x: (tm, K) bf16, w: (K, N) bf16, b: (1, N) f32 -> o: (tm, N)
    acc = jnp.dot(x_ref[...], w_ref[...], preferred_element_type=jnp.float32)
    acc = acc + b_ref[...]                      # f32 epilogue (v5e-safe: no bf16 VPU/EUP)
    if act == "relu":
        acc = jnp.maximum(acc, 0.0)
    elif act == "sigmoid":
        acc = jax.nn.sigmoid(acc)
    o_ref[...] = acc.astype(o_ref.dtype)


def _deconv_mm_kernel(act, x_ref, w_ref, b_ref, o_ref):
    # All 4 ConvTranspose parity classes in ONE grid step: 4 back-to-back MXU
    # matmuls from a single (4, tm, K) VMEM block (one launch, one weight DMA).
    for g in range(4):
        acc = jnp.dot(x_ref[g], w_ref[g], preferred_element_type=jnp.float32)
        acc = acc + b_ref[g]
        if act == "relu":
            acc = jnp.maximum(acc, 0.0)
        elif act == "sigmoid":
            acc = jax.nn.sigmoid(acc)
        o_ref[g] = acc.astype(o_ref.dtype)


def _latent_kernel(x_ref, wml_ref, bml_ref, eps_ref, wd_ref, bd_ref,
                   mu_ref, lv_ref, d_ref):
    # Fused: [fc_mu | fc_log_var] (one 256-wide MXU pass) + reparameterize + fc_decode.
    x = x_ref[...]                                                   # (B, 2048) bf16
    ml = jnp.dot(x, wml_ref[...], preferred_element_type=jnp.float32) + bml_ref[...]
    mu = ml[:, :LATENT_PAD]                                          # lane-tile aligned slices
    lv = ml[:, LATENT_PAD:]
    # Padded lanes: mu=0, lv=0, eps=0  ->  z stays exactly 0 there, so the
    # zero-padded rows of fc_decode contribute nothing.
    z = mu + eps_ref[...] * jnp.exp(0.5 * lv)
    d = jnp.dot(z.astype(jnp.bfloat16), wd_ref[...],
                preferred_element_type=jnp.float32) + bd_ref[...]
    mu_ref[...] = mu
    lv_ref[...] = lv
    d_ref[...] = d.astype(d_ref.dtype)


# ----------------------------------------------------------------------------
# Pallas call wrappers
# ----------------------------------------------------------------------------
def _pick_tile_m(m, max_tile=1024):
    """M-axis tile: full block when small, bounded multiple-of-8 tile otherwise.

    When m >= 256, cap the tile so there are >=2 grid steps (keeps both v7x
    TensorCores busy); non-dividing M falls back to a pl.cdiv grid whose final
    partial tile is clipped on writeback.
    """
    if m >= 256:
        max_tile = min(max_tile, max(128, ((m // 2 + 7) // 8) * 8))
    if m <= max_tile:
        return m
    max_tile -= max_tile % 8
    for t in range(max_tile, 7, -8):
        if m % t == 0:
            return t
    return max_tile


_COMPILER_PARAMS = pltpu.CompilerParams(
    dimension_semantics=("parallel",),
    vmem_limit_bytes=32 * 1024 * 1024,   # ample for these tiles; < v7x's 64 MiB physical
)


def matmul_bias_act(x, w, b, act, out_dtype=jnp.bfloat16):
    """act(x @ w + b): x (M, K) bf16, w (K, N) bf16, b (1, N) f32 -> (M, N)."""
    m, k = x.shape
    n = w.shape[-1]
    tm = _pick_tile_m(m)
    return pl.pallas_call(
        functools.partial(_mm_bias_act_kernel, act),
        out_shape=jax.ShapeDtypeStruct((m, n), out_dtype),
        grid=(pl.cdiv(m, tm),),
        in_specs=[
            pl.BlockSpec((tm, k), lambda mi: (mi, 0)),
            pl.BlockSpec((k, n), lambda mi: (0, 0)),
            pl.BlockSpec((1, n), lambda mi: (0, 0)),
        ],
        out_specs=pl.BlockSpec((tm, n), lambda mi: (mi, 0)),
        compiler_params=_COMPILER_PARAMS,
    )(x, w, b)


def deconv_matmul_bias_act(x, w, b, act, out_dtype=jnp.bfloat16):
    """Fused 4-parity matmul: x (4, M, K), w (4, K, N), b (4, 1, N) -> (4, M, N)."""
    g, m, k = x.shape
    n = w.shape[-1]
    tm = _pick_tile_m(m)
    return pl.pallas_call(
        functools.partial(_deconv_mm_kernel, act),
        out_shape=jax.ShapeDtypeStruct((g, m, n), out_dtype),
        grid=(pl.cdiv(m, tm),),
        in_specs=[
            pl.BlockSpec((g, tm, k), lambda mi: (0, mi, 0)),
            pl.BlockSpec((g, k, n), lambda mi: (0, 0, 0)),
            pl.BlockSpec((g, 1, n), lambda mi: (0, 0, 0)),
        ],
        out_specs=pl.BlockSpec((g, tm, n), lambda mi: (0, mi, 0)),
        compiler_params=_COMPILER_PARAMS,
    )(x, w, b)


def latent_block(flat, w_ml, b_ml, eps_pad, wd, bd):
    """Fused latent head: returns (mu_pad, log_var_pad, fc_decode_out)."""
    bsz, kdim = flat.shape
    return pl.pallas_call(
        _latent_kernel,
        out_shape=(
            jax.ShapeDtypeStruct((bsz, LATENT_PAD), jnp.float32),
            jax.ShapeDtypeStruct((bsz, LATENT_PAD), jnp.float32),
            jax.ShapeDtypeStruct((bsz, kdim), jnp.bfloat16),
        ),
        grid=(1,),
        in_specs=[
            pl.BlockSpec((bsz, kdim), lambda i: (0, 0)),
            pl.BlockSpec((kdim, 2 * LATENT_PAD), lambda i: (0, 0)),
            pl.BlockSpec((1, 2 * LATENT_PAD), lambda i: (0, 0)),
            pl.BlockSpec((bsz, LATENT_PAD), lambda i: (0, 0)),
            pl.BlockSpec((LATENT_PAD, kdim), lambda i: (0, 0)),
            pl.BlockSpec((1, kdim), lambda i: (0, 0)),
        ],
        out_specs=(
            pl.BlockSpec((bsz, LATENT_PAD), lambda i: (0, 0)),
            pl.BlockSpec((bsz, LATENT_PAD), lambda i: (0, 0)),
            pl.BlockSpec((bsz, kdim), lambda i: (0, 0)),
        ),
        compiler_params=pltpu.CompilerParams(
            dimension_semantics=("arbitrary",),
            vmem_limit_bytes=32 * 1024 * 1024,
        ),
    )(flat, w_ml, b_ml, eps_pad, wd, bd)


# ----------------------------------------------------------------------------
# Conv / ConvTranspose lowering (XLA glue: im2col; all matmuls are in Pallas)
# ----------------------------------------------------------------------------
def _im2col_nhwc(x, k, stride, pad):
    # x: (N, H, W, C) -> (N*Ho*Wo, k*k*C), feature order (kh, kw, C).
    n, h, w, c = x.shape
    if pad:
        x = jnp.pad(x, ((0, 0), (pad, pad), (pad, pad), (0, 0)))
    ho = (h + 2 * pad - k) // stride + 1
    wo = (w + 2 * pad - k) // stride + 1
    taps = []
    for i in range(k):
        for j in range(k):
            taps.append(x[:, i:i + stride * ho:stride, j:j + stride * wo:stride, :])
    patches = jnp.stack(taps, axis=3)                  # (n, ho, wo, k*k, c)
    return patches.reshape(n * ho * wo, k * k * c), (n, ho, wo)


def conv2d_nhwc(x, w_mat, b, k, stride, pad, act, out_dtype=jnp.bfloat16):
    patches, (n, ho, wo) = _im2col_nhwc(x, k, stride, pad)
    out = matmul_bias_act(patches.astype(jnp.bfloat16), w_mat, b, act, out_dtype)
    return out.reshape(n, ho, wo, w_mat.shape[-1])


def conv_transpose2d_x2_nhwc(x, w_sub, b_sub, act, out_dtype=jnp.bfloat16):
    """ConvTranspose2d(k=4, stride=2, padding=1) via sub-pixel decomposition.

    4 parity classes, each a 2x2 stride-1 conv over a shifted view of the
    padded input; all 4 run inside ONE pallas_call and the results are
    pixel-shuffled into the 2x-upsampled map.
    """
    n, h, w, _ = x.shape
    xp = jnp.pad(x, ((0, 0), (1, 1), (1, 1), (0, 0)))
    views = (xp[:, 0:h + 1, 0:w + 1, :],    # output (even row, even col)
             xp[:, 0:h + 1, 1:w + 2, :],    # (even, odd)
             xp[:, 1:h + 2, 0:w + 1, :],    # (odd, even)
             xp[:, 1:h + 2, 1:w + 2, :])    # (odd, odd)
    patches = jnp.stack([_im2col_nhwc(v, 2, 1, 0)[0] for v in views],
                        axis=0).astype(jnp.bfloat16)          # (4, n*h*w, 4*C)
    out = deconv_matmul_bias_act(patches, w_sub, b_sub, act, out_dtype)
    co = w_sub.shape[-1]
    out = out.reshape(2, 2, n, h, w, co).transpose(2, 3, 0, 4, 1, 5)
    return out.reshape(n, 2 * h, 2 * w, co)


# ----------------------------------------------------------------------------
# Parameters: raw PyTorch-layout init + one-time preparation (hoisted reshapes)
# ----------------------------------------------------------------------------
def init_params(key, latent_dim):
    """Raw parameters in PyTorch layouts (what the nn.Module state_dict holds)."""
    ks = jax.random.split(key, 9)
    w = lambda k, shape: (0.05 * jax.random.normal(k, shape)).astype(jnp.float32)
    z = lambda n: jnp.zeros((n,), jnp.float32)
    return {
        "enc1_w": w(ks[0], (32, 3, 4, 4)),    "enc1_b": z(32),
        "enc2_w": w(ks[1], (64, 32, 4, 4)),   "enc2_b": z(64),
        "enc3_w": w(ks[2], (128, 64, 4, 4)),  "enc3_b": z(128),
        "fc_mu_w": w(ks[3], (latent_dim, 2048)),  "fc_mu_b": z(latent_dim),
        "fc_lv_w": w(ks[4], (latent_dim, 2048)),  "fc_lv_b": z(latent_dim),
        "fc_dec_w": w(ks[5], (2048, latent_dim)), "fc_dec_b": z(2048),
        "dec1_w": w(ks[6], (128, 64, 4, 4)),  "dec1_b": z(64),
        "dec2_w": w(ks[7], (64, 32, 4, 4)),   "dec2_b": z(32),
        "dec3_w": w(ks[8], (32, 3, 4, 4)),    "dec3_b": z(3),
    }


def _pad_to(x, axis, size):
    pad = [(0, 0)] * x.ndim
    pad[axis] = (0, size - x.shape[axis])
    return jnp.pad(x, pad)


def _conv_weight(w_pt, c_out_pad):
    # nn.Conv2d weight (C_out, C_in, k, k) -> (k*k*C_in, c_out_pad) bf16, rows
    # ordered (kh, kw, C_in) to match NHWC im2col features.  K = real C_in (no
    # zero rows); only the output/N side is padded for lane-dense stores.
    c_out, c_in, k, _ = w_pt.shape
    w = jnp.transpose(w_pt, (2, 3, 1, 0)).reshape(k * k * c_in, c_out)
    return _pad_to(w, 1, c_out_pad).astype(jnp.bfloat16)


def _deconv_subweights(w_pt, c_out_pad):
    # nn.ConvTranspose2d weight (C_in, C_out, 4, 4), stride=2, padding=1 ->
    # (4, 4*C_in, c_out_pad) stack of 2x2 stride-1 sub-kernels.  Even output
    # parity uses kernel taps (3, 1); odd parity uses (2, 0).  K = real C_in.
    taps = ((3, 1), (2, 0))
    subs = []
    for pr in range(2):
        for pc in range(2):
            sub = jnp.stack(
                [jnp.stack([w_pt[:, :, taps[pr][di], taps[pc][dj]]
                            for dj in range(2)], axis=0)
                 for di in range(2)], axis=0)                   # (2, 2, Cin, Cout)
            sub = sub.reshape(4 * w_pt.shape[0], w_pt.shape[1])
            subs.append(_pad_to(sub, 1, c_out_pad))
    return jnp.stack(subs, axis=0).astype(jnp.bfloat16)         # (4, 4*Cin, Cout_pad)


def _bias(b_pt, c_out_pad):
    return _pad_to(b_pt, 0, c_out_pad).reshape(1, c_out_pad).astype(jnp.float32)


def _dec_bias(b_pt, c_out_pad):
    return jnp.tile(_bias(b_pt, c_out_pad)[None], (4, 1, 1))    # (4, 1, Cout_pad)


def prepare_params(p, latent_dim):
    """Hoist every reshape / transpose / tap-extraction / pad out of the forward."""
    # fc heads: PyTorch in-features ordered (c, h, w) -> reorder to (h, w, c),
    # then concat mu & log_var along N for a single 256-wide MXU pass.
    def head(w):
        w = w.reshape(latent_dim, 128, 4, 4).transpose(0, 2, 3, 1)
        return _pad_to(w.reshape(latent_dim, 2048).T, 1, LATENT_PAD)     # (2048, 128)
    w_ml = jnp.concatenate([head(p["fc_mu_w"]), head(p["fc_lv_w"])],
                           axis=1).astype(jnp.bfloat16)                  # (2048, 256)
    b_ml = jnp.concatenate([_pad_to(p["fc_mu_b"], 0, LATENT_PAD),
                            _pad_to(p["fc_lv_b"], 0, LATENT_PAD)]
                           ).reshape(1, 2 * LATENT_PAD).astype(jnp.float32)
    # fc_decode: PyTorch out-features ordered (c, h, w) -> reorder to (h, w, c).
    fc_dec = p["fc_dec_w"].reshape(128, 4, 4, latent_dim)
    fc_dec = fc_dec.transpose(1, 2, 0, 3).reshape(2048, latent_dim).T
    fc_dec_b = p["fc_dec_b"].reshape(128, 4, 4).transpose(1, 2, 0).reshape(1, 2048)
    return {
        "enc1_w": _conv_weight(p["enc1_w"], C_PAD), "enc1_b": _bias(p["enc1_b"], C_PAD),
        "enc2_w": _conv_weight(p["enc2_w"], C_PAD), "enc2_b": _bias(p["enc2_b"], C_PAD),
        "enc3_w": _conv_weight(p["enc3_w"], C_PAD), "enc3_b": _bias(p["enc3_b"], C_PAD),
        "fc_ml_w": w_ml, "fc_ml_b": b_ml,
        "fc_dec_w": _pad_to(fc_dec, 0, LATENT_PAD).astype(jnp.bfloat16),
        "fc_dec_b": fc_dec_b.astype(jnp.float32),
        "dec1_w": _deconv_subweights(p["dec1_w"], C_PAD), "dec1_b": _dec_bias(p["dec1_b"], C_PAD),
        "dec2_w": _deconv_subweights(p["dec2_w"], C_PAD), "dec2_b": _dec_bias(p["dec2_b"], C_PAD),
        "dec3_w": _deconv_subweights(p["dec3_w"], C_PAD), "dec3_b": _dec_bias(p["dec3_b"], C_PAD),
    }


# ----------------------------------------------------------------------------
# Forward pass
# ----------------------------------------------------------------------------
def vae_forward(params, x_nchw, eps, latent_dim):
    x = jnp.transpose(x_nchw, (0, 2, 3, 1))                                      # NCHW -> NHWC (once)
    # --- encoder --- (outputs lane-padded to 128 channels; sliced back to the
    #     real channel count before the next im2col so K carries no zero rows)
    h = conv2d_nhwc(x, params["enc1_w"], params["enc1_b"], 4, 2, 1, "relu")              # (N,16,16,[32]128)
    h = conv2d_nhwc(h[..., :32], params["enc2_w"], params["enc2_b"], 4, 2, 1, "relu")    # (N, 8, 8,[64]128)
    h = conv2d_nhwc(h[..., :64], params["enc3_w"], params["enc3_b"], 4, 2, 1, "relu")    # (N, 4, 4,128)
    n = h.shape[0]
    flat = h.reshape(n, 4 * 4 * 128)                                             # (h, w, c) feature order
    # --- fused latent head: [mu|log_var] + reparameterize + fc_decode ---
    eps_pad = jnp.pad(eps, ((0, 0), (0, LATENT_PAD - latent_dim))).astype(jnp.float32)
    mu_p, lv_p, d = latent_block(flat, params["fc_ml_w"], params["fc_ml_b"],
                                 eps_pad, params["fc_dec_w"], params["fc_dec_b"])
    # --- decoder ---
    d = d.reshape(n, 4, 4, 128)
    d = conv_transpose2d_x2_nhwc(d, params["dec1_w"], params["dec1_b"], "relu")               # (N, 8, 8,[64]128)
    d = conv_transpose2d_x2_nhwc(d[..., :64], params["dec2_w"], params["dec2_b"], "relu")     # (N,16,16,[32]128)
    d = conv_transpose2d_x2_nhwc(d[..., :32], params["dec3_w"], params["dec3_b"], "sigmoid")  # (N,32,32,[3]128) bf16
    out = jnp.transpose(d[..., :3].astype(jnp.float32), (0, 3, 1, 2))             # NHWC -> NCHW
    return out, mu_p[:, :latent_dim], lv_p[:, :latent_dim]


# ----------------------------------------------------------------------------
# Pure-JAX f32 reference (exact PyTorch-module semantics) for validation
# ----------------------------------------------------------------------------
def vae_reference(raw, x_nchw, eps):
    def conv(x, w, b):
        y = jax.lax.conv_general_dilated(
            x, w, window_strides=(2, 2), padding=((1, 1), (1, 1)),
            dimension_numbers=("NCHW", "OIHW", "NCHW"))
        return y + b.reshape(1, -1, 1, 1)

    def deconv(x, w, b):
        # ConvTranspose2d(k=4, s=2, p=1) == lhs-dilated conv with the flipped,
        # in/out-transposed kernel and padding k-1-p = 2.
        w_f = jnp.flip(w, axis=(2, 3)).transpose(1, 0, 2, 3)
        y = jax.lax.conv_general_dilated(
            x, w_f, window_strides=(1, 1), padding=((2, 2), (2, 2)),
            lhs_dilation=(2, 2), dimension_numbers=("NCHW", "OIHW", "NCHW"))
        return y + b.reshape(1, -1, 1, 1)

    h = jax.nn.relu(conv(x_nchw, raw["enc1_w"], raw["enc1_b"]))
    h = jax.nn.relu(conv(h, raw["enc2_w"], raw["enc2_b"]))
    h = jax.nn.relu(conv(h, raw["enc3_w"], raw["enc3_b"]))
    flat = h.reshape(h.shape[0], -1)
    mu = flat @ raw["fc_mu_w"].T + raw["fc_mu_b"]
    lv = flat @ raw["fc_lv_w"].T + raw["fc_lv_b"]
    z = mu + eps * jnp.exp(0.5 * lv)
    d = (z @ raw["fc_dec_w"].T + raw["fc_dec_b"]).reshape(-1, 128, 4, 4)
    d = jax.nn.relu(deconv(d, raw["dec1_w"], raw["dec1_b"]))
    d = jax.nn.relu(deconv(d, raw["dec2_w"], raw["dec2_b"]))
    out = jax.nn.sigmoid(deconv(d, raw["dec3_w"], raw["dec3_b"]))
    return out, mu, lv


if __name__ == "__main__":
    latent_dim = 32
    batch = 2
    key = jax.random.PRNGKey(0)
    k_param, k_x, k_eps = jax.random.split(key, 3)

    raw_params = init_params(k_param, latent_dim)
    params = prepare_params(raw_params, latent_dim)

    # CIFAR-shaped input (NCHW): the flatten to 128*4*4 requires 32x32 spatial.
    x = jax.random.normal(k_x, (batch, 3, 32, 32), dtype=jnp.float32)
    # eps plays the role of torch.randn_like(std) (sampled outside the kernel).
    eps = jax.random.normal(k_eps, (batch, latent_dim), dtype=jnp.float32)

    fwd = jax.jit(functools.partial(vae_forward, latent_dim=latent_dim))
    out, mu, log_var = fwd(params, x, eps)
    jax.block_until_ready((out, mu, log_var))

    assert out.shape == (batch, 3, 32, 32)
    assert mu.shape == (batch, latent_dim) and log_var.shape == (batch, latent_dim)
    assert float(out.min()) >= 0.0 and float(out.max()) <= 1.0  # sigmoid output

    # Validate against a pure-JAX f32 reference (bf16 Pallas path -> loose tol).
    ref_out, ref_mu, ref_lv = jax.jit(vae_reference)(raw_params, x, eps)
    jax.block_until_ready((ref_out, ref_mu, ref_lv))
    assert float(jnp.max(jnp.abs(out - ref_out))) < 1e-1
    assert float(jnp.max(jnp.abs(mu - ref_mu))) < 1e-1
    assert float(jnp.max(jnp.abs(log_var - ref_lv))) < 1e-1

    print("KERNEL_OK")
</pallas_src>

<mosaic_0001>
module attributes {stable_mosaic.version = 11 : i64} {
  func.func @_mm_bias_act_kernel(%arg0: i32, %arg1: memref<256x48xbf16, #tpu.memory_space<vmem>>, %arg2: memref<48x128xbf16, #tpu.memory_space<vmem>>, %arg3: memref<1x128xf32, #tpu.memory_space<vmem>>, %arg4: memref<256x128xbf16, #tpu.memory_space<vmem>>) attributes {dimension_semantics = [#tpu.dimension_semantics<parallel>], iteration_bounds = array<i64: 2>, scalar_prefetch = 0 : i64, scratch_operands = 0 : i64, tpu.core_type = #tpu.core_type<tc>, window_params = [{transform_indices = @transform_0, window_bounds = array<i64: 256, 48>}, {pipeline_mode = #tpu.pipeline_mode<synchronous>, transform_indices = @transform_1, window_bounds = array<i64: 48, 128>}, {pipeline_mode = #tpu.pipeline_mode<synchronous>, transform_indices = @transform_2, window_bounds = array<i64: 1, 128>}, {transform_indices = @transform_3, window_bounds = array<i64: 256, 128>}]} {
    %c0 = arith.constant 0 : index
    %c0_0 = arith.constant 0 : index
    %0 = vector.load %arg1[%c0, %c0_0] : memref<256x48xbf16, #tpu.memory_space<vmem>>, vector<256x48xbf16>
    %c0_1 = arith.constant 0 : index
    %c0_2 = arith.constant 0 : index
    %1 = vector.load %arg2[%c0_1, %c0_2] : memref<48x128xbf16, #tpu.memory_space<vmem>>, vector<48x128xbf16>
    %cst = arith.constant dense<0.000000e+00> : vector<256x128xf32>
    %2 = tpu.matmul %0, %1, %cst {dimension_numbers = #tpu.dot_dimension_numbers<[1], [0], [0], [1], [0, 0, 1, 1], [], []>} : vector<256x48xbf16>, vector<48x128xbf16>, vector<256x128xf32> -> vector<256x128xf32>
    %c0_3 = arith.constant 0 : index
    %c0_4 = arith.constant 0 : index
    %3 = vector.load %arg3[%c0_3, %c0_4] : memref<1x128xf32, #tpu.memory_space<vmem>>, vector<1x128xf32>
    %4 = vector.broadcast %3 : vector<1x128xf32> to vector<256x128xf32>
    %5 = arith.addf %2, %4 : vector<256x128xf32>
    %cst_5 = arith.constant 0.000000e+00 : f32
    %6 = vector.broadcast %cst_5 : f32 to vector<256x128xf32>
    %7 = arith.maximumf %5, %6 : vector<256x128xf32>
    %8 = arith.truncf %7 : vector<256x128xf32> to vector<256x128xbf16>
    %c0_6 = arith.constant 0 : index
    %c0_7 = arith.constant 0 : index
    %9 = vector.load %arg4[%c0_6, %c0_7] : memref<256x128xbf16, #tpu.memory_space<vmem>>, vector<256x128xbf16>
    tpu.vector_store %arg4[%c0_6, %c0_7], %8 {strides = array<i32>} : memref<256x128xbf16, #tpu.memory_space<vmem>>, vector<256x128xbf16>,
    return
  }
  func.func @transform_0(%arg0: i32) -> (i32, i32) {
    %c0_i32 = arith.constant 0 : i32
    %c0_i32_0 = arith.constant 0 : i32
    return %arg0, %c0_i32 : i32, i32
  }
  func.func @transform_1(%arg0: i32) -> (i32, i32) {
    %c0_i32 = arith.constant 0 : i32
    %c0_i32_0 = arith.constant 0 : i32
    %c0_i32_1 = arith.constant 0 : i32
    return %c0_i32, %c0_i32_0 : i32, i32
  }
  func.func @transform_2(%arg0: i32) -> (i32, i32) {
    %c0_i32 = arith.constant 0 : i32
    %c0_i32_0 = arith.constant 0 : i32
    %c0_i32_1 = arith.constant 0 : i32
    return %c0_i32, %c0_i32_0 : i32, i32
  }
  func.func @transform_3(%arg0: i32) -> (i32, i32) {
    %c0_i32 = arith.constant 0 : i32
    %c0_i32_0 = arith.constant 0 : i32
    return %arg0, %c0_i32 : i32, i32
  }
}

module attributes {stable_mosaic.version = 11 : i64} {
  func.func @_mm_bias_act_kernel(%arg0: i32, %arg1: memref<128x512xbf16, #tpu.memory_space<vmem>>, %arg2: memref<512x128xbf16, #tpu.memory_space<vmem>>, %arg3: memref<1x128xf32, #tpu.memory_space<vmem>>, %arg4: memref<128x128xbf16, #tpu.memory_space<vmem>>) attributes {dimension_semantics = [#tpu.dimension_semantics<parallel>], iteration_bounds = array<i64: 1>, scalar_prefetch = 0 : i64, scratch_operands = 0 : i64, tpu.core_type = #tpu.core_type<tc>, window_params = [{transform_indices = @transform_0, window_bounds = array<i64: 128, 512>}, {pipeline_mode = #tpu.pipeline_mode<synchronous>, transform_indices = @transform_1, window_bounds = array<i64: 512, 128>}, {pipeline_mode = #tpu.pipeline_mode<synchronous>, transform_indices = @transform_2, window_bounds = array<i64: 1, 128>}, {transform_indices = @transform_3, window_bounds = array<i64: 128, 128>}]} {
    %c0 = arith.constant 0 : index
    %c0_0 = arith.constant 0 : index
    %0 = vector.load %arg1[%c0, %c0_0] : memref<128x512xbf16, #tpu.memory_space<vmem>>, vector<128x512xbf16>
    %c0_1 = arith.constant 0 : index
    %c0_2 = arith.constant 0 : index
    %1 = vector.load %arg2[%c0_1, %c0_2] : memref<512x128xbf16, #tpu.memory_space<vmem>>, vector<512x128xbf16>
    %cst = arith.constant dense<0.000000e+00> : vector<128x128xf32>
    %2 = tpu.matmul %0, %1, %cst {dimension_numbers = #tpu.dot_dimension_numbers<[1], [0], [0], [1], [0, 0, 1, 1], [], []>} : vector<128x512xbf16>, vector<512x128xbf16>, vector<128x128xf32> -> vector<128x128xf32>
    %c0_3 = arith.constant 0 : index
    %c0_4 = arith.constant 0 : index
    %3 = vector.load %arg3[%c0_3, %c0_4] : memref<1x128xf32, #tpu.memory_space<vmem>>, vector<1x128xf32>
    %4 = vector.broadcast %3 : vector<1x128xf32> to vector<128x128xf32>
    %5 = arith.addf %2, %4 : vector<128x128xf32>
    %cst_5 = arith.constant 0.000000e+00 : f32
    %6 = vector.broadcast %cst_5 : f32 to vector<128x128xf32>
    %7 = arith.maximumf %5, %6 : vector<128x128xf32>
    %8 = arith.truncf %7 : vector<128x128xf32> to vector<128x128xbf16>
    %c0_6 = arith.constant 0 : index
    %c0_7 = arith.constant 0 : index
    %9 = vector.load %arg4[%c0_6, %c0_7] : memref<128x128xbf16, #tpu.memory_space<vmem>>, vector<128x128xbf16>
    tpu.vector_store %arg4[%c0_6, %c0_7], %8 {strides = array<i32>} : memref<128x128xbf16, #tpu.memory_space<vmem>>, vector<128x128xbf16>,
    return
  }
  func.func @transform_0(%arg0: i32) -> (i32, i32) {
    %c0_i32 = arith.constant 0 : i32
    %c0_i32_0 = arith.constant 0 : i32
    return %arg0, %c0_i32 : i32, i32
  }
  func.func @transform_1(%arg0: i32) -> (i32, i32) {
    %c0_i32 = arith.constant 0 : i32
    %c0_i32_0 = arith.constant 0 : i32
    %c0_i32_1 = arith.constant 0 : i32
    return %c0_i32, %c0_i32_0 : i32, i32
  }
  func.func @transform_2(%arg0: i32) -> (i32, i32) {
    %c0_i32 = arith.constant 0 : i32
    %c0_i32_0 = arith.constant 0 : i32
    %c0_i32_1 = arith.constant 0 : i32
    return %c0_i32, %c0_i32_0 : i32, i32
  }
  func.func @transform_3(%arg0: i32) -> (i32, i32) {
    %c0_i32 = arith.constant 0 : i32
    %c0_i32_0 = arith.constant 0 : i32
    return %arg0, %c0_i32 : i32, i32
  }
}

module attributes {stable_mosaic.version = 11 : i64} {
  func.func @_mm_bias_act_kernel(%arg0: i32, %arg1: memref<32x1024xbf16, #tpu.memory_space<vmem>>, %arg2: memref<1024x128xbf16, #tpu.memory_space<vmem>>, %arg3: memref<1x128xf32, #tpu.memory_space<vmem>>, %arg4: memref<32x128xbf16, #tpu.memory_space<vmem>>) attributes {dimension_semantics = [#tpu.dimension_semantics<parallel>], iteration_bounds = array<i64: 1>, scalar_prefetch = 0 : i64, scratch_operands = 0 : i64, tpu.core_type = #tpu.core_type<tc>, window_params = [{transform_indices = @transform_0, window_bounds = array<i64: 32, 1024>}, {pipeline_mode = #tpu.pipeline_mode<synchronous>, transform_indices = @transform_1, window_bounds = array<i64: 1024, 128>}, {pipeline_mode = #tpu.pipeline_mode<synchronous>, transform_indices = @transform_2, window_bounds = array<i64: 1, 128>}, {transform_indices = @transform_3, window_bounds = array<i64: 32, 128>}]} {
    %c0 = arith.constant 0 : index
    %c0_0 = arith.constant 0 : index
    %0 = vector.load %arg1[%c0, %c0_0] : memref<32x1024xbf16, #tpu.memory_space<vmem>>, vector<32x1024xbf16>
    %c0_1 = arith.constant 0 : index
    %c0_2 = arith.constant 0 : index
    %1 = vector.load %arg2[%c0_1, %c0_2] : memref<1024x128xbf16, #tpu.memory_space<vmem>>, vector<1024x128xbf16>
    %cst = arith.constant dense<0.000000e+00> : vector<32x128xf32>
    %2 = tpu.matmul %0, %1, %cst {dimension_numbers = #tpu.dot_dimension_numbers<[1], [0], [0], [1], [0, 0, 1, 1], [], []>} : vector<32x1024xbf16>, vector<1024x128xbf16>, vector<32x128xf32> -> vector<32x128xf32>
    %c0_3 = arith.constant 0 : index
    %c0_4 = arith.constant 0 : index
    %3 = vector.load %arg3[%c0_3, %c0_4] : memref<1x128xf32, #tpu.memory_space<vmem>>, vector<1x128xf32>
    %4 = vector.broadcast %3 : vector<1x128xf32> to vector<32x128xf32>
    %5 = arith.addf %2, %4 : vector<32x128xf32>
    %cst_5 = arith.constant 0.000000e+00 : f32
    %6 = vector.broadcast %cst_5 : f32 to vector<32x128xf32>
    %7 = arith.maximumf %5, %6 : vector<32x128xf32>
    %8 = arith.truncf %7 : vector<32x128xf32> to vector<32x128xbf16>
    %c0_6 = arith.constant 0 : index
    %c0_7 = arith.constant 0 : index
    %9 = vector.load %arg4[%c0_6, %c0_7] : memref<32x128xbf16, #tpu.memory_space<vmem>>, vector<32x128xbf16>
    tpu.vector_store %arg4[%c0_6, %c0_7], %8 {strides = array<i32>} : memref<32x128xbf16, #tpu.memory_space<vmem>>, vector<32x128xbf16>,
    return
  }
  func.func @transform_0(%arg0: i32) -> (i32, i32) {
    %c0_i32 = arith.constant 0 : i32
    %c0_i32_0 = arith.constant 0 : i32
    return %arg0, %c0_i32 : i32, i32
  }
  func.func @transform_1(%arg0: i32) -> (i32, i32) {
    %c0_i32 = arith.constant 0 : i32
    %c0_i32_0 = arith.constant 0 : i32
    %c0_i32_1 = arith.constant 0 : i32
    return %c0_i32, %c0_i32_0 : i32, i32
  }
  func.func @transform_2(%arg0: i32) -> (i32, i32) {
    %c0_i32 = arith.constant 0 : i32
    %c0_i32_0 = arith.constant 0 : i32
    %c0_i32_1 = arith.constant 0 : i32
    return %c0_i32, %c0_i32_0 : i32, i32
  }
  func.func @transform_3(%arg0: i32) -> (i32, i32) {
    %c0_i32 = arith.constant 0 : i32
    %c0_i32_0 = arith.constant 0 : i32
    return %arg0, %c0_i32 : i32, i32
  }
}

module attributes {stable_mosaic.version = 11 : i64} {
  func.func @_latent_kernel(%arg0: i32, %arg1: memref<2x2048xbf16, #tpu.memory_space<vmem>>, %arg2: memref<2048x256xbf16, #tpu.memory_space<vmem>>, %arg3: memref<1x256xf32, #tpu.memory_space<vmem>>, %arg4: memref<2x128xf32, #tpu.memory_space<vmem>>, %arg5: memref<128x2048xbf16, #tpu.memory_space<vmem>>, %arg6: memref<1x2048xf32, #tpu.memory_space<vmem>>, %arg7: memref<2x128xf32, #tpu.memory_space<vmem>>, %arg8: memref<2x128xf32, #tpu.memory_space<vmem>>, %arg9: memref<2x2048xbf16, #tpu.memory_space<vmem>>) attributes {dimension_semantics = [#tpu.dimension_semantics<arbitrary>], iteration_bounds = array<i64: 1>, scalar_prefetch = 0 : i64, scratch_operands = 0 : i64, tpu.core_type = #tpu.core_type<tc>, window_params = [{pipeline_mode = #tpu.pipeline_mode<synchronous>, transform_indices = @transform_0, window_bounds = array<i64: 2, 2048>}, {pipeline_mode = #tpu.pipeline_mode<synchronous>, transform_indices = @transform_1, window_bounds = array<i64: 2048, 256>}, {pipeline_mode = #tpu.pipeline_mode<synchronous>, transform_indices = @transform_2, window_bounds = array<i64: 1, 256>}, {pipeline_mode = #tpu.pipeline_mode<synchronous>, transform_indices = @transform_3, window_bounds = array<i64: 2, 128>}, {pipeline_mode = #tpu.pipeline_mode<synchronous>, transform_indices = @transform_4, window_bounds = array<i64: 128, 2048>}, {pipeline_mode = #tpu.pipeline_mode<synchronous>, transform_indices = @transform_5, window_bounds = array<i64: 1, 2048>}, {pipeline_mode = #tpu.pipeline_mode<synchronous>, transform_indices = @transform_6, window_bounds = array<i64: 2, 128>}, {pipeline_mode = #tpu.pipeline_mode<synchronous>, transform_indices = @transform_7, window_bounds = array<i64: 2, 128>}, {pipeline_mode = #tpu.pipeline_mode<synchronous>, transform_indices = @transform_8, window_bounds = array<i64: 2, 2048>}]} {
    %c0 = arith.constant 0 : index
    %c0_0 = arith.constant 0 : index
    %0 = vector.load %arg1[%c0, %c0_0] : memref<2x2048xbf16, #tpu.memory_space<vmem>>, vector<2x2048xbf16>
    %c0_1 = arith.constant 0 : index
    %c0_2 = arith.constant 0 : index
    %1 = vector.load %arg2[%c0_1, %c0_2] : memref<2048x256xbf16, #tpu.memory_space<vmem>>, vector<2048x256xbf16>
    %cst = arith.constant dense<0.000000e+00> : vector<2x256xf32>
    %2 = tpu.matmul %0, %1, %cst {dimension_numbers = #tpu.dot_dimension_numbers<[1], [0], [0], [1], [0, 0, 1, 1], [], []>} : vector<2x2048xbf16>, vector<2048x256xbf16>, vector<2x256xf32> -> vector<2x256xf32>
    %c0_3 = arith.constant 0 : index
    %c0_4 = arith.constant 0 : index
    %3 = vector.load %arg3[%c0_3, %c0_4] : memref<1x256xf32, #tpu.memory_space<vmem>>, vector<1x256xf32>
    %4 = vector.broadcast %3 : vector<1x256xf32> to vector<2x256xf32>
    %5 = arith.addf %2, %4 : vector<2x256xf32>
    %6 = vector.extract_strided_slice %5 {offsets = [0, 0], sizes = [2, 128], strides = [1, 1]} : vector<2x256xf32> to vector<2x128xf32>
    %7 = vector.extract_strided_slice %5 {offsets = [0, 128], sizes = [2, 128], strides = [1, 1]} : vector<2x256xf32> to vector<2x128xf32>
    %c0_5 = arith.constant 0 : index
    %c0_6 = arith.constant 0 : index
    %8 = vector.load %arg4[%c0_5, %c0_6] : memref<2x128xf32, #tpu.memory_space<vmem>>, vector<2x128xf32>
    %cst_7 = arith.constant 5.000000e-01 : f32
    %9 = vector.broadcast %cst_7 : f32 to vector<2x128xf32>
    %10 = arith.mulf %9, %7 : vector<2x128xf32>
    %11 = math.exp %10 : vector<2x128xf32>
    %12 = arith.mulf %8, %11 : vector<2x128xf32>
    %13 = arith.addf %6, %12 : vector<2x128xf32>
    %14 = arith.truncf %13 : vector<2x128xf32> to vector<2x128xbf16>
    %c0_8 = arith.constant 0 : index
    %c0_9 = arith.constant 0 : index
    %15 = vector.load %arg5[%c0_8, %c0_9] : memref<128x2048xbf16, #tpu.memory_space<vmem>>, vector<128x2048xbf16>
    %cst_10 = arith.constant dense<0.000000e+00> : vector<2x2048xf32>
    %16 = tpu.matmul %14, %15, %cst_10 {dimension_numbers = #tpu.dot_dimension_numbers<[1], [0], [0], [1], [0, 0, 1, 1], [], []>} : vector<2x128xbf16>, vector<128x2048xbf16>, vector<2x2048xf32> -> vector<2x2048xf32>
    %c0_11 = arith.constant 0 : index
    %c0_12 = arith.constant 0 : index
    %17 = vector.load %arg6[%c0_11, %c0_12] : memref<1x2048xf32, #tpu.memory_space<vmem>>, vector<1x2048xf32>
    %18 = vector.broadcast %17 : vector<1x2048xf32> to vector<2x2048xf32>
    %19 = arith.addf %16, %18 : vector<2x2048xf32>
    %c0_13 = arith.constant 0 : index
    %c0_14 = arith.constant 0 : index
    %20 = vector.load %arg7[%c0_13, %c0_14] : memref<2x128xf32, #tpu.memory_space<vmem>>, vector<2x128xf32>
    tpu.vector_store %arg7[%c0_13, %c0_14], %6 {strides = array<i32>} : memref<2x128xf32, #tpu.memory_space<vmem>>, vector<2x128xf32>,
    %c0_15 = arith.constant 0 : index
    %c0_16 = arith.constant 0 : index
    %21 = vector.load %arg8[%c0_15, %c0_16] : memref<2x128xf32, #tpu.memory_space<vmem>>, vector<2x128xf32>
    tpu.vector_store %arg8[%c0_15, %c0_16], %7 {strides = array<i32>} : memref<2x128xf32, #tpu.memory_space<vmem>>, vector<2x128xf32>,
    %22 = arith.truncf %19 : vector<2x2048xf32> to vector<2x2048xbf16>
    %c0_17 = arith.constant 0 : index
    %c0_18 = arith.constant 0 : index
    %23 = vector.load %arg9[%c0_17, %c0_18] : memref<2x2048xbf16, #tpu.memory_space<vmem>>, vector<2x2048xbf16>
    tpu.vector_store %arg9[%c0_17, %c0_18], %22 {strides = array<i32>} : memref<2x2048xbf16, #tpu.memory_space<vmem>>, vector<2x2048xbf16>,
    return
  }
  func.func @transform_0(%arg0: i32) -> (i32, i32) {
    %c0_i32 = arith.constant 0 : i32
    %c0_i32_0 = arith.constant 0 : i32
    %c0_i32_1 = arith.constant 0 : i32
    return %c0_i32, %c0_i32_0 : i32, i32
  }
  func.func @transform_1(%arg0: i32) -> (i32, i32) {
    %c0_i32 = arith.constant 0 : i32
    %c0_i32_0 = arith.constant 0 : i32
    %c0_i32_1 = arith.constant 0 : i32
    return %c0_i32, %c0_i32_0 : i32, i32
  }
  func.func @transform_2(%arg0: i32) -> (i32, i32) {
    %c0_i32 = arith.constant 0 : i32
    %c0_i32_0 = arith.constant 0 : i32
    %c0_i32_1 = arith.constant 0 : i32
    return %c0_i32, %c0_i32_0 : i32, i32
  }
  func.func @transform_3(%arg0: i32) -> (i32, i32) {
    %c0_i32 = arith.constant 0 : i32
    %c0_i32_0 = arith.constant 0 : i32
    %c0_i32_1 = arith.constant 0 : i32
    return %c0_i32, %c0_i32_0 : i32, i32
  }
  func.func @transform_4(%arg0: i32) -> (i32, i32) {
    %c0_i32 = arith.constant 0 : i32
    %c0_i32_0 = arith.constant 0 : i32
    %c0_i32_1 = arith.constant 0 : i32
    return %c0_i32, %c0_i32_0 : i32, i32
  }
  func.func @transform_5(%arg0: i32) -> (i32, i32) {
    %c0_i32 = arith.constant 0 : i32
    %c0_i32_0 = arith.constant 0 : i32
    %c0_i32_1 = arith.constant 0 : i32
    return %c0_i32, %c0_i32_0 : i32, i32
  }
  func.func @transform_6(%arg0: i32) -> (i32, i32) {
    %c0_i32 = arith.constant 0 : i32
    %c0_i32_0 = arith.constant 0 : i32
    %c0_i32_1 = arith.constant 0 : i32
    return %c0_i32, %c0_i32_0 : i32, i32
  }
  func.func @transform_7(%arg0: i32) -> (i32, i32) {
    %c0_i32 = arith.constant 0 : i32
    %c0_i32_0 = arith.constant 0 : i32
    %c0_i32_1 = arith.constant 0 : i32
    return %c0_i32, %c0_i32_0 : i32, i32
  }
  func.func @transform_8(%arg0: i32) -> (i32, i32) {
    %c0_i32 = arith.constant 0 : i32
    %c0_i32_0 = arith.constant 0 : i32
    %c0_i32_1 = arith.constant 0 : i32
    return %c0_i32, %c0_i32_0 : i32, i32
  }
}

module attributes {stable_mosaic.version = 11 : i64} {
  func.func @_deconv_mm_kernel(%arg0: i32, %arg1: memref<4x32x512xbf16, #tpu.memory_space<vmem>>, %arg2: memref<4x512x128xbf16, #tpu.memory_space<vmem>>, %arg3: memref<4x1x128xf32, #tpu.memory_space<vmem>>, %arg4: memref<4x32x128xbf16, #tpu.memory_space<vmem>>) attributes {dimension_semantics = [#tpu.dimension_semantics<parallel>], iteration_bounds = array<i64: 1>, scalar_prefetch = 0 : i64, scratch_operands = 0 : i64, tpu.core_type = #tpu.core_type<tc>, window_params = [{transform_indices = @transform_0, window_bounds = array<i64: 4, 32, 512>}, {pipeline_mode = #tpu.pipeline_mode<synchronous>, transform_indices = @transform_1, window_bounds = array<i64: 4, 512, 128>}, {pipeline_mode = #tpu.pipeline_mode<synchronous>, transform_indices = @transform_2, window_bounds = array<i64: 4, 1, 128>}, {transform_indices = @transform_3, window_bounds = array<i64: 4, 32, 128>}]} {
    %c0 = arith.constant 0 : index
    %c0_0 = arith.constant 0 : index
    %c0_1 = arith.constant 0 : index
    %0 = vector.load %arg1[%c0, %c0_0, %c0_1] : memref<4x32x512xbf16, #tpu.memory_space<vmem>>, vector<1x32x512xbf16>
    %1 = vector.shape_cast %0 : vector<1x32x512xbf16> to vector<32x512xbf16>
    %c0_2 = arith.constant 0 : index
    %c0_3 = arith.constant 0 : index
    %c0_4 = arith.constant 0 : index
    %2 = vector.load %arg2[%c0_2, %c0_3, %c0_4] : memref<4x512x128xbf16, #tpu.memory_space<vmem>>, vector<1x512x128xbf16>
    %3 = vector.shape_cast %2 : vector<1x512x128xbf16> to vector<512x128xbf16>
    %cst = arith.constant dense<0.000000e+00> : vector<32x128xf32>
    %4 = tpu.matmul %1, %3, %cst {dimension_numbers = #tpu.dot_dimension_numbers<[1], [0], [0], [1], [0, 0, 1, 1], [], []>} : vector<32x512xbf16>, vector<512x128xbf16>, vector<32x128xf32> -> vector<32x128xf32>
    %c0_5 = arith.constant 0 : index
    %c0_6 = arith.constant 0 : index
    %c0_7 = arith.constant 0 : index
    %5 = vector.load %arg3[%c0_5, %c0_6, %c0_7] : memref<4x1x128xf32, #tpu.memory_space<vmem>>, vector<1x1x128xf32>
    %6 = vector.shape_cast %5 : vector<1x1x128xf32> to vector<1x128xf32>
    %7 = vector.broadcast %6 : vector<1x128xf32> to vector<32x128xf32>
    %8 = arith.addf %4, %7 : vector<32x128xf32>
    %cst_8 = arith.constant 0.000000e+00 : f32
    %9 = vector.broadcast %cst_8 : f32 to vector<32x128xf32>
    %10 = arith.maximumf %8, %9 : vector<32x128xf32>
    %11 = arith.truncf %10 : vector<32x128xf32> to vector<32x128xbf16>
    %c0_9 = arith.constant 0 : index
    %c0_10 = arith.constant 0 : index
    %c0_11 = arith.constant 0 : index
    %12 = vector.load %arg4[%c0_9, %c0_10, %c0_11] : memref<4x32x128xbf16, #tpu.memory_space<vmem>>, vector<1x32x128xbf16>
    %13 = vector.shape_cast %12 : vector<1x32x128xbf16> to vector<32x128xbf16>
    %14 = vector.shape_cast %11 : vector<32x128xbf16> to vector<1x32x128xbf16>
    tpu.vector_store %arg4[%c0_9, %c0_10, %c0_11], %14 {strides = array<i32>} : memref<4x32x128xbf16, #tpu.memory_space<vmem>>, vector<1x32x128xbf16>,
    %c1 = arith.constant 1 : index
    %c0_12 = arith.constant 0 : index
    %c0_13 = arith.constant 0 : index
    %15 = vector.load %arg1[%c1, %c0_12, %c0_13] : memref<4x32x512xbf16, #tpu.memory_space<vmem>>, vector<1x32x512xbf16>
    %16 = vector.shape_cast %15 : vector<1x32x512xbf16> to vector<32x512xbf16>
    %c1_14 = arith.constant 1 : index
    %c0_15 = arith.constant 0 : index
    %c0_16 = arith.constant 0 : index
    %17 = vector.load %arg2[%c1_14, %c0_15, %c0_16] : memref<4x512x128xbf16, #tpu.memory_space<vmem>>, vector<1x512x128xbf16>
    %18 = vector.shape_cast %17 : vector<1x512x128xbf16> to vector<512x128xbf16>
    %cst_17 = arith.constant dense<0.000000e+00> : vector<32x128xf32>
    %19 = tpu.matmul %16, %18, %cst_17 {dimension_numbers = #tpu.dot_dimension_numbers<[1], [0], [0], [1], [0, 0, 1, 1], [], []>} : vector<32x512xbf16>, vector<512x128xbf16>, vector<32x128xf32> -> vector<32x128xf32>
    %c1_18 = arith.constant 1 : index
    %c0_19 = arith.constant 0 : index
    %c0_20 = arith.constant 0 : index
    %20 = vector.load %arg3[%c1_18, %c0_19, %c0_20] : memref<4x1x128xf32, #tpu.memory_space<vmem>>, vector<1x1x128xf32>
    %21 = vector.shape_cast %20 : vector<1x1x128xf32> to vector<1x128xf32>
    %22 = vector.broadcast %21 : vector<1x128xf32> to vector<32x128xf32>
    %23 = arith.addf %19, %22 : vector<32x128xf32>
    %cst_21 = arith.constant 0.000000e+00 : f32
    %24 = vector.broadcast %cst_21 : f32 to vector<32x128xf32>
    %25 = arith.maximumf %23, %24 : vector<32x128xf32>
    %26 = arith.truncf %25 : vector<32x128xf32> to vector<32x128xbf16>
    %c1_22 = arith.constant 1 : index
    %c0_23 = arith.constant 0 : index
    %c0_24 = arith.constant 0 : index
    %27 = vector.load %arg4[%c1_22, %c0_23, %c0_24] : memref<4x32x128xbf16, #tpu.memory_space<vmem>>, vector<1x32x128xbf16>
    %28 = vector.shape_cast %27 : vector<1x32x128xbf16> to vector<32x128xbf16>
    %29 = vector.shape_cast %26 : vector<32x128xbf16> to vector<1x32x128xbf16>
    tpu.vector_store %arg4[%c1_22, %c0_23, %c0_24], %29 {strides = array<i32>} : memref<4x32x128xbf16, #tpu.memory_space<vmem>>, vector<1x32x128xbf16>,
    %c2 = arith.constant 2 : index
    %c0_25 = arith.constant 0 : index
    %c0_26 = arith.constant 0 : index
    %30 = vector.load %arg1[%c2, %c0_25, %c0_26] : memref<4x32x512xbf16, #tpu.memory_space<vmem>>, vector<1x32x512xbf16>
    %31 = vector.shape_cast %30 : vector<1x32x512xbf16> to vector<32x512xbf16>
    %c2_27 = arith.constant 2 : index
    %c0_28 = arith.constant 0 : index
    %c0_29 = arith.constant 0 : index
    %32 = vector.load %arg2[%c2_27, %c0_28, %c0_29] : memref<4x512x128xbf16, #tpu.memory_space<vmem>>, vector<1x512x128xbf16>
    %33 = vector.shape_cast %32 : vector<1x512x128xbf16> to vector<512x128xbf16>
    %cst_30 = arith.constant dense<0.000000e+00> : vector<32x128xf32>
    %34 = tpu.matmul %31, %33, %cst_30 {dimension_numbers = #tpu.dot_dimension_numbers<[1], [0], [0], [1], [0, 0, 1, 1], [], []>} : vector<32x512xbf16>, vector<512x128xbf16>, vector<32x128xf32> -> vector<32x128xf32>
    %c2_31 = arith.constant 2 : index
    %c0_32 = arith.constant 0 : index
    %c0_33 = arith.constant 0 : index
    %35 = vector.load %arg3[%c2_31, %c0_32, %c0_33] : memref<4x1x128xf32, #tpu.memory_space<vmem>>, vector<1x1x128xf32>
    %36 = vector.shape_cast %35 : vector<1x1x128xf32> to vector<1x128xf32>
    %37 = vector.broadcast %36 : vector<1x128xf32> to vector<32x128xf32>
    %38 = arith.addf %34, %37 : vector<32x128xf32>
    %cst_34 = arith.constant 0.000000e+00 : f32
    %39 = vector.broadcast %cst_34 : f32 to vector<32x128xf32>
    %40 = arith.maximumf %38, %39 : vector<32x128xf32>
    %41 = arith.truncf %40 : vector<32x128xf32> to vector<32x128xbf16>
    %c2_35 = arith.constant 2 : index
    %c0_36 = arith.constant 0 : index
    %c0_37 = arith.constant 0 : index
    %42 = vector.load %arg4[%c2_35, %c0_36, %c0_37] : memref<4x32x128xbf16, #tpu.memory_space<vmem>>, vector<1x32x128xbf16>
    %43 = vector.shape_cast %42 : vector<1x32x128xbf16> to vector<32x128xbf16>
    %44 = vector.shape_cast %41 : vector<32x128xbf16> to vector<1x32x128xbf16>
    tpu.vector_store %arg4[%c2_35, %c0_36, %c0_37], %44 {strides = array<i32>} : memref<4x32x128xbf16, #tpu.memory_space<vmem>>, vector<1x32x128xbf16>,
    %c3 = arith.constant 3 : index
    %c0_38 = arith.constant 0 : index
    %c0_39 = arith.constant 0 : index
    %45 = vector.load %arg1[%c3, %c0_38, %c0_39] : memref<4x32x512xbf16, #tpu.memory_space<vmem>>, vector<1x32x512xbf16>
    %46 = vector.shape_cast %45 : vector<1x32x512xbf16> to vector<32x512xbf16>
    %c3_40 = arith.constant 3 : index
    %c0_41 = arith.constant 0 : index
    %c0_42 = arith.constant 0 : index
    %47 = vector.load %arg2[%c3_40, %c0_41, %c0_42] : memref<4x512x128xbf16, #tpu.memory_space<vmem>>, vector<1x512x128xbf16>
    %48 = vector.shape_cast %47 : vector<1x512x128xbf16> to vector<512x128xbf16>
    %cst_43 = arith.constant dense<0.000000e+00> : vector<32x128xf32>
    %49 = tpu.matmul %46, %48, %cst_43 {dimension_numbers = #tpu.dot_dimension_numbers<[1], [0], [0], [1], [0, 0, 1, 1], [], []>} : vector<32x512xbf16>, vector<512x128xbf16>, vector<32x128xf32> -> vector<32x128xf32>
    %c3_44 = arith.constant 3 : index
    %c0_45 = arith.constant 0 : index
    %c0_46 = arith.constant 0 : index
    %50 = vector.load %arg3[%c3_44, %c0_45, %c0_46] : memref<4x1x128xf32, #tpu.memory_space<vmem>>, vector<1x1x128xf32>
    %51 = vector.shape_cast %50 : vector<1x1x128xf32> to vector<1x128xf32>
    %52 = vector.broadcast %51 : vector<1x128xf32> to vector<32x128xf32>
    %53 = arith.addf %49, %52 : vector<32x128xf32>
    %cst_47 = arith.constant 0.000000e+00 : f32
    %54 = vector.broadcast %cst_47 : f32 to vector<32x128xf32>
    %55 = arith.maximumf %53, %54 : vector<32x128xf32>
    %56 = arith.truncf %55 : vector<32x128xf32> to vector<32x128xbf16>
    %c3_48 = arith.constant 3 : index
    %c0_49 = arith.constant 0 : index
    %c0_50 = arith.constant 0 : index
    %57 = vector.load %arg4[%c3_48, %c0_49, %c0_50] : memref<4x32x128xbf16, #tpu.memory_space<vmem>>, vector<1x32x128xbf16>
    %58 = vector.shape_cast %57 : vector<1x32x128xbf16> to vector<32x128xbf16>
    %59 = vector.shape_cast %56 : vector<32x128xbf16> to vector<1x32x128xbf16>
    tpu.vector_store %arg4[%c3_48, %c0_49, %c0_50], %59 {strides = array<i32>} : memref<4x32x128xbf16, #tpu.memory_space<vmem>>, vector<1x32x128xbf16>,
    return
  }
  func.func @transform_0(%arg0: i32) -> (i32, i32, i32) {
    %c0_i32 = arith.constant 0 : i32
    %c0_i32_0 = arith.constant 0 : i32
    %c0_i32_1 = arith.constant 0 : i32
    return %c0_i32, %arg0, %c0_i32_0 : i32, i32, i32
  }
  func.func @transform_1(%arg0: i32) -> (i32, i32, i32) {
    %c0_i32 = arith.constant 0 : i32
    %c0_i32_0 = arith.constant 0 : i32
    %c0_i32_1 = arith.constant 0 : i32
    %c0_i32_2 = arith.constant 0 : i32
    return %c0_i32, %c0_i32_0, %c0_i32_1 : i32, i32, i32
  }
  func.func @transform_2(%arg0: i32) -> (i32, i32, i32) {
    %c0_i32 = arith.constant 0 : i32
    %c0_i32_0 = arith.constant 0 : i32
    %c0_i32_1 = arith.constant 0 : i32
    %c0_i32_2 = arith.constant 0 : i32
    return %c0_i32, %c0_i32_0, %c0_i32_1 : i32, i32, i32
  }
  func.func @transform_3(%arg0: i32) -> (i32, i32, i32) {
    %c0_i32 = arith.constant 0 : i32
    %c0_i32_0 = arith.constant 0 : i32
    %c0_i32_1 = arith.constant 0 : i32
    return %c0_i32, %arg0, %c0_i32_0 : i32, i32, i32
  }
}

module attributes {stable_mosaic.version = 11 : i64} {
  func.func @_deconv_mm_kernel(%arg0: i32, %arg1: memref<4x128x256xbf16, #tpu.memory_space<vmem>>, %arg2: memref<4x256x128xbf16, #tpu.memory_space<vmem>>, %arg3: memref<4x1x128xf32, #tpu.memory_space<vmem>>, %arg4: memref<4x128x128xbf16, #tpu.memory_space<vmem>>) attributes {dimension_semantics = [#tpu.dimension_semantics<parallel>], iteration_bounds = array<i64: 1>, scalar_prefetch = 0 : i64, scratch_operands = 0 : i64, tpu.core_type = #tpu.core_type<tc>, window_params = [{transform_indices = @transform_0, window_bounds = array<i64: 4, 128, 256>}, {pipeline_mode = #tpu.pipeline_mode<synchronous>, transform_indices = @transform_1, window_bounds = array<i64: 4, 256, 128>}, {pipeline_mode = #tpu.pipeline_mode<synchronous>, transform_indices = @transform_2, window_bounds = array<i64: 4, 1, 128>}, {transform_indices = @transform_3, window_bounds = array<i64: 4, 128, 128>}]} {
    %c0 = arith.constant 0 : index
    %c0_0 = arith.constant 0 : index
    %c0_1 = arith.constant 0 : index
    %0 = vector.load %arg1[%c0, %c0_0, %c0_1] : memref<4x128x256xbf16, #tpu.memory_space<vmem>>, vector<1x128x256xbf16>
    %1 = vector.shape_cast %0 : vector<1x128x256xbf16> to vector<128x256xbf16>
    %c0_2 = arith.constant 0 : index
    %c0_3 = arith.constant 0 : index
    %c0_4 = arith.constant 0 : index
    %2 = vector.load %arg2[%c0_2, %c0_3, %c0_4] : memref<4x256x128xbf16, #tpu.memory_space<vmem>>, vector<1x256x128xbf16>
    %3 = vector.shape_cast %2 : vector<1x256x128xbf16> to vector<256x128xbf16>
    %cst = arith.constant dense<0.000000e+00> : vector<128x128xf32>
    %4 = tpu.matmul %1, %3, %cst {dimension_numbers = #tpu.dot_dimension_numbers<[1], [0], [0], [1], [0, 0, 1, 1], [], []>} : vector<128x256xbf16>, vector<256x128xbf16>, vector<128x128xf32> -> vector<128x128xf32>
    %c0_5 = arith.constant 0 : index
    %c0_6 = arith.constant 0 : index
    %c0_7 = arith.constant 0 : index
    %5 = vector.load %arg3[%c0_5, %c0_6, %c0_7] : memref<4x1x128xf32, #tpu.memory_space<vmem>>, vector<1x1x128xf32>
    %6 = vector.shape_cast %5 : vector<1x1x128xf32> to vector<1x128xf32>
    %7 = vector.broadcast %6 : vector<1x128xf32> to vector<128x128xf32>
    %8 = arith.addf %4, %7 : vector<128x128xf32>
    %cst_8 = arith.constant 0.000000e+00 : f32
    %9 = vector.broadcast %cst_8 : f32 to vector<128x128xf32>
    %10 = arith.maximumf %8, %9 : vector<128x128xf32>
    %11 = arith.truncf %10 : vector<128x128xf32> to vector<128x128xbf16>
    %c0_9 = arith.constant 0 : index
    %c0_10 = arith.constant 0 : index
    %c0_11 = arith.constant 0 : index
    %12 = vector.load %arg4[%c0_9, %c0_10, %c0_11] : memref<4x128x128xbf16, #tpu.memory_space<vmem>>, vector<1x128x128xbf16>
    %13 = vector.shape_cast %12 : vector<1x128x128xbf16> to vector<128x128xbf16>
    %14 = vector.shape_cast %11 : vector<128x128xbf16> to vector<1x128x128xbf16>
    tpu.vector_store %arg4[%c0_9, %c0_10, %c0_11], %14 {strides = array<i32>} : memref<4x128x128xbf16, #tpu.memory_space<vmem>>, vector<1x128x128xbf16>,
    %c1 = arith.constant 1 : index
    %c0_12 = arith.constant 0 : index
    %c0_13 = arith.constant 0 : index
    %15 = vector.load %arg1[%c1, %c0_12, %c0_13] : memref<4x128x256xbf16, #tpu.memory_space<vmem>>, vector<1x128x256xbf16>
    %16 = vector.shape_cast %15 : vector<1x128x256xbf16> to vector<128x256xbf16>
    %c1_14 = arith.constant 1 : index
    %c0_15 = arith.constant 0 : index
    %c0_16 = arith.constant 0 : index
    %17 = vector.load %arg2[%c1_14, %c0_15, %c0_16] : memref<4x256x128xbf16, #tpu.memory_space<vmem>>, vector<1x256x128xbf16>
    %18 = vector.shape_cast %17 : vector<1x256x128xbf16> to vector<256x128xbf16>
    %cst_17 = arith.constant dense<0.000000e+00> : vector<128x128xf32>
    %19 = tpu.matmul %16, %18, %cst_17 {dimension_numbers = #tpu.dot_dimension_numbers<[1], [0], [0], [1], [0, 0, 1, 1], [], []>} : vector<128x256xbf16>, vector<256x128xbf16>, vector<128x128xf32> -> vector<128x128xf32>
    %c1_18 = arith.constant 1 : index
    %c0_19 = arith.constant 0 : index
    %c0_20 = arith.constant 0 : index
    %20 = vector.load %arg3[%c1_18, %c0_19, %c0_20] : memref<4x1x128xf32, #tpu.memory_space<vmem>>, vector<1x1x128xf32>
    %21 = vector.shape_cast %20 : vector<1x1x128xf32> to vector<1x128xf32>
    %22 = vector.broadcast %21 : vector<1x128xf32> to vector<128x128xf32>
    %23 = arith.addf %19, %22 : vector<128x128xf32>
    %cst_21 = arith.constant 0.000000e+00 : f32
    %24 = vector.broadcast %cst_21 : f32 to vector<128x128xf32>
    %25 = arith.maximumf %23, %24 : vector<128x128xf32>
    %26 = arith.truncf %25 : vector<128x128xf32> to vector<128x128xbf16>
    %c1_22 = arith.constant 1 : index
    %c0_23 = arith.constant 0 : index
    %c0_24 = arith.constant 0 : index
    %27 = vector.load %arg4[%c1_22, %c0_23, %c0_24] : memref<4x128x128xbf16, #tpu.memory_space<vmem>>, vector<1x128x128xbf16>
    %28 = vector.shape_cast %27 : vector<1x128x128xbf16> to vector<128x128xbf16>
    %29 = vector.shape_cast %26 : vector<128x128xbf16> to vector<1x128x128xbf16>
    tpu.vector_store %arg4[%c1_22, %c0_23, %c0_24], %29 {strides = array<i32>} : memref<4x128x128xbf16, #tpu.memory_space<vmem>>, vector<1x128x128xbf16>,
    %c2 = arith.constant 2 : index
    %c0_25 = arith.constant 0 : index
    %c0_26 = arith.constant 0 : index
    %30 = vector.load %arg1[%c2, %c0_25, %c0_26] : memref<4x128x256xbf16, #tpu.memory_space<vmem>>, vector<1x128x256xbf16>
    %31 = vector.shape_cast %30 : vector<1x128x256xbf16> to vector<128x256xbf16>
    %c2_27 = arith.constant 2 : index
    %c0_28 = arith.constant 0 : index
    %c0_29 = arith.constant 0 : index
    %32 = vector.load %arg2[%c2_27, %c0_28, %c0_29] : memref<4x256x128xbf16, #tpu.memory_space<vmem>>, vector<1x256x128xbf16>
    %33 = vector.shape_cast %32 : vector<1x256x128xbf16> to vector<256x128xbf16>
    %cst_30 = arith.constant dense<0.000000e+00> : vector<128x128xf32>
    %34 = tpu.matmul %31, %33, %cst_30 {dimension_numbers = #tpu.dot_dimension_numbers<[1], [0], [0], [1], [0, 0, 1, 1], [], []>} : vector<128x256xbf16>, vector<256x128xbf16>, vector<128x128xf32> -> vector<128x128xf32>
    %c2_31 = arith.constant 2 : index
    %c0_32 = arith.constant 0 : index
    %c0_33 = arith.constant 0 : index
    %35 = vector.load %arg3[%c2_31, %c0_32, %c0_33] : memref<4x1x128xf32, #tpu.memory_space<vmem>>, vector<1x1x128xf32>
    %36 = vector.shape_cast %35 : vector<1x1x128xf32> to vector<1x128xf32>
    %37 = vector.broadcast %36 : vector<1x128xf32> to vector<128x128xf32>
    %38 = arith.addf %34, %37 : vector<128x128xf32>
    %cst_34 = arith.constant 0.000000e+00 : f32
    %39 = vector.broadcast %cst_34 : f32 to vector<128x128xf32>
    %40 = arith.maximumf %38, %39 : vector<128x128xf32>
    %41 = arith.truncf %40 : vector<128x128xf32> to vector<128x128xbf16>
    %c2_35 = arith.constant 2 : index
    %c0_36 = arith.constant 0 : index
    %c0_37 = arith.constant 0 : index
    %42 = vector.load %arg4[%c2_35, %c0_36, %c0_37] : memref<4x128x128xbf16, #tpu.memory_space<vmem>>, vector<1x128x128xbf16>
    %43 = vector.shape_cast %42 : vector<1x128x128xbf16> to vector<128x128xbf16>
    %44 = vector.shape_cast %41 : vector<128x128xbf16> to vector<1x128x128xbf16>
    tpu.vector_store %arg4[%c2_35, %c0_36, %c0_37], %44 {strides = array<i32>} : memref<4x128x128xbf16, #tpu.memory_space<vmem>>, vector<1x128x128xbf16>,
    %c3 = arith.constant 3 : index
    %c0_38 = arith.constant 0 : index
    %c0_39 = arith.constant 0 : index
    %45 = vector.load %arg1[%c3, %c0_38, %c0_39] : memref<4x128x256xbf16, #tpu.memory_space<vmem>>, vector<1x128x256xbf16>
    %46 = vector.shape_cast %45 : vector<1x128x256xbf16> to vector<128x256xbf16>
    %c3_40 = arith.constant 3 : index
    %c0_41 = arith.constant 0 : index
    %c0_42 = arith.constant 0 : index
    %47 = vector.load %arg2[%c3_40, %c0_41, %c0_42] : memref<4x256x128xbf16, #tpu.memory_space<vmem>>, vector<1x256x128xbf16>
    %48 = vector.shape_cast %47 : vector<1x256x128xbf16> to vector<256x128xbf16>
    %cst_43 = arith.constant dense<0.000000e+00> : vector<128x128xf32>
    %49 = tpu.matmul %46, %48, %cst_43 {dimension_numbers = #tpu.dot_dimension_numbers<[1], [0], [0], [1], [0, 0, 1, 1], [], []>} : vector<128x256xbf16>, vector<256x128xbf16>, vector<128x128xf32> -> vector<128x128xf32>
    %c3_44 = arith.constant 3 : index
    %c0_45 = arith.constant 0 : index
    %c0_46 = arith.constant 0 : index
    %50 = vector.load %arg3[%c3_44, %c0_45, %c0_46] : memref<4x1x128xf32, #tpu.memory_space<vmem>>, vector<1x1x128xf32>
    %51 = vector.shape_cast %50 : vector<1x1x128xf32> to vector<1x128xf32>
    %52 = vector.broadcast %51 : vector<1x128xf32> to vector<128x128xf32>
    %53 = arith.addf %49, %52 : vector<128x128xf32>
    %cst_47 = arith.constant 0.000000e+00 : f32
    %54 = vector.broadcast %cst_47 : f32 to vector<128x128xf32>
    %55 = arith.maximumf %53, %54 : vector<128x128xf32>
    %56 = arith.truncf %55 : vector<128x128xf32> to vector<128x128xbf16>
    %c3_48 = arith.constant 3 : index
    %c0_49 = arith.constant 0 : index
    %c0_50 = arith.constant 0 : index
    %57 = vector.load %arg4[%c3_48, %c0_49, %c0_50] : memref<4x128x128xbf16, #tpu.memory_space<vmem>>, vector<1x128x128xbf16>
    %58 = vector.shape_cast %57 : vector<1x128x128xbf16> to vector<128x128xbf16>
    %59 = vector.shape_cast %56 : vector<128x128xbf16> to vector<1x128x128xbf16>
    tpu.vector_store %arg4[%c3_48, %c0_49, %c0_50], %59 {strides = array<i32>} : memref<4x128x128xbf16, #tpu.memory_space<vmem>>, vector<1x128x128xbf16>,
    return
  }
  func.func @transform_0(%arg0: i32) -> (i32, i32, i32) {
    %c0_i32 = arith.constant 0 : i32
    %c0_i32_0 = arith.constant 0 : i32
    %c0_i32_1 = arith.constant 0 : i32
    return %c0_i32, %arg0, %c0_i32_0 : i32, i32, i32
  }
  func.func @transform_1(%arg0: i32) -> (i32, i32, i32) {
    %c0_i32 = arith.constant 0 : i32
    %c0_i32_0 = arith.constant 0 : i32
    %c0_i32_1 = arith.constant 0 : i32
    %c0_i32_2 = arith.constant 0 : i32
    return %c0_i32, %c0_i32_0, %c0_i32_1 : i32, i32, i32
  }
  func.func @transform_2(%arg0: i32) -> (i32, i32, i32) {
    %c0_i32 = arith.constant 0 : i32
    %c0_i32_0 = arith.constant 0 : i32
    %c0_i32_1 = arith.constant 0 : i32
    %c0_i32_2 = arith.constant 0 : i32
    return %c0_i32, %c0_i32_0, %c0_i32_1 : i32, i32, i32
  }
  func.func @transform_3(%arg0: i32) -> (i32, i32, i32) {
    %c0_i32 = arith.constant 0 : i32
    %c0_i32_0 = arith.constant 0 : i32
    %c0_i32_1 = arith.constant 0 : i32
    return %c0_i32, %arg0, %c0_i32_0 : i32, i32, i32
  }
}

module attributes {stable_mosaic.version = 11 : i64} {
  func.func @_deconv_mm_kernel(%arg0: i32, %arg1: memref<4x256x128xbf16, #tpu.memory_space<vmem>>, %arg2: memref<4x128x128xbf16, #tpu.memory_space<vmem>>, %arg3: memref<4x1x128xf32, #tpu.memory_space<vmem>>, %arg4: memref<4x256x128xbf16, #tpu.memory_space<vmem>>) attributes {dimension_semantics = [#tpu.dimension_semantics<parallel>], iteration_bounds = array<i64: 2>, scalar_prefetch = 0 : i64, scratch_operands = 0 : i64, tpu.core_type = #tpu.core_type<tc>, window_params = [{transform_indices = @transform_0, window_bounds = array<i64: 4, 256, 128>}, {pipeline_mode = #tpu.pipeline_mode<synchronous>, transform_indices = @transform_1, window_bounds = array<i64: 4, 128, 128>}, {pipeline_mode = #tpu.pipeline_mode<synchronous>, transform_indices = @transform_2, window_bounds = array<i64: 4, 1, 128>}, {transform_indices = @transform_3, window_bounds = array<i64: 4, 256, 128>}]} {
    %c0 = arith.constant 0 : index
    %c0_0 = arith.constant 0 : index
    %c0_1 = arith.constant 0 : index
    %0 = vector.load %arg1[%c0, %c0_0, %c0_1] : memref<4x256x128xbf16, #tpu.memory_space<vmem>>, vector<1x256x128xbf16>
    %1 = vector.shape_cast %0 : vector<1x256x128xbf16> to vector<256x128xbf16>
    %c0_2 = arith.constant 0 : index
    %c0_3 = arith.constant 0 : index
    %c0_4 = arith.constant 0 : index
    %2 = vector.load %arg2[%c0_2, %c0_3, %c0_4] : memref<4x128x128xbf16, #tpu.memory_space<vmem>>, vector<1x128x128xbf16>
    %3 = vector.shape_cast %2 : vector<1x128x128xbf16> to vector<128x128xbf16>
    %cst = arith.constant dense<0.000000e+00> : vector<256x128xf32>
    %4 = tpu.matmul %1, %3, %cst {dimension_numbers = #tpu.dot_dimension_numbers<[1], [0], [0], [1], [0, 0, 1, 1], [], []>} : vector<256x128xbf16>, vector<128x128xbf16>, vector<256x128xf32> -> vector<256x128xf32>
    %c0_5 = arith.constant 0 : index
    %c0_6 = arith.constant 0 : index
    %c0_7 = arith.constant 0 : index
    %5 = vector.load %arg3[%c0_5, %c0_6, %c0_7] : memref<4x1x128xf32, #tpu.memory_space<vmem>>, vector<1x1x128xf32>
    %6 = vector.shape_cast %5 : vector<1x1x128xf32> to vector<1x128xf32>
    %7 = vector.broadcast %6 : vector<1x128xf32> to vector<256x128xf32>
    %8 = arith.addf %4, %7 : vector<256x128xf32>
    %9 = arith.negf %8 : vector<256x128xf32>
    %10 = math.exp %9 : vector<256x128xf32>
    %cst_8 = arith.constant 1.000000e+00 : f32
    %11 = vector.broadcast %cst_8 : f32 to vector<256x128xf32>
    %12 = arith.addf %11, %10 : vector<256x128xf32>
    %13 = arith.divf %11, %12 : vector<256x128xf32>
    %14 = arith.truncf %13 : vector<256x128xf32> to vector<256x128xbf16>
    %c0_9 = arith.constant 0 : index
    %c0_10 = arith.constant 0 : index
    %c0_11 = arith.constant 0 : index
    %15 = vector.load %arg4[%c0_9, %c0_10, %c0_11] : memref<4x256x128xbf16, #tpu.memory_space<vmem>>, vector<1x256x128xbf16>
    %16 = vector.shape_cast %15 : vector<1x256x128xbf16> to vector<256x128xbf16>
    %17 = vector.shape_cast %14 : vector<256x128xbf16> to vector<1x256x128xbf16>
    tpu.vector_store %arg4[%c0_9, %c0_10, %c0_11], %17 {strides = array<i32>} : memref<4x256x128xbf16, #tpu.memory_space<vmem>>, vector<1x256x128xbf16>,
    %c1 = arith.constant 1 : index
    %c0_12 = arith.constant 0 : index
    %c0_13 = arith.constant 0 : index
    %18 = vector.load %arg1[%c1, %c0_12, %c0_13] : memref<4x256x128xbf16, #tpu.memory_space<vmem>>, vector<1x256x128xbf16>
    %19 = vector.shape_cast %18 : vector<1x256x128xbf16> to vector<256x128xbf16>
    %c1_14 = arith.constant 1 : index
    %c0_15 = arith.constant 0 : index
    %c0_16 = arith.constant 0 : index
    %20 = vector.load %arg2[%c1_14, %c0_15, %c0_16] : memref<4x128x128xbf16, #tpu.memory_space<vmem>>, vector<1x128x128xbf16>
    %21 = vector.shape_cast %20 : vector<1x128x128xbf16> to vector<128x128xbf16>
    %cst_17 = arith.constant dense<0.000000e+00> : vector<256x128xf32>
    %22 = tpu.matmul %19, %21, %cst_17 {dimension_numbers = #tpu.dot_dimension_numbers<[1], [0], [0], [1], [0, 0, 1, 1], [], []>} : vector<256x128xbf16>, vector<128x128xbf16>, vector<256x128xf32> -> vector<256x128xf32>
    %c1_18 = arith.constant 1 : index
    %c0_19 = arith.constant 0 : index
    %c0_20 = arith.constant 0 : index
    %23 = vector.load %arg3[%c1_18, %c0_19, %c0_20] : memref<4x1x128xf32, #tpu.memory_space<vmem>>, vector<1x1x128xf32>
    %24 = vector.shape_cast %23 : vector<1x1x128xf32> to vector<1x128xf32>
    %25 = vector.broadcast %24 : vector<1x128xf32> to vector<256x128xf32>
    %26 = arith.addf %22, %25 : vector<256x128xf32>
    %27 = arith.negf %26 : vector<256x128xf32>
    %28 = math.exp %27 : vector<256x128xf32>
    %cst_21 = arith.constant 1.000000e+00 : f32
    %29 = vector.broadcast %cst_21 : f32 to vector<256x128xf32>
    %30 = arith.addf %29, %28 : vector<256x128xf32>
    %31 = arith.divf %29, %30 : vector<256x128xf32>
    %32 = arith.truncf %31 : vector<256x128xf32> to vector<256x128xbf16>
    %c1_22 = arith.constant 1 : index
    %c0_23 = arith.constant 0 : index
    %c0_24 = arith.constant 0 : index
    %33 = vector.load %arg4[%c1_22, %c0_23, %c0_24] : memref<4x256x128xbf16, #tpu.memory_space<vmem>>, vector<1x256x128xbf16>
    %34 = vector.shape_cast %33 : vector<1x256x128xbf16> to vector<256x128xbf16>
    %35 = vector.shape_cast %32 : vector<256x128xbf16> to vector<1x256x128xbf16>
    tpu.vector_store %arg4[%c1_22, %c0_23, %c0_24], %35 {strides = array<i32>} : memref<4x256x128xbf16, #tpu.memory_space<vmem>>, vector<1x256x128xbf16>,
    %c2 = arith.constant 2 : index
    %c0_25 = arith.constant 0 : index
    %c0_26 = arith.constant 0 : index
    %36 = vector.load %arg1[%c2, %c0_25, %c0_26] : memref<4x256x128xbf16, #tpu.memory_space<vmem>>, vector<1x256x128xbf16>
    %37 = vector.shape_cast %36 : vector<1x256x128xbf16> to vector<256x128xbf16>
    %c2_27 = arith.constant 2 : index
    %c0_28 = arith.constant 0 : index
    %c0_29 = arith.constant 0 : index
    %38 = vector.load %arg2[%c2_27, %c0_28, %c0_29] : memref<4x128x128xbf16, #tpu.memory_space<vmem>>, vector<1x128x128xbf16>
    %39 = vector.shape_cast %38 : vector<1x128x128xbf16> to vector<128x128xbf16>
    %cst_30 = arith.constant dense<0.000000e+00> : vector<256x128xf32>
    %40 = tpu.matmul %37, %39, %cst_30 {dimension_numbers = #tpu.dot_dimension_numbers<[1], [0], [0], [1], [0, 0, 1, 1], [], []>} : vector<256x128xbf16>, vector<128x128xbf16>, vector<256x128xf32> -> vector<256x128xf32>
    %c2_31 = arith.constant 2 : index
    %c0_32 = arith.constant 0 : index
    %c0_33 = arith.constant 0 : index
    %41 = vector.load %arg3[%c2_31, %c0_32, %c0_33] : memref<4x1x128xf32, #tpu.memory_space<vmem>>, vector<1x1x128xf32>
    %42 = vector.shape_cast %41 : vector<1x1x128xf32> to vector<1x128xf32>
    %43 = vector.broadcast %42 : vector<1x128xf32> to vector<256x128xf32>
    %44 = arith.addf %40, %43 : vector<256x128xf32>
    %45 = arith.negf %44 : vector<256x128xf32>
    %46 = math.exp %45 : vector<256x128xf32>
    %cst_34 = arith.constant 1.000000e+00 : f32
    %47 = vector.broadcast %cst_34 : f32 to vector<256x128xf32>
    %48 = arith.addf %47, %46 : vector<256x128xf32>
    %49 = arith.divf %47, %48 : vector<256x128xf32>
    %50 = arith.truncf %49 : vector<256x128xf32> to vector<256x128xbf16>
    %c2_35 = arith.constant 2 : index
    %c0_36 = arith.constant 0 : index
    %c0_37 = arith.constant 0 : index
    %51 = vector.load %arg4[%c2_35, %c0_36, %c0_37] : memref<4x256x128xbf16, #tpu.memory_space<vmem>>, vector<1x256x128xbf16>
    %52 = vector.shape_cast %51 : vector<1x256x128xbf16> to vector<256x128xbf16>
    %53 = vector.shape_cast %50 : vector<256x128xbf16> to vector<1x256x128xbf16>
    tpu.vector_store %arg4[%c2_35, %c0_36, %c0_37], %53 {strides = array<i32>} : memref<4x256x128xbf16, #tpu.memory_space<vmem>>, vector<1x256x128xbf16>,
    %c3 = arith.constant 3 : index
    %c0_38 = arith.constant 0 : index
    %c0_39 = arith.constant 0 : index
    %54 = vector.load %arg1[%c3, %c0_38, %c0_39] : memref<4x256x128xbf16, #tpu.memory_space<vmem>>, vector<1x256x128xbf16>
    %55 = vector.shape_cast %54 : vector<1x256x128xbf16> to vector<256x128xbf16>
    %c3_40 = arith.constant 3 : index
    %c0_41 = arith.constant 0 : index
    %c0_42 = arith.constant 0 : index
    %56 = vector.load %arg2[%c3_40, %c0_41, %c0_42] : memref<4x128x128xbf16, #tpu.memory_space<vmem>>, vector<1x128x128xbf16>
    %57 = vector.shape_cast %56 : vector<1x128x128xbf16> to vector<128x128xbf16>
    %cst_43 = arith.constant dense<0.000000e+00> : vector<256x128xf32>
    %58 = tpu.matmul %55, %57, %cst_43 {dimension_numbers = #tpu.dot_dimension_numbers<[1], [0], [0], [1], [0, 0, 1, 1], [], []>} : vector<256x128xbf16>, vector<128x128xbf16>, vector<256x128xf32> -> vector<256x128xf32>
    %c3_44 = arith.constant 3 : index
    %c0_45 = arith.constant 0 : index
    %c0_46 = arith.constant 0 : index
    %59 = vector.load %arg3[%c3_44, %c0_45, %c0_46] : memref<4x1x128xf32, #tpu.memory_space<vmem>>, vector<1x1x128xf32>
    %60 = vector.shape_cast %59 : vector<1x1x128xf32> to vector<1x128xf32>
    %61 = vector.broadcast %60 : vector<1x128xf32> to vector<256x128xf32>
    %62 = arith.addf %58, %61 : vector<256x128xf32>
    %63 = arith.negf %62 : vector<256x128xf32>
    %64 = math.exp %63 : vector<256x128xf32>
    %cst_47 = arith.constant 1.000000e+00 : f32
    %65 = vector.broadcast %cst_47 : f32 to vector<256x128xf32>
    %66 = arith.addf %65, %64 : vector<256x128xf32>
    %67 = arith.divf %65, %66 : vector<256x128xf32>
    %68 = arith.truncf %67 : vector<256x128xf32> to vector<256x128xbf16>
    %c3_48 = arith.constant 3 : index
    %c0_49 = arith.constant 0 : index
    %c0_50 = arith.constant 0 : index
    %69 = vector.load %arg4[%c3_48, %c0_49, %c0_50] : memref<4x256x128xbf16, #tpu.memory_space<vmem>>, vector<1x256x128xbf16>
    %70 = vector.shape_cast %69 : vector<1x256x128xbf16> to vector<256x128xbf16>
    %71 = vector.shape_cast %68 : vector<256x128xbf16> to vector<1x256x128xbf16>
    tpu.vector_store %arg4[%c3_48, %c0_49, %c0_50], %71 {strides = array<i32>} : memref<4x256x128xbf16, #tpu.memory_space<vmem>>, vector<1x256x128xbf16>,
    return
  }
  func.func @transform_0(%arg0: i32) -> (i32, i32, i32) {
    %c0_i32 = arith.constant 0 : i32
    %c0_i32_0 = arith.constant 0 : i32
    %c0_i32_1 = arith.constant 0 : i32
    return %c0_i32, %arg0, %c0_i32_0 : i32, i32, i32
  }
  func.func @transform_1(%arg0: i32) -> (i32, i32, i32) {
    %c0_i32 = arith.constant 0 : i32
    %c0_i32_0 = arith.constant 0 : i32
    %c0_i32_1 = arith.constant 0 : i32
    %c0_i32_2 = arith.constant 0 : i32
    return %c0_i32, %c0_i32_0, %c0_i32_1 : i32, i32, i32
  }
  func.func @transform_2(%arg0: i32) -> (i32, i32, i32) {
    %c0_i32 = arith.constant 0 : i32
    %c0_i32_0 = arith.constant 0 : i32
    %c0_i32_1 = arith.constant 0 : i32
    %c0_i32_2 = arith.constant 0 : i32
    return %c0_i32, %c0_i32_0, %c0_i32_1 : i32, i32, i32
  }
  func.func @transform_3(%arg0: i32) -> (i32, i32, i32) {
    %c0_i32 = arith.constant 0 : i32
    %c0_i32_0 = arith.constant 0 : i32
    %c0_i32_1 = arith.constant 0 : i32
    return %c0_i32, %arg0, %c0_i32_0 : i32, i32, i32
  }
}

</mosaic_0001>

<bundles_post_ra>
// kernel: vae_forward.7
= control target key start
LH: loop header
LB: loop body
LE: loop exit
PB: predicated region body
PF: predicated region fallthrough
CT: control target
= control target key end

     0   :  { %s1100_s12 = smov 0   ;;  %s1222_s0 = inlined_call_operand.vmem [shape: bf16[512,48], index: 0, kind: input, shape index: {}]   ;;  %s1223_s1 = inlined_call_operand.vmem [shape: bf16[48,128], index: 1, kind: input, shape index: {}]   ;;  %s1224_s2 = inlined_call_operand.vmem [shape: f32[1,128], index: 2, kind: input, shape index: {}]   ;;  %s1225_s3 = inlined_call_operand.vmem [shape: bf16[512,128], index: 3, kind: output, shape index: {}]  }
   0x1 LB: > { %s776_s13 = sadd.s32 4294967295, %s1078_s12   ;;  %p780_p0 = scmp.ge.s32.totalorder %s1078_s12, 1  ;;  %s1078_s12 = sphi %s1100_s12, %s13_s12  }
   0x2   : > { %p138_p1 = scmp.lt.s32.totalorder %s1078_s12, 3 }
   0x4   : > { %p139_p2 = pnand %p780_p0, %p138_p1 }
   0x5   : > { %v1053_v0 = vld [vmem:[%s1223_s1] sm:$0xff] (!%p139_p2)   ;;  %s781_s16 = sshll.u32 (!%p139_p2), %s776_s13, 5  ;;  %v1054_v1 = vld [vmem:[%s1223_s1 + $0x8] sm:$0xff] (!%p139_p2)   ;;  %v1055_v2 = vld [vmem:[%s1223_s1 + $0x10] sm:$0xff] (!%p139_p2)   ;;  %vm318_vm0 = vcmask (!%p139_p2), 392192  }
   0x6   : > { %142 = sbr.rel (%p139_p2) target bundleno = 265 (0x109), region = 32  ;;  %p163_p3 = scmp.lt.s32.totalorder (!%p139_p2), %s781_s16, 63  ;;  %1001 = vmatprep.subr.bf16.mxu0 (!%p139_p2), %v1053_v0  ;;  %1039 = vmatprep.subr.bf16.mxu1 (!%p139_p2), %v1053_v0  ;;  %v1162_v19 = vld [vmem:[%s1224_s2] ss:$0 sm:$0xff] (!%p139_p2) }
   0x7   : > { %1002 = vmatpush3.bf16.msra.mxu0 (!%p139_p2), %v1053_v0  ;;  %1042 = vmatpush3.bf16.msra.mxu1 (!%p139_p2), %v1053_v0 }
   0x8   : > { %1003 = vmatprep.subr.bf16.mxu0 (!%p139_p2), %v1054_v1  ;;  %1040 = vmatprep.subr.bf16.mxu1 (!%p139_p2), %v1054_v1 }
   0xb   : > { %1004 = vmatpush3.bf16.msra.mxu0 (!%p139_p2), %v1054_v1  ;;  %1043 = vmatpush3.bf16.msra.mxu1 (!%p139_p2), %v1054_v1 }
   0xc   : > { %1005 = vmatprep.subr.bf16.mxu0 (!%p139_p2), %v1055_v2  ;;  %1041 = vmatprep.subr.bf16.mxu1 (!%p139_p2), %v1055_v2 }
   0xd   : > { %s1227_s16 = smov (!%p163_p3, %s781_s16), 63 }
   0xe   : > { %s782_s21 = sshll.u32 %s1227_s16, 2 }
   0xf   : > { %s1125_s24 = scalar_lea.vmem %s1222_s0, %s782_s21  ;;  %1006 = vmatpush3.bf16.msra.mxu0 %v1055_v2  ;;  %1044 = vmatpush3.bf16.msra.mxu1 %v1055_v2  ;;  %s1177_s29 = scalar_lea.vmem %s1225_s3, %s782_s21 }
  0x10   : > { %v1056_v3 = vld [vmem:[%s1125_s24] sm:$0xff]   ;;  %v1058_v5 = vld [vmem:[%s1125_s24 + $0x8] sm:$0xff]   ;;  %v1060_v7 = vld [vmem:[%s1125_s24 + $0x10] sm:$0xff]  }
  0x11   : > { %v1057_v4 = vld [vmem:[%s1125_s24 + $0x40] sm:$0xff]   ;;  %1007 = vmatprep.mubr.msk.bf16.mxu0 %vm318_vm0, %v1056_v3  ;;  %v1059_v6 = vld [vmem:[%s1125_s24 + $0x48] sm:$0xff]   ;;  %v1061_v8 = vld [vmem:[%s1125_s24 + $0x50] sm:$0xff]  }
  0x12   : > { %1023 = vmatprep.mubr.msk.bf16.mxu1 %vm318_vm0, %v1057_v4  ;;  %1008 = vmatmul.mubr.msk.bf16.vlgmr.msra.gmra.mrb[0].mxu0 %vm318_vm0, %v1058_v5  ;;  %v1062_v9 = vld [vmem:[%s1125_s24 + $0x18] sm:$0xff]   ;;  %v1064_v11 = vld [vmem:[%s1125_s24 + $0x20] sm:$0xff]   ;;  %v1066_v13 = vld [vmem:[%s1125_s24 + $0x28] sm:$0xff]  }
  0x13   : > { %1024 = vmatmul.mubr.msk.bf16.vlgmr.msra.gmra.mrb[0].mxu1 %vm318_vm0, %v1059_v6  ;;  %1011 = vmatprep.mubr.msk.bf16.mxu0 %vm318_vm0, %v1060_v7  ;;  %v1063_v10 = vld [vmem:[%s1125_s24 + $0x58] sm:$0xff]   ;;  %v1065_v12 = vld [vmem:[%s1125_s24 + $0x60] sm:$0xff]   ;;  %v1067_v14 = vld [vmem:[%s1125_s24 + $0x68] sm:$0xff]  }
  0x14   : > { %1027 = vmatprep.mubr.msk.bf16.mxu1 %vm318_vm0, %v1061_v8  ;;  %v1068_v15 = vld [vmem:[%s1125_s24 + $0x30] sm:$0xff]   ;;  %v1070_v17 = vld [vmem:[%s1125_s24 + $0x38] sm:$0xff]  }
  0x15   : > { %v1069_v16 = vld [vmem:[%s1125_s24 + $0x70] sm:$0xff]   ;;  %v1071_v18 = vld [vmem:[%s1125_s24 + $0x78] sm:$0xff]  }
  0x1a   : > { %1012 = vmatmul.mubr.msk.bf16.gmra.mrb[4].mxu0 %vm318_vm0, %v1062_v9 }
  0x1b   : > { %1028 = vmatmul.mubr.msk.bf16.gmra.mrb[4].mxu1 %vm318_vm0, %v1063_v10  ;;  %1015 = vmatprep.mubr.msk.bf16.mxu0 %vm318_vm0, %v1064_v11 }
  0x1c   : > { %1031 = vmatprep.mubr.msk.bf16.mxu1 %vm318_vm0, %v1065_v12 }
  0x22   : > { %1016 = vmatmul.mubr.msk.bf16.gmra.mrb[8].mxu0 %vm318_vm0, %v1066_v13 }
  0x23   : > { %1032 = vmatmul.mubr.msk.bf16.gmra.mrb[8].mxu1 %vm318_vm0, %v1067_v14  ;;  %1019 = vmatprep.mubr.msk.bf16.mxu0 %vm318_vm0, %v1068_v15 }
  0x24   : > { %1035 = vmatprep.mubr.msk.bf16.mxu1 %vm318_vm0, %v1069_v16 }
  0x2a   : > { %1020 = vmatmul.mubr.msk.bf16.gmra.mrb[12].mxu0 %vm318_vm0, %v1070_v17 }
  0x2b   : > { %1036 = vmatmul.mubr.msk.bf16.gmra.mrb[12].mxu1 %vm318_vm0, %v1071_v18 }
  0xe5   : > { %v1009_v20 = vpop.f32.mrb[0].mxu0 }
  0xe6   : > { %v1025_v21 = vpop.f32.mrb[0].mxu1  ;;  %v410_v22 = vadd.f32 %v1009_v20, %v1162_v19  ;;  %v401_v24 = vpop.f32.mrb[1].mxu0 }
  0xe7   : > { %v474_v23 = vadd.f32 %v1025_v21, %v1162_v19  ;;  %v465_v25 = vpop.f32.mrb[1].mxu1  ;;  %v402_v26 = vadd.f32 %v1162_v19, %v401_v24  ;;  %v1010_v28 = vpop.f32.mrb[2].mxu0 }
  0xe8   : > { %v466_v27 = vadd.f32 %v1162_v19, %v465_v25  ;;  %v1026_v29 = vpop.f32.mrb[2].mxu1  ;;  %v413_v30 = vadd.f32 %v1010_v28, %v1162_v19  ;;  %v404_v32 = vpop.f32.mrb[3].mxu0  ;;  %v530_v36 = vmax.f32 %v410_v22, 0.0 }
  0xe9   : > { %v477_v31 = vadd.f32 %v1026_v29, %v1162_v19  ;;  %v468_v33 = vpop.f32.mrb[3].mxu1  ;;  %v405_v34 = vadd.f32 %v1162_v19, %v404_v32  ;;  %v546_v37 = vmax.f32 %v474_v23, 0.0  ;;  %v528_v40 = vmax.f32 %v402_v26, 0.0 }
  0xea   : > { %v469_v35 = vadd.f32 %v1162_v19, %v468_v33  ;;  %v531_v38 = vmax.f32 %v413_v30, 0.0  ;;  %v544_v41 = vmax.f32 %v466_v27, 0.0 }
  0xeb   : > { %v547_v39 = vmax.f32 %v477_v31, 0.0  ;;  %v529_v42 = vmax.f32 %v405_v34, 0.0 }
  0xec   : > { %v545_v43 = vmax.f32 %v469_v35, 0.0  ;;  %v895_v44 = vpack.c.bf16 %v531_v38, %v530_v36 }
  0xed   : > { %v935_v45 = vpack.c.bf16 %v547_v39, %v546_v37  ;;  %v890_v46 = vpack.c.bf16 %v529_v42, %v528_v40  ;;  %v1013_v48 = vpop.f32.mrb[4].mxu0 }
  0xee   : > { %v930_v47 = vpack.c.bf16 %v545_v43, %v544_v41  ;;  %v1029_v49 = vpop.f32.mrb[4].mxu1  ;;  %967 = vst [vmem:[%s1177_s29 + $0x8] sm:$0xff] %v895_v44   ;;  %v426_v50 = vadd.f32 %v1013_v48, %v1162_v19  ;;  %v417_v52 = vpop.f32.mrb[5].mxu0 }
  0xef   : > { %975 = vst [vmem:[%s1177_s29 + $0x48] sm:$0xff] %v935_v45   ;;  %v490_v51 = vadd.f32 %v1029_v49, %v1162_v19  ;;  %v481_v53 = vpop.f32.mrb[5].mxu1  ;;  %891 = vst [vmem:[%s1177_s29] sm:$0xff] %v890_v46   ;;  %v418_v54 = vadd.f32 %v1162_v19, %v417_v52  ;;  %v1014_v56 = vpop.f32.mrb[6].mxu0 }
  0xf0   : > { %974 = vst [vmem:[%s1177_s29 + $0x40] sm:$0xff] %v930_v47   ;;  %v482_v55 = vadd.f32 %v1162_v19, %v481_v53  ;;  %v1030_v57 = vpop.f32.mrb[6].mxu1  ;;  %v429_v58 = vadd.f32 %v1014_v56, %v1162_v19  ;;  %v420_v60 = vpop.f32.mrb[7].mxu0  ;;  %v534_v0 = vmax.f32 %v426_v50, 0.0 }
  0xf1   : > { %v493_v59 = vadd.f32 %v1030_v57, %v1162_v19  ;;  %v484_v61 = vpop.f32.mrb[7].mxu1  ;;  %v421_v62 = vadd.f32 %v1162_v19, %v420_v60  ;;  %v550_v1 = vmax.f32 %v490_v51, 0.0  ;;  %v532_v4 = vmax.f32 %v418_v54, 0.0 }
  0xf2   : > { %v485_v63 = vadd.f32 %v1162_v19, %v484_v61  ;;  %v535_v2 = vmax.f32 %v429_v58, 0.0  ;;  %v548_v5 = vmax.f32 %v482_v55, 0.0 }
  0xf3   : > { %v551_v3 = vmax.f32 %v493_v59, 0.0  ;;  %v533_v6 = vmax.f32 %v421_v62, 0.0 }
  0xf4   : > { %v549_v7 = vmax.f32 %v485_v63, 0.0  ;;  %v905_v8 = vpack.c.bf16 %v535_v2, %v534_v0 }
  0xf5   : > { %v945_v9 = vpack.c.bf16 %v551_v3, %v550_v1  ;;  %v900_v10 = vpack.c.bf16 %v533_v6, %v532_v4  ;;  %v1017_v12 = vpop.f32.mrb[8].mxu0 }
  0xf6   : > { %v940_v11 = vpack.c.bf16 %v549_v7, %v548_v5  ;;  %v1033_v13 = vpop.f32.mrb[8].mxu1  ;;  %969 = vst [vmem:[%s1177_s29 + $0x18] sm:$0xff] %v905_v8   ;;  %v442_v14 = vadd.f32 %v1017_v12, %v1162_v19  ;;  %v433_v16 = vpop.f32.mrb[9].mxu0 }
  0xf7   : > { %977 = vst [vmem:[%s1177_s29 + $0x58] sm:$0xff] %v945_v9   ;;  %v506_v15 = vadd.f32 %v1033_v13, %v1162_v19  ;;  %v497_v17 = vpop.f32.mrb[9].mxu1  ;;  %968 = vst [vmem:[%s1177_s29 + $0x10] sm:$0xff] %v900_v10   ;;  %v434_v18 = vadd.f32 %v1162_v19, %v433_v16  ;;  %v1018_v21 = vpop.f32.mrb[10].mxu0 }
  0xf8   : > { %976 = vst [vmem:[%s1177_s29 + $0x50] sm:$0xff] %v940_v11   ;;  %v498_v20 = vadd.f32 %v1162_v19, %v497_v17  ;;  %v1034_v22 = vpop.f32.mrb[10].mxu1  ;;  %v445_v23 = vadd.f32 %v1018_v21, %v1162_v19  ;;  %v436_v25 = vpop.f32.mrb[11].mxu0  ;;  %v538_v29 = vmax.f32 %v442_v14, 0.0 }
  0xf9   : > { %v509_v24 = vadd.f32 %v1034_v22, %v1162_v19  ;;  %v500_v26 = vpop.f32.mrb[11].mxu1  ;;  %v437_v27 = vadd.f32 %v1162_v19, %v436_v25  ;;  %v554_v30 = vmax.f32 %v506_v15, 0.0  ;;  %v536_v33 = vmax.f32 %v434_v18, 0.0 }
  0xfa   : > { %v501_v28 = vadd.f32 %v1162_v19, %v500_v26  ;;  %v539_v31 = vmax.f32 %v445_v23, 0.0  ;;  %v552_v34 = vmax.f32 %v498_v20, 0.0 }
  0xfb   : > { %v555_v32 = vmax.f32 %v509_v24, 0.0  ;;  %v537_v35 = vmax.f32 %v437_v27, 0.0 }
  0xfc   : > { %v553_v36 = vmax.f32 %v501_v28, 0.0  ;;  %v915_v37 = vpack.c.bf16 %v539_v31, %v538_v29 }
  0xfd   : > { %v955_v38 = vpack.c.bf16 %v555_v32, %v554_v30  ;;  %v910_v39 = vpack.c.bf16 %v537_v35, %v536_v33  ;;  %v1021_v41 = vpop.f32.mrb[12].mxu0 }
  0xfe   : > { %v950_v40 = vpack.c.bf16 %v553_v36, %v552_v34  ;;  %v1037_v42 = vpop.f32.mrb[12].mxu1  ;;  %971 = vst [vmem:[%s1177_s29 + $0x28] sm:$0xff] %v915_v37   ;;  %v458_v43 = vadd.f32 %v1021_v41, %v1162_v19  ;;  %v449_v45 = vpop.f32.mrb[13].mxu0 }
  0xff   : > { %979 = vst [vmem:[%s1177_s29 + $0x68] sm:$0xff] %v955_v38   ;;  %v522_v44 = vadd.f32 %v1037_v42, %v1162_v19  ;;  %v513_v46 = vpop.f32.mrb[13].mxu1  ;;  %970 = vst [vmem:[%s1177_s29 + $0x20] sm:$0xff] %v910_v39   ;;  %v450_v47 = vadd.f32 %v1162_v19, %v449_v45  ;;  %v1022_v49 = vpop.f32.mrb[14].mxu0 }
 0x100   : > { %978 = vst [vmem:[%s1177_s29 + $0x60] sm:$0xff] %v950_v40   ;;  %v514_v48 = vadd.f32 %v1162_v19, %v513_v46  ;;  %v1038_v50 = vpop.f32.mrb[14].mxu1  ;;  %v461_v51 = vadd.f32 %v1022_v49, %v1162_v19  ;;  %v452_v53 = vpop.f32.mrb[15].mxu0  ;;  %v542_v57 = vmax.f32 %v458_v43, 0.0 }
 0x101   : > { %v525_v52 = vadd.f32 %v1038_v50, %v1162_v19  ;;  %v516_v54 = vpop.f32.mrb[15].mxu1  ;;  %v453_v55 = vadd.f32 %v1162_v19, %v452_v53  ;;  %v558_v58 = vmax.f32 %v522_v44, 0.0  ;;  %v540_v61 = vmax.f32 %v450_v47, 0.0 }
 0x102   : > { %v517_v56 = vadd.f32 %v1162_v19, %v516_v54  ;;  %v543_v59 = vmax.f32 %v461_v51, 0.0  ;;  %v556_v62 = vmax.f32 %v514_v48, 0.0 }
 0x103   : > { %v559_v60 = vmax.f32 %v525_v52, 0.0  ;;  %v541_v63 = vmax.f32 %v453_v55, 0.0 }
 0x104   : > { %v557_v0 = vmax.f32 %v517_v56, 0.0  ;;  %v925_v1 = vpack.c.bf16 %v543_v59, %v542_v57 }
 0x105   : > { %v965_v2 = vpack.c.bf16 %v559_v60, %v558_v58  ;;  %v920_v3 = vpack.c.bf16 %v541_v63, %v540_v61 }
 0x106   : > { %v960_v4 = vpack.c.bf16 %v557_v0, %v556_v62  ;;  %973 = vst [vmem:[%s1177_s29 + $0x38] sm:$0xff] %v925_v1  }
 0x107   : > { %981 = vst [vmem:[%s1177_s29 + $0x78] sm:$0xff] %v965_v2   ;;  %972 = vst [vmem:[%s1177_s29 + $0x30] sm:$0xff] %v920_v3  }
 0x108   : > { %980 = vst [vmem:[%s1177_s29 + $0x70] sm:$0xff] %v960_v4  }
 0x109 PF: > { %s13_s12 = sadd.s32 1, %s1078_s12  }
 0x10a   : > { %p10_p4 = scmp.ge.s32.totalorder %s13_s12, 4  }
 0x10c   :  { %12 = sbr.rel (!%p10_p4) target bundleno = 1 (0x1), region = 62 }

// kernel: vae_forward.8
= control target key start
LH: loop header
LB: loop body
LE: loop exit
PB: predicated region body
PF: predicated region fallthrough
CT: control target
= control target key end

     0   :  { %s1373_s1 = inlined_call_operand.vmem [shape: bf16[512,128], index: 1, kind: input, shape index: {}]   ;;  %s1374_s0 = inlined_call_operand.vmem [shape: bf16[128,512], index: 0, kind: input, shape index: {}]   ;;  %s1375_s2 = inlined_call_operand.vmem [shape: f32[1,128], index: 2, kind: input, shape index: {}]   ;;  %s1376_s3 = inlined_call_operand.vmem [shape: bf16[128,128], index: 3, kind: output, shape index: {}]  }
   0x1   :  { %v1036_v0 = vld [vmem:[%s1373_s1 + $0x40] sm:$0xff]   ;;  %v1040_v4 = vld [vmem:[%s1373_s1 + $0x48] sm:$0xff]   ;;  %v1044_v8 = vld [vmem:[%s1373_s1 + $0x50] sm:$0xff]  }
   0x2   :  { %v1037_v1 = vld [vmem:[%s1373_s1 + $0xc0] sm:$0xff]   ;;  %908 = vmatprep.subr.bf16.mxu0 %v1036_v0  ;;  %v1041_v5 = vld [vmem:[%s1373_s1 + $0xc8] sm:$0xff]   ;;  %v1045_v9 = vld [vmem:[%s1373_s1 + $0xd0] sm:$0xff]  }
   0x3   :  { %v1038_v2 = vld [vmem:[%s1373_s1] sm:$0xff]   ;;  %972 = vmatprep.subr.bf16.mxu1 %v1037_v1  ;;  %v1042_v6 = vld [vmem:[%s1373_s1 + $0x8] sm:$0xff]   ;;  %v1046_v10 = vld [vmem:[%s1373_s1 + $0x10] sm:$0xff]  }
   0x4   :  { %v1039_v3 = vld [vmem:[%s1373_s1 + $0x80] sm:$0xff]   ;;  %909 = vmatpush3.bf16.msra.mxu0 %v1038_v2  ;;  %v1043_v7 = vld [vmem:[%s1373_s1 + $0x88] sm:$0xff]   ;;  %v1047_v11 = vld [vmem:[%s1373_s1 + $0x90] sm:$0xff]  }
   0x5   :  { %973 = vmatpush3.bf16.msra.mxu1 %v1039_v3  ;;  %910 = vmatprep.subr.bf16.mxu0 %v1040_v4  ;;  %v1048_v12 = vld [vmem:[%s1373_s1 + $0x58] sm:$0xff]   ;;  %v1052_v16 = vld [vmem:[%s1373_s1 + $0x60] sm:$0xff]   ;;  %v1056_v20 = vld [vmem:[%s1373_s1 + $0x68] sm:$0xff]  }
   0x6   :  { %974 = vmatprep.subr.bf16.mxu1 %v1041_v5  ;;  %v1049_v13 = vld [vmem:[%s1373_s1 + $0xd8] sm:$0xff]   ;;  %v1053_v17 = vld [vmem:[%s1373_s1 + $0xe0] sm:$0xff]   ;;  %v1057_v21 = vld [vmem:[%s1373_s1 + $0xe8] sm:$0xff]  }
   0x7   :  { %v1050_v14 = vld [vmem:[%s1373_s1 + $0x18] sm:$0xff]   ;;  %v1054_v18 = vld [vmem:[%s1373_s1 + $0x20] sm:$0xff]   ;;  %v1058_v22 = vld [vmem:[%s1373_s1 + $0x28] sm:$0xff]  }
   0x8   :  { %911 = vmatpush3.bf16.msra.mxu0 %v1042_v6  ;;  %v1051_v15 = vld [vmem:[%s1373_s1 + $0x98] sm:$0xff]   ;;  %v1055_v19 = vld [vmem:[%s1373_s1 + $0xa0] sm:$0xff]   ;;  %v1059_v23 = vld [vmem:[%s1373_s1 + $0xa8] sm:$0xff]  }
   0x9   :  { %975 = vmatpush3.bf16.msra.mxu1 %v1043_v7  ;;  %912 = vmatprep.subr.bf16.mxu0 %v1044_v8  ;;  %v1060_v24 = vld [vmem:[%s1373_s1 + $0x70] sm:$0xff]   ;;  %v1064_v28 = vld [vmem:[%s1373_s1 + $0x78] sm:$0xff]   ;;  %v1331_v2 = vld [vmem:[%s1375_s2] ss:$0 sm:$0xff] }
   0xa   :  { %976 = vmatprep.subr.bf16.mxu1 %v1045_v9  ;;  %v1061_v25 = vld [vmem:[%s1373_s1 + $0xf0] sm:$0xff]   ;;  %v1065_v29 = vld [vmem:[%s1373_s1 + $0xf8] sm:$0xff]  }
   0xb   :  { %v1062_v26 = vld [vmem:[%s1373_s1 + $0x30] sm:$0xff]   ;;  %v1066_v30 = vld [vmem:[%s1373_s1 + $0x38] sm:$0xff]  }
   0xc   :  { %913 = vmatpush3.bf16.msra.mxu0 %v1046_v10  ;;  %v1063_v27 = vld [vmem:[%s1373_s1 + $0xb0] sm:$0xff]   ;;  %v1067_v31 = vld [vmem:[%s1373_s1 + $0xb8] sm:$0xff]  }
   0xd   :  { %977 = vmatpush3.bf16.msra.mxu1 %v1047_v11  ;;  %914 = vmatprep.subr.bf16.mxu0 %v1048_v12  ;;  %v1068_v32 = vld [vmem:[%s1374_s0] ss:$16 sps:$4 sm:$0xff]   ;;  %v1070_v33 = vld [vmem:[%s1374_s0 + $0x4] ss:$16 sps:$4 sm:$0xff]   ;;  %v1071_v34 = vld [vmem:[%s1374_s0 + $0x8] ss:$16 sps:$4 sm:$0xff]  }
   0xe   :  { %978 = vmatprep.subr.bf16.mxu1 %v1049_v13  ;;  %v1073_v35 = vld [vmem:[%s1374_s0 + $0xc] ss:$16 sps:$4 sm:$0xff]   ;;  %502 = vmatprep.mubr.bf16.mxu0 %v1070_v33  ;;  %v1074_v36 = vld [vmem:[%s1374_s0 + $0x24] ss:$16 sps:$4 sm:$0xff]   ;;  %v1078_v38 = vld [vmem:[%s1374_s0 + $0x20] ss:$16 sps:$4 sm:$0xff]  }
   0xf   :  { %599 = vmatprep.mubr.bf16.mxu1 %v1073_v35  ;;  %v1076_v37 = vld [vmem:[%s1374_s0 + $0x2c] ss:$16 sps:$4 sm:$0xff]   ;;  %v1079_v39 = vld [vmem:[%s1374_s0 + $0x28] ss:$16 sps:$4 sm:$0xff]   ;;  %v1080_v40 = vld [vmem:[%s1374_s0 + $0x44] ss:$16 sps:$4 sm:$0xff]  }
  0x10   :  { %915 = vmatpush3.bf16.msra.mxu0 %v1050_v14  ;;  %v1082_v41 = vld [vmem:[%s1374_s0 + $0x4c] ss:$16 sps:$4 sm:$0xff]   ;;  %v1084_v42 = vld [vmem:[%s1374_s0 + $0x40] ss:$16 sps:$4 sm:$0xff]   ;;  %v1085_v43 = vld [vmem:[%s1374_s0 + $0x48] ss:$16 sps:$4 sm:$0xff]  }
  0x11   :  { %979 = vmatpush3.bf16.msra.mxu1 %v1051_v15  ;;  %916 = vmatprep.subr.bf16.mxu0 %v1052_v16  ;;  %v1086_v44 = vld [vmem:[%s1374_s0 + $0x64] ss:$16 sps:$4 sm:$0xff]   ;;  %v1088_v45 = vld [vmem:[%s1374_s0 + $0x6c] ss:$16 sps:$4 sm:$0xff]   ;;  %v1090_v46 = vld [vmem:[%s1374_s0 + $0x60] ss:$16 sps:$4 sm:$0xff]  }
  0x12   :  { %980 = vmatprep.subr.bf16.mxu1 %v1053_v17  ;;  %v1091_v47 = vld [vmem:[%s1374_s0 + $0x68] ss:$16 sps:$4 sm:$0xff]   ;;  %v1092_v48 = vld [vmem:[%s1374_s0 + $0x84] ss:$16 sps:$4 sm:$0xff]   ;;  %v1094_v49 = vld [vmem:[%s1374_s0 + $0x8c] ss:$16 sps:$4 sm:$0xff]  }
  0x13   :  { %v1096_v50 = vld [vmem:[%s1374_s0 + $0x80] ss:$16 sps:$4 sm:$0xff]   ;;  %v1097_v51 = vld [vmem:[%s1374_s0 + $0x88] ss:$16 sps:$4 sm:$0xff]   ;;  %v1098_v52 = vld [vmem:[%s1374_s0 + $0xa4] ss:$16 sps:$4 sm:$0xff]  }
  0x14   :  { %917 = vmatpush3.bf16.msra.mxu0 %v1054_v18  ;;  %v1100_v53 = vld [vmem:[%s1374_s0 + $0xac] ss:$16 sps:$4 sm:$0xff]   ;;  %v1102_v54 = vld [vmem:[%s1374_s0 + $0xa0] ss:$16 sps:$4 sm:$0xff]   ;;  %v1103_v55 = vld [vmem:[%s1374_s0 + $0xa8] ss:$16 sps:$4 sm:$0xff]  }
  0x15   :  { %981 = vmatpush3.bf16.msra.mxu1 %v1055_v19  ;;  %918 = vmatprep.subr.bf16.mxu0 %v1056_v20  ;;  %v1104_v56 = vld [vmem:[%s1374_s0 + $0xc4] ss:$16 sps:$4 sm:$0xff]   ;;  %v1106_v57 = vld [vmem:[%s1374_s0 + $0xcc] ss:$16 sps:$4 sm:$0xff]   ;;  %v1108_v58 = vld [vmem:[%s1374_s0 + $0xc0] ss:$16 sps:$4 sm:$0xff]  }
  0x16   :  { %982 = vmatprep.subr.bf16.mxu1 %v1057_v21  ;;  %v1109_v59 = vld [vmem:[%s1374_s0 + $0xc8] ss:$16 sps:$4 sm:$0xff]   ;;  %v1110_v60 = vld [vmem:[%s1374_s0 + $0xe4] ss:$16 sps:$4 sm:$0xff]   ;;  %v1112_v61 = vld [vmem:[%s1374_s0 + $0xec] ss:$16 sps:$4 sm:$0xff]  }
  0x17   :  { %v1114_v62 = vld [vmem:[%s1374_s0 + $0xe0] ss:$16 sps:$4 sm:$0xff]   ;;  %v1115_v63 = vld [vmem:[%s1374_s0 + $0xe8] ss:$16 sps:$4 sm:$0xff]  }
  0x18   :  { %919 = vmatpush3.bf16.msra.mxu0 %v1058_v22 }
  0x19   :  { %983 = vmatpush3.bf16.msra.mxu1 %v1059_v23  ;;  %920 = vmatprep.subr.bf16.mxu0 %v1060_v24 }
  0x1a   :  { %984 = vmatprep.subr.bf16.mxu1 %v1061_v25 }
  0x1c   :  { %921 = vmatpush3.bf16.msra.mxu0 %v1062_v26 }
  0x1d   :  { %985 = vmatpush3.bf16.msra.mxu1 %v1063_v27  ;;  %922 = vmatprep.subr.bf16.mxu0 %v1064_v28 }
  0x1e   :  { %986 = vmatprep.subr.bf16.mxu1 %v1065_v29 }
  0x20   :  { %923 = vmatpush3.bf16.msra.mxu0 %v1066_v30 }
  0x21   :  { %987 = vmatpush3.bf16.msra.mxu1 %v1067_v31 }
  0x23   :  { %503 = vmatmul.mubr.bf16.vlgmr.msra.gmra.mrb[0].mxu0 %v1068_v32 }
  0x24   :  { %600 = vmatmul.mubr.bf16.vlgmr.msra.gmra.mrb[0].mxu1 %v1071_v34  ;;  %510 = vmatprep.mubr.bf16.mxu0 %v1074_v36 }
  0x25   :  { %607 = vmatprep.mubr.bf16.mxu1 %v1076_v37 }
  0x2b   :  { %511 = vmatmul.mubr.bf16.gmra.mrb[4].mxu0 %v1078_v38 }
  0x2c   :  { %608 = vmatmul.mubr.bf16.gmra.mrb[4].mxu1 %v1079_v39  ;;  %518 = vmatprep.mubr.bf16.mxu0 %v1080_v40 }
  0x2d   :  { %615 = vmatprep.mubr.bf16.mxu1 %v1082_v41 }
  0x33   :  { %519 = vmatmul.mubr.bf16.gmra.mrb[8].mxu0 %v1084_v42 }
  0x34   :  { %616 = vmatmul.mubr.bf16.gmra.mrb[8].mxu1 %v1085_v43  ;;  %526 = vmatprep.mubr.bf16.mxu0 %v1086_v44 }
  0x35   :  { %623 = vmatprep.mubr.bf16.mxu1 %v1088_v45 }
  0x3b   :  { %527 = vmatmul.mubr.bf16.gmra.mrb[12].mxu0 %v1090_v46 }
  0x3c   :  { %624 = vmatmul.mubr.bf16.gmra.mrb[12].mxu1 %v1091_v47  ;;  %534 = vmatprep.mubr.bf16.mxu0 %v1092_v48 }
  0x3d   :  { %631 = vmatprep.mubr.bf16.mxu1 %v1094_v49 }
  0x43   :  { %535 = vmatmul.mubr.bf16.gmra.mrb[16].mxu0 %v1096_v50 }
  0x44   :  { %632 = vmatmul.mubr.bf16.gmra.mrb[16].mxu1 %v1097_v51  ;;  %542 = vmatprep.mubr.bf16.mxu0 %v1098_v52 }
  0x45   :  { %639 = vmatprep.mubr.bf16.mxu1 %v1100_v53 }
  0x4b   :  { %543 = vmatmul.mubr.bf16.gmra.mrb[20].mxu0 %v1102_v54 }
  0x4c   :  { %640 = vmatmul.mubr.bf16.gmra.mrb[20].mxu1 %v1103_v55  ;;  %550 = vmatprep.mubr.bf16.mxu0 %v1104_v56 }
  0x4d   :  { %647 = vmatprep.mubr.bf16.mxu1 %v1106_v57 }
  0x53   :  { %551 = vmatmul.mubr.bf16.gmra.mrb[24].mxu0 %v1108_v58 }
  0x54   :  { %648 = vmatmul.mubr.bf16.gmra.mrb[24].mxu1 %v1109_v59  ;;  %558 = vmatprep.mubr.bf16.mxu0 %v1110_v60 }
  0x55   :  { %655 = vmatprep.mubr.bf16.mxu1 %v1112_v61 }
  0x5b   :  { %559 = vmatmul.mubr.bf16.gmra.mrb[28].mxu0 %v1114_v62 }
  0x5c   :  { %656 = vmatmul.mubr.bf16.gmra.mrb[28].mxu1 %v1115_v63 }
  0xf6   :  { %v924_v0 = vpop.f32.mrb[0].mxu0 }
  0xf7   :  { %v988_v1 = vpop.f32.mrb[0].mxu1  ;;  %v925_v3 = vpop.f32.mrb[1].mxu0 }
  0xf8   :  { %v926_v4 = vadd.f32 %v925_v3, %v924_v0  ;;  %v989_v5 = vpop.f32.mrb[1].mxu1  ;;  %v927_v6 = vpop.f32.mrb[2].mxu0 }
  0xf9   :  { %v990_v7 = vadd.f32 %v989_v5, %v988_v1  ;;  %v991_v8 = vpop.f32.mrb[2].mxu1  ;;  %v928_v9 = vpop.f32.mrb[3].mxu0 }
  0xfa   :  { %v505_v10 = vadd.f32 %v926_v4, %v1331_v2  ;;  %v929_v11 = vadd.f32 %v928_v9, %v927_v6  ;;  %v992_v12 = vpop.f32.mrb[3].mxu1 }
  0xfb   :  { %v993_v13 = vadd.f32 %v992_v12, %v991_v8 }
  0xfc   :  { %v602_v14 = vadd.f32 %v990_v7, %v505_v10  ;;  %v508_v15 = vadd.f32 %v929_v11, %v1331_v2 }
  0xfe   :  { %v605_v16 = vadd.f32 %v993_v13, %v508_v15  ;;  %v930_v17 = vpop.f32.mrb[4].mxu0  ;;  %v664_v20 = vmax.f32 %v602_v14, 0.0 }
  0xff   :  { %v994_v18 = vpop.f32.mrb[4].mxu1  ;;  %v931_v19 = vpop.f32.mrb[5].mxu0 }
 0x100   :  { %v665_v21 = vmax.f32 %v605_v16, 0.0  ;;  %v932_v22 = vadd.f32 %v931_v19, %v930_v17  ;;  %v995_v23 = vpop.f32.mrb[5].mxu1  ;;  %v933_v24 = vpop.f32.mrb[6].mxu0 }
 0x101   :  { %v996_v25 = vadd.f32 %v995_v23, %v994_v18  ;;  %v997_v26 = vpop.f32.mrb[6].mxu1  ;;  %v934_v27 = vpop.f32.mrb[7].mxu0 }
 0x102   :  { %v864_v28 = vpack.c.bf16 %v665_v21, %v664_v20  ;;  %v513_v29 = vadd.f32 %v932_v22, %v1331_v2  ;;  %v935_v30 = vadd.f32 %v934_v27, %v933_v24  ;;  %v998_v31 = vpop.f32.mrb[7].mxu1 }
 0x103   :  { %v999_v32 = vadd.f32 %v998_v31, %v997_v26 }
 0x104   :  { %865 = vst [vmem:[%s1376_s3] sm:$0xff] %v864_v28   ;;  %v610_v33 = vadd.f32 %v996_v25, %v513_v29  ;;  %v516_v34 = vadd.f32 %v935_v30, %v1331_v2 }
 0x106   :  { %v613_v35 = vadd.f32 %v999_v32, %v516_v34  ;;  %v936_v36 = vpop.f32.mrb[8].mxu0  ;;  %v666_v39 = vmax.f32 %v610_v33, 0.0 }
 0x107   :  { %v1000_v37 = vpop.f32.mrb[8].mxu1  ;;  %v937_v38 = vpop.f32.mrb[9].mxu0 }
 0x108   :  { %v667_v40 = vmax.f32 %v613_v35, 0.0  ;;  %v938_v41 = vadd.f32 %v937_v38, %v936_v36  ;;  %v1001_v42 = vpop.f32.mrb[9].mxu1  ;;  %v939_v43 = vpop.f32.mrb[10].mxu0 }
 0x109   :  { %v1002_v44 = vadd.f32 %v1001_v42, %v1000_v37  ;;  %v1003_v45 = vpop.f32.mrb[10].mxu1  ;;  %v940_v46 = vpop.f32.mrb[11].mxu0 }
 0x10a   :  { %v869_v47 = vpack.c.bf16 %v667_v40, %v666_v39  ;;  %v521_v48 = vadd.f32 %v938_v41, %v1331_v2  ;;  %v941_v49 = vadd.f32 %v940_v46, %v939_v43  ;;  %v1004_v50 = vpop.f32.mrb[11].mxu1 }
 0x10b   :  { %v1005_v51 = vadd.f32 %v1004_v50, %v1003_v45 }
 0x10c   :  { %901 = vst [vmem:[%s1376_s3 + $0x8] sm:$0xff] %v869_v47   ;;  %v618_v52 = vadd.f32 %v1002_v44, %v521_v48  ;;  %v524_v53 = vadd.f32 %v941_v49, %v1331_v2 }
 0x10e   :  { %v621_v54 = vadd.f32 %v1005_v51, %v524_v53  ;;  %v942_v55 = vpop.f32.mrb[12].mxu0  ;;  %v668_v58 = vmax.f32 %v618_v52, 0.0 }
 0x10f   :  { %v1006_v56 = vpop.f32.mrb[12].mxu1  ;;  %v943_v57 = vpop.f32.mrb[13].mxu0 }
 0x110   :  { %v669_v59 = vmax.f32 %v621_v54, 0.0  ;;  %v944_v60 = vadd.f32 %v943_v57, %v942_v55  ;;  %v1007_v61 = vpop.f32.mrb[13].mxu1  ;;  %v945_v62 = vpop.f32.mrb[14].mxu0 }
 0x111   :  { %v1008_v63 = vadd.f32 %v1007_v61, %v1006_v56  ;;  %v1009_v0 = vpop.f32.mrb[14].mxu1  ;;  %v946_v1 = vpop.f32.mrb[15].mxu0 }
 0x112   :  { %v874_v3 = vpack.c.bf16 %v669_v59, %v668_v58  ;;  %v529_v4 = vadd.f32 %v944_v60, %v1331_v2  ;;  %v947_v5 = vadd.f32 %v946_v1, %v945_v62  ;;  %v1010_v6 = vpop.f32.mrb[15].mxu1 }
 0x113   :  { %v1011_v7 = vadd.f32 %v1010_v6, %v1009_v0 }
 0x114   :  { %902 = vst [vmem:[%s1376_s3 + $0x10] sm:$0xff] %v874_v3   ;;  %v626_v8 = vadd.f32 %v1008_v63, %v529_v4  ;;  %v532_v9 = vadd.f32 %v947_v5, %v1331_v2 }
 0x116   :  { %v629_v10 = vadd.f32 %v1011_v7, %v532_v9  ;;  %v948_v11 = vpop.f32.mrb[16].mxu0  ;;  %v670_v14 = vmax.f32 %v626_v8, 0.0 }
 0x117   :  { %v1012_v12 = vpop.f32.mrb[16].mxu1  ;;  %v949_v13 = vpop.f32.mrb[17].mxu0 }
 0x118   :  { %v671_v15 = vmax.f32 %v629_v10, 0.0  ;;  %v950_v16 = vadd.f32 %v949_v13, %v948_v11  ;;  %v1013_v17 = vpop.f32.mrb[17].mxu1  ;;  %v951_v18 = vpop.f32.mrb[18].mxu0 }
 0x119   :  { %v1014_v19 = vadd.f32 %v1013_v17, %v1012_v12  ;;  %v1015_v20 = vpop.f32.mrb[18].mxu1  ;;  %v952_v21 = vpop.f32.mrb[19].mxu0 }
 0x11a   :  { %v879_v22 = vpack.c.bf16 %v671_v15, %v670_v14  ;;  %v537_v23 = vadd.f32 %v950_v16, %v1331_v2  ;;  %v953_v24 = vadd.f32 %v952_v21, %v951_v18  ;;  %v1016_v25 = vpop.f32.mrb[19].mxu1 }
 0x11b   :  { %v1017_v26 = vadd.f32 %v1016_v25, %v1015_v20 }
 0x11c   :  { %903 = vst [vmem:[%s1376_s3 + $0x18] sm:$0xff] %v879_v22   ;;  %v634_v27 = vadd.f32 %v1014_v19, %v537_v23  ;;  %v540_v28 = vadd.f32 %v953_v24, %v1331_v2 }
 0x11e   :  { %v637_v29 = vadd.f32 %v1017_v26, %v540_v28  ;;  %v954_v30 = vpop.f32.mrb[20].mxu0  ;;  %v672_v33 = vmax.f32 %v634_v27, 0.0 }
 0x11f   :  { %v1018_v31 = vpop.f32.mrb[20].mxu1  ;;  %v955_v32 = vpop.f32.mrb[21].mxu0 }
 0x120   :  { %v673_v34 = vmax.f32 %v637_v29, 0.0  ;;  %v956_v35 = vadd.f32 %v955_v32, %v954_v30  ;;  %v1019_v36 = vpop.f32.mrb[21].mxu1  ;;  %v957_v37 = vpop.f32.mrb[22].mxu0 }
 0x121   :  { %v1020_v38 = vadd.f32 %v1019_v36, %v1018_v31  ;;  %v1021_v39 = vpop.f32.mrb[22].mxu1  ;;  %v958_v40 = vpop.f32.mrb[23].mxu0 }
 0x122   :  { %v884_v41 = vpack.c.bf16 %v673_v34, %v672_v33  ;;  %v545_v42 = vadd.f32 %v956_v35, %v1331_v2  ;;  %v959_v43 = vadd.f32 %v958_v40, %v957_v37  ;;  %v1022_v44 = vpop.f32.mrb[23].mxu1 }
 0x123   :  { %v1023_v45 = vadd.f32 %v1022_v44, %v1021_v39 }
 0x124   :  { %904 = vst [vmem:[%s1376_s3 + $0x20] sm:$0xff] %v884_v41   ;;  %v642_v46 = vadd.f32 %v1020_v38, %v545_v42  ;;  %v548_v47 = vadd.f32 %v959_v43, %v1331_v2 }
 0x126   :  { %v645_v48 = vadd.f32 %v1023_v45, %v548_v47  ;;  %v960_v49 = vpop.f32.mrb[24].mxu0  ;;  %v674_v52 = vmax.f32 %v642_v46, 0.0 }
 0x127   :  { %v1024_v50 = vpop.f32.mrb[24].mxu1  ;;  %v961_v51 = vpop.f32.mrb[25].mxu0 }
 0x128   :  { %v675_v53 = vmax.f32 %v645_v48, 0.0  ;;  %v962_v54 = vadd.f32 %v961_v51, %v960_v49  ;;  %v1025_v55 = vpop.f32.mrb[25].mxu1  ;;  %v963_v56 = vpop.f32.mrb[26].mxu0 }
 0x129   :  { %v1026_v57 = vadd.f32 %v1025_v55, %v1024_v50  ;;  %v1027_v58 = vpop.f32.mrb[26].mxu1  ;;  %v964_v59 = vpop.f32.mrb[27].mxu0 }
 0x12a   :  { %v889_v60 = vpack.c.bf16 %v675_v53, %v674_v52  ;;  %v553_v61 = vadd.f32 %v962_v54, %v1331_v2  ;;  %v965_v62 = vadd.f32 %v964_v59, %v963_v56  ;;  %v1028_v63 = vpop.f32.mrb[27].mxu1 }
 0x12b   :  { %v1029_v0 = vadd.f32 %v1028_v63, %v1027_v58 }
 0x12c   :  { %905 = vst [vmem:[%s1376_s3 + $0x28] sm:$0xff] %v889_v60   ;;  %v650_v1 = vadd.f32 %v1026_v57, %v553_v61  ;;  %v556_v3 = vadd.f32 %v965_v62, %v1331_v2 }
 0x12e   :  { %v653_v4 = vadd.f32 %v1029_v0, %v556_v3  ;;  %v966_v5 = vpop.f32.mrb[28].mxu0  ;;  %v676_v8 = vmax.f32 %v650_v1, 0.0 }
 0x12f   :  { %v1030_v6 = vpop.f32.mrb[28].mxu1  ;;  %v967_v7 = vpop.f32.mrb[29].mxu0 }
 0x130   :  { %v677_v9 = vmax.f32 %v653_v4, 0.0  ;;  %v968_v10 = vadd.f32 %v967_v7, %v966_v5  ;;  %v1031_v11 = vpop.f32.mrb[29].mxu1  ;;  %v969_v12 = vpop.f32.mrb[30].mxu0 }
 0x131   :  { %v1032_v13 = vadd.f32 %v1031_v11, %v1030_v6  ;;  %v1033_v14 = vpop.f32.mrb[30].mxu1  ;;  %v970_v15 = vpop.f32.mrb[31].mxu0 }
 0x132   :  { %v894_v16 = vpack.c.bf16 %v677_v9, %v676_v8  ;;  %v561_v17 = vadd.f32 %v968_v10, %v1331_v2  ;;  %v971_v18 = vadd.f32 %v970_v15, %v969_v12  ;;  %v1034_v19 = vpop.f32.mrb[31].mxu1 }
 0x133   :  { %v1035_v20 = vadd.f32 %v1034_v19, %v1033_v14 }
 0x134   :  { %906 = vst [vmem:[%s1376_s3 + $0x30] sm:$0xff] %v894_v16   ;;  %v658_v21 = vadd.f32 %v1032_v13, %v561_v17  ;;  %v564_v22 = vadd.f32 %v971_v18, %v1331_v2 }
 0x136   :  { %v661_v23 = vadd.f32 %v1035_v20, %v564_v22  ;;  %v678_v24 = vmax.f32 %v658_v21, 0.0 }
 0x138   :  { %v679_v25 = vmax.f32 %v661_v23, 0.0 }
 0x13a   :  { %v899_v26 = vpack.c.bf16 %v679_v25, %v678_v24 }
 0x13c   :  { %907 = vst [vmem:[%s1376_s3 + $0x38] sm:$0xff] %v899_v26  }

// kernel: vae_forward.9
= control target key start
LH: loop header
LB: loop body
LE: loop exit
PB: predicated region body
PF: predicated region fallthrough
CT: control target
= control target key end

     0   :  { %s1399_s1 = inlined_call_operand.vmem [shape: bf16[1024,128], index: 1, kind: input, shape index: {}]   ;;  %s1400_s0 = inlined_call_operand.vmem [shape: bf16[32,1024], index: 0, kind: input, shape index: {}]   ;;  %s1401_s2 = inlined_call_operand.vmem [shape: f32[1,128], index: 2, kind: input, shape index: {}]   ;;  %s1402_s3 = inlined_call_operand.vmem [shape: bf16[32,128], index: 3, kind: output, shape index: {}]  }
   0x1   :  { %v1066_v0 = vld [vmem:[%s1399_s1 + $0x40] sm:$0xff]   ;;  %v1070_v4 = vld [vmem:[%s1399_s1 + $0x48] sm:$0xff]   ;;  %v1074_v8 = vld [vmem:[%s1399_s1 + $0x50] sm:$0xff]  }
   0x2   :  { %v1067_v1 = vld [vmem:[%s1399_s1 + $0xc0] sm:$0xff]   ;;  %954 = vmatprep.subr.bf16.mxu0 %v1066_v0  ;;  %v1071_v5 = vld [vmem:[%s1399_s1 + $0xc8] sm:$0xff]   ;;  %v1075_v9 = vld [vmem:[%s1399_s1 + $0xd0] sm:$0xff]  }
   0x3   :  { %v1068_v2 = vld [vmem:[%s1399_s1] sm:$0xff]   ;;  %982 = vmatprep.subr.bf16.mxu1 %v1067_v1  ;;  %v1072_v6 = vld [vmem:[%s1399_s1 + $0x8] sm:$0xff]   ;;  %v1076_v10 = vld [vmem:[%s1399_s1 + $0x10] sm:$0xff]  }
   0x4   :  { %v1069_v3 = vld [vmem:[%s1399_s1 + $0x80] sm:$0xff]   ;;  %955 = vmatpush3.bf16.msra.mxu0 %v1068_v2  ;;  %v1073_v7 = vld [vmem:[%s1399_s1 + $0x88] sm:$0xff]   ;;  %v1077_v11 = vld [vmem:[%s1399_s1 + $0x90] sm:$0xff]  }
   0x5   :  { %983 = vmatpush3.bf16.msra.mxu1 %v1069_v3  ;;  %956 = vmatprep.subr.bf16.mxu0 %v1070_v4  ;;  %v1078_v12 = vld [vmem:[%s1399_s1 + $0x58] sm:$0xff]   ;;  %v1082_v16 = vld [vmem:[%s1399_s1 + $0x60] sm:$0xff]   ;;  %v1086_v20 = vld [vmem:[%s1399_s1 + $0x68] sm:$0xff]  }
   0x6   :  { %984 = vmatprep.subr.bf16.mxu1 %v1071_v5  ;;  %v1079_v13 = vld [vmem:[%s1399_s1 + $0xd8] sm:$0xff]   ;;  %v1083_v17 = vld [vmem:[%s1399_s1 + $0xe0] sm:$0xff]   ;;  %v1087_v21 = vld [vmem:[%s1399_s1 + $0xe8] sm:$0xff]  }
   0x7   :  { %v1080_v14 = vld [vmem:[%s1399_s1 + $0x18] sm:$0xff]   ;;  %v1084_v18 = vld [vmem:[%s1399_s1 + $0x20] sm:$0xff]   ;;  %v1088_v22 = vld [vmem:[%s1399_s1 + $0x28] sm:$0xff]  }
   0x8   :  { %957 = vmatpush3.bf16.msra.mxu0 %v1072_v6  ;;  %v1081_v15 = vld [vmem:[%s1399_s1 + $0x98] sm:$0xff]   ;;  %v1085_v19 = vld [vmem:[%s1399_s1 + $0xa0] sm:$0xff]   ;;  %v1089_v23 = vld [vmem:[%s1399_s1 + $0xa8] sm:$0xff]  }
   0x9   :  { %985 = vmatpush3.bf16.msra.mxu1 %v1073_v7  ;;  %958 = vmatprep.subr.bf16.mxu0 %v1074_v8  ;;  %v1090_v24 = vld [vmem:[%s1399_s1 + $0x70] sm:$0xff]   ;;  %v1094_v28 = vld [vmem:[%s1399_s1 + $0x78] sm:$0xff]   ;;  %v15_v32 = vld [vmem:[%s1400_s0] sm:$0xff] }
   0xa   :  { %986 = vmatprep.subr.bf16.mxu1 %v1075_v9  ;;  %v1091_v25 = vld [vmem:[%s1399_s1 + $0xf0] sm:$0xff]   ;;  %v1095_v29 = vld [vmem:[%s1399_s1 + $0xf8] sm:$0xff]   ;;  %v19_v33 = vld [vmem:[%s1400_s0 + $0x20] sm:$0xff] }
   0xb   :  { %v1092_v26 = vld [vmem:[%s1399_s1 + $0x30] sm:$0xff]   ;;  %v1096_v30 = vld [vmem:[%s1399_s1 + $0x38] sm:$0xff]   ;;  %v16_v34 = vld [vmem:[%s1400_s0 + $0x8] sm:$0xff]  ;;  %v855_v35 = vcombine.low %v15_v32, %v19_v33  ;;  %v856_v36 = vcombine.high %v15_v32, %v19_v33 }
   0xc   :  { %959 = vmatpush3.bf16.msra.mxu0 %v1076_v10  ;;  %v1093_v27 = vld [vmem:[%s1399_s1 + $0xb0] sm:$0xff]   ;;  %v1097_v31 = vld [vmem:[%s1399_s1 + $0xb8] sm:$0xff]   ;;  %v20_v37 = vld [vmem:[%s1400_s0 + $0x28] sm:$0xff] }
   0xd   :  { %987 = vmatpush3.bf16.msra.mxu1 %v1077_v11  ;;  %960 = vmatprep.subr.bf16.mxu0 %v1078_v12  ;;  %v857_v38 = vcombine.low %v16_v34, %v20_v37  ;;  %v858_v39 = vcombine.high %v16_v34, %v20_v37  ;;  %v1098_v40 = vld [vmem:[%s1399_s1 + $0x140] sm:$0xff]   ;;  %v1102_v44 = vld [vmem:[%s1399_s1 + $0x148] sm:$0xff]   ;;  %v1106_v48 = vld [vmem:[%s1399_s1 + $0x150] sm:$0xff]  }
   0xe   :  { %988 = vmatprep.subr.bf16.mxu1 %v1079_v13  ;;  %662 = vmatprep.mubr.bf16.mxu0 %v856_v36  ;;  %v1099_v41 = vld [vmem:[%s1399_s1 + $0x1c0] sm:$0xff]   ;;  %v1103_v45 = vld [vmem:[%s1399_s1 + $0x1c8] sm:$0xff]   ;;  %v1107_v49 = vld [vmem:[%s1399_s1 + $0x1d0] sm:$0xff]  }
   0xf   :  { %711 = vmatprep.mubr.bf16.mxu1 %v858_v39  ;;  %v1100_v42 = vld [vmem:[%s1399_s1 + $0x100] sm:$0xff]   ;;  %v1104_v46 = vld [vmem:[%s1399_s1 + $0x108] sm:$0xff]   ;;  %v1108_v50 = vld [vmem:[%s1399_s1 + $0x110] sm:$0xff]  }
  0x10   :  { %961 = vmatpush3.bf16.msra.mxu0 %v1080_v14  ;;  %v1101_v43 = vld [vmem:[%s1399_s1 + $0x180] sm:$0xff]   ;;  %v1105_v47 = vld [vmem:[%s1399_s1 + $0x188] sm:$0xff]   ;;  %v1109_v51 = vld [vmem:[%s1399_s1 + $0x190] sm:$0xff]  }
  0x11   :  { %989 = vmatpush3.bf16.msra.mxu1 %v1081_v15  ;;  %962 = vmatprep.subr.bf16.mxu0 %v1082_v16  ;;  %v1110_v52 = vld [vmem:[%s1399_s1 + $0x158] sm:$0xff]   ;;  %v1114_v56 = vld [vmem:[%s1399_s1 + $0x160] sm:$0xff]   ;;  %v1118_v63 = vld [vmem:[%s1399_s1 + $0x168] sm:$0xff]  }
  0x12   :  { %990 = vmatprep.subr.bf16.mxu1 %v1083_v17  ;;  %v1111_v53 = vld [vmem:[%s1399_s1 + $0x1d8] sm:$0xff]   ;;  %v1115_v57 = vld [vmem:[%s1399_s1 + $0x1e0] sm:$0xff]   ;;  %v1119_v1 = vld [vmem:[%s1399_s1 + $0x1e8] sm:$0xff]  }
  0x13   :  { %v1112_v54 = vld [vmem:[%s1399_s1 + $0x118] sm:$0xff]   ;;  %v1116_v58 = vld [vmem:[%s1399_s1 + $0x120] sm:$0xff]   ;;  %v1120_v2 = vld [vmem:[%s1399_s1 + $0x128] sm:$0xff]  }
  0x14   :  { %963 = vmatpush3.bf16.msra.mxu0 %v1084_v18  ;;  %v1113_v55 = vld [vmem:[%s1399_s1 + $0x198] sm:$0xff]   ;;  %v1117_v59 = vld [vmem:[%s1399_s1 + $0x1a0] sm:$0xff]   ;;  %v1121_v3 = vld [vmem:[%s1399_s1 + $0x1a8] sm:$0xff]  }
  0x15   :  { %991 = vmatpush3.bf16.msra.mxu1 %v1085_v19  ;;  %964 = vmatprep.subr.bf16.mxu0 %v1086_v20  ;;  %v23_v60 = vld [vmem:[%s1400_s0 + $0x40] sm:$0xff]  ;;  %v24_v4 = vld [vmem:[%s1400_s0 + $0x48] sm:$0xff]  ;;  %v1122_v8 = vld [vmem:[%s1399_s1 + $0x170] sm:$0xff]  }
  0x16   :  { %992 = vmatprep.subr.bf16.mxu1 %v1087_v21  ;;  %v27_v61 = vld [vmem:[%s1400_s0 + $0x60] sm:$0xff]  ;;  %v28_v5 = vld [vmem:[%s1400_s0 + $0x68] sm:$0xff]  ;;  %v1123_v9 = vld [vmem:[%s1399_s1 + $0x1f0] sm:$0xff]  }
  0x17   :  { %v864_v62 = vcombine.high %v23_v60, %v27_v61  ;;  %v863_v0 = vcombine.low %v23_v60, %v27_v61  ;;  %v866_v6 = vcombine.high %v24_v4, %v28_v5  ;;  %v865_v7 = vcombine.low %v24_v4, %v28_v5  ;;  %v1124_v10 = vld [vmem:[%s1399_s1 + $0x130] sm:$0xff]   ;;  %v1126_v12 = vld [vmem:[%s1399_s1 + $0x178] sm:$0xff]   ;;  %v854_v34 = vld [vmem:[%s1401_s2] ss:$0 sm:$0xff] }
  0x18   :  { %965 = vmatpush3.bf16.msra.mxu0 %v1088_v22  ;;  %v1125_v11 = vld [vmem:[%s1399_s1 + $0x1b0] sm:$0xff]   ;;  %v1127_v13 = vld [vmem:[%s1399_s1 + $0x1f8] sm:$0xff]  }
  0x19   :  { %993 = vmatpush3.bf16.msra.mxu1 %v1089_v23  ;;  %966 = vmatprep.subr.bf16.mxu0 %v1090_v24  ;;  %v1128_v14 = vld [vmem:[%s1399_s1 + $0x138] sm:$0xff]   ;;  %v17_v16 = vld [vmem:[%s1400_s0 + $0x10] sm:$0xff] }
  0x1a   :  { %994 = vmatprep.subr.bf16.mxu1 %v1091_v25  ;;  %v1129_v15 = vld [vmem:[%s1399_s1 + $0x1b8] sm:$0xff]   ;;  %v21_v17 = vld [vmem:[%s1400_s0 + $0x30] sm:$0xff] }
  0x1b   :  { %v18_v18 = vld [vmem:[%s1400_s0 + $0x18] sm:$0xff]  ;;  %v859_v20 = vcombine.low %v17_v16, %v21_v17  ;;  %v860_v21 = vcombine.high %v17_v16, %v21_v17  ;;  %v25_v24 = vld [vmem:[%s1400_s0 + $0x50] sm:$0xff] }
  0x1c   :  { %967 = vmatpush3.bf16.msra.mxu0 %v1092_v26  ;;  %v22_v19 = vld [vmem:[%s1400_s0 + $0x38] sm:$0xff]  ;;  %v29_v25 = vld [vmem:[%s1400_s0 + $0x70] sm:$0xff] }
  0x1d   :  { %995 = vmatpush3.bf16.msra.mxu1 %v1093_v27  ;;  %968 = vmatprep.subr.bf16.mxu0 %v1094_v28  ;;  %v861_v22 = vcombine.low %v18_v18, %v22_v19  ;;  %v862_v23 = vcombine.high %v18_v18, %v22_v19  ;;  %v26_v26 = vld [vmem:[%s1400_s0 + $0x58] sm:$0xff]  ;;  %v868_v27 = vcombine.high %v25_v24, %v29_v25 }
  0x1e   :  { %996 = vmatprep.subr.bf16.mxu1 %v1095_v29  ;;  %v30_v28 = vld [vmem:[%s1400_s0 + $0x78] sm:$0xff] }
  0x1f   :  { %v870_v29 = vcombine.high %v26_v26, %v30_v28 }
  0x20   :  { %969 = vmatpush3.bf16.msra.mxu0 %v1096_v30  ;;  %v867_v30 = vcombine.low %v25_v24, %v29_v25 }
  0x21   :  { %997 = vmatpush3.bf16.msra.mxu1 %v1097_v31  ;;  %1010 = vmatprep.subr.bf16.mxu0 %v1098_v40  ;;  %v869_v31 = vcombine.low %v26_v26, %v30_v28 }
  0x22   :  { %1038 = vmatprep.subr.bf16.mxu1 %v1099_v41 }
  0x23   :  { %663 = vmatmul.mubr.bf16.vlgmr.msra.gmra.mrb[0].mxu0 %v855_v35 }
  0x24   :  { %712 = vmatmul.mubr.bf16.vlgmr.msra.gmra.mrb[0].mxu1 %v857_v38  ;;  %1011 = vmatpush3.bf16.msra.mxu0 %v1100_v42 }
  0x25   :  { %1039 = vmatpush3.bf16.msra.mxu1 %v1101_v43  ;;  %1012 = vmatprep.subr.bf16.mxu0 %v1102_v44 }
  0x26   :  { %1040 = vmatprep.subr.bf16.mxu1 %v1103_v45  ;;  %670 = vmatprep.mubr.bf16.mxu0 %v864_v62 }
  0x27   :  { %719 = vmatprep.mubr.bf16.mxu1 %v866_v6 }
  0x28   :  { %1013 = vmatpush3.bf16.msra.mxu0 %v1104_v46 }
  0x29   :  { %1041 = vmatpush3.bf16.msra.mxu1 %v1105_v47  ;;  %1014 = vmatprep.subr.bf16.mxu0 %v1106_v48 }
  0x2a   :  { %1042 = vmatprep.subr.bf16.mxu1 %v1107_v49 }
  0x2b   :  { %671 = vmatmul.mubr.bf16.gmra.mrb[4].mxu0 %v863_v0 }
  0x2c   :  { %1015 = vmatpush3.bf16.msra.mxu0 %v1108_v50  ;;  %720 = vmatmul.mubr.bf16.gmra.mrb[4].mxu1 %v865_v7 }
  0x2d   :  { %1043 = vmatpush3.bf16.msra.mxu1 %v1109_v51  ;;  %1016 = vmatprep.subr.bf16.mxu0 %v1110_v52 }
  0x2e   :  { %1044 = vmatprep.subr.bf16.mxu1 %v1111_v53  ;;  %760 = vmatprep.mubr.bf16.mxu0 %v860_v21 }
  0x2f   :  { %809 = vmatprep.mubr.bf16.mxu1 %v862_v23 }
  0x30   :  { %1017 = vmatpush3.bf16.msra.mxu0 %v1112_v54 }
  0x31   :  { %1045 = vmatpush3.bf16.msra.mxu1 %v1113_v55  ;;  %1018 = vmatprep.subr.bf16.mxu0 %v1114_v56 }
  0x32   :  { %1046 = vmatprep.subr.bf16.mxu1 %v1115_v57 }
  0x34   :  { %1019 = vmatpush3.bf16.msra.mxu0 %v1116_v58 }
  0x35   :  { %1047 = vmatpush3.bf16.msra.mxu1 %v1117_v59  ;;  %1020 = vmatprep.subr.bf16.mxu0 %v1118_v63 }
  0x36   :  { %1048 = vmatprep.subr.bf16.mxu1 %v1119_v1 }
  0x38   :  { %1021 = vmatpush3.bf16.msra.mxu0 %v1120_v2 }
  0x39   :  { %1049 = vmatpush3.bf16.msra.mxu1 %v1121_v3  ;;  %1022 = vmatprep.subr.bf16.mxu0 %v1122_v8 }
  0x3a   :  { %1050 = vmatprep.subr.bf16.mxu1 %v1123_v9 }
  0x3c   :  { %1023 = vmatpush3.bf16.msra.mxu0 %v1124_v10 }
  0x3d   :  { %1051 = vmatpush3.bf16.msra.mxu1 %v1125_v11  ;;  %1024 = vmatprep.subr.bf16.mxu0 %v1126_v12 }
  0x3e   :  { %1052 = vmatprep.subr.bf16.mxu1 %v1127_v13 }
  0x40   :  { %1025 = vmatpush3.bf16.msra.mxu0 %v1128_v14 }
  0x41   :  { %1053 = vmatpush3.bf16.msra.mxu1 %v1129_v15 }
  0x43   :  { %761 = vmatmul.mubr.bf16.vlgmr.msra.gmra.mrb[8].mxu0 %v859_v20 }
  0x44   :  { %810 = vmatmul.mubr.bf16.vlgmr.msra.gmra.mrb[8].mxu1 %v861_v22  ;;  %768 = vmatprep.mubr.bf16.mxu0 %v868_v27 }
  0x45   :  { %817 = vmatprep.mubr.bf16.mxu1 %v870_v29 }
  0x4b   :  { %769 = vmatmul.mubr.bf16.gmra.mrb[12].mxu0 %v867_v30 }
  0x4c   :  { %818 = vmatmul.mubr.bf16.gmra.mrb[12].mxu1 %v869_v31 }
  0xf6   :  { %v970_v32 = vpop.f32.mrb[0].mxu0 }
  0xf7   :  { %v998_v33 = vpop.f32.mrb[0].mxu1  ;;  %v971_v35 = vpop.f32.mrb[1].mxu0 }
  0xf8   :  { %v972_v36 = vadd.f32 %v971_v35, %v970_v32  ;;  %v999_v37 = vpop.f32.mrb[1].mxu1  ;;  %v973_v38 = vpop.f32.mrb[2].mxu0 }
  0xf9   :  { %v1000_v39 = vadd.f32 %v999_v37, %v998_v33  ;;  %v1001_v40 = vpop.f32.mrb[2].mxu1  ;;  %v974_v41 = vpop.f32.mrb[3].mxu0 }
  0xfa   :  { %v665_v42 = vadd.f32 %v972_v36, %v854_v34  ;;  %v975_v43 = vadd.f32 %v974_v41, %v973_v38  ;;  %v1002_v44 = vpop.f32.mrb[3].mxu1 }
  0xfb   :  { %v1003_v45 = vadd.f32 %v1002_v44, %v1001_v40 }
  0xfc   :  { %v714_v46 = vadd.f32 %v1000_v39, %v665_v42  ;;  %v668_v47 = vadd.f32 %v975_v43, %v854_v34 }
  0xfe   :  { %v717_v48 = vadd.f32 %v1003_v45, %v668_v47  ;;  %v976_v49 = vpop.f32.mrb[4].mxu0 }
  0xff   :  { %v977_v50 = vpop.f32.mrb[5].mxu0  ;;  %v1004_v56 = vpop.f32.mrb[4].mxu1 }
 0x100   :  { %v978_v51 = vadd.f32 %v977_v50, %v976_v49  ;;  %v979_v52 = vpop.f32.mrb[6].mxu0  ;;  %v1005_v57 = vpop.f32.mrb[5].mxu1 }
 0x101   :  { %v980_v53 = vpop.f32.mrb[7].mxu0  ;;  %v1006_v59 = vadd.f32 %v1005_v57, %v1004_v56  ;;  %v1007_v60 = vpop.f32.mrb[6].mxu1 }
 0x102   :  { %v981_v54 = vadd.f32 %v980_v53, %v979_v52  ;;  %v673_v55 = vadd.f32 %v978_v51, %v854_v34  ;;  %v1008_v61 = vpop.f32.mrb[7].mxu1 }
 0x103   :  { %v1009_v63 = vadd.f32 %v1008_v61, %v1007_v60 }
 0x104   :  { %v676_v58 = vadd.f32 %v981_v54, %v854_v34  ;;  %v722_v62 = vadd.f32 %v1006_v59, %v673_v55 }
 0x106   :  { %v725_v0 = vadd.f32 %v1009_v63, %v676_v58 }
 0x116   :  { %v1026_v1 = vpop.f32.mrb[8].mxu0 }
 0x117   :  { %v1054_v2 = vpop.f32.mrb[8].mxu1  ;;  %v1027_v3 = vpop.f32.mrb[9].mxu0 }
 0x118   :  { %v1055_v4 = vpop.f32.mrb[9].mxu1  ;;  %v1028_v5 = vadd.f32 %v1027_v3, %v1026_v1  ;;  %v1029_v7 = vpop.f32.mrb[10].mxu0 }
 0x119   :  { %v1056_v6 = vadd.f32 %v1055_v4, %v1054_v2  ;;  %v1057_v8 = vpop.f32.mrb[10].mxu1  ;;  %v1030_v9 = vpop.f32.mrb[11].mxu0 }
 0x11a   :  { %v1058_v10 = vpop.f32.mrb[11].mxu1  ;;  %v763_v11 = vadd.f32 %v1028_v5, %v714_v46  ;;  %v1031_v12 = vadd.f32 %v1030_v9, %v1029_v7 }
 0x11b   :  { %v1059_v13 = vadd.f32 %v1058_v10, %v1057_v8 }
 0x11c   :  { %v812_v14 = vadd.f32 %v1056_v6, %v763_v11  ;;  %v766_v15 = vadd.f32 %v1031_v12, %v717_v48 }
 0x11e   :  { %v815_v16 = vadd.f32 %v1059_v13, %v766_v15  ;;  %v1032_v17 = vpop.f32.mrb[12].mxu0  ;;  %v826_v21 = vmax.f32 %v812_v14, 0.0 }
 0x11f   :  { %v1060_v18 = vpop.f32.mrb[12].mxu1  ;;  %v1033_v19 = vpop.f32.mrb[13].mxu0 }
 0x120   :  { %v1061_v20 = vpop.f32.mrb[13].mxu1  ;;  %v827_v22 = vmax.f32 %v815_v16, 0.0  ;;  %v1034_v23 = vadd.f32 %v1033_v19, %v1032_v17  ;;  %v1035_v25 = vpop.f32.mrb[14].mxu0 }
 0x121   :  { %v1062_v24 = vadd.f32 %v1061_v20, %v1060_v18  ;;  %v1063_v26 = vpop.f32.mrb[14].mxu1  ;;  %v1036_v27 = vpop.f32.mrb[15].mxu0 }
 0x122   :  { %v1064_v28 = vpop.f32.mrb[15].mxu1  ;;  %v946_v29 = vpack.c.bf16 %v827_v22, %v826_v21  ;;  %v771_v30 = vadd.f32 %v1034_v23, %v722_v62  ;;  %v1037_v31 = vadd.f32 %v1036_v27, %v1035_v25 }
 0x123   :  { %v1065_v32 = vadd.f32 %v1064_v28, %v1063_v26 }
 0x124   :  { %947 = vst [vmem:[%s1402_s3] sm:$0xff] %v946_v29   ;;  %v820_v33 = vadd.f32 %v1062_v24, %v771_v30  ;;  %v774_v34 = vadd.f32 %v1037_v31, %v725_v0 }
 0x126   :  { %v823_v35 = vadd.f32 %v1065_v32, %v774_v34  ;;  %v828_v36 = vmax.f32 %v820_v33, 0.0 }
 0x128   :  { %v829_v37 = vmax.f32 %v823_v35, 0.0 }
 0x12a   :  { %v951_v38 = vpack.c.bf16 %v829_v37, %v828_v36 }
 0x12c   :  { %953 = vst [vmem:[%s1402_s3 + $0x8] sm:$0xff] %v951_v38  }

// kernel: vae_forward.11
= control target key start
LH: loop header
LB: loop body
LE: loop exit
PB: predicated region body
PF: predicated region fallthrough
CT: control target
= control target key end

     0   :  { %s3173_s1 = inlined_call_operand.vmem [shape: bf16[4,512,128], index: 1, kind: input, shape index: {}]   ;;  %s3174_s0 = inlined_call_operand.vmem [shape: bf16[4,32,512], index: 0, kind: input, shape index: {}]   ;;  %s3175_s2 = inlined_call_operand.vmem [shape: f32[4,1,128], index: 2, kind: input, shape index: {}]   ;;  %s3176_s3 = inlined_call_operand.vmem [shape: bf16[4,32,128], index: 3, kind: output, shape index: {}]  }
   0x1   :  { %v2461_v0 = vld [vmem:[%s3173_s1 + $0x40] sm:$0xff]   ;;  %v2465_v4 = vld [vmem:[%s3173_s1 + $0x48] sm:$0xff]   ;;  %v2469_v8 = vld [vmem:[%s3173_s1 + $0x50] sm:$0xff]  }
   0x2   :  { %v2462_v1 = vld [vmem:[%s3173_s1 + $0xc0] sm:$0xff]   ;;  %2237 = vmatprep.subr.bf16.mxu0 %v2461_v0  ;;  %v2466_v5 = vld [vmem:[%s3173_s1 + $0xc8] sm:$0xff]   ;;  %v2470_v9 = vld [vmem:[%s3173_s1 + $0xd0] sm:$0xff]  }
   0x3   :  { %v2463_v2 = vld [vmem:[%s3173_s1] sm:$0xff]   ;;  %2265 = vmatprep.subr.bf16.mxu1 %v2462_v1  ;;  %v2467_v6 = vld [vmem:[%s3173_s1 + $0x8] sm:$0xff]   ;;  %v2471_v10 = vld [vmem:[%s3173_s1 + $0x10] sm:$0xff]  }
   0x4   :  { %v2464_v3 = vld [vmem:[%s3173_s1 + $0x80] sm:$0xff]   ;;  %2238 = vmatpush3.bf16.msra.mxu0 %v2463_v2  ;;  %v2468_v7 = vld [vmem:[%s3173_s1 + $0x88] sm:$0xff]   ;;  %v2472_v11 = vld [vmem:[%s3173_s1 + $0x90] sm:$0xff]  }
   0x5   :  { %2266 = vmatpush3.bf16.msra.mxu1 %v2464_v3  ;;  %2239 = vmatprep.subr.bf16.mxu0 %v2465_v4  ;;  %v2473_v12 = vld [vmem:[%s3173_s1 + $0x58] sm:$0xff]   ;;  %v2477_v16 = vld [vmem:[%s3173_s1 + $0x60] sm:$0xff]   ;;  %v2481_v20 = vld [vmem:[%s3173_s1 + $0x68] sm:$0xff]  }
   0x6   :  { %2267 = vmatprep.subr.bf16.mxu1 %v2466_v5  ;;  %v2474_v13 = vld [vmem:[%s3173_s1 + $0xd8] sm:$0xff]   ;;  %v2478_v17 = vld [vmem:[%s3173_s1 + $0xe0] sm:$0xff]   ;;  %v2482_v21 = vld [vmem:[%s3173_s1 + $0xe8] sm:$0xff]  }
   0x7   :  { %v2475_v14 = vld [vmem:[%s3173_s1 + $0x18] sm:$0xff]   ;;  %v2479_v18 = vld [vmem:[%s3173_s1 + $0x20] sm:$0xff]   ;;  %v2483_v22 = vld [vmem:[%s3173_s1 + $0x28] sm:$0xff]  }
   0x8   :  { %2240 = vmatpush3.bf16.msra.mxu0 %v2467_v6  ;;  %v2476_v15 = vld [vmem:[%s3173_s1 + $0x98] sm:$0xff]   ;;  %v2480_v19 = vld [vmem:[%s3173_s1 + $0xa0] sm:$0xff]   ;;  %v2484_v23 = vld [vmem:[%s3173_s1 + $0xa8] sm:$0xff]  }
   0x9   :  { %2268 = vmatpush3.bf16.msra.mxu1 %v2468_v7  ;;  %2241 = vmatprep.subr.bf16.mxu0 %v2469_v8  ;;  %v2485_v24 = vld [vmem:[%s3173_s1 + $0x70] sm:$0xff]   ;;  %v2489_v28 = vld [vmem:[%s3173_s1 + $0x78] sm:$0xff]   ;;  %v2499_v36 = vld [vmem:[%s3173_s1 + $0x140] sm:$0xff]  }
   0xa   :  { %2269 = vmatprep.subr.bf16.mxu1 %v2470_v9  ;;  %v2486_v25 = vld [vmem:[%s3173_s1 + $0xf0] sm:$0xff]   ;;  %v2490_v29 = vld [vmem:[%s3173_s1 + $0xf8] sm:$0xff]   ;;  %v2500_v37 = vld [vmem:[%s3173_s1 + $0x1c0] sm:$0xff]  }
   0xb   :  { %v2487_v26 = vld [vmem:[%s3173_s1 + $0x30] sm:$0xff]   ;;  %v2491_v30 = vld [vmem:[%s3173_s1 + $0x38] sm:$0xff]   ;;  %v2501_v38 = vld [vmem:[%s3173_s1 + $0x100] sm:$0xff]  }
   0xc   :  { %2242 = vmatpush3.bf16.msra.mxu0 %v2471_v10  ;;  %v2488_v27 = vld [vmem:[%s3173_s1 + $0xb0] sm:$0xff]   ;;  %v2492_v31 = vld [vmem:[%s3173_s1 + $0xb8] sm:$0xff]   ;;  %v2502_v39 = vld [vmem:[%s3173_s1 + $0x180] sm:$0xff]  }
   0xd   :  { %2270 = vmatpush3.bf16.msra.mxu1 %v2472_v11  ;;  %2243 = vmatprep.subr.bf16.mxu0 %v2473_v12  ;;  %v2493_v32 = vld [vmem:[%s3174_s0] ss:$16 sps:$4 sm:$0xff]   ;;  %v2495_v33 = vld [vmem:[%s3174_s0 + $0x4] ss:$16 sps:$4 sm:$0xff]   ;;  %v2496_v34 = vld [vmem:[%s3174_s0 + $0x8] ss:$16 sps:$4 sm:$0xff]  }
   0xe   :  { %2271 = vmatprep.subr.bf16.mxu1 %v2474_v13  ;;  %v2498_v35 = vld [vmem:[%s3174_s0 + $0xc] ss:$16 sps:$4 sm:$0xff]   ;;  %358 = vmatprep.mubr.bf16.mxu0 %v2495_v33  ;;  %v2507_v44 = vld [vmem:[%s3173_s1 + $0x150] sm:$0xff]   ;;  %v2515_v52 = vld [vmem:[%s3173_s1 + $0x160] sm:$0xff]  }
   0xf   :  { %407 = vmatprep.mubr.bf16.mxu1 %v2498_v35  ;;  %v2503_v40 = vld [vmem:[%s3173_s1 + $0x148] sm:$0xff]   ;;  %v2508_v45 = vld [vmem:[%s3173_s1 + $0x1d0] sm:$0xff]   ;;  %v2511_v48 = vld [vmem:[%s3173_s1 + $0x158] sm:$0xff]  }
  0x10   :  { %2244 = vmatpush3.bf16.msra.mxu0 %v2475_v14  ;;  %v2504_v41 = vld [vmem:[%s3173_s1 + $0x1c8] sm:$0xff]   ;;  %v2509_v46 = vld [vmem:[%s3173_s1 + $0x110] sm:$0xff]   ;;  %v2512_v49 = vld [vmem:[%s3173_s1 + $0x1d8] sm:$0xff]  }
  0x11   :  { %2272 = vmatpush3.bf16.msra.mxu1 %v2476_v15  ;;  %2245 = vmatprep.subr.bf16.mxu0 %v2477_v16  ;;  %v2505_v42 = vld [vmem:[%s3173_s1 + $0x108] sm:$0xff]   ;;  %v2510_v47 = vld [vmem:[%s3173_s1 + $0x190] sm:$0xff]   ;;  %v2513_v50 = vld [vmem:[%s3173_s1 + $0x118] sm:$0xff]  }
  0x12   :  { %2273 = vmatprep.subr.bf16.mxu1 %v2478_v17  ;;  %v2506_v43 = vld [vmem:[%s3173_s1 + $0x188] sm:$0xff]   ;;  %v2514_v51 = vld [vmem:[%s3173_s1 + $0x198] sm:$0xff]   ;;  %v2516_v53 = vld [vmem:[%s3173_s1 + $0x1e0] sm:$0xff]  }
  0x13   :  { %v2517_v54 = vld [vmem:[%s3173_s1 + $0x120] sm:$0xff]   ;;  %v2519_v56 = vld [vmem:[%s3173_s1 + $0x168] sm:$0xff]   ;;  %v2529_v0 = vld [vmem:[%s3173_s1 + $0x170] sm:$0xff]  }
  0x14   :  { %2246 = vmatpush3.bf16.msra.mxu0 %v2479_v18  ;;  %v2518_v55 = vld [vmem:[%s3173_s1 + $0x1a0] sm:$0xff]   ;;  %v2520_v57 = vld [vmem:[%s3173_s1 + $0x1e8] sm:$0xff]   ;;  %v2530_v1 = vld [vmem:[%s3173_s1 + $0x1f0] sm:$0xff]  }
  0x15   :  { %2274 = vmatpush3.bf16.msra.mxu1 %v2480_v19  ;;  %2247 = vmatprep.subr.bf16.mxu0 %v2481_v20  ;;  %v2521_v58 = vld [vmem:[%s3174_s0 + $0x24] ss:$16 sps:$4 sm:$0xff]   ;;  %v2523_v59 = vld [vmem:[%s3173_s1 + $0x128] sm:$0xff]   ;;  %v2525_v61 = vld [vmem:[%s3174_s0 + $0x20] ss:$16 sps:$4 sm:$0xff]  }
  0x16   :  { %2275 = vmatprep.subr.bf16.mxu1 %v2482_v21  ;;  %v2524_v60 = vld [vmem:[%s3173_s1 + $0x1a8] sm:$0xff]   ;;  %v2531_v2 = vld [vmem:[%s3173_s1 + $0x130] sm:$0xff]   ;;  %v2533_v4 = vld [vmem:[%s3173_s1 + $0x178] sm:$0xff]  }
  0x17   :  { %v2526_v62 = vld [vmem:[%s3174_s0 + $0x2c] ss:$16 sps:$4 sm:$0xff]   ;;  %v2528_v63 = vld [vmem:[%s3174_s0 + $0x28] ss:$16 sps:$4 sm:$0xff]   ;;  %v2532_v3 = vld [vmem:[%s3173_s1 + $0x1b0] sm:$0xff]  }
  0x18   :  { %2248 = vmatpush3.bf16.msra.mxu0 %v2483_v22  ;;  %v2534_v5 = vld [vmem:[%s3173_s1 + $0x1f8] sm:$0xff]   ;;  %v2537_v8 = vld [vmem:[%s3174_s0 + $0x40] ss:$16 sps:$4 sm:$0xff]   ;;  %v2539_v9 = vld [vmem:[%s3174_s0 + $0x44] ss:$16 sps:$4 sm:$0xff]  }
  0x19   :  { %2276 = vmatpush3.bf16.msra.mxu1 %v2484_v23  ;;  %2249 = vmatprep.subr.bf16.mxu0 %v2485_v24  ;;  %v2535_v6 = vld [vmem:[%s3173_s1 + $0x138] sm:$0xff]   ;;  %v2543_v12 = vld [vmem:[%s3173_s1 + $0x240] sm:$0xff]   ;;  %v2547_v16 = vld [vmem:[%s3173_s1 + $0x248] sm:$0xff]  }
  0x1a   :  { %2277 = vmatprep.subr.bf16.mxu1 %v2486_v25  ;;  %v2536_v7 = vld [vmem:[%s3173_s1 + $0x1b8] sm:$0xff]   ;;  %v2544_v13 = vld [vmem:[%s3173_s1 + $0x2c0] sm:$0xff]   ;;  %v2548_v17 = vld [vmem:[%s3173_s1 + $0x2c8] sm:$0xff]  }
  0x1b   :  { %v2540_v10 = vld [vmem:[%s3174_s0 + $0x48] ss:$16 sps:$4 sm:$0xff]   ;;  %v2542_v11 = vld [vmem:[%s3174_s0 + $0x4c] ss:$16 sps:$4 sm:$0xff]   ;;  %v2545_v14 = vld [vmem:[%s3173_s1 + $0x200] sm:$0xff]  }
  0x1c   :  { %2250 = vmatpush3.bf16.msra.mxu0 %v2487_v26  ;;  %v2546_v15 = vld [vmem:[%s3173_s1 + $0x280] sm:$0xff]   ;;  %v2549_v18 = vld [vmem:[%s3173_s1 + $0x208] sm:$0xff]   ;;  %v2551_v20 = vld [vmem:[%s3173_s1 + $0x250] sm:$0xff]  }
  0x1d   :  { %2278 = vmatpush3.bf16.msra.mxu1 %v2488_v27  ;;  %2251 = vmatprep.subr.bf16.mxu0 %v2489_v28  ;;  %v2550_v19 = vld [vmem:[%s3173_s1 + $0x288] sm:$0xff]   ;;  %v2552_v21 = vld [vmem:[%s3173_s1 + $0x2d0] sm:$0xff]   ;;  %v2555_v24 = vld [vmem:[%s3173_s1 + $0x258] sm:$0xff]  }
  0x1e   :  { %2279 = vmatprep.subr.bf16.mxu1 %v2490_v29  ;;  %v2553_v22 = vld [vmem:[%s3173_s1 + $0x210] sm:$0xff]   ;;  %v2556_v25 = vld [vmem:[%s3173_s1 + $0x2d8] sm:$0xff]   ;;  %v2559_v28 = vld [vmem:[%s3173_s1 + $0x260] sm:$0xff]  }
  0x1f   :  { %v2554_v23 = vld [vmem:[%s3173_s1 + $0x290] sm:$0xff]   ;;  %v2557_v26 = vld [vmem:[%s3173_s1 + $0x218] sm:$0xff]   ;;  %v2560_v29 = vld [vmem:[%s3173_s1 + $0x2e0] sm:$0xff]  }
  0x20   :  { %2252 = vmatpush3.bf16.msra.mxu0 %v2491_v30  ;;  %v2558_v27 = vld [vmem:[%s3173_s1 + $0x298] sm:$0xff]   ;;  %v2561_v30 = vld [vmem:[%s3173_s1 + $0x220] sm:$0xff]   ;;  %v2564_v33 = vld [vmem:[%s3173_s1 + $0x2e8] sm:$0xff]  }
  0x21   :  { %2280 = vmatpush3.bf16.msra.mxu1 %v2492_v31  ;;  %2293 = vmatprep.subr.bf16.mxu0 %v2499_v36  ;;  %v2562_v31 = vld [vmem:[%s3173_s1 + $0x2a0] sm:$0xff]   ;;  %v2567_v35 = vld [vmem:[%s3173_s1 + $0x228] sm:$0xff]  }
  0x22   :  { %2321 = vmatprep.subr.bf16.mxu1 %v2500_v37  ;;  %v2568_v36 = vld [vmem:[%s3173_s1 + $0x2a8] sm:$0xff]   ;;  %v2569_v37 = vld [vmem:[%s3174_s0 + $0x60] ss:$16 sps:$4 sm:$0xff]  }
  0x23   :  { %359 = vmatmul.mubr.bf16.vlgmr.msra.gmra.mrb[0].mxu0 %v2493_v32  ;;  %v2563_v32 = vld [vmem:[%s3173_s1 + $0x268] sm:$0xff]  }
  0x24   :  { %408 = vmatmul.mubr.bf16.vlgmr.msra.gmra.mrb[0].mxu1 %v2496_v34  ;;  %2294 = vmatpush3.bf16.msra.mxu0 %v2501_v38  ;;  %v2565_v34 = vld [vmem:[%s3174_s0 + $0x64] ss:$16 sps:$4 sm:$0xff]   ;;  %v2570_v38 = vld [vmem:[%s3174_s0 + $0x6c] ss:$16 sps:$4 sm:$0xff]  }
  0x25   :  { %2322 = vmatpush3.bf16.msra.mxu1 %v2502_v39  ;;  %2295 = vmatprep.subr.bf16.mxu0 %v2503_v40  ;;  %v2572_v39 = vld [vmem:[%s3174_s0 + $0x68] ss:$16 sps:$4 sm:$0xff]   ;;  %v2573_v40 = vld [vmem:[%s3173_s1 + $0x270] sm:$0xff]  }
  0x26   :  { %2323 = vmatprep.subr.bf16.mxu1 %v2504_v41  ;;  %366 = vmatprep.mubr.bf16.mxu0 %v2521_v58  ;;  %v2574_v41 = vld [vmem:[%s3173_s1 + $0x2f0] sm:$0xff]   ;;  %v2593_v58 = vld [vmem:[%s3173_s1 + $0x308] sm:$0xff]  }
  0x27   :  { %415 = vmatprep.mubr.bf16.mxu1 %v2526_v62  ;;  %v2597_v62 = vld [vmem:[%s3173_s1 + $0x310] sm:$0xff]  }
  0x28   :  { %2296 = vmatpush3.bf16.msra.mxu0 %v2505_v42  ;;  %v2575_v42 = vld [vmem:[%s3173_s1 + $0x230] sm:$0xff]  }
  0x29   :  { %2324 = vmatpush3.bf16.msra.mxu1 %v2506_v43  ;;  %2297 = vmatprep.subr.bf16.mxu0 %v2507_v44  ;;  %v2576_v43 = vld [vmem:[%s3173_s1 + $0x2b0] sm:$0xff]   ;;  %v2577_v44 = vld [vmem:[%s3173_s1 + $0x278] sm:$0xff]  }
  0x2a   :  { %2325 = vmatprep.subr.bf16.mxu1 %v2508_v45  ;;  %v2578_v45 = vld [vmem:[%s3173_s1 + $0x2f8] sm:$0xff]  }
  0x2b   :  { %367 = vmatmul.mubr.bf16.gmra.mrb[4].mxu0 %v2525_v61  ;;  %v2596_v61 = vld [vmem:[%s3173_s1 + $0x3d0] sm:$0xff]  }
  0x2c   :  { %2298 = vmatpush3.bf16.msra.mxu0 %v2509_v46  ;;  %416 = vmatmul.mubr.bf16.gmra.mrb[4].mxu1 %v2528_v63  ;;  %v2579_v46 = vld [vmem:[%s3173_s1 + $0x238] sm:$0xff]   ;;  %v2598_v63 = vld [vmem:[%s3173_s1 + $0x390] sm:$0xff]  }
  0x2d   :  { %2326 = vmatpush3.bf16.msra.mxu1 %v2510_v47  ;;  %2299 = vmatprep.subr.bf16.mxu0 %v2511_v48  ;;  %v2580_v47 = vld [vmem:[%s3173_s1 + $0x2b8] sm:$0xff]   ;;  %v2581_v48 = vld [vmem:[%s3174_s0 + $0x80] ss:$16 sps:$4 sm:$0xff]  }
  0x2e   :  { %2327 = vmatprep.subr.bf16.mxu1 %v2512_v49  ;;  %794 = vmatprep.mubr.bf16.mxu0 %v2539_v9  ;;  %v2583_v49 = vld [vmem:[%s3174_s0 + $0x84] ss:$16 sps:$4 sm:$0xff]   ;;  %v2609_v9 = vld [vmem:[%s3173_s1 + $0x368] sm:$0xff]  }
  0x2f   :  { %843 = vmatprep.mubr.bf16.mxu1 %v2542_v11  ;;  %v2611_v11 = vld [vmem:[%s3174_s0 + $0xa0] ss:$16 sps:$4 sm:$0xff]  }
  0x30   :  { %2300 = vmatpush3.bf16.msra.mxu0 %v2513_v50  ;;  %v2584_v50 = vld [vmem:[%s3174_s0 + $0x88] ss:$16 sps:$4 sm:$0xff]  }
  0x31   :  { %2328 = vmatpush3.bf16.msra.mxu1 %v2514_v51  ;;  %2301 = vmatprep.subr.bf16.mxu0 %v2515_v52  ;;  %v2586_v51 = vld [vmem:[%s3174_s0 + $0x8c] ss:$16 sps:$4 sm:$0xff]   ;;  %v2587_v52 = vld [vmem:[%s3173_s1 + $0x340] sm:$0xff]  }
  0x32   :  { %2329 = vmatprep.subr.bf16.mxu1 %v2516_v53  ;;  %v2588_v53 = vld [vmem:[%s3173_s1 + $0x3c0] sm:$0xff]  }
  0x34   :  { %2302 = vmatpush3.bf16.msra.mxu0 %v2517_v54  ;;  %v2589_v54 = vld [vmem:[%s3173_s1 + $0x300] sm:$0xff]  }
  0x35   :  { %2330 = vmatpush3.bf16.msra.mxu1 %v2518_v55  ;;  %2303 = vmatprep.subr.bf16.mxu0 %v2519_v56  ;;  %v2590_v55 = vld [vmem:[%s3173_s1 + $0x380] sm:$0xff]   ;;  %v2591_v56 = vld [vmem:[%s3173_s1 + $0x348] sm:$0xff]  }
  0x36   :  { %2331 = vmatprep.subr.bf16.mxu1 %v2520_v57  ;;  %v2592_v57 = vld [vmem:[%s3173_s1 + $0x3c8] sm:$0xff]  }
  0x38   :  { %2304 = vmatpush3.bf16.msra.mxu0 %v2523_v59  ;;  %v2594_v59 = vld [vmem:[%s3173_s1 + $0x388] sm:$0xff]  }
  0x39   :  { %2332 = vmatpush3.bf16.msra.mxu1 %v2524_v60  ;;  %2305 = vmatprep.subr.bf16.mxu0 %v2529_v0  ;;  %v2595_v60 = vld [vmem:[%s3173_s1 + $0x350] sm:$0xff]   ;;  %v2599_v0 = vld [vmem:[%s3173_s1 + $0x358] sm:$0xff]  }
  0x3a   :  { %2333 = vmatprep.subr.bf16.mxu1 %v2530_v1  ;;  %v2600_v1 = vld [vmem:[%s3173_s1 + $0x3d8] sm:$0xff]  }
  0x3c   :  { %2306 = vmatpush3.bf16.msra.mxu0 %v2531_v2  ;;  %v2601_v2 = vld [vmem:[%s3173_s1 + $0x318] sm:$0xff]  }
  0x3d   :  { %2334 = vmatpush3.bf16.msra.mxu1 %v2532_v3  ;;  %2307 = vmatprep.subr.bf16.mxu0 %v2533_v4  ;;  %v2602_v3 = vld [vmem:[%s3173_s1 + $0x398] sm:$0xff]   ;;  %v2603_v4 = vld [vmem:[%s3173_s1 + $0x360] sm:$0xff]  }
  0x3e   :  { %2335 = vmatprep.subr.bf16.mxu1 %v2534_v5  ;;  %v2604_v5 = vld [vmem:[%s3173_s1 + $0x3e0] sm:$0xff]  }
  0x40   :  { %2308 = vmatpush3.bf16.msra.mxu0 %v2535_v6  ;;  %v2605_v6 = vld [vmem:[%s3173_s1 + $0x320] sm:$0xff]  }
  0x41   :  { %2336 = vmatpush3.bf16.msra.mxu1 %v2536_v7  ;;  %2349 = vmatprep.subr.bf16.mxu0 %v2543_v12  ;;  %v2606_v7 = vld [vmem:[%s3173_s1 + $0x3a0] sm:$0xff]   ;;  %v2612_v12 = vld [vmem:[%s3173_s1 + $0x328] sm:$0xff]  }
  0x42   :  { %2377 = vmatprep.subr.bf16.mxu1 %v2544_v13  ;;  %v2613_v13 = vld [vmem:[%s3173_s1 + $0x3a8] sm:$0xff]  }
  0x43   :  { %795 = vmatmul.mubr.bf16.vlgmr.msra.gmra.mrb[8].mxu0 %v2537_v8  ;;  %v2607_v8 = vld [vmem:[%s3174_s0 + $0xa4] ss:$16 sps:$4 sm:$0xff]  }
  0x44   :  { %844 = vmatmul.mubr.bf16.vlgmr.msra.gmra.mrb[8].mxu1 %v2540_v10  ;;  %2350 = vmatpush3.bf16.msra.mxu0 %v2545_v14  ;;  %v2610_v10 = vld [vmem:[%s3173_s1 + $0x3e8] sm:$0xff]  }
  0x45   :  { %2378 = vmatpush3.bf16.msra.mxu1 %v2546_v15  ;;  %2351 = vmatprep.subr.bf16.mxu0 %v2547_v16  ;;  %v2614_v14 = vld [vmem:[%s3174_s0 + $0xac] ss:$16 sps:$4 sm:$0xff]   ;;  %v2616_v15 = vld [vmem:[%s3174_s0 + $0xa8] ss:$16 sps:$4 sm:$0xff]   ;;  %v2617_v16 = vld [vmem:[%s3173_s1 + $0x370] sm:$0xff]  }
  0x46   :  { %2379 = vmatprep.subr.bf16.mxu1 %v2548_v17  ;;  %802 = vmatprep.mubr.bf16.mxu0 %v2565_v34  ;;  %v2618_v17 = vld [vmem:[%s3173_s1 + $0x3f0] sm:$0xff]   ;;  %v1763_v34 = vld [vmem:[%s3175_s2] ss:$0 sm:$0xff] }
  0x47   :  { %851 = vmatprep.mubr.bf16.mxu1 %v2570_v38 }
  0x48   :  { %2352 = vmatpush3.bf16.msra.mxu0 %v2549_v18  ;;  %v2619_v18 = vld [vmem:[%s3173_s1 + $0x330] sm:$0xff]  }
  0x49   :  { %2380 = vmatpush3.bf16.msra.mxu1 %v2550_v19  ;;  %2353 = vmatprep.subr.bf16.mxu0 %v2551_v20  ;;  %v2620_v19 = vld [vmem:[%s3173_s1 + $0x3b0] sm:$0xff]   ;;  %v2621_v20 = vld [vmem:[%s3173_s1 + $0x378] sm:$0xff]  }
  0x4a   :  { %2381 = vmatprep.subr.bf16.mxu1 %v2552_v21  ;;  %v2622_v21 = vld [vmem:[%s3173_s1 + $0x3f8] sm:$0xff]  }
  0x4b   :  { %803 = vmatmul.mubr.bf16.gmra.mrb[12].mxu0 %v2569_v37 }
  0x4c   :  { %2354 = vmatpush3.bf16.msra.mxu0 %v2553_v22  ;;  %852 = vmatmul.mubr.bf16.gmra.mrb[12].mxu1 %v2572_v39  ;;  %v2623_v22 = vld [vmem:[%s3173_s1 + $0x338] sm:$0xff]  }
  0x4d   :  { %2382 = vmatpush3.bf16.msra.mxu1 %v2554_v23  ;;  %2355 = vmatprep.subr.bf16.mxu0 %v2555_v24  ;;  %v2624_v23 = vld [vmem:[%s3173_s1 + $0x3b8] sm:$0xff]   ;;  %v2625_v24 = vld [vmem:[%s3174_s0 + $0xc0] ss:$16 sps:$4 sm:$0xff]  }
  0x4e   :  { %2383 = vmatprep.subr.bf16.mxu1 %v2556_v25  ;;  %1231 = vmatprep.mubr.bf16.mxu0 %v2583_v49  ;;  %v2627_v25 = vld [vmem:[%s3174_s0 + $0xc4] ss:$16 sps:$4 sm:$0xff]  }
  0x4f   :  { %1280 = vmatprep.mubr.bf16.mxu1 %v2586_v51 }
  0x50   :  { %2356 = vmatpush3.bf16.msra.mxu0 %v2557_v26  ;;  %v2628_v26 = vld [vmem:[%s3174_s0 + $0xc8] ss:$16 sps:$4 sm:$0xff]  }
  0x51   :  { %2384 = vmatpush3.bf16.msra.mxu1 %v2558_v27  ;;  %2357 = vmatprep.subr.bf16.mxu0 %v2559_v28  ;;  %v2630_v27 = vld [vmem:[%s3174_s0 + $0xcc] ss:$16 sps:$4 sm:$0xff]   ;;  %v2631_v28 = vld [vmem:[%s3174_s0 + $0xe4] ss:$16 sps:$4 sm:$0xff]  }
  0x52   :  { %2385 = vmatprep.subr.bf16.mxu1 %v2560_v29  ;;  %v2633_v29 = vld [vmem:[%s3174_s0 + $0xec] ss:$16 sps:$4 sm:$0xff]  }
  0x54   :  { %2358 = vmatpush3.bf16.msra.mxu0 %v2561_v30  ;;  %v2635_v30 = vld [vmem:[%s3174_s0 + $0xe0] ss:$16 sps:$4 sm:$0xff]  }
  0x55   :  { %2386 = vmatpush3.bf16.msra.mxu1 %v2562_v31  ;;  %2359 = vmatprep.subr.bf16.mxu0 %v2563_v32  ;;  %v2636_v31 = vld [vmem:[%s3174_s0 + $0xe8] ss:$16 sps:$4 sm:$0xff]  }
  0x56   :  { %2387 = vmatprep.subr.bf16.mxu1 %v2564_v33 }
  0x58   :  { %2360 = vmatpush3.bf16.msra.mxu0 %v2567_v35 }
  0x59   :  { %2388 = vmatpush3.bf16.msra.mxu1 %v2568_v36  ;;  %2361 = vmatprep.subr.bf16.mxu0 %v2573_v40 }
  0x5a   :  { %2389 = vmatprep.subr.bf16.mxu1 %v2574_v41 }
  0x5c   :  { %2362 = vmatpush3.bf16.msra.mxu0 %v2575_v42 }
  0x5d   :  { %2390 = vmatpush3.bf16.msra.mxu1 %v2576_v43  ;;  %2363 = vmatprep.subr.bf16.mxu0 %v2577_v44 }
  0x5e   :  { %2391 = vmatprep.subr.bf16.mxu1 %v2578_v45 }
  0x60   :  { %2364 = vmatpush3.bf16.msra.mxu0 %v2579_v46 }
  0x61   :  { %2392 = vmatpush3.bf16.msra.mxu1 %v2580_v47  ;;  %2405 = vmatprep.subr.bf16.mxu0 %v2587_v52 }
  0x62   :  { %2433 = vmatprep.subr.bf16.mxu1 %v2588_v53 }
  0x63   :  { %1232 = vmatmul.mubr.bf16.vlgmr.msra.gmra.mrb[16].mxu0 %v2581_v48 }
  0x64   :  { %1281 = vmatmul.mubr.bf16.vlgmr.msra.gmra.mrb[16].mxu1 %v2584_v50  ;;  %2406 = vmatpush3.bf16.msra.mxu0 %v2589_v54 }
  0x65   :  { %2434 = vmatpush3.bf16.msra.mxu1 %v2590_v55  ;;  %2407 = vmatprep.subr.bf16.mxu0 %v2591_v56 }
  0x66   :  { %2435 = vmatprep.subr.bf16.mxu1 %v2592_v57  ;;  %1239 = vmatprep.mubr.bf16.mxu0 %v2607_v8 }
  0x67   :  { %1288 = vmatprep.mubr.bf16.mxu1 %v2614_v14 }
  0x68   :  { %2408 = vmatpush3.bf16.msra.mxu0 %v2593_v58 }
  0x69   :  { %2436 = vmatpush3.bf16.msra.mxu1 %v2594_v59  ;;  %2409 = vmatprep.subr.bf16.mxu0 %v2595_v60 }
  0x6a   :  { %2437 = vmatprep.subr.bf16.mxu1 %v2596_v61 }
  0x6b   :  { %1240 = vmatmul.mubr.bf16.gmra.mrb[20].mxu0 %v2611_v11 }
  0x6c   :  { %2410 = vmatpush3.bf16.msra.mxu0 %v2597_v62  ;;  %1289 = vmatmul.mubr.bf16.gmra.mrb[20].mxu1 %v2616_v15 }
  0x6d   :  { %2438 = vmatpush3.bf16.msra.mxu1 %v2598_v63  ;;  %2411 = vmatprep.subr.bf16.mxu0 %v2599_v0 }
  0x6e   :  { %2439 = vmatprep.subr.bf16.mxu1 %v2600_v1  ;;  %1668 = vmatprep.mubr.bf16.mxu0 %v2627_v25 }
  0x6f   :  { %1717 = vmatprep.mubr.bf16.mxu1 %v2630_v27 }
  0x70   :  { %2412 = vmatpush3.bf16.msra.mxu0 %v2601_v2 }
  0x71   :  { %2440 = vmatpush3.bf16.msra.mxu1 %v2602_v3  ;;  %2413 = vmatprep.subr.bf16.mxu0 %v2603_v4 }
  0x72   :  { %2441 = vmatprep.subr.bf16.mxu1 %v2604_v5 }
  0x74   :  { %2414 = vmatpush3.bf16.msra.mxu0 %v2605_v6 }
  0x75   :  { %2442 = vmatpush3.bf16.msra.mxu1 %v2606_v7  ;;  %2415 = vmatprep.subr.bf16.mxu0 %v2609_v9  ;;  %v1881_v9 = vld [vmem:[%s3175_s2 + $0x1] ss:$0 sm:$0xff] }
  0x76   :  { %2443 = vmatprep.subr.bf16.mxu1 %v2610_v10 }
  0x78   :  { %2416 = vmatpush3.bf16.msra.mxu0 %v2612_v12 }
  0x79   :  { %2444 = vmatpush3.bf16.msra.mxu1 %v2613_v13  ;;  %2417 = vmatprep.subr.bf16.mxu0 %v2617_v16 }
  0x7a   :  { %2445 = vmatprep.subr.bf16.mxu1 %v2618_v17 }
  0x7c   :  { %2418 = vmatpush3.bf16.msra.mxu0 %v2619_v18 }
  0x7d   :  { %2446 = vmatpush3.bf16.msra.mxu1 %v2620_v19  ;;  %2419 = vmatprep.subr.bf16.mxu0 %v2621_v20 }
  0x7e   :  { %2447 = vmatprep.subr.bf16.mxu1 %v2622_v21 }
  0x80   :  { %2420 = vmatpush3.bf16.msra.mxu0 %v2623_v22 }
  0x81   :  { %2448 = vmatpush3.bf16.msra.mxu1 %v2624_v23 }
  0x83   :  { %1669 = vmatmul.mubr.bf16.vlgmr.msra.gmra.mrb[24].mxu0 %v2625_v24 }
  0x84   :  { %1718 = vmatmul.mubr.bf16.vlgmr.msra.gmra.mrb[24].mxu1 %v2628_v26  ;;  %1676 = vmatprep.mubr.bf16.mxu0 %v2631_v28 }
  0x85   :  { %1725 = vmatprep.mubr.bf16.mxu1 %v2633_v29 }
  0x8b   :  { %1677 = vmatmul.mubr.bf16.gmra.mrb[28].mxu0 %v2635_v30 }
  0x8c   :  { %1726 = vmatmul.mubr.bf16.gmra.mrb[28].mxu1 %v2636_v31 }
  0xf6   :  { %v2253_v32 = vpop.f32.mrb[0].mxu0 }
  0xf7   :  { %v2281_v33 = vpop.f32.mrb[0].mxu1  ;;  %v2254_v35 = vpop.f32.mrb[1].mxu0 }
  0xf8   :  { %v2255_v36 = vadd.f32 %v2254_v35, %v2253_v32  ;;  %v2282_v37 = vpop.f32.mrb[1].mxu1  ;;  %v2256_v38 = vpop.f32.mrb[2].mxu0 }
  0xf9   :  { %v2283_v39 = vadd.f32 %v2282_v37, %v2281_v33  ;;  %v2284_v40 = vpop.f32.mrb[2].mxu1  ;;  %v2257_v41 = vpop.f32.mrb[3].mxu0 }
  0xfa   :  { %v361_v42 = vadd.f32 %v2255_v36, %v1763_v34  ;;  %v2258_v43 = vadd.f32 %v2257_v41, %v2256_v38  ;;  %v2285_v44 = vpop.f32.mrb[3].mxu1 }
  0xfb   :  { %v2286_v45 = vadd.f32 %v2285_v44, %v2284_v40 }
  0xfc   :  { %v410_v46 = vadd.f32 %v2283_v39, %v361_v42  ;;  %v364_v47 = vadd.f32 %v2258_v43, %v1763_v34 }
  0xfe   :  { %v413_v48 = vadd.f32 %v2286_v45, %v364_v47  ;;  %v424_v49 = vmax.f32 %v410_v46, 0.0  ;;  %v2259_v52 = vpop.f32.mrb[4].mxu0  ;;  %v2003_v47 = vld [vmem:[%s3175_s2 + $0x2] ss:$0 sm:$0xff] }
  0xff   :  { %v2260_v53 = vpop.f32.mrb[5].mxu0  ;;  %v2287_v56 = vpop.f32.mrb[4].mxu1 }
 0x100   :  { %v425_v50 = vmax.f32 %v413_v48, 0.0  ;;  %v2261_v54 = vadd.f32 %v2260_v53, %v2259_v52  ;;  %v2262_v55 = vpop.f32.mrb[6].mxu0  ;;  %v2288_v58 = vpop.f32.mrb[5].mxu1 }
 0x101   :  { %v2263_v57 = vpop.f32.mrb[7].mxu0  ;;  %v2289_v61 = vadd.f32 %v2288_v58, %v2287_v56  ;;  %v2290_v62 = vpop.f32.mrb[6].mxu1 }
 0x102   :  { %v2193_v51 = vpack.c.bf16 %v425_v50, %v424_v49  ;;  %v369_v59 = vadd.f32 %v2261_v54, %v1763_v34  ;;  %v2264_v60 = vadd.f32 %v2263_v57, %v2262_v55  ;;  %v2291_v63 = vpop.f32.mrb[7].mxu1 }
 0x103   :  { %v2292_v2 = vadd.f32 %v2291_v63, %v2290_v62 }
 0x104   :  { %2194 = vst [vmem:[%s3176_s3] sm:$0xff] %v2193_v51   ;;  %v372_v0 = vadd.f32 %v2264_v60, %v1763_v34  ;;  %v418_v1 = vadd.f32 %v2289_v61, %v369_v59 }
 0x106   :  { %v426_v3 = vmax.f32 %v418_v1, 0.0  ;;  %v421_v4 = vadd.f32 %v2292_v2, %v372_v0 }
 0x108   :  { %v427_v5 = vmax.f32 %v421_v4, 0.0 }
 0x10a   :  { %v2198_v6 = vpack.c.bf16 %v427_v5, %v426_v3 }
 0x10c   :  { %2230 = vst [vmem:[%s3176_s3 + $0x8] sm:$0xff] %v2198_v6  }
 0x116   :  { %v2309_v7 = vpop.f32.mrb[8].mxu0 }
 0x117   :  { %v2337_v8 = vpop.f32.mrb[8].mxu1  ;;  %v2310_v10 = vpop.f32.mrb[9].mxu0 }
 0x118   :  { %v2311_v11 = vadd.f32 %v2310_v10, %v2309_v7  ;;  %v2338_v12 = vpop.f32.mrb[9].mxu1  ;;  %v2312_v13 = vpop.f32.mrb[10].mxu0 }
 0x119   :  { %v2339_v14 = vadd.f32 %v2338_v12, %v2337_v8  ;;  %v2340_v15 = vpop.f32.mrb[10].mxu1  ;;  %v2313_v16 = vpop.f32.mrb[11].mxu0 }
 0x11a   :  { %v797_v17 = vadd.f32 %v2311_v11, %v1881_v9  ;;  %v2314_v18 = vadd.f32 %v2313_v16, %v2312_v13  ;;  %v2341_v19 = vpop.f32.mrb[11].mxu1 }
 0x11b   :  { %v2342_v20 = vadd.f32 %v2341_v19, %v2340_v15 }
 0x11c   :  { %v846_v21 = vadd.f32 %v2339_v14, %v797_v17  ;;  %v800_v22 = vadd.f32 %v2314_v18, %v1881_v9 }
 0x11e   :  { %v849_v23 = vadd.f32 %v2342_v20, %v800_v22  ;;  %v860_v24 = vmax.f32 %v846_v21, 0.0  ;;  %v2315_v27 = vpop.f32.mrb[12].mxu0 }
 0x11f   :  { %v2316_v28 = vpop.f32.mrb[13].mxu0  ;;  %v2343_v31 = vpop.f32.mrb[12].mxu1 }
 0x120   :  { %v861_v25 = vmax.f32 %v849_v23, 0.0  ;;  %v2317_v29 = vadd.f32 %v2316_v28, %v2315_v27  ;;  %v2318_v30 = vpop.f32.mrb[14].mxu0  ;;  %v2344_v33 = vpop.f32.mrb[13].mxu1  ;;  %v2125_v23 = vld [vmem:[%s3175_s2 + $0x3] ss:$0 sm:$0xff] }
 0x121   :  { %v2319_v32 = vpop.f32.mrb[15].mxu0  ;;  %v2345_v36 = vadd.f32 %v2344_v33, %v2343_v31  ;;  %v2346_v37 = vpop.f32.mrb[14].mxu1 }
 0x122   :  { %v2203_v26 = vpack.c.bf16 %v861_v25, %v860_v24  ;;  %v805_v34 = vadd.f32 %v2317_v29, %v1881_v9  ;;  %v2320_v35 = vadd.f32 %v2319_v32, %v2318_v30  ;;  %v2347_v38 = vpop.f32.mrb[15].mxu1 }
 0x123   :  { %v2348_v41 = vadd.f32 %v2347_v38, %v2346_v37 }
 0x124   :  { %2231 = vst [vmem:[%s3176_s3 + $0x10] sm:$0xff] %v2203_v26   ;;  %v808_v39 = vadd.f32 %v2320_v35, %v1881_v9  ;;  %v854_v40 = vadd.f32 %v2345_v36, %v805_v34 }
 0x126   :  { %v862_v42 = vmax.f32 %v854_v40, 0.0  ;;  %v857_v43 = vadd.f32 %v2348_v41, %v808_v39 }
 0x128   :  { %v863_v44 = vmax.f32 %v857_v43, 0.0 }
 0x12a   :  { %v2208_v46 = vpack.c.bf16 %v863_v44, %v862_v42 }
 0x12c   :  { %2232 = vst [vmem:[%s3176_s3 + $0x18] sm:$0xff] %v2208_v46  }
 0x136   :  { %v2365_v45 = vpop.f32.mrb[16].mxu0 }
 0x137   :  { %v2366_v48 = vpop.f32.mrb[17].mxu0  ;;  %v2393_v49 = vpop.f32.mrb[16].mxu1 }
 0x138   :  { %v2367_v50 = vadd.f32 %v2366_v48, %v2365_v45  ;;  %v2368_v51 = vpop.f32.mrb[18].mxu0  ;;  %v2394_v52 = vpop.f32.mrb[17].mxu1 }
 0x139   :  { %v2369_v53 = vpop.f32.mrb[19].mxu0  ;;  %v2395_v55 = vadd.f32 %v2394_v52, %v2393_v49  ;;  %v2396_v56 = vpop.f32.mrb[18].mxu1 }
 0x13a   :  { %v1234_v54 = vadd.f32 %v2367_v50, %v2003_v47  ;;  %v2370_v57 = vadd.f32 %v2369_v53, %v2368_v51  ;;  %v2397_v58 = vpop.f32.mrb[19].mxu1 }
 0x13b   :  { %v2398_v61 = vadd.f32 %v2397_v58, %v2396_v56 }
 0x13c   :  { %v1283_v59 = vadd.f32 %v2395_v55, %v1234_v54  ;;  %v1237_v60 = vadd.f32 %v2370_v57, %v2003_v47 }
 0x13e   :  { %v1286_v62 = vadd.f32 %v2398_v61, %v1237_v60  ;;  %v1297_v63 = vmax.f32 %v1283_v59, 0.0  ;;  %v2371_v2 = vpop.f32.mrb[20].mxu0 }
 0x13f   :  { %v2372_v3 = vpop.f32.mrb[21].mxu0  ;;  %v2399_v8 = vpop.f32.mrb[20].mxu1 }
 0x140   :  { %v1298_v0 = vmax.f32 %v1286_v62, 0.0  ;;  %v2373_v4 = vadd.f32 %v2372_v3, %v2371_v2  ;;  %v2374_v5 = vpop.f32.mrb[22].mxu0  ;;  %v2400_v10 = vpop.f32.mrb[21].mxu1 }
 0x141   :  { %v2375_v6 = vpop.f32.mrb[23].mxu0  ;;  %v2401_v12 = vadd.f32 %v2400_v10, %v2399_v8  ;;  %v2402_v13 = vpop.f32.mrb[22].mxu1 }
 0x142   :  { %v2213_v1 = vpack.c.bf16 %v1298_v0, %v1297_v63  ;;  %v1242_v7 = vadd.f32 %v2373_v4, %v2003_v47  ;;  %v2376_v9 = vadd.f32 %v2375_v6, %v2374_v5  ;;  %v2403_v14 = vpop.f32.mrb[23].mxu1 }
 0x143   :  { %v2404_v16 = vadd.f32 %v2403_v14, %v2402_v13 }
 0x144   :  { %2233 = vst [vmem:[%s3176_s3 + $0x20] sm:$0xff] %v2213_v1   ;;  %v1245_v11 = vadd.f32 %v2376_v9, %v2003_v47  ;;  %v1291_v15 = vadd.f32 %v2401_v12, %v1242_v7 }
 0x146   :  { %v1299_v17 = vmax.f32 %v1291_v15, 0.0  ;;  %v1294_v18 = vadd.f32 %v2404_v16, %v1245_v11 }
 0x148   :  { %v1300_v19 = vmax.f32 %v1294_v18, 0.0 }
 0x14a   :  { %v2218_v20 = vpack.c.bf16 %v1300_v19, %v1299_v17 }
 0x14c   :  { %2234 = vst [vmem:[%s3176_s3 + $0x28] sm:$0xff] %v2218_v20  }
 0x156   :  { %v2421_v21 = vpop.f32.mrb[24].mxu0 }
 0x157   :  { %v2449_v22 = vpop.f32.mrb[24].mxu1  ;;  %v2422_v24 = vpop.f32.mrb[25].mxu0 }
 0x158   :  { %v2423_v25 = vadd.f32 %v2422_v24, %v2421_v21  ;;  %v2450_v26 = vpop.f32.mrb[25].mxu1  ;;  %v2424_v27 = vpop.f32.mrb[26].mxu0 }
 0x159   :  { %v2451_v28 = vadd.f32 %v2450_v26, %v2449_v22  ;;  %v2452_v29 = vpop.f32.mrb[26].mxu1  ;;  %v2425_v30 = vpop.f32.mrb[27].mxu0 }
 0x15a   :  { %v1671_v31 = vadd.f32 %v2423_v25, %v2125_v23  ;;  %v2426_v32 = vadd.f32 %v2425_v30, %v2424_v27  ;;  %v2453_v33 = vpop.f32.mrb[27].mxu1 }
 0x15b   :  { %v2454_v34 = vadd.f32 %v2453_v33, %v2452_v29 }
 0x15c   :  { %v1720_v35 = vadd.f32 %v2451_v28, %v1671_v31  ;;  %v1674_v36 = vadd.f32 %v2426_v32, %v2125_v23 }
 0x15e   :  { %v1723_v37 = vadd.f32 %v2454_v34, %v1674_v36  ;;  %v2427_v38 = vpop.f32.mrb[28].mxu0  ;;  %v1734_v41 = vmax.f32 %v1720_v35, 0.0 }
 0x15f   :  { %v2455_v39 = vpop.f32.mrb[28].mxu1  ;;  %v2428_v40 = vpop.f32.mrb[29].mxu0 }
 0x160   :  { %v1735_v42 = vmax.f32 %v1723_v37, 0.0  ;;  %v2429_v43 = vadd.f32 %v2428_v40, %v2427_v38  ;;  %v2456_v44 = vpop.f32.mrb[29].mxu1  ;;  %v2430_v45 = vpop.f32.mrb[30].mxu0 }
 0x161   :  { %v2457_v46 = vadd.f32 %v2456_v44, %v2455_v39  ;;  %v2458_v47 = vpop.f32.mrb[30].mxu1  ;;  %v2431_v48 = vpop.f32.mrb[31].mxu0 }
 0x162   :  { %v2223_v49 = vpack.c.bf16 %v1735_v42, %v1734_v41  ;;  %v1679_v50 = vadd.f32 %v2429_v43, %v2125_v23  ;;  %v2432_v51 = vadd.f32 %v2431_v48, %v2430_v45  ;;  %v2459_v52 = vpop.f32.mrb[31].mxu1 }
 0x163   :  { %v2460_v53 = vadd.f32 %v2459_v52, %v2458_v47 }
 0x164   :  { %2235 = vst [vmem:[%s3176_s3 + $0x30] sm:$0xff] %v2223_v49   ;;  %v1728_v54 = vadd.f32 %v2457_v46, %v1679_v50  ;;  %v1682_v55 = vadd.f32 %v2432_v51, %v2125_v23 }
 0x166   :  { %v1731_v56 = vadd.f32 %v2460_v53, %v1682_v55  ;;  %v1736_v57 = vmax.f32 %v1728_v54, 0.0 }
 0x168   :  { %v1737_v58 = vmax.f32 %v1731_v56, 0.0 }
 0x16a   :  { %v2228_v59 = vpack.c.bf16 %v1737_v58, %v1736_v57 }
 0x16c   :  { %2236 = vst [vmem:[%s3176_s3 + $0x38] sm:$0xff] %v2228_v59  }

// kernel: vae_forward.10
= control target key start
LH: loop header
LB: loop body
LE: loop exit
PB: predicated region body
PF: predicated region fallthrough
CT: control target
= control target key end

     0   :  { %14 = vsyncpa [#allocation3], 0  ;;  %v289_v9 = vlaneseq  ;;  %v4238_v10 = vmov 1966171168   ;;  %s5626_s0 = inlined_call_operand.vmem [shape: bf16[2,2048], index: 0, kind: input, shape index: {}]   ;;  %s5627_s1 = inlined_call_operand.vmem [shape: bf16[2048,256], index: 1, kind: input, shape index: {}]   ;;  %s5628_s2 = inlined_call_operand.vmem [shape: f32[1,256], index: 2, kind: input, shape index: {}]   ;;  %s5629_s3 = inlined_call_operand.vmem [shape: f32[2,128], index: 3, kind: input, shape index: {}]   ;;  %s5630_s4 = inlined_call_operand.vmem [shape: bf16[128,2048], index: 4, kind: input, shape index: {}]   ;;  %s5631_s5 = inlined_call_operand.vmem [shape: f32[1,2048], index: 5, kind: input, shape index: {}]   ;;  %s5632_s6 = inlined_call_operand.hbm [shape: f32[2,128], index: 6, kind: output, shape index: {0}]   ;;  %s5633_s7 = inlined_call_operand.hbm [shape: f32[2,128], index: 7, kind: output, shape index: {1}]   ;;  %s5634_s8 = inlined_call_operand.vmem [shape: bf16[2,2048], index: 8, kind: output, shape index: {2}]  }
   0x1   :  { %v3802_v0 = vld [vmem:[%s5627_s1 + $0x204] ss:$8 sps:$4 sm:$0xff]   ;;  %v3804_v1 = vld [vmem:[%s5627_s1 + $0x200] ss:$8 sps:$4 sm:$0xff]   ;;  %v3805_v2 = vld [vmem:[%s5627_s1 + $0x214] ss:$8 sps:$4 sm:$0xff]   ;;  %v303_v11 = vunpack.c.l.s4 %v4238_v10 }
   0x2   :  { %1777 = vmatprep.subr.bf16.mxu0 %v3802_v0  ;;  %v3807_v3 = vld [vmem:[%s5627_s1 + $0x210] ss:$8 sps:$4 sm:$0xff]   ;;  %v3808_v4 = vld [vmem:[%s5627_s1 + $0x224] ss:$8 sps:$4 sm:$0xff]   ;;  %v3810_v5 = vld [vmem:[%s5627_s1 + $0x220] ss:$8 sps:$4 sm:$0xff]  }
   0x3   :  { %1778 = vmatpush1.bf16.msra.mxu0 %v3804_v1  ;;  %v3811_v6 = vld [vmem:[%s5627_s1 + $0x234] ss:$8 sps:$4 sm:$0xff]   ;;  %v3813_v7 = vld [vmem:[%s5627_s1 + $0x230] ss:$8 sps:$4 sm:$0xff]   ;;  %v3814_v8 = vld [vmem:[%s5627_s1 + $0x244] ss:$8 sps:$4 sm:$0xff]   ;;  %v304_v15 = vunpack.c.0.s8 %v303_v11 }
   0x4   :  { %1779 = vmatprep.subr.bf16.mxu0 %v3805_v2  ;;  %v3816_v12 = vld [vmem:[%s5627_s1 + $0x240] ss:$8 sps:$4 sm:$0xff]   ;;  %v3817_v13 = vld [vmem:[%s5627_s1 + $0x254] ss:$8 sps:$4 sm:$0xff]   ;;  %v4320_v14 = vshrl.u32 %v289_v9, 7 }
   0x5   :  { %v3819_v16 = vld [vmem:[%s5627_s1 + $0x250] ss:$8 sps:$4 sm:$0xff]   ;;  %v3820_v17 = vld [vmem:[%s5627_s1 + $0x264] ss:$8 sps:$4 sm:$0xff]   ;;  %v3822_v21 = vld [vmem:[%s5627_s1 + $0x260] ss:$8 sps:$4 sm:$0xff]  }
   0x6   :  { %v4329_v18 = vsub.s32 %v304_v15, %v4320_v14  ;;  %v4334_v19 = vld [vmem:[%s5626_s0] sm:$0xff]  ;;  %v3823_v22 = vld [vmem:[%s5627_s1 + $0x274] ss:$8 sps:$4 sm:$0xff]   ;;  %v3825_v25 = vld [vmem:[%s5627_s1 + $0x270] ss:$8 sps:$4 sm:$0xff]  }
   0x7   :  { %1780 = vmatpush1.bf16.msra.mxu0 %v3807_v3  ;;  %v301_v20 = vcombine.high %v4334_v19, %v4334_v19  ;;  %v3826_v26 = vld [vmem:[%s5627_s1 + $0x284] ss:$8 sps:$4 sm:$0xff]   ;;  %v3828_v28 = vld [vmem:[%s5627_s1 + $0x280] ss:$8 sps:$4 sm:$0xff]   ;;  %v3829_v29 = vld [vmem:[%s5627_s1 + $0x294] ss:$8 sps:$4 sm:$0xff]  }
   0x8   :  { %1781 = vmatprep.subr.bf16.mxu0 %v3808_v4  ;;  %v3831_v30 = vld [vmem:[%s5627_s1 + $0x290] ss:$8 sps:$4 sm:$0xff]   ;;  %v3832_v31 = vld [vmem:[%s5627_s1 + $0x2a4] ss:$8 sps:$4 sm:$0xff]   ;;  %v3834_v32 = vld [vmem:[%s5627_s1 + $0x2a0] ss:$8 sps:$4 sm:$0xff]  }
   0x9   :  { %v315_v23 = vrot.slane %v301_v20, %v4329_v18  ;;  %v3835_v33 = vld [vmem:[%s5627_s1 + $0x2b4] ss:$8 sps:$4 sm:$0xff]   ;;  %v3837_v34 = vld [vmem:[%s5627_s1 + $0x2b0] ss:$8 sps:$4 sm:$0xff]   ;;  %v3838_v35 = vld [vmem:[%s5627_s1 + $0x2c4] ss:$8 sps:$4 sm:$0xff]  }
   0xa   :  { %v3840_v36 = vld [vmem:[%s5627_s1 + $0x2c0] ss:$8 sps:$4 sm:$0xff]   ;;  %v3841_v37 = vld [vmem:[%s5627_s1 + $0x2d4] ss:$8 sps:$4 sm:$0xff]   ;;  %v3843_v38 = vld [vmem:[%s5627_s1 + $0x2d0] ss:$8 sps:$4 sm:$0xff]  }
   0xb   :  { %1782 = vmatpush1.bf16.msra.mxu0 %v3810_v5  ;;  %v317_v24 = vcombine.high %v315_v23, %v315_v23  ;;  %v3844_v39 = vld [vmem:[%s5627_s1 + $0x2e4] ss:$8 sps:$4 sm:$0xff]   ;;  %v3846_v40 = vld [vmem:[%s5627_s1 + $0x2e0] ss:$8 sps:$4 sm:$0xff]   ;;  %v3847_v41 = vld [vmem:[%s5627_s1 + $0x2f4] ss:$8 sps:$4 sm:$0xff]   ;;  %v4404_v45 = vrot.slane %v315_v23, %v4329_v18 }
   0xc   :  { %1783 = vmatprep.subr.bf16.mxu0 %v3811_v6  ;;  %v3849_v42 = vld [vmem:[%s5627_s1 + $0x2f0] ss:$8 sps:$4 sm:$0xff]   ;;  %v3853_v43 = vld [vmem:[%s5627_s1 + $0x304] ss:$8 sps:$4 sm:$0xff]   ;;  %v3851_v44 = vld [vmem:[%s5627_s1 + $0x300] ss:$8 sps:$4 sm:$0xff]  }
   0xd   :  { %v345_v27 = vrot.slane %v317_v24, %v4329_v18  ;;  %v3944_v47 = vld [vmem:[%s5627_s1 + $0x4] ss:$8 sps:$4 sm:$0xff]   ;;  %v3856_v48 = vld [vmem:[%s5627_s1 + $0x314] ss:$8 sps:$4 sm:$0xff]   ;;  %v3949_v49 = vld [vmem:[%s5627_s1] ss:$8 sps:$4 sm:$0xff]  }
   0xe   :  { %1695 = vmatprep.subr.bf16.mxu1 %v3944_v47  ;;  %v3950_v50 = vld [vmem:[%s5627_s1 + $0x14] ss:$8 sps:$4 sm:$0xff]   ;;  %v3854_v51 = vld [vmem:[%s5627_s1 + $0x310] ss:$8 sps:$4 sm:$0xff]   ;;  %v3859_v52 = vld [vmem:[%s5627_s1 + $0x324] ss:$8 sps:$4 sm:$0xff]  }
   0xf   :  { %1784 = vmatpush1.bf16.msra.mxu0 %v3813_v7  ;;  %1809 = vmatprep.mubr.bf16.mxu0 %v345_v27  ;;  %v349_v46 = vcombine.high %v345_v27, %v345_v27  ;;  %v3955_v53 = vld [vmem:[%s5627_s1 + $0x10] ss:$8 sps:$4 sm:$0xff]   ;;  %v3956_v54 = vld [vmem:[%s5627_s1 + $0x24] ss:$8 sps:$4 sm:$0xff]   ;;  %v3857_v55 = vld [vmem:[%s5627_s1 + $0x320] ss:$8 sps:$4 sm:$0xff]  }
  0x10   :  { %1785 = vmatprep.subr.bf16.mxu0 %v3814_v8  ;;  %1696 = vmatpush1.bf16.msra.mxu1 %v3949_v49  ;;  %v3862_v56 = vld [vmem:[%s5627_s1 + $0x334] ss:$8 sps:$4 sm:$0xff]   ;;  %v3961_v57 = vld [vmem:[%s5627_s1 + $0x20] ss:$8 sps:$4 sm:$0xff]   ;;  %v3860_v59 = vld [vmem:[%s5627_s1 + $0x330] ss:$8 sps:$4 sm:$0xff]   ;;  %v308_v49 = vrot.slane %v4334_v19, %v4329_v18 }
  0x11   :  { %1697 = vmatprep.subr.bf16.mxu1 %v3950_v50  ;;  %v3962_v58 = vld [vmem:[%s5627_s1 + $0x34] ss:$8 sps:$4 sm:$0xff]   ;;  %v3865_v60 = vld [vmem:[%s5627_s1 + $0x344] ss:$8 sps:$4 sm:$0xff]   ;;  %v3967_v61 = vld [vmem:[%s5627_s1 + $0x30] ss:$8 sps:$4 sm:$0xff]  }
  0x12   :  { %v3968_v62 = vld [vmem:[%s5627_s1 + $0x44] ss:$8 sps:$4 sm:$0xff]   ;;  %v3863_v63 = vld [vmem:[%s5627_s1 + $0x340] ss:$8 sps:$4 sm:$0xff]   ;;  %v3868_v0 = vld [vmem:[%s5627_s1 + $0x354] ss:$8 sps:$4 sm:$0xff]   ;;  %v316_v50 = vcombine.high %v308_v49, %v308_v49 }
  0x13   :  { %1786 = vmatpush1.bf16.msra.mxu0 %v3816_v12  ;;  %v3973_v1 = vld [vmem:[%s5627_s1 + $0x40] ss:$8 sps:$4 sm:$0xff]   ;;  %v3974_v2 = vld [vmem:[%s5627_s1 + $0x54] ss:$8 sps:$4 sm:$0xff]   ;;  %v3866_v3 = vld [vmem:[%s5627_s1 + $0x350] ss:$8 sps:$4 sm:$0xff]  }
  0x14   :  { %1787 = vmatprep.subr.bf16.mxu0 %v3817_v13  ;;  %1698 = vmatpush1.bf16.msra.mxu1 %v3955_v53  ;;  %v3871_v4 = vld [vmem:[%s5627_s1 + $0x364] ss:$8 sps:$4 sm:$0xff]   ;;  %v3979_v5 = vld [vmem:[%s5627_s1 + $0x50] ss:$8 sps:$4 sm:$0xff]   ;;  %v3869_v7 = vld [vmem:[%s5627_s1 + $0x360] ss:$8 sps:$4 sm:$0xff]   ;;  %v338_v19 = vrot.slane %v316_v50, %v4329_v18 }
  0x15   :  { %1699 = vmatprep.subr.bf16.mxu1 %v3956_v54  ;;  %v3980_v6 = vld [vmem:[%s5627_s1 + $0x64] ss:$8 sps:$4 sm:$0xff]   ;;  %v3874_v8 = vld [vmem:[%s5627_s1 + $0x374] ss:$8 sps:$4 sm:$0xff]   ;;  %v3985_v9 = vld [vmem:[%s5627_s1 + $0x60] ss:$8 sps:$4 sm:$0xff]  }
  0x16   :  { %v3986_v10 = vld [vmem:[%s5627_s1 + $0x74] ss:$8 sps:$4 sm:$0xff]   ;;  %v3872_v11 = vld [vmem:[%s5627_s1 + $0x370] ss:$8 sps:$4 sm:$0xff]   ;;  %v3877_v12 = vld [vmem:[%s5627_s1 + $0x384] ss:$8 sps:$4 sm:$0xff]   ;;  %1727 = vmatprep.mubr.bf16.mxu1 %v338_v19 }
  0x17   :  { %1788 = vmatpush1.bf16.msra.mxu0 %v3819_v16  ;;  %v3991_v13 = vld [vmem:[%s5627_s1 + $0x70] ss:$8 sps:$4 sm:$0xff]   ;;  %v3992_v15 = vld [vmem:[%s5627_s1 + $0x84] ss:$8 sps:$4 sm:$0xff]   ;;  %v3875_v16 = vld [vmem:[%s5627_s1 + $0x380] ss:$8 sps:$4 sm:$0xff]  }
  0x18   :  { %1789 = vmatprep.subr.bf16.mxu0 %v3820_v17  ;;  %1700 = vmatpush1.bf16.msra.mxu1 %v3961_v57  ;;  %v3880_v17 = vld [vmem:[%s5627_s1 + $0x394] ss:$8 sps:$4 sm:$0xff]   ;;  %v3997_v20 = vld [vmem:[%s5627_s1 + $0x80] ss:$8 sps:$4 sm:$0xff]   ;;  %v3883_v23 = vld [vmem:[%s5627_s1 + $0x3a4] ss:$8 sps:$4 sm:$0xff]  }
  0x19   :  { %1701 = vmatprep.subr.bf16.mxu1 %v3962_v58  ;;  %v4003_v24 = vld [vmem:[%s5627_s1 + $0x90] ss:$8 sps:$4 sm:$0xff]   ;;  %v3886_v27 = vld [vmem:[%s5627_s1 + $0x3b4] ss:$8 sps:$4 sm:$0xff]   ;;  %v4033_v47 = vld [vmem:[%s5627_s1 + $0xe0] ss:$8 sps:$4 sm:$0xff]  }
  0x1a   :  { %v4039_v54 = vld [vmem:[%s5627_s1 + $0xf0] ss:$8 sps:$4 sm:$0xff]   ;;  %v3899_v57 = vld [vmem:[%s5627_s1 + $0x400] ss:$8 sps:$4 sm:$0xff]   ;;  %v3904_v58 = vld [vmem:[%s5627_s1 + $0x414] ss:$8 sps:$4 sm:$0xff]  }
  0x1b   :  { %1790 = vmatpush1.bf16.msra.mxu0 %v3822_v21  ;;  %v3998_v21 = vld [vmem:[%s5627_s1 + $0x94] ss:$8 sps:$4 sm:$0xff]  }
  0x1c   :  { %1791 = vmatprep.subr.bf16.mxu0 %v3823_v22  ;;  %1702 = vmatpush1.bf16.msra.mxu1 %v3967_v61  ;;  %v3878_v22 = vld [vmem:[%s5627_s1 + $0x390] ss:$8 sps:$4 sm:$0xff]   ;;  %v4048_v61 = vld [vmem:[%s5627_s1 + $0x114] ss:$8 sps:$4 sm:$0xff]  }
  0x1d   :  { %1703 = vmatprep.subr.bf16.mxu1 %v3968_v62  ;;  %v348_v62 = vcombine.high %v338_v19, %v338_v19 }
  0x1f   :  { %1792 = vmatpush1.bf16.msra.mxu0 %v3825_v25  ;;  %v4004_v25 = vld [vmem:[%s5627_s1 + $0xa4] ss:$8 sps:$4 sm:$0xff]  }
  0x20   :  { %1793 = vmatprep.subr.bf16.mxu0 %v3826_v26  ;;  %1704 = vmatpush1.bf16.msra.mxu1 %v3973_v1  ;;  %v3881_v26 = vld [vmem:[%s5627_s1 + $0x3a0] ss:$8 sps:$4 sm:$0xff]   ;;  %v4046_v1 = vld [vmem:[%s5627_s1 + $0x110] ss:$8 sps:$4 sm:$0xff]  }
  0x21   :  { %1705 = vmatprep.subr.bf16.mxu1 %v3974_v2  ;;  %v4054_v2 = vld [vmem:[%s5627_s1 + $0x124] ss:$8 sps:$4 sm:$0xff]  }
  0x23   :  { %1794 = vmatpush1.bf16.msra.mxu0 %v3828_v28  ;;  %v4009_v28 = vld [vmem:[%s5627_s1 + $0xa0] ss:$8 sps:$4 sm:$0xff]  }
  0x24   :  { %1795 = vmatprep.subr.bf16.mxu0 %v3829_v29  ;;  %1706 = vmatpush1.bf16.msra.mxu1 %v3979_v5  ;;  %v4010_v29 = vld [vmem:[%s5627_s1 + $0xb4] ss:$8 sps:$4 sm:$0xff]   ;;  %v4052_v5 = vld [vmem:[%s5627_s1 + $0x120] ss:$8 sps:$4 sm:$0xff]  }
  0x25   :  { %1707 = vmatprep.subr.bf16.mxu1 %v3980_v6  ;;  %v4060_v6 = vld [vmem:[%s5627_s1 + $0x134] ss:$8 sps:$4 sm:$0xff]  }
  0x27   :  { %1796 = vmatpush1.bf16.msra.mxu0 %v3831_v30  ;;  %v3884_v30 = vld [vmem:[%s5627_s1 + $0x3b0] ss:$8 sps:$4 sm:$0xff]  }
  0x28   :  { %1797 = vmatprep.subr.bf16.mxu0 %v3832_v31  ;;  %1708 = vmatpush1.bf16.msra.mxu1 %v3985_v9  ;;  %v3889_v31 = vld [vmem:[%s5627_s1 + $0x3c4] ss:$8 sps:$4 sm:$0xff]   ;;  %v4058_v9 = vld [vmem:[%s5627_s1 + $0x130] ss:$8 sps:$4 sm:$0xff]  }
  0x29   :  { %1709 = vmatprep.subr.bf16.mxu1 %v3986_v10  ;;  %v4066_v10 = vld [vmem:[%s5627_s1 + $0x144] ss:$8 sps:$4 sm:$0xff]  }
  0x2b   :  { %1798 = vmatpush1.bf16.msra.mxu0 %v3834_v32  ;;  %v4015_v32 = vld [vmem:[%s5627_s1 + $0xb0] ss:$8 sps:$4 sm:$0xff]  }
  0x2c   :  { %1799 = vmatprep.subr.bf16.mxu0 %v3835_v33  ;;  %1710 = vmatpush1.bf16.msra.mxu1 %v3991_v13  ;;  %v4016_v33 = vld [vmem:[%s5627_s1 + $0xc4] ss:$8 sps:$4 sm:$0xff]   ;;  %v4064_v13 = vld [vmem:[%s5627_s1 + $0x140] ss:$8 sps:$4 sm:$0xff]  }
  0x2d   :  { %1711 = vmatprep.subr.bf16.mxu1 %v3992_v15  ;;  %v4072_v15 = vld [vmem:[%s5627_s1 + $0x154] ss:$8 sps:$4 sm:$0xff]  }
  0x2f   :  { %1800 = vmatpush1.bf16.msra.mxu0 %v3837_v34  ;;  %v3887_v34 = vld [vmem:[%s5627_s1 + $0x3c0] ss:$8 sps:$4 sm:$0xff]  }
  0x30   :  { %1801 = vmatprep.subr.bf16.mxu0 %v3838_v35  ;;  %1712 = vmatpush1.bf16.msra.mxu1 %v3997_v20  ;;  %v3892_v35 = vld [vmem:[%s5627_s1 + $0x3d4] ss:$8 sps:$4 sm:$0xff]  }
  0x31   :  { %1713 = vmatprep.subr.bf16.mxu1 %v3998_v21 }
  0x33   :  { %1802 = vmatpush1.bf16.msra.mxu0 %v3840_v36  ;;  %v4021_v36 = vld [vmem:[%s5627_s1 + $0xc0] ss:$8 sps:$4 sm:$0xff]  }
  0x34   :  { %1803 = vmatprep.subr.bf16.mxu0 %v3841_v37  ;;  %1714 = vmatpush1.bf16.msra.mxu1 %v4003_v24  ;;  %v4022_v37 = vld [vmem:[%s5627_s1 + $0xd4] ss:$8 sps:$4 sm:$0xff]  }
  0x35   :  { %1715 = vmatprep.subr.bf16.mxu1 %v4004_v25 }
  0x37   :  { %1804 = vmatpush1.bf16.msra.mxu0 %v3843_v38  ;;  %v3890_v38 = vld [vmem:[%s5627_s1 + $0x3d0] ss:$8 sps:$4 sm:$0xff]  }
  0x38   :  { %1805 = vmatprep.subr.bf16.mxu0 %v3844_v39  ;;  %1716 = vmatpush1.bf16.msra.mxu1 %v4009_v28  ;;  %v3895_v39 = vld [vmem:[%s5627_s1 + $0x3e4] ss:$8 sps:$4 sm:$0xff]  }
  0x39   :  { %1717 = vmatprep.subr.bf16.mxu1 %v4010_v29 }
  0x3b   :  { %1806 = vmatpush1.bf16.msra.mxu0 %v3846_v40  ;;  %v4572_v40 = vld [vmem:[%s5626_s0 + $0x8] sm:$0xff] }
  0x3c   :  { %1807 = vmatprep.subr.bf16.mxu0 %v3847_v41  ;;  %1718 = vmatpush1.bf16.msra.mxu1 %v4015_v32  ;;  %v4027_v41 = vld [vmem:[%s5627_s1 + $0xd0] ss:$8 sps:$4 sm:$0xff]  }
  0x3d   :  { %1719 = vmatprep.subr.bf16.mxu1 %v4016_v33 }
  0x3f   :  { %1808 = vmatpush1.bf16.msra.mxu0 %v3849_v42  ;;  %v4028_v42 = vld [vmem:[%s5627_s1 + $0xe4] ss:$8 sps:$4 sm:$0xff]  }
  0x40   :  { %1818 = vmatprep.subr.bf16.mxu0 %v3853_v43  ;;  %1720 = vmatpush1.bf16.msra.mxu1 %v4021_v36  ;;  %v3893_v43 = vld [vmem:[%s5627_s1 + $0x3e0] ss:$8 sps:$4 sm:$0xff]  }
  0x41   :  { %1721 = vmatprep.subr.bf16.mxu1 %v4022_v37 }
  0x42   :  { %1810 = vmatmul.mubr.bf16.vlgmr.msra.gmra.mrb[0].mxu0 %v4404_v45 }
  0x43   :  { %1819 = vmatpush1.bf16.msra.mxu0 %v3851_v44  ;;  %1850 = vmatprep.mubr.bf16.mxu0 %v349_v46  ;;  %v3898_v44 = vld [vmem:[%s5627_s1 + $0x3f4] ss:$8 sps:$4 sm:$0xff]   ;;  %v4588_v46 = vrot.slane %v4572_v40, %v4329_v18 }
  0x44   :  { %1820 = vmatprep.subr.bf16.mxu0 %v3856_v48  ;;  %1722 = vmatpush1.bf16.msra.mxu1 %v4027_v41  ;;  %v4034_v48 = vld [vmem:[%s5627_s1 + $0xf4] ss:$8 sps:$4 sm:$0xff]  }
  0x45   :  { %1723 = vmatprep.subr.bf16.mxu1 %v4028_v42  ;;  %v365_v53 = vcombine.high %v4588_v46, %v4588_v46 }
  0x47   :  { %1821 = vmatpush1.bf16.msra.mxu0 %v3854_v51  ;;  %v3896_v51 = vld [vmem:[%s5627_s1 + $0x3f0] ss:$8 sps:$4 sm:$0xff]  }
  0x48   :  { %1822 = vmatprep.subr.bf16.mxu0 %v3859_v52  ;;  %v3901_v52 = vld [vmem:[%s5627_s1 + $0x404] ss:$8 sps:$4 sm:$0xff]   ;;  %1724 = vmatpush1.bf16.msra.mxu1 %v4033_v47 }
  0x49   :  { %1725 = vmatprep.subr.bf16.mxu1 %v4034_v48 }
  0x4b   :  { %1823 = vmatpush1.bf16.msra.mxu0 %v3857_v55  ;;  %v4042_v55 = vld [vmem:[%s5627_s1 + $0x104] ss:$8 sps:$4 sm:$0xff]  }
  0x4c   :  { %1824 = vmatprep.subr.bf16.mxu0 %v3862_v56  ;;  %v347_v56 = vcombine.high %v4404_v45, %v4404_v45  ;;  %1726 = vmatpush1.bf16.msra.mxu1 %v4039_v54  ;;  %v4628_v45 = vrot.slane %v308_v49, %v4329_v18 }
  0x4d   :  { %1736 = vmatprep.subr.bf16.mxu1 %v4042_v55 }
  0x4f   :  { %1825 = vmatpush1.bf16.msra.mxu0 %v3860_v59  ;;  %v4622_v59 = vrot.slane %v365_v53, %v4329_v18  ;;  %1728 = vmatmul.mubr.bf16.vlgmr.msra.gmra.mrb[0].mxu1 %v4628_v45 }
  0x50   :  { %1826 = vmatprep.subr.bf16.mxu0 %v3865_v60  ;;  %v4040_v60 = vld [vmem:[%s5627_s1 + $0x100] ss:$8 sps:$4 sm:$0xff]   ;;  %1768 = vmatprep.mubr.bf16.mxu1 %v348_v62 }
  0x51   :  { %1737 = vmatpush1.bf16.msra.mxu1 %v4040_v60 }
  0x52   :  { %1738 = vmatprep.subr.bf16.mxu1 %v4048_v61 }
  0x53   :  { %1827 = vmatpush1.bf16.msra.mxu0 %v3863_v63  ;;  %v3902_v63 = vld [vmem:[%s5627_s1 + $0x410] ss:$8 sps:$4 sm:$0xff]  }
  0x54   :  { %1828 = vmatprep.subr.bf16.mxu0 %v3868_v0  ;;  %v3907_v0 = vld [vmem:[%s5627_s1 + $0x424] ss:$8 sps:$4 sm:$0xff]  }
  0x55   :  { %1739 = vmatpush1.bf16.msra.mxu1 %v4046_v1 }
  0x56   :  { %1740 = vmatprep.subr.bf16.mxu1 %v4054_v2 }
  0x57   :  { %1829 = vmatpush1.bf16.msra.mxu0 %v3866_v3  ;;  %v3905_v3 = vld [vmem:[%s5627_s1 + $0x420] ss:$8 sps:$4 sm:$0xff]  }
  0x58   :  { %1830 = vmatprep.subr.bf16.mxu0 %v3871_v4  ;;  %v3910_v4 = vld [vmem:[%s5627_s1 + $0x434] ss:$8 sps:$4 sm:$0xff]  }
  0x59   :  { %1741 = vmatpush1.bf16.msra.mxu1 %v4052_v5 }
  0x5a   :  { %1742 = vmatprep.subr.bf16.mxu1 %v4060_v6 }
  0x5b   :  { %1831 = vmatpush1.bf16.msra.mxu0 %v3869_v7  ;;  %v3908_v7 = vld [vmem:[%s5627_s1 + $0x430] ss:$8 sps:$4 sm:$0xff]  }
  0x5c   :  { %1832 = vmatprep.subr.bf16.mxu0 %v3874_v8  ;;  %v3913_v8 = vld [vmem:[%s5627_s1 + $0x444] ss:$8 sps:$4 sm:$0xff]  }
  0x5d   :  { %1743 = vmatpush1.bf16.msra.mxu1 %v4058_v9 }
  0x5e   :  { %1744 = vmatprep.subr.bf16.mxu1 %v4066_v10 }
  0x5f   :  { %1833 = vmatpush1.bf16.msra.mxu0 %v3872_v11  ;;  %v3911_v11 = vld [vmem:[%s5627_s1 + $0x440] ss:$8 sps:$4 sm:$0xff]  }
  0x60   :  { %1834 = vmatprep.subr.bf16.mxu0 %v3877_v12  ;;  %v3916_v12 = vld [vmem:[%s5627_s1 + $0x454] ss:$8 sps:$4 sm:$0xff]  }
  0x63   :  { %1835 = vmatpush1.bf16.msra.mxu0 %v3875_v16 }
  0x64   :  { %1836 = vmatprep.subr.bf16.mxu0 %v3880_v17 }
  0x67   :  { %1837 = vmatpush1.bf16.msra.mxu0 %v3878_v22 }
  0x68   :  { %1838 = vmatprep.subr.bf16.mxu0 %v3883_v23 }
  0x6b   :  { %1839 = vmatpush1.bf16.msra.mxu0 %v3881_v26 }
  0x6c   :  { %1840 = vmatprep.subr.bf16.mxu0 %v3886_v27 }
  0x6f   :  { %1841 = vmatpush1.bf16.msra.mxu0 %v3884_v30 }
  0x70   :  { %1842 = vmatprep.subr.bf16.mxu0 %v3889_v31 }
  0x73   :  { %1843 = vmatpush1.bf16.msra.mxu0 %v3887_v34 }
  0x74   :  { %1844 = vmatprep.subr.bf16.mxu0 %v3892_v35 }
  0x77   :  { %1845 = vmatpush1.bf16.msra.mxu0 %v3890_v38 }
  0x78   :  { %1846 = vmatprep.subr.bf16.mxu0 %v3895_v39 }
  0x7b   :  { %1847 = vmatpush1.bf16.msra.mxu0 %v3893_v43 }
  0x7c   :  { %1848 = vmatprep.subr.bf16.mxu0 %v3898_v44 }
  0x7f   :  { %1849 = vmatpush1.bf16.msra.mxu0 %v3896_v51 }
  0x80   :  { %1859 = vmatprep.subr.bf16.mxu0 %v3901_v52 }
  0x82   :  { %1851 = vmatmul.mubr.bf16.vlgmr.msra.gmra.mrb[0].mxu0 %v347_v56 }
  0x83   :  { %1860 = vmatpush1.bf16.msra.mxu0 %v3899_v57  ;;  %1891 = vmatprep.mubr.bf16.mxu0 %v4622_v59 }
  0x84   :  { %1861 = vmatprep.subr.bf16.mxu0 %v3904_v58 }
  0x87   :  { %1862 = vmatpush1.bf16.msra.mxu0 %v3902_v63 }
  0x88   :  { %1863 = vmatprep.subr.bf16.mxu0 %v3907_v0 }
  0x8b   :  { %1864 = vmatpush1.bf16.msra.mxu0 %v3905_v3 }
  0x8c   :  { %1865 = vmatprep.subr.bf16.mxu0 %v3910_v4 }
  0x8f   :  { %1866 = vmatpush1.bf16.msra.mxu0 %v3908_v7 }
  0x90   :  { %1867 = vmatprep.subr.bf16.mxu0 %v3913_v8 }
  0x91   :  { %15 = vsyncpa [#allocation5], 0  ;;  %v3914_v16 = vld [vmem:[%s5627_s1 + $0x450] ss:$8 sps:$4 sm:$0xff]   ;;  %v3919_v17 = vld [vmem:[%s5627_s1 + $0x464] ss:$8 sps:$4 sm:$0xff]   ;;  %1745 = vmatpush1.bf16.msra.mxu1 %v4064_v13  ;;  %v4814_v0 = vrot.slane %v4588_v46, %v4329_v18  ;;  %v397_v2 = vcombine.high %v4622_v59, %v4622_v59  ;;  %v346_v4 = vcombine.high %v4628_v45, %v4628_v45 }
  0x92   :  { %v4070_v20 = vld [vmem:[%s5627_s1 + $0x150] ss:$8 sps:$4 sm:$0xff]   ;;  %1746 = vmatprep.subr.bf16.mxu1 %v4072_v15  ;;  %v4078_v21 = vld [vmem:[%s5627_s1 + $0x164] ss:$8 sps:$4 sm:$0xff]   ;;  %v3917_v22 = vld [vmem:[%s5627_s1 + $0x460] ss:$8 sps:$4 sm:$0xff]  }
  0x93   :  { %1868 = vmatpush1.bf16.msra.mxu0 %v3911_v11  ;;  %v3922_v23 = vld [vmem:[%s5627_s1 + $0x474] ss:$8 sps:$4 sm:$0xff]   ;;  %v4076_v24 = vld [vmem:[%s5627_s1 + $0x160] ss:$8 sps:$4 sm:$0xff]   ;;  %v3920_v26 = vld [vmem:[%s5627_s1 + $0x470] ss:$8 sps:$4 sm:$0xff]  }
  0x94   :  { %1869 = vmatprep.subr.bf16.mxu0 %v3916_v12  ;;  %v4084_v25 = vld [vmem:[%s5627_s1 + $0x174] ss:$8 sps:$4 sm:$0xff]   ;;  %v3925_v27 = vld [vmem:[%s5627_s1 + $0x484] ss:$8 sps:$4 sm:$0xff]   ;;  %v4082_v28 = vld [vmem:[%s5627_s1 + $0x170] ss:$8 sps:$4 sm:$0xff]  }
  0x95   :  { %1747 = vmatpush1.bf16.msra.mxu1 %v4070_v20  ;;  %v4090_v29 = vld [vmem:[%s5627_s1 + $0x184] ss:$8 sps:$4 sm:$0xff]   ;;  %v3923_v30 = vld [vmem:[%s5627_s1 + $0x480] ss:$8 sps:$4 sm:$0xff]   ;;  %v3928_v31 = vld [vmem:[%s5627_s1 + $0x494] ss:$8 sps:$4 sm:$0xff]  }
  0x96   :  { %1748 = vmatprep.subr.bf16.mxu1 %v4078_v21  ;;  %v4088_v32 = vld [vmem:[%s5627_s1 + $0x180] ss:$8 sps:$4 sm:$0xff]   ;;  %v4096_v33 = vld [vmem:[%s5627_s1 + $0x194] ss:$8 sps:$4 sm:$0xff]   ;;  %v3926_v34 = vld [vmem:[%s5627_s1 + $0x490] ss:$8 sps:$4 sm:$0xff]  }
  0x97   :  { %1870 = vmatpush1.bf16.msra.mxu0 %v3914_v16  ;;  %v3931_v35 = vld [vmem:[%s5627_s1 + $0x4a4] ss:$8 sps:$4 sm:$0xff]   ;;  %v4094_v36 = vld [vmem:[%s5627_s1 + $0x190] ss:$8 sps:$4 sm:$0xff]   ;;  %v3929_v38 = vld [vmem:[%s5627_s1 + $0x4a0] ss:$8 sps:$4 sm:$0xff]  }
  0x98   :  { %1871 = vmatprep.subr.bf16.mxu0 %v3919_v17  ;;  %v4102_v37 = vld [vmem:[%s5627_s1 + $0x1a4] ss:$8 sps:$4 sm:$0xff]   ;;  %v3934_v39 = vld [vmem:[%s5627_s1 + $0x4b4] ss:$8 sps:$4 sm:$0xff]   ;;  %v4100_v41 = vld [vmem:[%s5627_s1 + $0x1a0] ss:$8 sps:$4 sm:$0xff]  }
  0x99   :  { %1749 = vmatpush1.bf16.msra.mxu1 %v4076_v24  ;;  %v4108_v42 = vld [vmem:[%s5627_s1 + $0x1b4] ss:$8 sps:$4 sm:$0xff]   ;;  %v3932_v43 = vld [vmem:[%s5627_s1 + $0x4b0] ss:$8 sps:$4 sm:$0xff]   ;;  %v3937_v44 = vld [vmem:[%s5627_s1 + $0x4c4] ss:$8 sps:$4 sm:$0xff]  }
  0x9a   :  { %1750 = vmatprep.subr.bf16.mxu1 %v4084_v25  ;;  %v4106_v47 = vld [vmem:[%s5627_s1 + $0x1b0] ss:$8 sps:$4 sm:$0xff]   ;;  %v4114_v48 = vld [vmem:[%s5627_s1 + $0x1c4] ss:$8 sps:$4 sm:$0xff]   ;;  %v3935_v49 = vld [vmem:[%s5627_s1 + $0x4c0] ss:$8 sps:$4 sm:$0xff]  }
  0x9b   :  { %1872 = vmatpush1.bf16.msra.mxu0 %v3917_v22  ;;  %v3940_v50 = vld [vmem:[%s5627_s1 + $0x4d4] ss:$8 sps:$4 sm:$0xff]   ;;  %v4112_v51 = vld [vmem:[%s5627_s1 + $0x1c0] ss:$8 sps:$4 sm:$0xff]   ;;  %v3938_v53 = vld [vmem:[%s5627_s1 + $0x4d0] ss:$8 sps:$4 sm:$0xff]  }
  0x9c   :  { %1873 = vmatprep.subr.bf16.mxu0 %v3922_v23  ;;  %v4120_v52 = vld [vmem:[%s5627_s1 + $0x1d4] ss:$8 sps:$4 sm:$0xff]   ;;  %v3943_v54 = vld [vmem:[%s5627_s1 + $0x4e4] ss:$8 sps:$4 sm:$0xff]   ;;  %v4118_v19 = vld [vmem:[%s5627_s1 + $0x1d0] ss:$8 sps:$4 sm:$0xff]  }
  0x9d   :  { %1751 = vmatpush1.bf16.msra.mxu1 %v4082_v28  ;;  %v4126_v55 = vld [vmem:[%s5627_s1 + $0x1e4] ss:$8 sps:$4 sm:$0xff]   ;;  %v3941_v56 = vld [vmem:[%s5627_s1 + $0x4e0] ss:$8 sps:$4 sm:$0xff]   ;;  %v3948_v57 = vld [vmem:[%s5627_s1 + $0x4f4] ss:$8 sps:$4 sm:$0xff]  }
  0x9e   :  { %1752 = vmatprep.subr.bf16.mxu1 %v4090_v29  ;;  %v4124_v58 = vld [vmem:[%s5627_s1 + $0x1e0] ss:$8 sps:$4 sm:$0xff]   ;;  %v4132_v60 = vld [vmem:[%s5627_s1 + $0x1f4] ss:$8 sps:$4 sm:$0xff]   ;;  %v3946_v61 = vld [vmem:[%s5627_s1 + $0x4f0] ss:$8 sps:$4 sm:$0xff]  }
  0x9f   :  { %1874 = vmatpush1.bf16.msra.mxu0 %v3920_v26  ;;  %v3954_v62 = vld [vmem:[%s5627_s1 + $0x504] ss:$8 sps:$4 sm:$0xff]   ;;  %v4130_v63 = vld [vmem:[%s5627_s1 + $0x1f0] ss:$8 sps:$4 sm:$0xff]   ;;  %v3952_v1 = vld [vmem:[%s5627_s1 + $0x500] ss:$8 sps:$4 sm:$0xff]  }
  0xa0   :  { %1875 = vmatprep.subr.bf16.mxu0 %v3925_v27  ;;  %v3960_v3 = vld [vmem:[%s5627_s1 + $0x514] ss:$8 sps:$4 sm:$0xff]   ;;  %v3958_v46 = vld [vmem:[%s5627_s1 + $0x510] ss:$8 sps:$4 sm:$0xff]   ;;  %v3966_v59 = vld [vmem:[%s5627_s1 + $0x524] ss:$8 sps:$4 sm:$0xff]  }
  0xa1   :  { %1753 = vmatpush1.bf16.msra.mxu1 %v4088_v32  ;;  %v3964_v45 = vld [vmem:[%s5627_s1 + $0x520] ss:$8 sps:$4 sm:$0xff]   ;;  %v3972_v5 = vld [vmem:[%s5627_s1 + $0x534] ss:$8 sps:$4 sm:$0xff]   ;;  %v3970_v6 = vld [vmem:[%s5627_s1 + $0x530] ss:$8 sps:$4 sm:$0xff]  }
  0xa2   :  { %1754 = vmatprep.subr.bf16.mxu1 %v4096_v33  ;;  %v3978_v7 = vld [vmem:[%s5627_s1 + $0x544] ss:$8 sps:$4 sm:$0xff]   ;;  %v3976_v8 = vld [vmem:[%s5627_s1 + $0x540] ss:$8 sps:$4 sm:$0xff]   ;;  %v3984_v9 = vld [vmem:[%s5627_s1 + $0x554] ss:$8 sps:$4 sm:$0xff]  }
  0xa3   :  { %1876 = vmatpush1.bf16.msra.mxu0 %v3923_v30  ;;  %v3982_v10 = vld [vmem:[%s5627_s1 + $0x550] ss:$8 sps:$4 sm:$0xff]   ;;  %v3990_v11 = vld [vmem:[%s5627_s1 + $0x564] ss:$8 sps:$4 sm:$0xff]   ;;  %v3988_v12 = vld [vmem:[%s5627_s1 + $0x560] ss:$8 sps:$4 sm:$0xff]   ;;  %v350_v30 = vcombine.high %v4572_v40, %v4572_v40 }
  0xa4   :  { %1877 = vmatprep.subr.bf16.mxu0 %v3928_v31  ;;  %v3996_v13 = vld [vmem:[%s5627_s1 + $0x574] ss:$8 sps:$4 sm:$0xff]   ;;  %v3994_v15 = vld [vmem:[%s5627_s1 + $0x570] ss:$8 sps:$4 sm:$0xff]   ;;  %v4002_v16 = vld [vmem:[%s5627_s1 + $0x584] ss:$8 sps:$4 sm:$0xff]  }
  0xa5   :  { %1755 = vmatpush1.bf16.msra.mxu1 %v4094_v36  ;;  %v4000_v17 = vld [vmem:[%s5627_s1 + $0x580] ss:$8 sps:$4 sm:$0xff]   ;;  %v4008_v20 = vld [vmem:[%s5627_s1 + $0x594] ss:$8 sps:$4 sm:$0xff]   ;;  %v4006_v21 = vld [vmem:[%s5627_s1 + $0x590] ss:$8 sps:$4 sm:$0xff]   ;;  %v4911_v33 = vrot.slane %v350_v30, %v4329_v18 }
  0xa6   :  { %1756 = vmatprep.subr.bf16.mxu1 %v4102_v37  ;;  %v4014_v22 = vld [vmem:[%s5627_s1 + $0x5a4] ss:$8 sps:$4 sm:$0xff]   ;;  %v4012_v23 = vld [vmem:[%s5627_s1 + $0x5a0] ss:$8 sps:$4 sm:$0xff]   ;;  %v4020_v24 = vld [vmem:[%s5627_s1 + $0x5b4] ss:$8 sps:$4 sm:$0xff]   ;;  %v395_v37 = vcombine.high %v4814_v0, %v4814_v0 }
  0xa7   :  { %1878 = vmatpush1.bf16.msra.mxu0 %v3926_v34  ;;  %v4018_v25 = vld [vmem:[%s5627_s1 + $0x5b0] ss:$8 sps:$4 sm:$0xff]   ;;  %v4026_v26 = vld [vmem:[%s5627_s1 + $0x5c4] ss:$8 sps:$4 sm:$0xff]   ;;  %v4024_v27 = vld [vmem:[%s5627_s1 + $0x5c0] ss:$8 sps:$4 sm:$0xff]  }
  0xa8   :  { %1879 = vmatprep.subr.bf16.mxu0 %v3931_v35  ;;  %v4032_v28 = vld [vmem:[%s5627_s1 + $0x5d4] ss:$8 sps:$4 sm:$0xff]   ;;  %v4030_v29 = vld [vmem:[%s5627_s1 + $0x5d0] ss:$8 sps:$4 sm:$0xff]   ;;  %v4038_v31 = vld [vmem:[%s5627_s1 + $0x5e4] ss:$8 sps:$4 sm:$0xff]   ;;  %v366_v35 = vcombine.high %v4911_v33, %v4911_v33 }
  0xa9   :  { %1757 = vmatpush1.bf16.msra.mxu1 %v4100_v41  ;;  %v4036_v32 = vld [vmem:[%s5627_s1 + $0x5e0] ss:$8 sps:$4 sm:$0xff]   ;;  %v4045_v34 = vld [vmem:[%s5627_s1 + $0x5f4] ss:$8 sps:$4 sm:$0xff]   ;;  %v4043_v40 = vld [vmem:[%s5627_s1 + $0x5f0] ss:$8 sps:$4 sm:$0xff]  }
  0xaa   :  { %1758 = vmatprep.subr.bf16.mxu1 %v4108_v42  ;;  %v4051_v36 = vld [vmem:[%s5627_s1 + $0x604] ss:$8 sps:$4 sm:$0xff]   ;;  %v4057_v41 = vld [vmem:[%s5627_s1 + $0x614] ss:$8 sps:$4 sm:$0xff]   ;;  %v4055_v42 = vld [vmem:[%s5627_s1 + $0x610] ss:$8 sps:$4 sm:$0xff]  }
  0xab   :  { %1880 = vmatpush1.bf16.msra.mxu0 %v3929_v38  ;;  %v4049_v38 = vld [vmem:[%s5627_s1 + $0x600] ss:$8 sps:$4 sm:$0xff]   ;;  %v4155_v30 = vld [vmem:[%s5627_s1 + $0x750] ss:$8 sps:$4 sm:$0xff]   ;;  %s4241_s27 = smov [#allocation4]  }
  0xac   :  { %1881 = vmatprep.subr.bf16.mxu0 %v3934_v39  ;;  %v4930_v39 = vrot.slane %v366_v35, %v4329_v18  ;;  %v4164_v35 = vld [vmem:[%s5627_s1 + $0x780] ss:$8 sps:$4 sm:$0xff]   ;;  %s3362_s28 = sshll.u32 %s4241_s27, 4  ;;  %s3363_s28 = int_to_ptr.vmem [resolvable:$true] %s3362_s28 }
  0xad   :  { %1759 = vmatpush1.bf16.msra.mxu1 %v4106_v47  ;;  %v4069_v47 = vld [vmem:[%s5627_s1 + $0x634] ss:$8 sps:$4 sm:$0xff]  }
  0xae   :  { %1760 = vmatprep.subr.bf16.mxu1 %v4114_v48  ;;  %v4067_v48 = vld [vmem:[%s5627_s1 + $0x630] ss:$8 sps:$4 sm:$0xff]  }
  0xaf   :  { %1882 = vmatpush1.bf16.msra.mxu0 %v3932_v43  ;;  %v4063_v43 = vld [vmem:[%s5627_s1 + $0x624] ss:$8 sps:$4 sm:$0xff]  }
  0xb0   :  { %1883 = vmatprep.subr.bf16.mxu0 %v3937_v44  ;;  %v4061_v44 = vld [vmem:[%s5627_s1 + $0x620] ss:$8 sps:$4 sm:$0xff]  }
  0xb1   :  { %1761 = vmatpush1.bf16.msra.mxu1 %v4112_v51  ;;  %v4081_v51 = vld [vmem:[%s5627_s1 + $0x654] ss:$8 sps:$4 sm:$0xff]  }
  0xb2   :  { %1762 = vmatprep.subr.bf16.mxu1 %v4120_v52  ;;  %v4079_v52 = vld [vmem:[%s5627_s1 + $0x650] ss:$8 sps:$4 sm:$0xff]  }
  0xb3   :  { %1884 = vmatpush1.bf16.msra.mxu0 %v3935_v49  ;;  %v4075_v49 = vld [vmem:[%s5627_s1 + $0x644] ss:$8 sps:$4 sm:$0xff]  }
  0xb4   :  { %1885 = vmatprep.subr.bf16.mxu0 %v3940_v50  ;;  %v4073_v50 = vld [vmem:[%s5627_s1 + $0x640] ss:$8 sps:$4 sm:$0xff]  }
  0xb5   :  { %1763 = vmatpush1.bf16.msra.mxu1 %v4118_v19  ;;  %v4093_v19 = vld [vmem:[%s5627_s1 + $0x674] ss:$8 sps:$4 sm:$0xff]  }
  0xb6   :  { %1764 = vmatprep.subr.bf16.mxu1 %v4126_v55  ;;  %v2030_v55 = vld [vmem:[%s5630_s4] sm:$0xff] }
  0xb7   :  { %1886 = vmatpush1.bf16.msra.mxu0 %v3938_v53  ;;  %v4087_v53 = vld [vmem:[%s5627_s1 + $0x664] ss:$8 sps:$4 sm:$0xff]  }
  0xb8   :  { %1887 = vmatprep.subr.bf16.mxu0 %v3943_v54  ;;  %v4085_v54 = vld [vmem:[%s5627_s1 + $0x660] ss:$8 sps:$4 sm:$0xff]  }
  0xb9   :  { %1765 = vmatpush1.bf16.msra.mxu1 %v4124_v58  ;;  %v4091_v58 = vld [vmem:[%s5627_s1 + $0x670] ss:$8 sps:$4 sm:$0xff]  }
  0xba   :  { %1766 = vmatprep.subr.bf16.mxu1 %v4132_v60 }
  0xbb   :  { %1888 = vmatpush1.bf16.msra.mxu0 %v3941_v56  ;;  %v2038_v56 = vld [vmem:[%s5630_s4 + $0x40] sm:$0xff] }
  0xbc   :  { %1889 = vmatprep.subr.bf16.mxu0 %v3948_v57  ;;  %v2046_v57 = vld [vmem:[%s5630_s4 + $0x80] sm:$0xff]  ;;  %v3634_v60 = vcombine.low %v2030_v55, %v2038_v56 }
  0xbd   :  { %1767 = vmatpush1.bf16.msra.mxu1 %v4130_v63  ;;  %v4099_v63 = vld [vmem:[%s5627_s1 + $0x684] ss:$8 sps:$4 sm:$0xff]  }
  0xbf   :  { %1890 = vmatpush1.bf16.msra.mxu0 %v3946_v61  ;;  %v3635_v61 = vcombine.high %v2030_v55, %v2038_v56 }
  0xc0   :  { %1900 = vmatprep.subr.bf16.mxu0 %v3954_v62  ;;  %1769 = vmatmul.mubr.bf16.vlgmr.msra.gmra.mrb[0].mxu1 %v346_v4  ;;  %v2054_v62 = vld [vmem:[%s5630_s4 + $0xc0] sm:$0xff]  ;;  %v4103_v4 = vld [vmem:[%s5627_s1 + $0x690] ss:$8 sps:$4 sm:$0xff]  }
  0xc1   :  { %2882 = vmatprep.subr.bf16.mxu1 %v3635_v61 }
  0xc2   :  { %1892 = vmatmul.mubr.bf16.vlgmr.msra.gmra.mrb[0].mxu0 %v4814_v0  ;;  %v3651_v0 = vcombine.high %v2046_v57, %v2054_v62  ;;  %2883 = vmatpush1.bf16.msra.mxu1 %v3634_v60 }
  0xc3   :  { %1901 = vmatpush1.bf16.msra.mxu0 %v3952_v1  ;;  %1932 = vmatprep.mubr.bf16.mxu0 %v397_v2  ;;  %v3650_v1 = vcombine.low %v2046_v57, %v2054_v62  ;;  %v4097_v2 = vld [vmem:[%s5627_s1 + $0x680] ss:$8 sps:$4 sm:$0xff]  }
  0xc4   :  { %1902 = vmatprep.subr.bf16.mxu0 %v3960_v3  ;;  %2884 = vmatprep.subr.bf16.mxu1 %v3651_v0  ;;  %v4105_v3 = vld [vmem:[%s5627_s1 + $0x694] ss:$8 sps:$4 sm:$0xff]   ;;  %v2062_v57 = vld [vmem:[%s5630_s4 + $0x100] sm:$0xff] }
  0xc5   :  { %v2078_v62 = vld [vmem:[%s5630_s4 + $0x180] sm:$0xff] }
  0xc6   :  { %2885 = vmatpush1.bf16.msra.mxu1 %v3650_v1 }
  0xc7   :  { %1903 = vmatpush1.bf16.msra.mxu0 %v3958_v46  ;;  %v4111_v46 = vld [vmem:[%s5627_s1 + $0x6a4] ss:$8 sps:$4 sm:$0xff]  }
  0xc8   :  { %1904 = vmatprep.subr.bf16.mxu0 %v3966_v59  ;;  %v4109_v59 = vld [vmem:[%s5627_s1 + $0x6a0] ss:$8 sps:$4 sm:$0xff]  }
  0xcb   :  { %1905 = vmatpush1.bf16.msra.mxu0 %v3964_v45  ;;  %v4117_v45 = vld [vmem:[%s5627_s1 + $0x6b4] ss:$8 sps:$4 sm:$0xff]  }
  0xcc   :  { %1906 = vmatprep.subr.bf16.mxu0 %v3972_v5  ;;  %v4115_v5 = vld [vmem:[%s5627_s1 + $0x6b0] ss:$8 sps:$4 sm:$0xff]  }
  0xcf   :  { %1907 = vmatpush1.bf16.msra.mxu0 %v3970_v6  ;;  %v4123_v6 = vld [vmem:[%s5627_s1 + $0x6c4] ss:$8 sps:$4 sm:$0xff]  }
  0xd0   :  { %1908 = vmatprep.subr.bf16.mxu0 %v3978_v7  ;;  %v4121_v7 = vld [vmem:[%s5627_s1 + $0x6c0] ss:$8 sps:$4 sm:$0xff]  }
  0xd3   :  { %1909 = vmatpush1.bf16.msra.mxu0 %v3976_v8  ;;  %v4129_v8 = vld [vmem:[%s5627_s1 + $0x6d4] ss:$8 sps:$4 sm:$0xff]  }
  0xd4   :  { %1910 = vmatprep.subr.bf16.mxu0 %v3984_v9  ;;  %v4127_v9 = vld [vmem:[%s5627_s1 + $0x6d0] ss:$8 sps:$4 sm:$0xff]  }
  0xd7   :  { %1911 = vmatpush1.bf16.msra.mxu0 %v3982_v10  ;;  %v4135_v10 = vld [vmem:[%s5627_s1 + $0x6e4] ss:$8 sps:$4 sm:$0xff]  }
  0xd8   :  { %1912 = vmatprep.subr.bf16.mxu0 %v3990_v11  ;;  %v4133_v11 = vld [vmem:[%s5627_s1 + $0x6e0] ss:$8 sps:$4 sm:$0xff]  }
  0xdb   :  { %1913 = vmatpush1.bf16.msra.mxu0 %v3988_v12  ;;  %v4138_v12 = vld [vmem:[%s5627_s1 + $0x6f4] ss:$8 sps:$4 sm:$0xff]  }
  0xdc   :  { %1914 = vmatprep.subr.bf16.mxu0 %v3996_v13  ;;  %v4136_v13 = vld [vmem:[%s5627_s1 + $0x6f0] ss:$8 sps:$4 sm:$0xff]  }
  0xdf   :  { %1915 = vmatpush1.bf16.msra.mxu0 %v3994_v15  ;;  %v4142_v15 = vld [vmem:[%s5627_s1 + $0x704] ss:$8 sps:$4 sm:$0xff]  }
  0xe0   :  { %1916 = vmatprep.subr.bf16.mxu0 %v4002_v16  ;;  %v5040_v16 = vrot.slane %v4911_v33, %v4329_v18  ;;  %v4163_v33 = vld [vmem:[%s5627_s1 + $0x774] ss:$8 sps:$4 sm:$0xff]  }
  0xe3   :  { %1917 = vmatpush1.bf16.msra.mxu0 %v4000_v17  ;;  %v4140_v17 = vld [vmem:[%s5627_s1 + $0x700] ss:$8 sps:$4 sm:$0xff]  }
  0xe4   :  { %1918 = vmatprep.subr.bf16.mxu0 %v4008_v20  ;;  %v398_v20 = vcombine.high %v4930_v39, %v4930_v39 }
  0xe7   :  { %1919 = vmatpush1.bf16.msra.mxu0 %v4006_v21  ;;  %v4145_v21 = vld [vmem:[%s5627_s1 + $0x714] ss:$8 sps:$4 sm:$0xff]  }
  0xe8   :  { %1920 = vmatprep.subr.bf16.mxu0 %v4014_v22  ;;  %v4143_v22 = vld [vmem:[%s5627_s1 + $0x710] ss:$8 sps:$4 sm:$0xff]  }
  0xeb   :  { %1921 = vmatpush1.bf16.msra.mxu0 %v4012_v23  ;;  %v4148_v23 = vld [vmem:[%s5627_s1 + $0x724] ss:$8 sps:$4 sm:$0xff]  }
  0xec   :  { %1922 = vmatprep.subr.bf16.mxu0 %v4020_v24  ;;  %v4146_v24 = vld [vmem:[%s5627_s1 + $0x720] ss:$8 sps:$4 sm:$0xff]  }
  0xef   :  { %1923 = vmatpush1.bf16.msra.mxu0 %v4018_v25  ;;  %v4151_v25 = vld [vmem:[%s5627_s1 + $0x734] ss:$8 sps:$4 sm:$0xff]  }
  0xf0   :  { %1924 = vmatprep.subr.bf16.mxu0 %v4026_v26  ;;  %v4149_v26 = vld [vmem:[%s5627_s1 + $0x730] ss:$8 sps:$4 sm:$0xff]  }
  0xf3   :  { %1925 = vmatpush1.bf16.msra.mxu0 %v4024_v27  ;;  %v4154_v27 = vld [vmem:[%s5627_s1 + $0x744] ss:$8 sps:$4 sm:$0xff]  }
  0xf4   :  { %1926 = vmatprep.subr.bf16.mxu0 %v4032_v28  ;;  %v4152_v28 = vld [vmem:[%s5627_s1 + $0x740] ss:$8 sps:$4 sm:$0xff]  }
  0xf7   :  { %1927 = vmatpush1.bf16.msra.mxu0 %v4030_v29  ;;  %v4157_v29 = vld [vmem:[%s5627_s1 + $0x754] ss:$8 sps:$4 sm:$0xff]  }
  0xf8   :  { %1928 = vmatprep.subr.bf16.mxu0 %v4038_v31  ;;  %v4160_v31 = vld [vmem:[%s5627_s1 + $0x764] ss:$8 sps:$4 sm:$0xff]  }
  0xfb   :  { %1929 = vmatpush1.bf16.msra.mxu0 %v4036_v32  ;;  %v4158_v32 = vld [vmem:[%s5627_s1 + $0x760] ss:$8 sps:$4 sm:$0xff]  }
  0xfc   :  { %1930 = vmatprep.subr.bf16.mxu0 %v4045_v34  ;;  %v4161_v34 = vld [vmem:[%s5627_s1 + $0x770] ss:$8 sps:$4 sm:$0xff]  }
  0xff   :  { %1931 = vmatpush1.bf16.msra.mxu0 %v4043_v40  ;;  %v4166_v40 = vld [vmem:[%s5627_s1 + $0x784] ss:$8 sps:$4 sm:$0xff]  }
 0x100   :  { %1941 = vmatprep.subr.bf16.mxu0 %v4051_v36  ;;  %v4169_v36 = vld [vmem:[%s5627_s1 + $0x794] ss:$8 sps:$4 sm:$0xff]  }
 0x102   :  { %1933 = vmatmul.mubr.bf16.vlgmr.msra.gmra.mrb[0].mxu0 %v395_v37  ;;  %v4167_v37 = vld [vmem:[%s5627_s1 + $0x790] ss:$8 sps:$4 sm:$0xff]  }
 0x103   :  { %1942 = vmatpush1.bf16.msra.mxu0 %v4049_v38  ;;  %1973 = vmatprep.mubr.bf16.mxu0 %v4930_v39  ;;  %v4172_v38 = vld [vmem:[%s5627_s1 + $0x7a4] ss:$8 sps:$4 sm:$0xff]   ;;  %v4170_v39 = vld [vmem:[%s5627_s1 + $0x7a0] ss:$8 sps:$4 sm:$0xff]  }
 0x104   :  { %1943 = vmatprep.subr.bf16.mxu0 %v4057_v41  ;;  %v4175_v41 = vld [vmem:[%s5627_s1 + $0x7b4] ss:$8 sps:$4 sm:$0xff]  }
 0x107   :  { %1944 = vmatpush1.bf16.msra.mxu0 %v4055_v42  ;;  %v4173_v42 = vld [vmem:[%s5627_s1 + $0x7b0] ss:$8 sps:$4 sm:$0xff]  }
 0x108   :  { %1945 = vmatprep.subr.bf16.mxu0 %v4063_v43  ;;  %v4178_v43 = vld [vmem:[%s5627_s1 + $0x7c4] ss:$8 sps:$4 sm:$0xff]  }
 0x10b   :  { %1946 = vmatpush1.bf16.msra.mxu0 %v4061_v44  ;;  %v4176_v44 = vld [vmem:[%s5627_s1 + $0x7c0] ss:$8 sps:$4 sm:$0xff]  }
 0x10c   :  { %1947 = vmatprep.subr.bf16.mxu0 %v4069_v47  ;;  %v4181_v47 = vld [vmem:[%s5627_s1 + $0x7d4] ss:$8 sps:$4 sm:$0xff]  }
 0x10f   :  { %1948 = vmatpush1.bf16.msra.mxu0 %v4067_v48  ;;  %v4179_v48 = vld [vmem:[%s5627_s1 + $0x7d0] ss:$8 sps:$4 sm:$0xff]  }
 0x110   :  { %1949 = vmatprep.subr.bf16.mxu0 %v4075_v49  ;;  %v4184_v49 = vld [vmem:[%s5627_s1 + $0x7e4] ss:$8 sps:$4 sm:$0xff]  }
 0x113   :  { %1950 = vmatpush1.bf16.msra.mxu0 %v4073_v50  ;;  %v4182_v50 = vld [vmem:[%s5627_s1 + $0x7e0] ss:$8 sps:$4 sm:$0xff]  }
 0x114   :  { %1951 = vmatprep.subr.bf16.mxu0 %v4081_v51  ;;  %v4187_v51 = vld [vmem:[%s5627_s1 + $0x7f4] ss:$8 sps:$4 sm:$0xff]  }
 0x117   :  { %1952 = vmatpush1.bf16.msra.mxu0 %v4079_v52  ;;  %v4185_v52 = vld [vmem:[%s5627_s1 + $0x7f0] ss:$8 sps:$4 sm:$0xff]  }
 0x118   :  { %1953 = vmatprep.subr.bf16.mxu0 %v4087_v53  ;;  %v396_v53 = vcombine.high %v5040_v16, %v5040_v16 }
 0x11b   :  { %1954 = vmatpush1.bf16.msra.mxu0 %v4085_v54 }
 0x11c   :  { %1955 = vmatprep.subr.bf16.mxu0 %v4093_v19 }
 0x11f   :  { %1956 = vmatpush1.bf16.msra.mxu0 %v4091_v58  ;;  %v2070_v58 = vld [vmem:[%s5630_s4 + $0x140] sm:$0xff] }
 0x120   :  { %1957 = vmatprep.subr.bf16.mxu0 %v4099_v63  ;;  %v3667_v60 = vcombine.high %v2062_v57, %v2070_v58  ;;  %v3666_v61 = vcombine.low %v2062_v57, %v2070_v58  ;;  %v2086_v63 = vld [vmem:[%s5630_s4 + $0x1c0] sm:$0xff] }
 0x121   :  { %v3683_v0 = vcombine.high %v2078_v62, %v2086_v63  ;;  %v3682_v1 = vcombine.low %v2078_v62, %v2086_v63 }
 0x122   :  { %2886 = vmatprep.subr.bf16.mxu1 %v3667_v60  ;;  %v2111_v60 = vld [vmem:[%s5630_s4 + $0x288] sm:$0xff] }
 0x123   :  { %1958 = vmatpush1.bf16.msra.mxu0 %v4097_v2  ;;  %2887 = vmatpush1.bf16.msra.mxu1 %v3666_v61  ;;  %v2094_v2 = vld [vmem:[%s5630_s4 + $0x200] sm:$0xff]  ;;  %v2119_v61 = vld [vmem:[%s5630_s4 + $0x2c8] sm:$0xff] }
 0x124   :  { %1959 = vmatprep.subr.bf16.mxu0 %v4105_v3  ;;  %2888 = vmatprep.subr.bf16.mxu1 %v3683_v0  ;;  %v2102_v3 = vld [vmem:[%s5630_s4 + $0x240] sm:$0xff]  ;;  %v3717_v63 = vcombine.high %v2111_v60, %v2119_v61  ;;  %v2127_v0 = vld [vmem:[%s5630_s4 + $0x308] sm:$0xff] }
 0x127   :  { %1960 = vmatpush1.bf16.msra.mxu0 %v4103_v4  ;;  %2889 = vmatpush1.bf16.msra.mxu1 %v3682_v1  ;;  %v3699_v4 = vcombine.high %v2094_v2, %v2102_v3  ;;  %v2135_v1 = vld [vmem:[%s5630_s4 + $0x348] sm:$0xff] }
 0x128   :  { %1961 = vmatprep.subr.bf16.mxu0 %v4111_v46  ;;  %v3698_v46 = vcombine.low %v2094_v2, %v2102_v3  ;;  %v3716_v2 = vcombine.low %v2111_v60, %v2119_v61  ;;  %v3733_v3 = vcombine.high %v2127_v0, %v2135_v1 }
 0x129   :  { %2890 = vmatprep.subr.bf16.mxu1 %v3699_v4  ;;  %v2143_v4 = vld [vmem:[%s5630_s4 + $0x388] sm:$0xff] }
 0x12b   :  { %1962 = vmatpush1.bf16.msra.mxu0 %v4109_v59  ;;  %2891 = vmatpush1.bf16.msra.mxu1 %v3698_v46  ;;  %v2110_v59 = vld [vmem:[%s5630_s4 + $0x280] sm:$0xff]  ;;  %v2151_v46 = vld [vmem:[%s5630_s4 + $0x3c8] sm:$0xff] }
 0x12c   :  { %1963 = vmatprep.subr.bf16.mxu0 %v4117_v45  ;;  %v2118_v45 = vld [vmem:[%s5630_s4 + $0x2c0] sm:$0xff] }
 0x12f   :  { %1964 = vmatpush1.bf16.msra.mxu0 %v4115_v5  ;;  %v3715_v5 = vcombine.high %v2110_v59, %v2118_v45 }
 0x130   :  { %1965 = vmatprep.subr.bf16.mxu0 %v4123_v6  ;;  %v3714_v6 = vcombine.low %v2110_v59, %v2118_v45  ;;  %v3732_v59 = vcombine.low %v2127_v0, %v2135_v1  ;;  %v3749_v45 = vcombine.high %v2143_v4, %v2151_v46 }
 0x131   :  { %2892 = vmatprep.subr.bf16.mxu1 %v3715_v5  ;;  %v2032_v5 = vld [vmem:[%s5630_s4 + $0x10] sm:$0xff] }
 0x132   :  { %2893 = vmatpush1.bf16.msra.mxu1 %v3714_v6  ;;  %v2040_v6 = vld [vmem:[%s5630_s4 + $0x50] sm:$0xff] }
 0x133   :  { %1966 = vmatpush1.bf16.msra.mxu0 %v4121_v7  ;;  %v2126_v7 = vld [vmem:[%s5630_s4 + $0x300] sm:$0xff] }
 0x134   :  { %1967 = vmatprep.subr.bf16.mxu0 %v4129_v8  ;;  %v2134_v8 = vld [vmem:[%s5630_s4 + $0x340] sm:$0xff] }
 0x137   :  { %1968 = vmatpush1.bf16.msra.mxu0 %v4127_v9  ;;  %v3731_v9 = vcombine.high %v2126_v7, %v2134_v8 }
 0x138   :  { %1969 = vmatprep.subr.bf16.mxu0 %v4135_v10  ;;  %v3730_v10 = vcombine.low %v2126_v7, %v2134_v8  ;;  %v3748_v7 = vcombine.low %v2143_v4, %v2151_v46  ;;  %v3639_v8 = vcombine.high %v2032_v5, %v2040_v6 }
 0x139   :  { %2894 = vmatprep.subr.bf16.mxu1 %v3731_v9  ;;  %v2048_v9 = vld [vmem:[%s5630_s4 + $0x90] sm:$0xff] }
 0x13a   :  { %2895 = vmatpush1.bf16.msra.mxu1 %v3730_v10  ;;  %v2056_v10 = vld [vmem:[%s5630_s4 + $0xd0] sm:$0xff] }
 0x13b   :  { %1970 = vmatpush1.bf16.msra.mxu0 %v4133_v11  ;;  %v2142_v11 = vld [vmem:[%s5630_s4 + $0x380] sm:$0xff] }
 0x13c   :  { %1971 = vmatprep.subr.bf16.mxu0 %v4138_v12  ;;  %v2150_v12 = vld [vmem:[%s5630_s4 + $0x3c0] sm:$0xff] }
 0x13f   :  { %1972 = vmatpush1.bf16.msra.mxu0 %v4136_v13  ;;  %v3747_v13 = vcombine.high %v2142_v11, %v2150_v12 }
 0x140   :  { %1982 = vmatprep.subr.bf16.mxu0 %v4142_v15  ;;  %v3746_v15 = vcombine.low %v2142_v11, %v2150_v12  ;;  %v3638_v11 = vcombine.low %v2032_v5, %v2040_v6  ;;  %v3655_v12 = vcombine.high %v2048_v9, %v2056_v10 }
 0x141   :  { %2896 = vmatprep.subr.bf16.mxu1 %v3747_v13  ;;  %v2064_v13 = vld [vmem:[%s5630_s4 + $0x110] sm:$0xff] }
 0x142   :  { %1974 = vmatmul.mubr.bf16.vlgmr.msra.gmra.mrb[0].mxu0 %v5040_v16  ;;  %2897 = vmatpush1.bf16.msra.mxu1 %v3746_v15  ;;  %v2031_v16 = vld [vmem:[%s5630_s4 + $0x8] sm:$0xff]  ;;  %v2072_v15 = vld [vmem:[%s5630_s4 + $0x150] sm:$0xff] }
 0x143   :  { %1983 = vmatpush1.bf16.msra.mxu0 %v4140_v17  ;;  %2014 = vmatprep.mubr.bf16.mxu0 %v398_v20  ;;  %v2039_v17 = vld [vmem:[%s5630_s4 + $0x48] sm:$0xff] }
 0x144   :  { %1984 = vmatprep.subr.bf16.mxu0 %v4145_v21  ;;  %v3637_v20 = vcombine.high %v2031_v16, %v2039_v17  ;;  %v3636_v21 = vcombine.low %v2031_v16, %v2039_v17  ;;  %v3654_v16 = vcombine.low %v2048_v9, %v2056_v10  ;;  %v3671_v17 = vcombine.high %v2064_v13, %v2072_v15 }
 0x146   :  { %2923 = vmatprep.subr.bf16.mxu1 %v3637_v20  ;;  %v2080_v20 = vld [vmem:[%s5630_s4 + $0x190] sm:$0xff] }
 0x147   :  { %1985 = vmatpush1.bf16.msra.mxu0 %v4143_v22  ;;  %v4239_v22 = vmov 0  }
 0x148   :  { %1986 = vmatprep.subr.bf16.mxu0 %v4148_v23  ;;  %2914 = vmatprep.mubr.bf16.mxu1 %v4239_v22  ;;  %v5184_v23 = vsub.s32 0, %v4320_v14 }
 0x14b   :  { %1987 = vmatpush1.bf16.msra.mxu0 %v4146_v24  ;;  %v287_v24 = vld [vmem:[%s5628_s2] sm:$0x3] }
 0x14c   :  { %1988 = vmatprep.subr.bf16.mxu0 %v4151_v25  ;;  %v5190_v25 = vsub.s32 1, %v4320_v14 }
 0x14f   :  { %1989 = vmatpush1.bf16.msra.mxu0 %v4149_v26  ;;  %v292_v26 = vrot.slane %v287_v24, %v5184_v23 }
 0x150   :  { %1990 = vmatprep.subr.bf16.mxu0 %v4154_v27  ;;  %v296_v27 = vrot.slane %v287_v24, %v5190_v25  ;;  %v3670_v24 = vcombine.low %v2064_v13, %v2072_v15 }
 0x153   :  { %1991 = vmatpush1.bf16.msra.mxu0 %v4152_v28 }
 0x154   :  { %1992 = vmatprep.subr.bf16.mxu0 %v4157_v29 }
 0x157   :  { %1993 = vmatpush1.bf16.msra.mxu0 %v4155_v30 }
 0x158   :  { %1994 = vmatprep.subr.bf16.mxu0 %v4160_v31 }
 0x15b   :  { %1995 = vmatpush1.bf16.msra.mxu0 %v4158_v32 }
 0x15c   :  { %1996 = vmatprep.subr.bf16.mxu0 %v4163_v33 }
 0x15f   :  { %1997 = vmatpush1.bf16.msra.mxu0 %v4161_v34 }
 0x160   :  { %1998 = vmatprep.subr.bf16.mxu0 %v4166_v40 }
 0x163   :  { %1999 = vmatpush1.bf16.msra.mxu0 %v4164_v35 }
 0x164   :  { %2000 = vmatprep.subr.bf16.mxu0 %v4169_v36 }
 0x167   :  { %2001 = vmatpush1.bf16.msra.mxu0 %v4167_v37  ;;  %v2023_v37 = vld [vmem:[%s5629_s3] sm:$0x3] }
 0x168   :  { %2002 = vmatprep.subr.bf16.mxu0 %v4172_v38 }
 0x16b   :  { %2003 = vmatpush1.bf16.msra.mxu0 %v4170_v39 }
 0x16c   :  { %2004 = vmatprep.subr.bf16.mxu0 %v4175_v41  ;;  %v2047_v41 = vld [vmem:[%s5630_s4 + $0x88] sm:$0xff] }
 0x16f   :  { %2005 = vmatpush1.bf16.msra.mxu0 %v4173_v42  ;;  %v2055_v42 = vld [vmem:[%s5630_s4 + $0xc8] sm:$0xff] }
 0x170   :  { %2006 = vmatprep.subr.bf16.mxu0 %v4178_v43 }
 0x173   :  { %2007 = vmatpush1.bf16.msra.mxu0 %v4176_v44 }
 0x174   :  { %2008 = vmatprep.subr.bf16.mxu0 %v4181_v47  ;;  %v3653_v47 = vcombine.high %v2047_v41, %v2055_v42 }
 0x177   :  { %2009 = vmatpush1.bf16.msra.mxu0 %v4179_v48  ;;  %v2063_v48 = vld [vmem:[%s5630_s4 + $0x108] sm:$0xff] }
 0x178   :  { %2010 = vmatprep.subr.bf16.mxu0 %v4184_v49  ;;  %v2071_v49 = vld [vmem:[%s5630_s4 + $0x148] sm:$0xff] }
 0x17b   :  { %2011 = vmatpush1.bf16.msra.mxu0 %v4182_v50  ;;  %v3652_v50 = vcombine.low %v2047_v41, %v2055_v42 }
 0x17c   :  { %2012 = vmatprep.subr.bf16.mxu0 %v4187_v51  ;;  %v3669_v51 = vcombine.high %v2063_v48, %v2071_v49 }
 0x17f   :  { %2013 = vmatpush1.bf16.msra.mxu0 %v4185_v52  ;;  %v2079_v52 = vld [vmem:[%s5630_s4 + $0x188] sm:$0xff] }
 0x182   :  { %2015 = vmatmul.mubr.bf16.vlgmr.msra.gmra.mrb[0].mxu0 %v396_v53  ;;  %v2087_v53 = vld [vmem:[%s5630_s4 + $0x1c8] sm:$0xff] }
 0x183   :  { %v3684_v57 = vcombine.low %v2079_v52, %v2087_v53 }
 0x193   :  { %v1770_v54 = vpop.f32.mrb[0].mxu1 }
 0x194   :  { %v1772_v19 = vpop.f32.mrb[1].mxu1  ;;  %v3770_v28 = vadd.f32 %v1770_v54, %v292_v26  ;;  %v3668_v54 = vcombine.low %v2063_v48, %v2071_v49 }
 0x195   :  { %v1774_v55 = vpop.f32.mrb[2].mxu1  ;;  %v3772_v29 = vadd.f32 %v1772_v19, %v296_v27  ;;  %v3685_v19 = vcombine.high %v2079_v52, %v2087_v53  ;;  %v2096_v27 = vld [vmem:[%s5630_s4 + $0x210] sm:$0xff] }
 0x196   :  { %v1775_v56 = vpop.f32.mrb[3].mxu1  ;;  %v2095_v55 = vld [vmem:[%s5630_s4 + $0x208] sm:$0xff] }
 0x197   :  { %v2103_v56 = vld [vmem:[%s5630_s4 + $0x248] sm:$0xff] }
 0x198   :  { %v3701_v58 = vcombine.high %v2095_v55, %v2103_v56  ;;  %v3700_v62 = vcombine.low %v2095_v55, %v2103_v56 }
 0x255   :  { %v2016_v30 = vpop.f32.mrb[0].mxu0 }
 0x256   :  { %v3771_v31 = vadd.f32 %v3770_v28, %v2016_v30  ;;  %v2018_v32 = vpop.f32.mrb[1].mxu0  ;;  %v2104_v28 = vld [vmem:[%s5630_s4 + $0x250] sm:$0xff] }
 0x257   :  { %v3773_v33 = vadd.f32 %v3772_v29, %v2018_v32  ;;  %v2020_v34 = vpop.f32.mrb[2].mxu0  ;;  %v3703_v30 = vcombine.high %v2096_v27, %v2104_v28  ;;  %v2120_v32 = vld [vmem:[%s5630_s4 + $0x2d0] sm:$0xff] }
 0x258   :  { %3210 = vst [vmem:[#allocation2] sm:$0x3] %v3771_v31  ;;  %v2021_v40 = vpop.f32.mrb[3].mxu0 }
 0x259   :  { %v2024_v35 = vmul.f32 0.5, %v3773_v33  ;;  %3211 = vst [vmem:[#allocation4] sm:$0x3] %v3773_v33  ;;  %v3702_v33 = vcombine.low %v2096_v27, %v2104_v28  ;;  %v2128_v40 = vld [vmem:[%s5630_s4 + $0x310] sm:$0xff] }
 0x25b   :  { %v2025_v36 = vmul.f32 1.442695, %v2024_v35  ;;  %v2136_v35 = vld [vmem:[%s5630_s4 + $0x350] sm:$0xff] }
 0x25c   :  { %v3734_v41 = vcombine.low %v2128_v40, %v2136_v35 }
 0x25d   :  { %4188 = vpow2.f32 %v2025_v36 }
 0x267   :  { %v4189_v38 = vpop.eup %4188 }
 0x268   :  { %v2027_v39 = vmul.f32 %v4189_v38, %v2023_v37  ;;  %v3735_v37 = vcombine.high %v2128_v40, %v2136_v35  ;;  %v2144_v38 = vld [vmem:[%s5630_s4 + $0x390] sm:$0xff] }
 0x26a   :  { %v2028_v43 = vadd.f32 %v3771_v31, %v2027_v39  ;;  %v2112_v31 = vld [vmem:[%s5630_s4 + $0x290] sm:$0xff] }
 0x26b   :  { %v3719_v34 = vcombine.high %v2112_v31, %v2120_v32  ;;  %v3718_v36 = vcombine.low %v2112_v31, %v2120_v32  ;;  %v2152_v39 = vld [vmem:[%s5630_s4 + $0x3d0] sm:$0xff] }
 0x26c   :  { %v5203_v44 = vpack.c.bf16 %v2028_v43, %v2028_v43  ;;  %v3751_v42 = vcombine.high %v2144_v38, %v2152_v39  ;;  %v2033_v43 = vld [vmem:[%s5630_s4 + $0x18] sm:$0xff]  ;;  %v3750_v48 = vcombine.low %v2144_v38, %v2152_v39 }
 0x26e   :  { %2915 = vmatmul.mubr.bf16.vlgmr.msra.gmra.mrb[4].mxu1 %v5203_v44 }
 0x26f   :  { %2924 = vmatpush1.bf16.msra.mxu1 %v3636_v21  ;;  %2955 = vmatprep.mubr.bf16.mxu1 %v4239_v22  ;;  %v2088_v21 = vld [vmem:[%s5630_s4 + $0x1d0] sm:$0xff] }
 0x270   :  { %2925 = vmatprep.subr.bf16.mxu1 %v3653_v47  ;;  %v3687_v26 = vcombine.high %v2080_v20, %v2088_v21  ;;  %v3686_v29 = vcombine.low %v2080_v20, %v2088_v21  ;;  %v2041_v47 = vld [vmem:[%s5630_s4 + $0x58] sm:$0xff] }
 0x271   :  { %v3641_v49 = vcombine.high %v2033_v43, %v2041_v47  ;;  %v3640_v52 = vcombine.low %v2033_v43, %v2041_v47 }
 0x273   :  { %2926 = vmatpush1.bf16.msra.mxu1 %v3652_v50  ;;  %v2049_v50 = vld [vmem:[%s5630_s4 + $0x98] sm:$0xff] }
 0x274   :  { %2927 = vmatprep.subr.bf16.mxu1 %v3669_v51  ;;  %v2057_v51 = vld [vmem:[%s5630_s4 + $0xd8] sm:$0xff] }
 0x275   :  { %v3657_v53 = vcombine.high %v2049_v50, %v2057_v51  ;;  %v3656_v55 = vcombine.low %v2049_v50, %v2057_v51 }
 0x277   :  { %2928 = vmatpush1.bf16.msra.mxu1 %v3668_v54  ;;  %v2065_v54 = vld [vmem:[%s5630_s4 + $0x118] sm:$0xff] }
 0x278   :  { %2929 = vmatprep.subr.bf16.mxu1 %v3685_v19  ;;  %v2073_v19 = vld [vmem:[%s5630_s4 + $0x158] sm:$0xff] }
 0x279   :  { %v3673_v56 = vcombine.high %v2065_v54, %v2073_v19  ;;  %v3672_v60 = vcombine.low %v2065_v54, %v2073_v19 }
 0x27b   :  { %2930 = vmatpush1.bf16.msra.mxu1 %v3684_v57  ;;  %v2081_v57 = vld [vmem:[%s5630_s4 + $0x198] sm:$0xff] }
 0x27c   :  { %2931 = vmatprep.subr.bf16.mxu1 %v3701_v58  ;;  %v2089_v58 = vld [vmem:[%s5630_s4 + $0x1d8] sm:$0xff] }
 0x27d   :  { %v3689_v61 = vcombine.high %v2081_v57, %v2089_v58  ;;  %v3688_v0 = vcombine.low %v2081_v57, %v2089_v58 }
 0x27f   :  { %2932 = vmatpush1.bf16.msra.mxu1 %v3700_v62  ;;  %v2097_v62 = vld [vmem:[%s5630_s4 + $0x218] sm:$0xff] }
 0x280   :  { %2933 = vmatprep.subr.bf16.mxu1 %v3717_v63  ;;  %v2105_v63 = vld [vmem:[%s5630_s4 + $0x258] sm:$0xff] }
 0x281   :  { %v3705_v1 = vcombine.high %v2097_v62, %v2105_v63  ;;  %v3704_v4 = vcombine.low %v2097_v62, %v2105_v63 }
 0x283   :  { %2934 = vmatpush1.bf16.msra.mxu1 %v3716_v2  ;;  %v2113_v2 = vld [vmem:[%s5630_s4 + $0x298] sm:$0xff] }
 0x284   :  { %2935 = vmatprep.subr.bf16.mxu1 %v3733_v3  ;;  %v2121_v3 = vld [vmem:[%s5630_s4 + $0x2d8] sm:$0xff] }
 0x285   :  { %v3721_v46 = vcombine.high %v2113_v2, %v2121_v3  ;;  %v3720_v5 = vcombine.low %v2113_v2, %v2121_v3 }
 0x287   :  { %2936 = vmatpush1.bf16.msra.mxu1 %v3732_v59  ;;  %v2129_v59 = vld [vmem:[%s5630_s4 + $0x318] sm:$0xff] }
 0x288   :  { %2937 = vmatprep.subr.bf16.mxu1 %v3749_v45  ;;  %v2137_v45 = vld [vmem:[%s5630_s4 + $0x358] sm:$0xff] }
 0x289   :  { %v3737_v6 = vcombine.high %v2129_v59, %v2137_v45  ;;  %v3736_v9 = vcombine.low %v2129_v59, %v2137_v45 }
 0x28b   :  { %2938 = vmatpush1.bf16.msra.mxu1 %v3748_v7  ;;  %v2145_v7 = vld [vmem:[%s5630_s4 + $0x398] sm:$0xff] }
 0x28c   :  { %2964 = vmatprep.subr.bf16.mxu1 %v3639_v8  ;;  %v2153_v8 = vld [vmem:[%s5630_s4 + $0x3d8] sm:$0xff] }
 0x28d   :  { %v3753_v10 = vcombine.high %v2145_v7, %v2153_v8  ;;  %v3752_v13 = vcombine.low %v2145_v7, %v2153_v8 }
 0x28e   :  { %2956 = vmatmul.mubr.bf16.vlgmr.msra.gmra.mrb[8].mxu1 %v5203_v44 }
 0x28f   :  { %2965 = vmatpush1.bf16.msra.mxu1 %v3638_v11  ;;  %2996 = vmatprep.mubr.bf16.mxu1 %v4239_v22  ;;  %v2034_v11 = vld [vmem:[%s5630_s4 + $0x20] sm:$0xff] }
 0x290   :  { %2966 = vmatprep.subr.bf16.mxu1 %v3655_v12  ;;  %v2042_v12 = vld [vmem:[%s5630_s4 + $0x60] sm:$0xff] }
 0x291   :  { %v3643_v15 = vcombine.high %v2034_v11, %v2042_v12  ;;  %v3642_v20 = vcombine.low %v2034_v11, %v2042_v12 }
 0x293   :  { %2967 = vmatpush1.bf16.msra.mxu1 %v3654_v16  ;;  %v2050_v16 = vld [vmem:[%s5630_s4 + $0xa0] sm:$0xff] }
 0x294   :  { %2968 = vmatprep.subr.bf16.mxu1 %v3671_v17  ;;  %v2058_v17 = vld [vmem:[%s5630_s4 + $0xe0] sm:$0xff] }
 0x295   :  { %v3659_v21 = vcombine.high %v2050_v16, %v2058_v17  ;;  %v3658_v27 = vcombine.low %v2050_v16, %v2058_v17 }
 0x297   :  { %2969 = vmatpush1.bf16.msra.mxu1 %v3670_v24  ;;  %v2066_v24 = vld [vmem:[%s5630_s4 + $0x120] sm:$0xff] }
 0x298   :  { %2970 = vmatprep.subr.bf16.mxu1 %v3687_v26  ;;  %v2074_v26 = vld [vmem:[%s5630_s4 + $0x160] sm:$0xff] }
 0x299   :  { %v3675_v28 = vcombine.high %v2066_v24, %v2074_v26  ;;  %v3674_v31 = vcombine.low %v2066_v24, %v2074_v26 }
 0x29b   :  { %2971 = vmatpush1.bf16.msra.mxu1 %v3686_v29  ;;  %v2082_v29 = vld [vmem:[%s5630_s4 + $0x1a0] sm:$0xff] }
 0x29c   :  { %2972 = vmatprep.subr.bf16.mxu1 %v3703_v30  ;;  %v2090_v30 = vld [vmem:[%s5630_s4 + $0x1e0] sm:$0xff] }
 0x29d   :  { %v3691_v32 = vcombine.high %v2082_v29, %v2090_v30  ;;  %v3690_v40 = vcombine.low %v2082_v29, %v2090_v30 }
 0x29f   :  { %2973 = vmatpush1.bf16.msra.mxu1 %v3702_v33  ;;  %v2098_v33 = vld [vmem:[%s5630_s4 + $0x220] sm:$0xff] }
 0x2a0   :  { %2974 = vmatprep.subr.bf16.mxu1 %v3719_v34  ;;  %v2106_v34 = vld [vmem:[%s5630_s4 + $0x260] sm:$0xff] }
 0x2a1   :  { %v3707_v35 = vcombine.high %v2098_v33, %v2106_v34  ;;  %v3706_v38 = vcombine.low %v2098_v33, %v2106_v34 }
 0x2a3   :  { %2975 = vmatpush1.bf16.msra.mxu1 %v3718_v36  ;;  %v2114_v36 = vld [vmem:[%s5630_s4 + $0x2a0] sm:$0xff] }
 0x2a4   :  { %2976 = vmatprep.subr.bf16.mxu1 %v3735_v37  ;;  %v2122_v37 = vld [vmem:[%s5630_s4 + $0x2e0] sm:$0xff] }
 0x2a5   :  { %v3723_v39 = vcombine.high %v2114_v36, %v2122_v37  ;;  %v3722_v43 = vcombine.low %v2114_v36, %v2122_v37 }
 0x2a7   :  { %2977 = vmatpush1.bf16.msra.mxu1 %v3734_v41  ;;  %v2130_v41 = vld [vmem:[%s5630_s4 + $0x320] sm:$0xff] }
 0x2a8   :  { %2978 = vmatprep.subr.bf16.mxu1 %v3751_v42  ;;  %v2138_v42 = vld [vmem:[%s5630_s4 + $0x360] sm:$0xff] }
 0x2a9   :  { %v3739_v47 = vcombine.high %v2130_v41, %v2138_v42  ;;  %v3738_v50 = vcombine.low %v2130_v41, %v2138_v42 }
 0x2ab   :  { %2979 = vmatpush1.bf16.msra.mxu1 %v3750_v48  ;;  %v2146_v48 = vld [vmem:[%s5630_s4 + $0x3a0] sm:$0xff] }
 0x2ac   :  { %3005 = vmatprep.subr.bf16.mxu1 %v3641_v49  ;;  %v2154_v49 = vld [vmem:[%s5630_s4 + $0x3e0] sm:$0xff] }
 0x2ad   :  { %v3755_v51 = vcombine.high %v2146_v48, %v2154_v49  ;;  %v3754_v54 = vcombine.low %v2146_v48, %v2154_v49 }
 0x2ae   :  { %2997 = vmatmul.mubr.bf16.vlgmr.msra.gmra.mrb[12].mxu1 %v5203_v44 }
 0x2af   :  { %3006 = vmatpush1.bf16.msra.mxu1 %v3640_v52  ;;  %3037 = vmatprep.mubr.bf16.mxu1 %v4239_v22  ;;  %v2035_v52 = vld [vmem:[%s5630_s4 + $0x28] sm:$0xff] }
 0x2b0   :  { %3007 = vmatprep.subr.bf16.mxu1 %v3657_v53  ;;  %v2043_v53 = vld [vmem:[%s5630_s4 + $0x68] sm:$0xff] }
 0x2b1   :  { %v3645_v19 = vcombine.high %v2035_v52, %v2043_v53  ;;  %v3644_v57 = vcombine.low %v2035_v52, %v2043_v53 }
 0x2b3   :  { %3008 = vmatpush1.bf16.msra.mxu1 %v3656_v55  ;;  %v2051_v55 = vld [vmem:[%s5630_s4 + $0xa8] sm:$0xff] }
 0x2b4   :  { %3009 = vmatprep.subr.bf16.mxu1 %v3673_v56  ;;  %v2059_v56 = vld [vmem:[%s5630_s4 + $0xe8] sm:$0xff] }
 0x2b5   :  { %v3661_v58 = vcombine.high %v2051_v55, %v2059_v56  ;;  %v3660_v62 = vcombine.low %v2051_v55, %v2059_v56 }
 0x2b7   :  { %3010 = vmatpush1.bf16.msra.mxu1 %v3672_v60  ;;  %v2067_v60 = vld [vmem:[%s5630_s4 + $0x128] sm:$0xff] }
 0x2b8   :  { %3011 = vmatprep.subr.bf16.mxu1 %v3689_v61  ;;  %v2075_v61 = vld [vmem:[%s5630_s4 + $0x168] sm:$0xff] }
 0x2b9   :  { %v3677_v63 = vcombine.high %v2067_v60, %v2075_v61  ;;  %v3676_v2 = vcombine.low %v2067_v60, %v2075_v61 }
 0x2bb   :  { %3012 = vmatpush1.bf16.msra.mxu1 %v3688_v0  ;;  %v2083_v0 = vld [vmem:[%s5630_s4 + $0x1a8] sm:$0xff] }
 0x2bc   :  { %3013 = vmatprep.subr.bf16.mxu1 %v3705_v1  ;;  %v2091_v1 = vld [vmem:[%s5630_s4 + $0x1e8] sm:$0xff] }
 0x2bd   :  { %v3693_v3 = vcombine.high %v2083_v0, %v2091_v1  ;;  %v3692_v59 = vcombine.low %v2083_v0, %v2091_v1 }
 0x2bf   :  { %3014 = vmatpush1.bf16.msra.mxu1 %v3704_v4  ;;  %v2099_v4 = vld [vmem:[%s5630_s4 + $0x228] sm:$0xff] }
 0x2c0   :  { %3015 = vmatprep.subr.bf16.mxu1 %v3721_v46  ;;  %v2107_v46 = vld [vmem:[%s5630_s4 + $0x268] sm:$0xff] }
 0x2c1   :  { %v3709_v45 = vcombine.high %v2099_v4, %v2107_v46  ;;  %v3708_v7 = vcombine.low %v2099_v4, %v2107_v46 }
 0x2c3   :  { %3016 = vmatpush1.bf16.msra.mxu1 %v3720_v5  ;;  %v2115_v5 = vld [vmem:[%s5630_s4 + $0x2a8] sm:$0xff] }
 0x2c4   :  { %3017 = vmatprep.subr.bf16.mxu1 %v3737_v6  ;;  %v2123_v6 = vld [vmem:[%s5630_s4 + $0x2e8] sm:$0xff] }
 0x2c5   :  { %v3725_v8 = vcombine.high %v2115_v5, %v2123_v6  ;;  %v3724_v11 = vcombine.low %v2115_v5, %v2123_v6 }
 0x2c7   :  { %3018 = vmatpush1.bf16.msra.mxu1 %v3736_v9  ;;  %v2131_v9 = vld [vmem:[%s5630_s4 + $0x328] sm:$0xff] }
 0x2c8   :  { %3019 = vmatprep.subr.bf16.mxu1 %v3753_v10  ;;  %v2139_v10 = vld [vmem:[%s5630_s4 + $0x368] sm:$0xff] }
 0x2c9   :  { %v3741_v12 = vcombine.high %v2131_v9, %v2139_v10  ;;  %v3740_v16 = vcombine.low %v2131_v9, %v2139_v10  ;;  %v2117_v10 = vld [vmem:[%s5630_s4 + $0x2b8] sm:$0xff] }
 0x2cb   :  { %3020 = vmatpush1.bf16.msra.mxu1 %v3752_v13  ;;  %v2147_v13 = vld [vmem:[%s5630_s4 + $0x3a8] sm:$0xff] }
 0x2cc   :  { %3046 = vmatprep.subr.bf16.mxu1 %v3643_v15  ;;  %v2155_v15 = vld [vmem:[%s5630_s4 + $0x3e8] sm:$0xff] }
 0x2cd   :  { %v3757_v17 = vcombine.high %v2147_v13, %v2155_v15  ;;  %v3756_v24 = vcombine.low %v2147_v13, %v2155_v15  ;;  %v2158_v13 = vld [vmem:[%s5631_s5] sm:$0xff] }
 0x2ce   :  { %3038 = vmatmul.mubr.bf16.vlgmr.msra.gmra.mrb[16].mxu1 %v5203_v44 }
 0x2cf   :  { %3047 = vmatpush1.bf16.msra.mxu1 %v3642_v20  ;;  %3078 = vmatprep.mubr.bf16.mxu1 %v4239_v22  ;;  %v2036_v20 = vld [vmem:[%s5630_s4 + $0x30] sm:$0xff] }
 0x2d0   :  { %3048 = vmatprep.subr.bf16.mxu1 %v3659_v21  ;;  %v2044_v21 = vld [vmem:[%s5630_s4 + $0x70] sm:$0xff] }
 0x2d1   :  { %v3647_v26 = vcombine.high %v2036_v20, %v2044_v21  ;;  %v3646_v29 = vcombine.low %v2036_v20, %v2044_v21  ;;  %v2165_v20 = vrot.slane %v2158_v13, %v5184_v23 }
 0x2d3   :  { %3049 = vmatpush1.bf16.msra.mxu1 %v3658_v27  ;;  %v2052_v27 = vld [vmem:[%s5630_s4 + $0xb0] sm:$0xff] }
 0x2d4   :  { %3050 = vmatprep.subr.bf16.mxu1 %v3675_v28  ;;  %v2060_v28 = vld [vmem:[%s5630_s4 + $0xf0] sm:$0xff] }
 0x2d5   :  { %v3663_v30 = vcombine.high %v2052_v27, %v2060_v28  ;;  %v3662_v33 = vcombine.low %v2052_v27, %v2060_v28  ;;  %v2149_v28 = vld [vmem:[%s5630_s4 + $0x3b8] sm:$0xff] }
 0x2d7   :  { %3051 = vmatpush1.bf16.msra.mxu1 %v3674_v31  ;;  %v2068_v31 = vld [vmem:[%s5630_s4 + $0x130] sm:$0xff] }
 0x2d8   :  { %3052 = vmatprep.subr.bf16.mxu1 %v3691_v32  ;;  %v2076_v32 = vld [vmem:[%s5630_s4 + $0x170] sm:$0xff] }
 0x2d9   :  { %v3679_v34 = vcombine.high %v2068_v31, %v2076_v32  ;;  %v3678_v36 = vcombine.low %v2068_v31, %v2076_v32 }
 0x2db   :  { %3053 = vmatpush1.bf16.msra.mxu1 %v3690_v40  ;;  %v2084_v40 = vld [vmem:[%s5630_s4 + $0x1b0] sm:$0xff] }
 0x2dc   :  { %3054 = vmatprep.subr.bf16.mxu1 %v3707_v35  ;;  %v2092_v35 = vld [vmem:[%s5630_s4 + $0x1f0] sm:$0xff] }
 0x2dd   :  { %v3695_v37 = vcombine.high %v2084_v40, %v2092_v35  ;;  %v3694_v41 = vcombine.low %v2084_v40, %v2092_v35 }
 0x2df   :  { %3055 = vmatpush1.bf16.msra.mxu1 %v3706_v38  ;;  %v2100_v38 = vld [vmem:[%s5630_s4 + $0x230] sm:$0xff] }
 0x2e0   :  { %3056 = vmatprep.subr.bf16.mxu1 %v3723_v39  ;;  %v2108_v39 = vld [vmem:[%s5630_s4 + $0x270] sm:$0xff] }
 0x2e1   :  { %v3711_v42 = vcombine.high %v2100_v38, %v2108_v39  ;;  %v3710_v48 = vcombine.low %v2100_v38, %v2108_v39  ;;  %v2172_v38 = vsub.s32 2, %v4320_v14  ;;  %v2176_v39 = vsub.s32 3, %v4320_v14 }
 0x2e3   :  { %3057 = vmatpush1.bf16.msra.mxu1 %v3722_v43  ;;  %v2116_v43 = vld [vmem:[%s5630_s4 + $0x2b0] sm:$0xff] }
 0x2e4   :  { %3058 = vmatprep.subr.bf16.mxu1 %v3739_v47  ;;  %v2124_v47 = vld [vmem:[%s5630_s4 + $0x2f0] sm:$0xff] }
 0x2e5   :  { %v3727_v49 = vcombine.high %v2116_v43, %v2124_v47  ;;  %v3726_v52 = vcombine.low %v2116_v43, %v2124_v47 }
 0x2e7   :  { %3059 = vmatpush1.bf16.msra.mxu1 %v3738_v50  ;;  %v2132_v50 = vld [vmem:[%s5630_s4 + $0x330] sm:$0xff] }
 0x2e8   :  { %3060 = vmatprep.subr.bf16.mxu1 %v3755_v51  ;;  %v2140_v51 = vld [vmem:[%s5630_s4 + $0x370] sm:$0xff] }
 0x2e9   :  { %v3743_v53 = vcombine.high %v2132_v50, %v2140_v51  ;;  %v3742_v55 = vcombine.low %v2132_v50, %v2140_v51 }
 0x2eb   :  { %3061 = vmatpush1.bf16.msra.mxu1 %v3754_v54  ;;  %v2148_v54 = vld [vmem:[%s5630_s4 + $0x3b0] sm:$0xff] }
 0x2ec   :  { %3087 = vmatprep.subr.bf16.mxu1 %v3645_v19  ;;  %v2156_v19 = vld [vmem:[%s5630_s4 + $0x3f0] sm:$0xff] }
 0x2ed   :  { %v3759_v56 = vcombine.high %v2148_v54, %v2156_v19  ;;  %v3758_v60 = vcombine.low %v2148_v54, %v2156_v19  ;;  %v2180_v19 = vsub.s32 4, %v4320_v14 }
 0x2ee   :  { %3079 = vmatmul.mubr.bf16.vlgmr.msra.gmra.mrb[20].mxu1 %v5203_v44 }
 0x2ef   :  { %3088 = vmatpush1.bf16.msra.mxu1 %v3644_v57  ;;  %3119 = vmatprep.mubr.bf16.mxu1 %v4239_v22  ;;  %v2037_v57 = vld [vmem:[%s5630_s4 + $0x38] sm:$0xff] }
 0x2f0   :  { %3089 = vmatprep.subr.bf16.mxu1 %v3661_v58  ;;  %v2045_v58 = vld [vmem:[%s5630_s4 + $0x78] sm:$0xff] }
 0x2f1   :  { %v3649_v61 = vcombine.high %v2037_v57, %v2045_v58  ;;  %v3648_v0 = vcombine.low %v2037_v57, %v2045_v58 }
 0x2f3   :  { %3090 = vmatpush1.bf16.msra.mxu1 %v3660_v62  ;;  %v2053_v62 = vld [vmem:[%s5630_s4 + $0xb8] sm:$0xff] }
 0x2f4   :  { %3091 = vmatprep.subr.bf16.mxu1 %v3677_v63  ;;  %v2061_v63 = vld [vmem:[%s5630_s4 + $0xf8] sm:$0xff] }
 0x2f5   :  { %v3665_v1 = vcombine.high %v2053_v62, %v2061_v63  ;;  %v3664_v4 = vcombine.low %v2053_v62, %v2061_v63 }
 0x2f7   :  { %3092 = vmatpush1.bf16.msra.mxu1 %v3676_v2  ;;  %v2069_v2 = vld [vmem:[%s5630_s4 + $0x138] sm:$0xff] }
 0x2f8   :  { %3093 = vmatprep.subr.bf16.mxu1 %v3693_v3  ;;  %v2077_v3 = vld [vmem:[%s5630_s4 + $0x178] sm:$0xff] }
 0x2f9   :  { %v3681_v46 = vcombine.high %v2069_v2, %v2077_v3  ;;  %v3680_v5 = vcombine.low %v2069_v2, %v2077_v3  ;;  %v2188_v2 = vsub.s32 6, %v4320_v14  ;;  %v2192_v3 = vsub.s32 7, %v4320_v14 }
 0x2fb   :  { %3094 = vmatpush1.bf16.msra.mxu1 %v3692_v59  ;;  %v2085_v59 = vld [vmem:[%s5630_s4 + $0x1b8] sm:$0xff] }
 0x2fc   :  { %3095 = vmatprep.subr.bf16.mxu1 %v3709_v45  ;;  %v2093_v45 = vld [vmem:[%s5630_s4 + $0x1f8] sm:$0xff] }
 0x2fd   :  { %v3697_v6 = vcombine.high %v2085_v59, %v2093_v45 }
 0x2ff   :  { %3096 = vmatpush1.bf16.msra.mxu1 %v3708_v7  ;;  %v2101_v7 = vld [vmem:[%s5630_s4 + $0x238] sm:$0xff] }
 0x300   :  { %3097 = vmatprep.subr.bf16.mxu1 %v3725_v8  ;;  %v3696_v8 = vcombine.low %v2085_v59, %v2093_v45 }
 0x303   :  { %3098 = vmatpush1.bf16.msra.mxu1 %v3724_v11  ;;  %v2125_v11 = vld [vmem:[%s5630_s4 + $0x2f8] sm:$0xff] }
 0x304   :  { %3099 = vmatprep.subr.bf16.mxu1 %v3741_v12  ;;  %v3729_v15 = vcombine.high %v2117_v10, %v2125_v11  ;;  %v3728_v21 = vcombine.low %v2117_v10, %v2125_v11 }
 0x307   :  { %3100 = vmatpush1.bf16.msra.mxu1 %v3740_v16  ;;  %v2133_v16 = vld [vmem:[%s5630_s4 + $0x338] sm:$0xff] }
 0x308   :  { %3101 = vmatprep.subr.bf16.mxu1 %v3757_v17  ;;  %v2141_v17 = vld [vmem:[%s5630_s4 + $0x378] sm:$0xff] }
 0x30b   :  { %3102 = vmatpush1.bf16.msra.mxu1 %v3756_v24  ;;  %v2169_v24 = vrot.slane %v2158_v13, %v5190_v25 }
 0x30c   :  { %3128 = vmatprep.subr.bf16.mxu1 %v3647_v26  ;;  %v3745_v26 = vcombine.high %v2133_v16, %v2141_v17 }
 0x30e   :  { %3120 = vmatmul.mubr.bf16.vlgmr.msra.gmra.mrb[24].mxu1 %v5203_v44 }
 0x30f   :  { %3129 = vmatpush1.bf16.msra.mxu1 %v3646_v29  ;;  %3160 = vmatprep.mubr.bf16.mxu1 %v4239_v22  ;;  %v2157_v29 = vld [vmem:[%s5630_s4 + $0x3f8] sm:$0xff] }
 0x310   :  { %3130 = vmatprep.subr.bf16.mxu1 %v3663_v30  ;;  %v3761_v35 = vcombine.high %v2149_v28, %v2157_v29 }
 0x313   :  { %3131 = vmatpush1.bf16.msra.mxu1 %v3662_v33 }
 0x314   :  { %3132 = vmatprep.subr.bf16.mxu1 %v3679_v34  ;;  %v3744_v34 = vcombine.low %v2133_v16, %v2141_v17 }
 0x317   :  { %3133 = vmatpush1.bf16.msra.mxu1 %v3678_v36 }
 0x318   :  { %3134 = vmatprep.subr.bf16.mxu1 %v3695_v37  ;;  %v3760_v37 = vcombine.low %v2149_v28, %v2157_v29 }
 0x31b   :  { %3135 = vmatpush1.bf16.msra.mxu1 %v3694_v41  ;;  %v2173_v41 = vrot.slane %v2158_v13, %v2172_v38 }
 0x31c   :  { %3136 = vmatprep.subr.bf16.mxu1 %v3711_v42  ;;  %v2177_v42 = vrot.slane %v2158_v13, %v2176_v39 }
 0x31f   :  { %3137 = vmatpush1.bf16.msra.mxu1 %v3710_v48 }
 0x320   :  { %3138 = vmatprep.subr.bf16.mxu1 %v3727_v49 }
 0x323   :  { %3139 = vmatpush1.bf16.msra.mxu1 %v3726_v52 }
 0x324   :  { %3140 = vmatprep.subr.bf16.mxu1 %v3743_v53 }
 0x327   :  { %3141 = vmatpush1.bf16.msra.mxu1 %v3742_v55  ;;  %v2184_v55 = vsub.s32 5, %v4320_v14 }
 0x328   :  { %3142 = vmatprep.subr.bf16.mxu1 %v3759_v56  ;;  %v2181_v56 = vrot.slane %v2158_v13, %v2180_v19 }
 0x329   :  { %v2185_v57 = vrot.slane %v2158_v13, %v2184_v55 }
 0x32b   :  { %3143 = vmatpush1.bf16.msra.mxu1 %v3758_v60 }
 0x32c   :  { %3169 = vmatprep.subr.bf16.mxu1 %v3649_v61 }
 0x32e   :  { %3161 = vmatmul.mubr.bf16.vlgmr.msra.gmra.mrb[28].mxu1 %v5203_v44 }
 0x32f   :  { %3170 = vmatpush1.bf16.msra.mxu1 %v3648_v0  ;;  %3201 = vmatprep.mubr.bf16.mxu1 %v4239_v22  ;;  %v2109_v22 = vld [vmem:[%s5630_s4 + $0x278] sm:$0xff]  ;;  %s4240_s4 = smov [#allocation2]  }
 0x330   :  { %3171 = vmatprep.subr.bf16.mxu1 %v3665_v1  ;;  %v3713_v9 = vcombine.high %v2101_v7, %v2109_v22  ;;  %v3712_v12 = vcombine.low %v2101_v7, %v2109_v22  ;;  %s3352_s26 = sshll.u32 %s4240_s4, 4  ;;  %s3353_s26 = int_to_ptr.vmem [resolvable:$true] %s3352_s26 }
 0x331   :  { %s4190_s9 = scalar_lea.vmem %s3353_s26, 32  ;;  %p4195_p1 = scmp.lt.s32.totalorder %s3353_s26, %s3353_s26 }
 0x332   :  { %p4191_p0 = scmp.ne.s32.totalorder %s3353_s26, %s4190_s9  ;;  %p4196_p2 = scmp.lt.s32.totalorder %s4190_s9, %s4190_s9 }
 0x333   :  { %3172 = vmatpush1.bf16.msra.mxu1 %v3664_v4  ;;  %v2189_v4 = vrot.slane %v2158_v13, %v2188_v2 }
 0x334   :  { %3173 = vmatprep.subr.bf16.mxu1 %v3681_v46  ;;  %v2193_v46 = vrot.slane %v2158_v13, %v2192_v3  ;;  %p4197_p3 = por %p4196_p2, %p4195_p1 }
 0x336   :  { %p4198_p4 = pnand %p4197_p3, %p4191_p0 }
 0x337   :  { %3174 = vmatpush1.bf16.msra.mxu1 %v3680_v5 }
 0x338   :  { %3175 = vmatprep.subr.bf16.mxu1 %v3697_v6 }
 0x33b   :  { %3176 = vmatpush1.bf16.msra.mxu1 %v3696_v8 }
 0x33c   :  { %3177 = vmatprep.subr.bf16.mxu1 %v3713_v9 }
 0x33f   :  { %3178 = vmatpush1.bf16.msra.mxu1 %v3712_v12 }
 0x340   :  { %3179 = vmatprep.subr.bf16.mxu1 %v3729_v15 }
 0x341   :  { %v2916_v27 = vpop.f32.mrb[4].mxu1 }
 0x342   :  { %v2917_v30 = vadd.f32 %v2916_v27, %v2165_v20  ;;  %v2918_v31 = vpop.f32.mrb[5].mxu1 }
 0x343   :  { %v2919_v32 = vadd.f32 %v2918_v31, %v2169_v24  ;;  %3180 = vmatpush1.bf16.msra.mxu1 %v3728_v21  ;;  %v2920_v33 = vpop.f32.mrb[6].mxu1 }
 0x344   :  { %v2921_v40 = vpop.f32.mrb[7].mxu1  ;;  %3181 = vmatprep.subr.bf16.mxu1 %v3745_v26 }
 0x345   :  { %v3762_v36 = vpack.c.bf16 %v2919_v32, %v2917_v30 }
 0x347   :  { %3182 = vmatpush1.bf16.msra.mxu1 %v3744_v34  ;;  %v3254_v53 = vrot.slane %v3762_v36, %v4329_v18 }
 0x348   :  { %3183 = vmatprep.subr.bf16.mxu1 %v3761_v35 }
 0x34b   :  { %3184 = vmatpush1.bf16.msra.mxu1 %v3760_v37 }
 0x34e   :  { %3202 = vmatmul.mubr.bf16.vlgmr.msra.gmra.mrb[32].mxu1 %v5203_v44 }
 0x361   :  { %v2957_v43 = vpop.f32.mrb[8].mxu1 }
 0x362   :  { %v2958_v47 = vadd.f32 %v2957_v43, %v2173_v41  ;;  %v2959_v48 = vpop.f32.mrb[9].mxu1 }
 0x363   :  { %v2960_v49 = vadd.f32 %v2959_v48, %v2177_v42  ;;  %v2961_v50 = vpop.f32.mrb[10].mxu1 }
 0x364   :  { %v2962_v51 = vpop.f32.mrb[11].mxu1 }
 0x365   :  { %v3763_v52 = vpack.c.bf16 %v2960_v49, %v2958_v47 }
 0x367   :  { %v3261_v44 = vrot.slane %v3763_v52, %v4329_v18 }
 0x369   :  { %v3276_v54 = vcombine.low %v3254_v53, %v3261_v44 }
 0x36b   :  { %v3284_v12 = vrot.slane %v3276_v54, %v4329_v18 }
 0x381   :  { %v2998_v58 = vpop.f32.mrb[12].mxu1 }
 0x382   :  { %v2999_v60 = vadd.f32 %v2998_v58, %v2181_v56  ;;  %v3000_v61 = vpop.f32.mrb[13].mxu1 }
 0x383   :  { %v3001_v62 = vadd.f32 %v3000_v61, %v2185_v57  ;;  %v3002_v63 = vpop.f32.mrb[14].mxu1 }
 0x384   :  { %v3003_v0 = vpop.f32.mrb[15].mxu1 }
 0x385   :  { %v3764_v1 = vpack.c.bf16 %v3001_v62, %v2999_v60 }
 0x387   :  { %v3268_v9 = vrot.slane %v3764_v1, %v4329_v18 }
 0x3a1   :  { %v3039_v59 = vpop.f32.mrb[16].mxu1 }
 0x3a2   :  { %v3040_v45 = vadd.f32 %v3039_v59, %v2189_v4  ;;  %v3041_v5 = vpop.f32.mrb[17].mxu1 }
 0x3a3   :  { %v3042_v6 = vadd.f32 %v3041_v5, %v2193_v46  ;;  %v3043_v7 = vpop.f32.mrb[18].mxu1 }
 0x3a4   :  { %v3044_v22 = vpop.f32.mrb[19].mxu1 }
 0x3a5   :  { %v3765_v8 = vpack.c.bf16 %v3042_v6, %v3040_v45 }
 0x3a7   :  { %v3275_v10 = vrot.slane %v3765_v8, %v4329_v18 }
 0x3a9   :  { %v3277_v11 = vcombine.low %v3268_v9, %v3275_v10 }
 0x3ab   :  { %v3291_v15 = vrot.slane %v3277_v11, %v4329_v18 }
 0x3ad   :  { %v3292_v16 = vcombine.low %v3284_v12, %v3291_v15 }
 0x3af   :  { %3344 = vst [vmem:[%s5634_s8] sm:$0xff] %v3292_v16 }
 0x3b0   :  { %4201 = shalt.err (!%p4198_p4)
}
 0x3b1   :  { %s4202_s1 = scalar_lea.hbm %s5632_s6, 32 }
 0x3b2   :  { %p4203_p5 = scmp.ne.s32.totalorder %s5632_s6, %s4202_s1  ;;  %p4206_p6 = scmp.lt.u32.totalorder %s4202_s1, %s5632_s6 }
 0x3b4   :  { %p4208_p7 = pnand %p4206_p6, %p4203_p5 }
 0x3b6   :  { %4211 = shalt.err (!%p4208_p7)
}
 0x3b7   :  { %3355 = dma.vmem_to_hbm [thread:$0]  %s3353_s26, 32, %s5632_s6, [#allocation3]  }
 0x3b8   :  { %s4212_s0 = scalar_lea.vmem %s3363_s28, 32  ;;  %p4217_p9 = scmp.lt.s32.totalorder %s3363_s28, %s3363_s28 }
 0x3b9   :  { %p4213_p8 = scmp.ne.s32.totalorder %s3363_s28, %s4212_s0  ;;  %p4218_p10 = scmp.lt.s32.totalorder %s4212_s0, %s4212_s0 }
 0x3bb   :  { %p4219_p11 = por %p4218_p10, %p4217_p9 }
 0x3bd   :  { %p4220_p12 = pnand %p4219_p11, %p4213_p8 }
 0x3bf   :  { %4223 = shalt.err (!%p4220_p12)
}
 0x3c0   :  { %s4224_s19 = scalar_lea.hbm %s5633_s7, 32 }
 0x3c1   :  { %p4225_p13 = scmp.ne.s32.totalorder %s5633_s7, %s4224_s19  ;;  %p4228_p0 = scmp.lt.u32.totalorder %s4224_s19, %s5633_s7 }
 0x3c3   :  { %p4230_p1 = pnand %p4228_p0, %p4225_p13 }
 0x3c5   :  { %4233 = shalt.err (!%p4230_p1)
}
 0x3c6   :  { %3365 = dma.vmem_to_hbm [thread:$0]  %s3363_s28, 32, %s5633_s7, [#allocation5]   ;;  %v2159_v13 = vld [vmem:[%s5631_s5 + $0x8] sm:$0xff]  ;;  %v3080_v21 = vpop.f32.mrb[20].mxu1 }
 0x3c7   :  { %v2197_v17 = vrot.slane %v2159_v13, %v5184_v23  ;;  %v2201_v20 = vrot.slane %v2159_v13, %v5190_v25  ;;  %v3082_v26 = vpop.f32.mrb[21].mxu1  ;;  %v2205_v31 = vrot.slane %v2159_v13, %v2172_v38  ;;  %v2209_v32 = vrot.slane %v2159_v13, %v2176_v39 }
 0x3c8   :  { %v3084_v28 = vpop.f32.mrb[22].mxu1  ;;  %v2213_v43 = vrot.slane %v2159_v13, %v2180_v19  ;;  %v2217_v38 = vrot.slane %v2159_v13, %v2184_v55  ;;  %v2221_v53 = vrot.slane %v2159_v13, %v2188_v2  ;;  %v2225_v44 = vrot.slane %v2159_v13, %v2192_v3 }
 0x3c9   :  { %v3081_v24 = vadd.f32 %v3080_v21, %v2197_v17  ;;  %v3083_v27 = vadd.f32 %v3082_v26, %v2201_v20  ;;  %v3085_v29 = vpop.f32.mrb[23].mxu1 }
 0x3cb   :  { %v3766_v30 = vpack.c.bf16 %v3083_v27, %v3081_v24 }
 0x3cd   :  { %v3303_v37 = vrot.slane %v3766_v30, %v4329_v18 }
 0x3e1   :  { %v3121_v33 = vpop.f32.mrb[24].mxu1 }
 0x3e2   :  { %v3122_v34 = vadd.f32 %v3121_v33, %v2205_v31  ;;  %v3123_v40 = vpop.f32.mrb[25].mxu1 }
 0x3e3   :  { %v3124_v35 = vadd.f32 %v3123_v40, %v2209_v32  ;;  %v3125_v23 = vpop.f32.mrb[26].mxu1 }
 0x3e4   :  { %v3126_v36 = vpop.f32.mrb[27].mxu1 }
 0x3e5   :  { %v3767_v25 = vpack.c.bf16 %v3124_v35, %v3122_v34 }
 0x3e7   :  { %v3310_v41 = vrot.slane %v3767_v25, %v4329_v18 }
 0x3e9   :  { %v3325_v42 = vcombine.low %v3303_v37, %v3310_v41 }
 0x3eb   :  { %v3333_v0 = vrot.slane %v3325_v42, %v4329_v18 }
 0x401   :  { %v3162_v47 = vpop.f32.mrb[28].mxu1 }
 0x402   :  { %v3163_v39 = vadd.f32 %v3162_v47, %v2213_v43  ;;  %v3164_v48 = vpop.f32.mrb[29].mxu1 }
 0x403   :  { %v3165_v49 = vadd.f32 %v3164_v48, %v2217_v38  ;;  %v3166_v50 = vpop.f32.mrb[30].mxu1 }
 0x404   :  { %v3167_v51 = vpop.f32.mrb[31].mxu1 }
 0x405   :  { %v3768_v52 = vpack.c.bf16 %v3165_v49, %v3163_v39 }
 0x407   :  { %v3317_v61 = vrot.slane %v3768_v52, %v4329_v18 }
 0x421   :  { %v3203_v54 = vpop.f32.mrb[32].mxu1 }
 0x422   :  { %v3204_v56 = vadd.f32 %v3203_v54, %v2221_v53  ;;  %v3205_v57 = vpop.f32.mrb[33].mxu1 }
 0x423   :  { %v3206_v19 = vadd.f32 %v3205_v57, %v2225_v44  ;;  %v3207_v58 = vpop.f32.mrb[34].mxu1 }
 0x424   :  { %v3208_v60 = vpop.f32.mrb[35].mxu1 }
 0x425   :  { %v3769_v55 = vpack.c.bf16 %v3206_v19, %v3204_v56 }
 0x427   :  { %v3324_v62 = vrot.slane %v3769_v55, %v4329_v18 }
 0x429   :  { %v3326_v63 = vcombine.low %v3317_v61, %v3324_v62 }
 0x42b   :  { %v3340_v1 = vrot.slane %v3326_v63, %v4329_v18 }
 0x42d   :  { %v3341_v2 = vcombine.low %v3333_v0, %v3340_v1 }
 0x42f   :  { %3345 = vst [vmem:[%s5634_s8 + $0x8] sm:$0xff] %v3341_v2 }
 0x430   :  { %4234 = dma.done.wait [#allocation3], 32  }
 0x431   :  { %4235 = vsyncadd [#allocation3], 4294967264 }
 0x432   :  { %4236 = dma.done.wait [#allocation5], 32  }
 0x433   :  { %4237 = vsyncadd [#allocation5], 4294967264 }
 0x434   :  { %3376 = vsyncpa [#allocation3], 1 }
 0x435   :  { %3377 = vsyncpa [#allocation5], 1 }

// kernel: vae_forward.12
= control target key start
LH: loop header
LB: loop body
LE: loop exit
PB: predicated region body
PF: predicated region fallthrough
CT: control target
= control target key end

     0   :  { %s3373_s1 = inlined_call_operand.vmem [shape: bf16[4,256,128], index: 1, kind: input, shape index: {}]   ;;  %s3374_s0 = inlined_call_operand.vmem [shape: bf16[4,128,256], index: 0, kind: input, shape index: {}]   ;;  %s3375_s2 = inlined_call_operand.vmem [shape: f32[4,1,128], index: 2, kind: input, shape index: {}]   ;;  %s3376_s3 = inlined_call_operand.vmem [shape: bf16[4,128,128], index: 3, kind: output, shape index: {}]  }
   0x1   :  { %v2629_v0 = vld [vmem:[%s3373_s1 + $0x40] sm:$0xff]   ;;  %v2633_v4 = vld [vmem:[%s3373_s1 + $0x48] sm:$0xff]   ;;  %v2637_v8 = vld [vmem:[%s3373_s1 + $0x50] sm:$0xff]  }
   0x2   :  { %v2630_v1 = vld [vmem:[%s3373_s1 + $0xc0] sm:$0xff]   ;;  %2373 = vmatprep.subr.bf16.mxu0 %v2629_v0  ;;  %v2634_v5 = vld [vmem:[%s3373_s1 + $0xc8] sm:$0xff]   ;;  %v2638_v9 = vld [vmem:[%s3373_s1 + $0xd0] sm:$0xff]  }
   0x3   :  { %v2631_v2 = vld [vmem:[%s3373_s1] sm:$0xff]   ;;  %2437 = vmatprep.subr.bf16.mxu1 %v2630_v1  ;;  %v2635_v6 = vld [vmem:[%s3373_s1 + $0x8] sm:$0xff]   ;;  %v2639_v10 = vld [vmem:[%s3373_s1 + $0x10] sm:$0xff]  }
   0x4   :  { %v2632_v3 = vld [vmem:[%s3373_s1 + $0x80] sm:$0xff]   ;;  %2374 = vmatpush3.bf16.msra.mxu0 %v2631_v2  ;;  %v2636_v7 = vld [vmem:[%s3373_s1 + $0x88] sm:$0xff]   ;;  %v2640_v11 = vld [vmem:[%s3373_s1 + $0x90] sm:$0xff]  }
   0x5   :  { %2438 = vmatpush3.bf16.msra.mxu1 %v2632_v3  ;;  %2375 = vmatprep.subr.bf16.mxu0 %v2633_v4  ;;  %v2641_v12 = vld [vmem:[%s3373_s1 + $0x58] sm:$0xff]   ;;  %v2645_v16 = vld [vmem:[%s3373_s1 + $0x60] sm:$0xff]   ;;  %v2649_v20 = vld [vmem:[%s3373_s1 + $0x68] sm:$0xff]  }
   0x6   :  { %2439 = vmatprep.subr.bf16.mxu1 %v2634_v5  ;;  %v2642_v13 = vld [vmem:[%s3373_s1 + $0xd8] sm:$0xff]   ;;  %v2646_v17 = vld [vmem:[%s3373_s1 + $0xe0] sm:$0xff]   ;;  %v2650_v21 = vld [vmem:[%s3373_s1 + $0xe8] sm:$0xff]  }
   0x7   :  { %v2643_v14 = vld [vmem:[%s3373_s1 + $0x18] sm:$0xff]   ;;  %v2647_v18 = vld [vmem:[%s3373_s1 + $0x20] sm:$0xff]   ;;  %v2651_v22 = vld [vmem:[%s3373_s1 + $0x28] sm:$0xff]  }
   0x8   :  { %2376 = vmatpush3.bf16.msra.mxu0 %v2635_v6  ;;  %v2644_v15 = vld [vmem:[%s3373_s1 + $0x98] sm:$0xff]   ;;  %v2648_v19 = vld [vmem:[%s3373_s1 + $0xa0] sm:$0xff]   ;;  %v2652_v23 = vld [vmem:[%s3373_s1 + $0xa8] sm:$0xff]  }
   0x9   :  { %2440 = vmatpush3.bf16.msra.mxu1 %v2636_v7  ;;  %2377 = vmatprep.subr.bf16.mxu0 %v2637_v8  ;;  %v2653_v24 = vld [vmem:[%s3373_s1 + $0x70] sm:$0xff]   ;;  %v2657_v28 = vld [vmem:[%s3373_s1 + $0x78] sm:$0xff]   ;;  %v2661_v32 = vld [vmem:[%s3374_s0] ss:$8 sps:$4 sm:$0xff]  }
   0xa   :  { %2441 = vmatprep.subr.bf16.mxu1 %v2638_v9  ;;  %v2654_v25 = vld [vmem:[%s3373_s1 + $0xf0] sm:$0xff]   ;;  %v2658_v29 = vld [vmem:[%s3373_s1 + $0xf8] sm:$0xff]   ;;  %v2663_v33 = vld [vmem:[%s3374_s0 + $0x4] ss:$8 sps:$4 sm:$0xff]  }
   0xb   :  { %v2655_v26 = vld [vmem:[%s3373_s1 + $0x30] sm:$0xff]   ;;  %v2659_v30 = vld [vmem:[%s3373_s1 + $0x38] sm:$0xff]   ;;  %v2664_v34 = vld [vmem:[%s3374_s0 + $0x80] ss:$8 sps:$4 sm:$0xff]   ;;  %278 = vmatprep.mubr.bf16.mxu0 %v2663_v33 }
   0xc   :  { %2378 = vmatpush3.bf16.msra.mxu0 %v2639_v10  ;;  %v2656_v27 = vld [vmem:[%s3373_s1 + $0xb0] sm:$0xff]   ;;  %v2660_v31 = vld [vmem:[%s3373_s1 + $0xb8] sm:$0xff]   ;;  %v2666_v35 = vld [vmem:[%s3374_s0 + $0x84] ss:$8 sps:$4 sm:$0xff]  }
   0xd   :  { %2442 = vmatpush3.bf16.msra.mxu1 %v2640_v11  ;;  %2379 = vmatprep.subr.bf16.mxu0 %v2641_v12  ;;  %v2667_v36 = vld [vmem:[%s3373_s1 + $0x140] sm:$0xff]   ;;  %v2671_v40 = vld [vmem:[%s3374_s0 + $0x14] ss:$8 sps:$4 sm:$0xff]   ;;  %v2675_v42 = vld [vmem:[%s3374_s0 + $0x10] ss:$8 sps:$4 sm:$0xff]  }
   0xe   :  { %2443 = vmatprep.subr.bf16.mxu1 %v2642_v13  ;;  %705 = vmatprep.mubr.bf16.mxu1 %v2666_v35  ;;  %v2668_v37 = vld [vmem:[%s3373_s1 + $0x1c0] sm:$0xff]   ;;  %v2673_v41 = vld [vmem:[%s3374_s0 + $0x94] ss:$8 sps:$4 sm:$0xff]   ;;  %v2676_v43 = vld [vmem:[%s3374_s0 + $0x90] ss:$8 sps:$4 sm:$0xff]  }
   0xf   :  { %v2669_v38 = vld [vmem:[%s3373_s1 + $0x100] sm:$0xff]   ;;  %v2677_v44 = vld [vmem:[%s3373_s1 + $0x148] sm:$0xff]   ;;  %v2687_v52 = vld [vmem:[%s3373_s1 + $0x150] sm:$0xff]  }
  0x10   :  { %2380 = vmatpush3.bf16.msra.mxu0 %v2643_v14  ;;  %v2670_v39 = vld [vmem:[%s3373_s1 + $0x180] sm:$0xff]   ;;  %v2678_v45 = vld [vmem:[%s3373_s1 + $0x1c8] sm:$0xff]   ;;  %v2688_v53 = vld [vmem:[%s3373_s1 + $0x1d0] sm:$0xff]  }
  0x11   :  { %2444 = vmatpush3.bf16.msra.mxu1 %v2644_v15  ;;  %2381 = vmatprep.subr.bf16.mxu0 %v2645_v16  ;;  %v2679_v46 = vld [vmem:[%s3373_s1 + $0x108] sm:$0xff]   ;;  %v2689_v54 = vld [vmem:[%s3373_s1 + $0x110] sm:$0xff]   ;;  %v2697_v60 = vld [vmem:[%s3373_s1 + $0x158] sm:$0xff]  }
  0x12   :  { %2445 = vmatprep.subr.bf16.mxu1 %v2646_v17  ;;  %v2680_v47 = vld [vmem:[%s3373_s1 + $0x188] sm:$0xff]   ;;  %v2690_v55 = vld [vmem:[%s3373_s1 + $0x190] sm:$0xff]   ;;  %v2698_v61 = vld [vmem:[%s3373_s1 + $0x1d8] sm:$0xff]  }
  0x13   :  { %v2681_v48 = vld [vmem:[%s3374_s0 + $0x24] ss:$8 sps:$4 sm:$0xff]   ;;  %v2685_v50 = vld [vmem:[%s3374_s0 + $0x20] ss:$8 sps:$4 sm:$0xff]   ;;  %v2691_v56 = vld [vmem:[%s3374_s0 + $0x34] ss:$8 sps:$4 sm:$0xff]  }
  0x14   :  { %2382 = vmatpush3.bf16.msra.mxu0 %v2647_v18  ;;  %v2683_v49 = vld [vmem:[%s3374_s0 + $0xa4] ss:$8 sps:$4 sm:$0xff]   ;;  %v2686_v51 = vld [vmem:[%s3374_s0 + $0xa0] ss:$8 sps:$4 sm:$0xff]   ;;  %v2693_v57 = vld [vmem:[%s3374_s0 + $0xb4] ss:$8 sps:$4 sm:$0xff]  }
  0x15   :  { %2446 = vmatpush3.bf16.msra.mxu1 %v2648_v19  ;;  %2383 = vmatprep.subr.bf16.mxu0 %v2649_v20  ;;  %v2695_v58 = vld [vmem:[%s3374_s0 + $0x30] ss:$8 sps:$4 sm:$0xff]   ;;  %v2701_v0 = vld [vmem:[%s3374_s0 + $0x44] ss:$8 sps:$4 sm:$0xff]   ;;  %v2705_v2 = vld [vmem:[%s3374_s0 + $0x40] ss:$8 sps:$4 sm:$0xff]  }
  0x16   :  { %2447 = vmatprep.subr.bf16.mxu1 %v2650_v21  ;;  %v2696_v59 = vld [vmem:[%s3374_s0 + $0xb0] ss:$8 sps:$4 sm:$0xff]   ;;  %v2703_v1 = vld [vmem:[%s3374_s0 + $0xc4] ss:$8 sps:$4 sm:$0xff]   ;;  %v2706_v4 = vld [vmem:[%s3374_s0 + $0xc0] ss:$8 sps:$4 sm:$0xff]  }
  0x17   :  { %v2699_v62 = vld [vmem:[%s3373_s1 + $0x118] sm:$0xff]   ;;  %v2707_v3 = vld [vmem:[%s3373_s1 + $0x160] sm:$0xff]   ;;  %v2717_v10 = vld [vmem:[%s3373_s1 + $0x168] sm:$0xff]  }
  0x18   :  { %2384 = vmatpush3.bf16.msra.mxu0 %v2651_v22  ;;  %v2700_v63 = vld [vmem:[%s3373_s1 + $0x198] sm:$0xff]   ;;  %v2708_v5 = vld [vmem:[%s3373_s1 + $0x1e0] sm:$0xff]   ;;  %v2718_v11 = vld [vmem:[%s3373_s1 + $0x1e8] sm:$0xff]  }
  0x19   :  { %2448 = vmatpush3.bf16.msra.mxu1 %v2652_v23  ;;  %2385 = vmatprep.subr.bf16.mxu0 %v2653_v24  ;;  %v2709_v6 = vld [vmem:[%s3373_s1 + $0x120] sm:$0xff]   ;;  %v2711_v8 = vld [vmem:[%s3374_s0 + $0x54] ss:$8 sps:$4 sm:$0xff]   ;;  %v2715_v12 = vld [vmem:[%s3374_s0 + $0x50] ss:$8 sps:$4 sm:$0xff]  }
  0x1a   :  { %2449 = vmatprep.subr.bf16.mxu1 %v2654_v25  ;;  %v2710_v7 = vld [vmem:[%s3373_s1 + $0x1a0] sm:$0xff]   ;;  %v2713_v9 = vld [vmem:[%s3374_s0 + $0xd4] ss:$8 sps:$4 sm:$0xff]   ;;  %v2719_v13 = vld [vmem:[%s3373_s1 + $0x128] sm:$0xff]  }
  0x1b   :  { %v2720_v14 = vld [vmem:[%s3373_s1 + $0x1a8] sm:$0xff]   ;;  %v2716_v15 = vld [vmem:[%s3374_s0 + $0xd0] ss:$8 sps:$4 sm:$0xff]   ;;  %v2731_v24 = vld [vmem:[%s3374_s0 + $0x74] ss:$8 sps:$4 sm:$0xff]  }
  0x1c   :  { %2386 = vmatpush3.bf16.msra.mxu0 %v2655_v26  ;;  %v2721_v16 = vld [vmem:[%s3374_s0 + $0x64] ss:$8 sps:$4 sm:$0xff]   ;;  %v2727_v18 = vld [vmem:[%s3373_s1 + $0x170] sm:$0xff]   ;;  %v2725_v22 = vld [vmem:[%s3374_s0 + $0x60] ss:$8 sps:$4 sm:$0xff]  }
  0x1d   :  { %2450 = vmatpush3.bf16.msra.mxu1 %v2656_v27  ;;  %2387 = vmatprep.subr.bf16.mxu0 %v2657_v28  ;;  %v2723_v17 = vld [vmem:[%s3374_s0 + $0xe4] ss:$8 sps:$4 sm:$0xff]   ;;  %v2728_v19 = vld [vmem:[%s3373_s1 + $0x1f0] sm:$0xff]   ;;  %v2726_v23 = vld [vmem:[%s3374_s0 + $0xe0] ss:$8 sps:$4 sm:$0xff]  }
  0x1e   :  { %2451 = vmatprep.subr.bf16.mxu1 %v2658_v29  ;;  %v2729_v20 = vld [vmem:[%s3373_s1 + $0x130] sm:$0xff]   ;;  %v2737_v26 = vld [vmem:[%s3373_s1 + $0x178] sm:$0xff]   ;;  %v2746_v33 = vld [vmem:[%s3374_s0 + $0x184] ss:$8 sps:$4 sm:$0xff]  }
  0x1f   :  { %v2730_v21 = vld [vmem:[%s3373_s1 + $0x1b0] sm:$0xff]   ;;  %v2738_v27 = vld [vmem:[%s3373_s1 + $0x1f8] sm:$0xff]   ;;  %v2744_v35 = vld [vmem:[%s3374_s0 + $0x180] ss:$8 sps:$4 sm:$0xff]  }
  0x20   :  { %2388 = vmatpush3.bf16.msra.mxu0 %v2659_v30  ;;  %v2733_v25 = vld [vmem:[%s3374_s0 + $0xf4] ss:$8 sps:$4 sm:$0xff]   ;;  %v2735_v30 = vld [vmem:[%s3374_s0 + $0x70] ss:$8 sps:$4 sm:$0xff]  }
  0x21   :  { %2452 = vmatpush3.bf16.msra.mxu1 %v2660_v31  ;;  %2501 = vmatprep.subr.bf16.mxu0 %v2667_v36  ;;  %v2739_v28 = vld [vmem:[%s3373_s1 + $0x138] sm:$0xff]  }
  0x22   :  { %2565 = vmatprep.subr.bf16.mxu1 %v2668_v37  ;;  %v2740_v29 = vld [vmem:[%s3373_s1 + $0x1b8] sm:$0xff]  }
  0x23   :  { %279 = vmatmul.mubr.bf16.vlgmr.msra.gmra.mrb[0].mxu0 %v2661_v32  ;;  %v2736_v31 = vld [vmem:[%s3374_s0 + $0xf0] ss:$8 sps:$4 sm:$0xff]   ;;  %v2743_v32 = vld [vmem:[%s3374_s0 + $0x104] ss:$8 sps:$4 sm:$0xff]   ;;  %v2747_v36 = vld [vmem:[%s3374_s0 + $0x114] ss:$8 sps:$4 sm:$0xff]  }
  0x24   :  { %706 = vmatmul.mubr.bf16.vlgmr.msra.gmra.mrb[0].mxu1 %v2664_v34  ;;  %2502 = vmatpush3.bf16.msra.mxu0 %v2669_v38  ;;  %v2741_v34 = vld [vmem:[%s3374_s0 + $0x100] ss:$8 sps:$4 sm:$0xff]   ;;  %v2749_v37 = vld [vmem:[%s3374_s0 + $0x194] ss:$8 sps:$4 sm:$0xff]   ;;  %v2751_v38 = vld [vmem:[%s3374_s0 + $0x110] ss:$8 sps:$4 sm:$0xff]  }
  0x25   :  { %2566 = vmatpush3.bf16.msra.mxu1 %v2670_v39  ;;  %286 = vmatprep.mubr.bf16.mxu0 %v2671_v40  ;;  %v2752_v39 = vld [vmem:[%s3374_s0 + $0x190] ss:$8 sps:$4 sm:$0xff]   ;;  %v2753_v40 = vld [vmem:[%s3374_s0 + $0x124] ss:$8 sps:$4 sm:$0xff]  }
  0x26   :  { %713 = vmatprep.mubr.bf16.mxu1 %v2673_v41  ;;  %2503 = vmatprep.subr.bf16.mxu0 %v2677_v44  ;;  %v2755_v41 = vld [vmem:[%s3374_s0 + $0x1a4] ss:$8 sps:$4 sm:$0xff]   ;;  %v2759_v44 = vld [vmem:[%s3374_s0 + $0x134] ss:$8 sps:$4 sm:$0xff]  }
  0x27   :  { %2567 = vmatprep.subr.bf16.mxu1 %v2678_v45  ;;  %v2761_v45 = vld [vmem:[%s3374_s0 + $0x1b4] ss:$8 sps:$4 sm:$0xff]  }
  0x28   :  { %2504 = vmatpush3.bf16.msra.mxu0 %v2679_v46  ;;  %v2763_v46 = vld [vmem:[%s3374_s0 + $0x130] ss:$8 sps:$4 sm:$0xff]  }
  0x29   :  { %2568 = vmatpush3.bf16.msra.mxu1 %v2680_v47  ;;  %2505 = vmatprep.subr.bf16.mxu0 %v2687_v52  ;;  %v2764_v47 = vld [vmem:[%s3374_s0 + $0x1b0] ss:$8 sps:$4 sm:$0xff]   ;;  %v2771_v52 = vld [vmem:[%s3374_s0 + $0x154] ss:$8 sps:$4 sm:$0xff]  }
  0x2a   :  { %2569 = vmatprep.subr.bf16.mxu1 %v2688_v53  ;;  %v2773_v53 = vld [vmem:[%s3374_s0 + $0x1d4] ss:$8 sps:$4 sm:$0xff]  }
  0x2b   :  { %287 = vmatmul.mubr.bf16.gmra.mrb[4].mxu0 %v2675_v42  ;;  %v2757_v42 = vld [vmem:[%s3374_s0 + $0x120] ss:$8 sps:$4 sm:$0xff]  }
  0x2c   :  { %714 = vmatmul.mubr.bf16.gmra.mrb[4].mxu1 %v2676_v43  ;;  %294 = vmatprep.mubr.bf16.mxu0 %v2681_v48  ;;  %v2758_v43 = vld [vmem:[%s3374_s0 + $0x1a0] ss:$8 sps:$4 sm:$0xff]   ;;  %v2765_v48 = vld [vmem:[%s3374_s0 + $0x144] ss:$8 sps:$4 sm:$0xff]  }
  0x2d   :  { %721 = vmatprep.mubr.bf16.mxu1 %v2683_v49  ;;  %2506 = vmatpush3.bf16.msra.mxu0 %v2689_v54  ;;  %v2767_v49 = vld [vmem:[%s3374_s0 + $0x1c4] ss:$8 sps:$4 sm:$0xff]   ;;  %v2775_v54 = vld [vmem:[%s3374_s0 + $0x150] ss:$8 sps:$4 sm:$0xff]  }
  0x2e   :  { %2570 = vmatpush3.bf16.msra.mxu1 %v2690_v55  ;;  %2507 = vmatprep.subr.bf16.mxu0 %v2697_v60  ;;  %v2776_v55 = vld [vmem:[%s3374_s0 + $0x1d0] ss:$8 sps:$4 sm:$0xff]   ;;  %v2783_v60 = vld [vmem:[%s3374_s0 + $0x174] ss:$8 sps:$4 sm:$0xff]  }
  0x2f   :  { %2571 = vmatprep.subr.bf16.mxu1 %v2698_v61  ;;  %v2785_v61 = vld [vmem:[%s3374_s0 + $0x1f4] ss:$8 sps:$4 sm:$0xff]  }
  0x31   :  { %2508 = vmatpush3.bf16.msra.mxu0 %v2699_v62  ;;  %v2787_v62 = vld [vmem:[%s3374_s0 + $0x170] ss:$8 sps:$4 sm:$0xff]  }
  0x32   :  { %2572 = vmatpush3.bf16.msra.mxu1 %v2700_v63  ;;  %2509 = vmatprep.subr.bf16.mxu0 %v2707_v3  ;;  %v2788_v63 = vld [vmem:[%s3374_s0 + $0x1f0] ss:$8 sps:$4 sm:$0xff]  }
  0x33   :  { %295 = vmatmul.mubr.bf16.gmra.mrb[8].mxu0 %v2685_v50  ;;  %2573 = vmatprep.subr.bf16.mxu1 %v2708_v5  ;;  %v2769_v50 = vld [vmem:[%s3374_s0 + $0x140] ss:$8 sps:$4 sm:$0xff]  }
  0x34   :  { %722 = vmatmul.mubr.bf16.gmra.mrb[8].mxu1 %v2686_v51  ;;  %302 = vmatprep.mubr.bf16.mxu0 %v2691_v56  ;;  %v2770_v51 = vld [vmem:[%s3374_s0 + $0x1c0] ss:$8 sps:$4 sm:$0xff]   ;;  %v2777_v56 = vld [vmem:[%s3374_s0 + $0x164] ss:$8 sps:$4 sm:$0xff]  }
  0x35   :  { %729 = vmatprep.mubr.bf16.mxu1 %v2693_v57  ;;  %2510 = vmatpush3.bf16.msra.mxu0 %v2709_v6  ;;  %v2779_v57 = vld [vmem:[%s3374_s0 + $0x1e4] ss:$8 sps:$4 sm:$0xff]   ;;  %v3201_v5 = vld [vmem:[%s3375_s2 + $0x1] ss:$0 sm:$0xff] }
  0x36   :  { %2574 = vmatpush3.bf16.msra.mxu1 %v2710_v7  ;;  %2511 = vmatprep.subr.bf16.mxu0 %v2717_v10 }
  0x37   :  { %2575 = vmatprep.subr.bf16.mxu1 %v2718_v11 }
  0x39   :  { %2512 = vmatpush3.bf16.msra.mxu0 %v2719_v13 }
  0x3a   :  { %2576 = vmatpush3.bf16.msra.mxu1 %v2720_v14  ;;  %2513 = vmatprep.subr.bf16.mxu0 %v2727_v18 }
  0x3b   :  { %303 = vmatmul.mubr.bf16.gmra.mrb[12].mxu0 %v2695_v58  ;;  %2577 = vmatprep.subr.bf16.mxu1 %v2728_v19  ;;  %v2781_v58 = vld [vmem:[%s3374_s0 + $0x160] ss:$8 sps:$4 sm:$0xff]  }
  0x3c   :  { %730 = vmatmul.mubr.bf16.gmra.mrb[12].mxu1 %v2696_v59  ;;  %310 = vmatprep.mubr.bf16.mxu0 %v2701_v0  ;;  %v2782_v59 = vld [vmem:[%s3374_s0 + $0x1e0] ss:$8 sps:$4 sm:$0xff]  }
  0x3d   :  { %737 = vmatprep.mubr.bf16.mxu1 %v2703_v1  ;;  %2514 = vmatpush3.bf16.msra.mxu0 %v2729_v20 }
  0x3e   :  { %2578 = vmatpush3.bf16.msra.mxu1 %v2730_v21  ;;  %2515 = vmatprep.subr.bf16.mxu0 %v2737_v26 }
  0x3f   :  { %2579 = vmatprep.subr.bf16.mxu1 %v2738_v27 }
  0x41   :  { %2516 = vmatpush3.bf16.msra.mxu0 %v2739_v28 }
  0x42   :  { %2580 = vmatpush3.bf16.msra.mxu1 %v2740_v29 }
  0x43   :  { %311 = vmatmul.mubr.bf16.gmra.mrb[16].mxu0 %v2705_v2  ;;  %v3196_v2 = vld [vmem:[%s3375_s2] ss:$0 sm:$0xff] }
  0x44   :  { %738 = vmatmul.mubr.bf16.gmra.mrb[16].mxu1 %v2706_v4  ;;  %318 = vmatprep.mubr.bf16.mxu0 %v2711_v8 }
  0x45   :  { %745 = vmatprep.mubr.bf16.mxu1 %v2713_v9 }
  0x4b   :  { %319 = vmatmul.mubr.bf16.gmra.mrb[20].mxu0 %v2715_v12 }
  0x4c   :  { %746 = vmatmul.mubr.bf16.gmra.mrb[20].mxu1 %v2716_v15  ;;  %326 = vmatprep.mubr.bf16.mxu0 %v2721_v16 }
  0x4d   :  { %753 = vmatprep.mubr.bf16.mxu1 %v2723_v17 }
  0x53   :  { %327 = vmatmul.mubr.bf16.gmra.mrb[24].mxu0 %v2725_v22 }
  0x54   :  { %754 = vmatmul.mubr.bf16.gmra.mrb[24].mxu1 %v2726_v23  ;;  %334 = vmatprep.mubr.bf16.mxu0 %v2731_v24 }
  0x55   :  { %761 = vmatprep.mubr.bf16.mxu1 %v2733_v25 }
  0x5b   :  { %335 = vmatmul.mubr.bf16.gmra.mrb[28].mxu0 %v2735_v30 }
  0x5c   :  { %762 = vmatmul.mubr.bf16.gmra.mrb[28].mxu1 %v2736_v31  ;;  %1133 = vmatprep.mubr.bf16.mxu0 %v2743_v32 }
  0x5d   :  { %1561 = vmatprep.mubr.bf16.mxu1 %v2746_v33 }
  0x63   :  { %1134 = vmatmul.mubr.bf16.vlgmr.msra.gmra.mrb[32].mxu0 %v2741_v34 }
  0x64   :  { %1562 = vmatmul.mubr.bf16.vlgmr.msra.gmra.mrb[32].mxu1 %v2744_v35  ;;  %1141 = vmatprep.mubr.bf16.mxu0 %v2747_v36 }
  0x65   :  { %1569 = vmatprep.mubr.bf16.mxu1 %v2749_v37 }
  0x6b   :  { %1142 = vmatmul.mubr.bf16.gmra.mrb[36].mxu0 %v2751_v38 }
  0x6c   :  { %1570 = vmatmul.mubr.bf16.gmra.mrb[36].mxu1 %v2752_v39  ;;  %1149 = vmatprep.mubr.bf16.mxu0 %v2753_v40 }
  0x6d   :  { %1577 = vmatprep.mubr.bf16.mxu1 %v2755_v41 }
  0x73   :  { %1150 = vmatmul.mubr.bf16.gmra.mrb[40].mxu0 %v2757_v42 }
  0x74   :  { %1578 = vmatmul.mubr.bf16.gmra.mrb[40].mxu1 %v2758_v43  ;;  %1157 = vmatprep.mubr.bf16.mxu0 %v2759_v44 }
  0x75   :  { %1585 = vmatprep.mubr.bf16.mxu1 %v2761_v45 }
  0x7b   :  { %1158 = vmatmul.mubr.bf16.gmra.mrb[44].mxu0 %v2763_v46 }
  0x7c   :  { %1586 = vmatmul.mubr.bf16.gmra.mrb[44].mxu1 %v2764_v47  ;;  %1165 = vmatprep.mubr.bf16.mxu0 %v2765_v48 }
  0x7d   :  { %1593 = vmatprep.mubr.bf16.mxu1 %v2767_v49 }
  0x83   :  { %1166 = vmatmul.mubr.bf16.gmra.mrb[48].mxu0 %v2769_v50 }
  0x84   :  { %1594 = vmatmul.mubr.bf16.gmra.mrb[48].mxu1 %v2770_v51  ;;  %1173 = vmatprep.mubr.bf16.mxu0 %v2771_v52 }
  0x85   :  { %1601 = vmatprep.mubr.bf16.mxu1 %v2773_v53 }
  0x8b   :  { %1174 = vmatmul.mubr.bf16.gmra.mrb[52].mxu0 %v2775_v54 }
  0x8c   :  { %1602 = vmatmul.mubr.bf16.gmra.mrb[52].mxu1 %v2776_v55  ;;  %1181 = vmatprep.mubr.bf16.mxu0 %v2777_v56 }
  0x8d   :  { %1609 = vmatprep.mubr.bf16.mxu1 %v2779_v57 }
  0x93   :  { %1182 = vmatmul.mubr.bf16.gmra.mrb[56].mxu0 %v2781_v58 }
  0x94   :  { %1610 = vmatmul.mubr.bf16.gmra.mrb[56].mxu1 %v2782_v59  ;;  %1189 = vmatprep.mubr.bf16.mxu0 %v2783_v60 }
  0x95   :  { %1617 = vmatprep.mubr.bf16.mxu1 %v2785_v61 }
  0x9b   :  { %1190 = vmatmul.mubr.bf16.gmra.mrb[60].mxu0 %v2787_v62 }
  0x9c   :  { %1618 = vmatmul.mubr.bf16.gmra.mrb[60].mxu1 %v2788_v63 }
  0xf6   :  { %v2389_v0 = vpop.f32.mrb[0].mxu0 }
  0xf7   :  { %v2453_v1 = vpop.f32.mrb[0].mxu1  ;;  %v2390_v3 = vpop.f32.mrb[1].mxu0 }
  0xf8   :  { %v2391_v4 = vadd.f32 %v2390_v3, %v2389_v0  ;;  %v2454_v6 = vpop.f32.mrb[1].mxu1  ;;  %v2392_v7 = vpop.f32.mrb[2].mxu0 }
  0xf9   :  { %v2455_v8 = vadd.f32 %v2454_v6, %v2453_v1  ;;  %v2456_v9 = vpop.f32.mrb[2].mxu1  ;;  %v2393_v10 = vpop.f32.mrb[3].mxu0 }
  0xfa   :  { %v281_v11 = vadd.f32 %v2391_v4, %v3196_v2  ;;  %v2394_v12 = vadd.f32 %v2393_v10, %v2392_v7  ;;  %v2457_v13 = vpop.f32.mrb[3].mxu1 }
  0xfb   :  { %v708_v14 = vadd.f32 %v2455_v8, %v3201_v5  ;;  %v2458_v15 = vadd.f32 %v2457_v13, %v2456_v9 }
  0xfc   :  { %v284_v16 = vadd.f32 %v2394_v12, %v3196_v2  ;;  %v343_v18 = vmax.f32 %v281_v11, 0.0 }
  0xfd   :  { %v711_v17 = vadd.f32 %v2458_v15, %v3201_v5  ;;  %v770_v21 = vmax.f32 %v708_v14, 0.0 }
  0xfe   :  { %v344_v19 = vmax.f32 %v284_v16, 0.0  ;;  %v2395_v20 = vpop.f32.mrb[4].mxu0 }
  0xff   :  { %v771_v22 = vmax.f32 %v711_v17, 0.0  ;;  %v2459_v23 = vpop.f32.mrb[4].mxu1  ;;  %v2396_v24 = vpop.f32.mrb[5].mxu0 }
 0x100   :  { %v2185_v25 = vpack.c.bf16 %v344_v19, %v343_v18  ;;  %v2397_v26 = vadd.f32 %v2396_v24, %v2395_v20  ;;  %v2460_v27 = vpop.f32.mrb[5].mxu1  ;;  %v2398_v28 = vpop.f32.mrb[6].mxu0 }
 0x101   :  { %v2225_v29 = vpack.c.bf16 %v771_v22, %v770_v21  ;;  %v2461_v30 = vadd.f32 %v2460_v27, %v2459_v23  ;;  %v2462_v31 = vpop.f32.mrb[6].mxu1  ;;  %v2399_v32 = vpop.f32.mrb[7].mxu0 }
 0x102   :  { %2186 = vst [vmem:[%s3376_s3] sm:$0xff] %v2185_v25   ;;  %v289_v33 = vadd.f32 %v2397_v26, %v3196_v2  ;;  %v2400_v34 = vadd.f32 %v2399_v32, %v2398_v28  ;;  %v2463_v35 = vpop.f32.mrb[7].mxu1 }
 0x103   :  { %2349 = vst [vmem:[%s3376_s3 + $0x40] sm:$0xff] %v2225_v29   ;;  %v716_v36 = vadd.f32 %v2461_v30, %v3201_v5  ;;  %v2464_v37 = vadd.f32 %v2463_v35, %v2462_v31 }
 0x104   :  { %v292_v38 = vadd.f32 %v2400_v34, %v3196_v2  ;;  %v345_v40 = vmax.f32 %v289_v33, 0.0 }
 0x105   :  { %v719_v39 = vadd.f32 %v2464_v37, %v3201_v5  ;;  %v772_v43 = vmax.f32 %v716_v36, 0.0 }
 0x106   :  { %v346_v41 = vmax.f32 %v292_v38, 0.0  ;;  %v2401_v42 = vpop.f32.mrb[8].mxu0 }
 0x107   :  { %v773_v44 = vmax.f32 %v719_v39, 0.0  ;;  %v2465_v45 = vpop.f32.mrb[8].mxu1  ;;  %v2402_v46 = vpop.f32.mrb[9].mxu0 }
 0x108   :  { %v2190_v47 = vpack.c.bf16 %v346_v41, %v345_v40  ;;  %v2403_v48 = vadd.f32 %v2402_v46, %v2401_v42  ;;  %v2466_v49 = vpop.f32.mrb[9].mxu1  ;;  %v2404_v50 = vpop.f32.mrb[10].mxu0 }
 0x109   :  { %v2230_v51 = vpack.c.bf16 %v773_v44, %v772_v43  ;;  %v2467_v52 = vadd.f32 %v2466_v49, %v2465_v45  ;;  %v2468_v53 = vpop.f32.mrb[10].mxu1  ;;  %v2405_v54 = vpop.f32.mrb[11].mxu0 }
 0x10a   :  { %2342 = vst [vmem:[%s3376_s3 + $0x8] sm:$0xff] %v2190_v47   ;;  %v297_v55 = vadd.f32 %v2403_v48, %v3196_v2  ;;  %v2406_v56 = vadd.f32 %v2405_v54, %v2404_v50  ;;  %v2469_v57 = vpop.f32.mrb[11].mxu1 }
 0x10b   :  { %2350 = vst [vmem:[%s3376_s3 + $0x48] sm:$0xff] %v2230_v51   ;;  %v724_v58 = vadd.f32 %v2467_v52, %v3201_v5  ;;  %v2470_v59 = vadd.f32 %v2469_v57, %v2468_v53 }
 0x10c   :  { %v300_v60 = vadd.f32 %v2406_v56, %v3196_v2  ;;  %v347_v62 = vmax.f32 %v297_v55, 0.0 }
 0x10d   :  { %v727_v61 = vadd.f32 %v2470_v59, %v3201_v5  ;;  %v774_v1 = vmax.f32 %v724_v58, 0.0 }
 0x10e   :  { %v348_v63 = vmax.f32 %v300_v60, 0.0  ;;  %v2407_v0 = vpop.f32.mrb[12].mxu0 }
 0x10f   :  { %v775_v3 = vmax.f32 %v727_v61, 0.0  ;;  %v2471_v4 = vpop.f32.mrb[12].mxu1  ;;  %v2408_v6 = vpop.f32.mrb[13].mxu0 }
 0x110   :  { %v2195_v7 = vpack.c.bf16 %v348_v63, %v347_v62  ;;  %v2409_v8 = vadd.f32 %v2408_v6, %v2407_v0  ;;  %v2472_v9 = vpop.f32.mrb[13].mxu1  ;;  %v2410_v10 = vpop.f32.mrb[14].mxu0 }
 0x111   :  { %v2235_v11 = vpack.c.bf16 %v775_v3, %v774_v1  ;;  %v2473_v12 = vadd.f32 %v2472_v9, %v2471_v4  ;;  %v2474_v13 = vpop.f32.mrb[14].mxu1  ;;  %v2411_v14 = vpop.f32.mrb[15].mxu0 }
 0x112   :  { %2343 = vst [vmem:[%s3376_s3 + $0x10] sm:$0xff] %v2195_v7   ;;  %v305_v15 = vadd.f32 %v2409_v8, %v3196_v2  ;;  %v2412_v16 = vadd.f32 %v2411_v14, %v2410_v10  ;;  %v2475_v17 = vpop.f32.mrb[15].mxu1 }
 0x113   :  { %2351 = vst [vmem:[%s3376_s3 + $0x50] sm:$0xff] %v2235_v11   ;;  %v732_v18 = vadd.f32 %v2473_v12, %v3201_v5  ;;  %v2476_v19 = vadd.f32 %v2475_v17, %v2474_v13 }
 0x114   :  { %v308_v20 = vadd.f32 %v2412_v16, %v3196_v2  ;;  %v349_v22 = vmax.f32 %v305_v15, 0.0 }
 0x115   :  { %v735_v21 = vadd.f32 %v2476_v19, %v3201_v5  ;;  %v776_v25 = vmax.f32 %v732_v18, 0.0 }
 0x116   :  { %v350_v23 = vmax.f32 %v308_v20, 0.0  ;;  %v2413_v24 = vpop.f32.mrb[16].mxu0 }
 0x117   :  { %v777_v26 = vmax.f32 %v735_v21, 0.0  ;;  %v2477_v27 = vpop.f32.mrb[16].mxu1  ;;  %v2414_v28 = vpop.f32.mrb[17].mxu0 }
 0x118   :  { %v2200_v29 = vpack.c.bf16 %v350_v23, %v349_v22  ;;  %v2415_v30 = vadd.f32 %v2414_v28, %v2413_v24  ;;  %v2478_v31 = vpop.f32.mrb[17].mxu1  ;;  %v2416_v32 = vpop.f32.mrb[18].mxu0 }
 0x119   :  { %v2240_v33 = vpack.c.bf16 %v777_v26, %v776_v25  ;;  %v2479_v34 = vadd.f32 %v2478_v31, %v2477_v27  ;;  %v2480_v35 = vpop.f32.mrb[18].mxu1  ;;  %v2417_v36 = vpop.f32.mrb[19].mxu0 }
 0x11a   :  { %2344 = vst [vmem:[%s3376_s3 + $0x18] sm:$0xff] %v2200_v29   ;;  %v313_v37 = vadd.f32 %v2415_v30, %v3196_v2  ;;  %v2418_v38 = vadd.f32 %v2417_v36, %v2416_v32  ;;  %v2481_v39 = vpop.f32.mrb[19].mxu1 }
 0x11b   :  { %2352 = vst [vmem:[%s3376_s3 + $0x58] sm:$0xff] %v2240_v33   ;;  %v740_v40 = vadd.f32 %v2479_v34, %v3201_v5  ;;  %v2482_v41 = vadd.f32 %v2481_v39, %v2480_v35 }
 0x11c   :  { %v316_v42 = vadd.f32 %v2418_v38, %v3196_v2  ;;  %v351_v44 = vmax.f32 %v313_v37, 0.0 }
 0x11d   :  { %v743_v43 = vadd.f32 %v2482_v41, %v3201_v5  ;;  %v778_v47 = vmax.f32 %v740_v40, 0.0 }
 0x11e   :  { %v352_v45 = vmax.f32 %v316_v42, 0.0  ;;  %v2419_v46 = vpop.f32.mrb[20].mxu0 }
 0x11f   :  { %v779_v48 = vmax.f32 %v743_v43, 0.0  ;;  %v2483_v49 = vpop.f32.mrb[20].mxu1  ;;  %v2420_v50 = vpop.f32.mrb[21].mxu0 }
 0x120   :  { %v2205_v51 = vpack.c.bf16 %v352_v45, %v351_v44  ;;  %v2421_v52 = vadd.f32 %v2420_v50, %v2419_v46  ;;  %v2484_v53 = vpop.f32.mrb[21].mxu1  ;;  %v2422_v54 = vpop.f32.mrb[22].mxu0 }
 0x121   :  { %v2245_v55 = vpack.c.bf16 %v779_v48, %v778_v47  ;;  %v2485_v56 = vadd.f32 %v2484_v53, %v2483_v49  ;;  %v2486_v57 = vpop.f32.mrb[22].mxu1  ;;  %v2423_v58 = vpop.f32.mrb[23].mxu0 }
 0x122   :  { %2345 = vst [vmem:[%s3376_s3 + $0x20] sm:$0xff] %v2205_v51   ;;  %v321_v59 = vadd.f32 %v2421_v52, %v3196_v2  ;;  %v2424_v60 = vadd.f32 %v2423_v58, %v2422_v54  ;;  %v2487_v61 = vpop.f32.mrb[23].mxu1  ;;  %v3280_v54 = vld [vmem:[%s3375_s2 + $0x2] ss:$0 sm:$0xff] }
 0x123   :  { %2353 = vst [vmem:[%s3376_s3 + $0x60] sm:$0xff] %v2245_v55   ;;  %v748_v62 = vadd.f32 %v2485_v56, %v3201_v5  ;;  %v2488_v63 = vadd.f32 %v2487_v61, %v2486_v57 }
 0x124   :  { %v324_v0 = vadd.f32 %v2424_v60, %v3196_v2  ;;  %v353_v3 = vmax.f32 %v321_v59, 0.0 }
 0x125   :  { %v751_v1 = vadd.f32 %v2488_v63, %v3201_v5  ;;  %v780_v7 = vmax.f32 %v748_v62, 0.0 }
 0x126   :  { %v354_v4 = vmax.f32 %v324_v0, 0.0  ;;  %v2425_v6 = vpop.f32.mrb[24].mxu0 }
 0x127   :  { %v781_v8 = vmax.f32 %v751_v1, 0.0  ;;  %v2489_v9 = vpop.f32.mrb[24].mxu1  ;;  %v2426_v10 = vpop.f32.mrb[25].mxu0 }
 0x128   :  { %v2210_v11 = vpack.c.bf16 %v354_v4, %v353_v3  ;;  %v2427_v12 = vadd.f32 %v2426_v10, %v2425_v6  ;;  %v2490_v13 = vpop.f32.mrb[25].mxu1  ;;  %v2428_v14 = vpop.f32.mrb[26].mxu0 }
 0x129   :  { %v2250_v15 = vpack.c.bf16 %v781_v8, %v780_v7  ;;  %v2491_v16 = vadd.f32 %v2490_v13, %v2489_v9  ;;  %v2492_v17 = vpop.f32.mrb[26].mxu1  ;;  %v2429_v18 = vpop.f32.mrb[27].mxu0 }
 0x12a   :  { %2346 = vst [vmem:[%s3376_s3 + $0x28] sm:$0xff] %v2210_v11   ;;  %v329_v19 = vadd.f32 %v2427_v12, %v3196_v2  ;;  %v2430_v20 = vadd.f32 %v2429_v18, %v2428_v14  ;;  %v2493_v21 = vpop.f32.mrb[27].mxu1 }
 0x12b   :  { %2354 = vst [vmem:[%s3376_s3 + $0x68] sm:$0xff] %v2250_v15   ;;  %v756_v22 = vadd.f32 %v2491_v16, %v3201_v5  ;;  %v2494_v23 = vadd.f32 %v2493_v21, %v2492_v17 }
 0x12c   :  { %v332_v24 = vadd.f32 %v2430_v20, %v3196_v2  ;;  %v355_v26 = vmax.f32 %v329_v19, 0.0 }
 0x12d   :  { %v759_v25 = vadd.f32 %v2494_v23, %v3201_v5  ;;  %v782_v29 = vmax.f32 %v756_v22, 0.0 }
 0x12e   :  { %v356_v27 = vmax.f32 %v332_v24, 0.0  ;;  %v2431_v28 = vpop.f32.mrb[28].mxu0 }
 0x12f   :  { %v783_v30 = vmax.f32 %v759_v25, 0.0  ;;  %v2495_v31 = vpop.f32.mrb[28].mxu1  ;;  %v2432_v32 = vpop.f32.mrb[29].mxu0 }
 0x130   :  { %v2215_v33 = vpack.c.bf16 %v356_v27, %v355_v26  ;;  %v2433_v34 = vadd.f32 %v2432_v32, %v2431_v28  ;;  %v2496_v35 = vpop.f32.mrb[29].mxu1  ;;  %v2434_v36 = vpop.f32.mrb[30].mxu0 }
 0x131   :  { %v2255_v37 = vpack.c.bf16 %v783_v30, %v782_v29  ;;  %v2497_v38 = vadd.f32 %v2496_v35, %v2495_v31  ;;  %v2498_v39 = vpop.f32.mrb[30].mxu1  ;;  %v2435_v40 = vpop.f32.mrb[31].mxu0 }
 0x132   :  { %2347 = vst [vmem:[%s3376_s3 + $0x30] sm:$0xff] %v2215_v33   ;;  %v337_v41 = vadd.f32 %v2433_v34, %v3196_v2  ;;  %v2436_v42 = vadd.f32 %v2435_v40, %v2434_v36  ;;  %v2499_v43 = vpop.f32.mrb[31].mxu1 }
 0x133   :  { %2355 = vst [vmem:[%s3376_s3 + $0x70] sm:$0xff] %v2255_v37   ;;  %v764_v44 = vadd.f32 %v2497_v38, %v3201_v5  ;;  %v2500_v45 = vadd.f32 %v2499_v43, %v2498_v39 }
 0x134   :  { %v340_v46 = vadd.f32 %v2436_v42, %v3196_v2  ;;  %v357_v48 = vmax.f32 %v337_v41, 0.0  ;;  %v3285_v2 = vld [vmem:[%s3375_s2 + $0x3] ss:$0 sm:$0xff] }
 0x135   :  { %v767_v47 = vadd.f32 %v2500_v45, %v3201_v5  ;;  %v784_v51 = vmax.f32 %v764_v44, 0.0 }
 0x136   :  { %v358_v49 = vmax.f32 %v340_v46, 0.0  ;;  %v2517_v50 = vpop.f32.mrb[32].mxu0 }
 0x137   :  { %v785_v52 = vmax.f32 %v767_v47, 0.0  ;;  %v2581_v53 = vpop.f32.mrb[32].mxu1  ;;  %v2518_v55 = vpop.f32.mrb[33].mxu0 }
 0x138   :  { %v2220_v56 = vpack.c.bf16 %v358_v49, %v357_v48  ;;  %v2519_v57 = vadd.f32 %v2518_v55, %v2517_v50  ;;  %v2582_v5 = vpop.f32.mrb[33].mxu1  ;;  %v2520_v58 = vpop.f32.mrb[34].mxu0 }
 0x139   :  { %v2260_v59 = vpack.c.bf16 %v785_v52, %v784_v51  ;;  %v2583_v60 = vadd.f32 %v2582_v5, %v2581_v53  ;;  %v2584_v61 = vpop.f32.mrb[34].mxu1  ;;  %v2521_v62 = vpop.f32.mrb[35].mxu0 }
 0x13a   :  { %2348 = vst [vmem:[%s3376_s3 + $0x38] sm:$0xff] %v2220_v56   ;;  %v1136_v63 = vadd.f32 %v2519_v57, %v3280_v54  ;;  %v2522_v0 = vadd.f32 %v2521_v62, %v2520_v58  ;;  %v2585_v1 = vpop.f32.mrb[35].mxu1 }
 0x13b   :  { %2356 = vst [vmem:[%s3376_s3 + $0x78] sm:$0xff] %v2260_v59   ;;  %v1564_v3 = vadd.f32 %v2583_v60, %v3285_v2  ;;  %v2586_v4 = vadd.f32 %v2585_v1, %v2584_v61 }
 0x13c   :  { %v1139_v6 = vadd.f32 %v2522_v0, %v3280_v54  ;;  %v1198_v8 = vmax.f32 %v1136_v63, 0.0 }
 0x13d   :  { %v1567_v7 = vadd.f32 %v2586_v4, %v3285_v2  ;;  %v1626_v11 = vmax.f32 %v1564_v3, 0.0 }
 0x13e   :  { %v1199_v9 = vmax.f32 %v1139_v6, 0.0  ;;  %v2523_v10 = vpop.f32.mrb[36].mxu0 }
 0x13f   :  { %v1627_v12 = vmax.f32 %v1567_v7, 0.0  ;;  %v2587_v13 = vpop.f32.mrb[36].mxu1  ;;  %v2524_v14 = vpop.f32.mrb[37].mxu0 }
 0x140   :  { %v2265_v15 = vpack.c.bf16 %v1199_v9, %v1198_v8  ;;  %v2525_v16 = vadd.f32 %v2524_v14, %v2523_v10  ;;  %v2588_v17 = vpop.f32.mrb[37].mxu1  ;;  %v2526_v18 = vpop.f32.mrb[38].mxu0 }
 0x141   :  { %v2305_v19 = vpack.c.bf16 %v1627_v12, %v1626_v11  ;;  %v2589_v20 = vadd.f32 %v2588_v17, %v2587_v13  ;;  %v2590_v21 = vpop.f32.mrb[38].mxu1  ;;  %v2527_v22 = vpop.f32.mrb[39].mxu0 }
 0x142   :  { %2357 = vst [vmem:[%s3376_s3 + $0x80] sm:$0xff] %v2265_v15   ;;  %v1144_v23 = vadd.f32 %v2525_v16, %v3280_v54  ;;  %v2528_v24 = vadd.f32 %v2527_v22, %v2526_v18  ;;  %v2591_v25 = vpop.f32.mrb[39].mxu1 }
 0x143   :  { %2365 = vst [vmem:[%s3376_s3 + $0xc0] sm:$0xff] %v2305_v19   ;;  %v1572_v26 = vadd.f32 %v2589_v20, %v3285_v2  ;;  %v2592_v27 = vadd.f32 %v2591_v25, %v2590_v21 }
 0x144   :  { %v1147_v28 = vadd.f32 %v2528_v24, %v3280_v54  ;;  %v1200_v30 = vmax.f32 %v1144_v23, 0.0 }
 0x145   :  { %v1575_v29 = vadd.f32 %v2592_v27, %v3285_v2  ;;  %v1628_v33 = vmax.f32 %v1572_v26, 0.0 }
 0x146   :  { %v1201_v31 = vmax.f32 %v1147_v28, 0.0  ;;  %v2529_v32 = vpop.f32.mrb[40].mxu0 }
 0x147   :  { %v1629_v34 = vmax.f32 %v1575_v29, 0.0  ;;  %v2593_v35 = vpop.f32.mrb[40].mxu1  ;;  %v2530_v36 = vpop.f32.mrb[41].mxu0 }
 0x148   :  { %v2270_v37 = vpack.c.bf16 %v1201_v31, %v1200_v30  ;;  %v2531_v38 = vadd.f32 %v2530_v36, %v2529_v32  ;;  %v2594_v39 = vpop.f32.mrb[41].mxu1  ;;  %v2532_v40 = vpop.f32.mrb[42].mxu0 }
 0x149   :  { %v2310_v41 = vpack.c.bf16 %v1629_v34, %v1628_v33  ;;  %v2595_v42 = vadd.f32 %v2594_v39, %v2593_v35  ;;  %v2596_v43 = vpop.f32.mrb[42].mxu1  ;;  %v2533_v44 = vpop.f32.mrb[43].mxu0 }
 0x14a   :  { %2358 = vst [vmem:[%s3376_s3 + $0x88] sm:$0xff] %v2270_v37   ;;  %v1152_v45 = vadd.f32 %v2531_v38, %v3280_v54  ;;  %v2534_v46 = vadd.f32 %v2533_v44, %v2532_v40  ;;  %v2597_v47 = vpop.f32.mrb[43].mxu1 }
 0x14b   :  { %2366 = vst [vmem:[%s3376_s3 + $0xc8] sm:$0xff] %v2310_v41   ;;  %v1580_v48 = vadd.f32 %v2595_v42, %v3285_v2  ;;  %v2598_v49 = vadd.f32 %v2597_v47, %v2596_v43 }
 0x14c   :  { %v1155_v50 = vadd.f32 %v2534_v46, %v3280_v54  ;;  %v1202_v52 = vmax.f32 %v1152_v45, 0.0 }
 0x14d   :  { %v1583_v51 = vadd.f32 %v2598_v49, %v3285_v2  ;;  %v1630_v56 = vmax.f32 %v1580_v48, 0.0 }
 0x14e   :  { %v1203_v53 = vmax.f32 %v1155_v50, 0.0  ;;  %v2535_v55 = vpop.f32.mrb[44].mxu0 }
 0x14f   :  { %v1631_v57 = vmax.f32 %v1583_v51, 0.0  ;;  %v2599_v5 = vpop.f32.mrb[44].mxu1  ;;  %v2536_v58 = vpop.f32.mrb[45].mxu0 }
 0x150   :  { %v2275_v59 = vpack.c.bf16 %v1203_v53, %v1202_v52  ;;  %v2537_v60 = vadd.f32 %v2536_v58, %v2535_v55  ;;  %v2600_v61 = vpop.f32.mrb[45].mxu1  ;;  %v2538_v62 = vpop.f32.mrb[46].mxu0 }
 0x151   :  { %v2315_v63 = vpack.c.bf16 %v1631_v57, %v1630_v56  ;;  %v2601_v0 = vadd.f32 %v2600_v61, %v2599_v5  ;;  %v2602_v1 = vpop.f32.mrb[46].mxu1  ;;  %v2539_v3 = vpop.f32.mrb[47].mxu0 }
 0x152   :  { %2359 = vst [vmem:[%s3376_s3 + $0x90] sm:$0xff] %v2275_v59   ;;  %v1160_v4 = vadd.f32 %v2537_v60, %v3280_v54  ;;  %v2540_v6 = vadd.f32 %v2539_v3, %v2538_v62  ;;  %v2603_v7 = vpop.f32.mrb[47].mxu1 }
 0x153   :  { %2367 = vst [vmem:[%s3376_s3 + $0xd0] sm:$0xff] %v2315_v63   ;;  %v1588_v8 = vadd.f32 %v2601_v0, %v3285_v2  ;;  %v2604_v9 = vadd.f32 %v2603_v7, %v2602_v1 }
 0x154   :  { %v1163_v10 = vadd.f32 %v2540_v6, %v3280_v54  ;;  %v1204_v12 = vmax.f32 %v1160_v4, 0.0 }
 0x155   :  { %v1591_v11 = vadd.f32 %v2604_v9, %v3285_v2  ;;  %v1632_v15 = vmax.f32 %v1588_v8, 0.0 }
 0x156   :  { %v1205_v13 = vmax.f32 %v1163_v10, 0.0  ;;  %v2541_v14 = vpop.f32.mrb[48].mxu0 }
 0x157   :  { %v1633_v16 = vmax.f32 %v1591_v11, 0.0  ;;  %v2605_v17 = vpop.f32.mrb[48].mxu1  ;;  %v2542_v18 = vpop.f32.mrb[49].mxu0 }
 0x158   :  { %v2280_v19 = vpack.c.bf16 %v1205_v13, %v1204_v12  ;;  %v2543_v20 = vadd.f32 %v2542_v18, %v2541_v14  ;;  %v2606_v21 = vpop.f32.mrb[49].mxu1  ;;  %v2544_v22 = vpop.f32.mrb[50].mxu0 }
 0x159   :  { %v2320_v23 = vpack.c.bf16 %v1633_v16, %v1632_v15  ;;  %v2607_v24 = vadd.f32 %v2606_v21, %v2605_v17  ;;  %v2608_v25 = vpop.f32.mrb[50].mxu1  ;;  %v2545_v26 = vpop.f32.mrb[51].mxu0 }
 0x15a   :  { %2360 = vst [vmem:[%s3376_s3 + $0x98] sm:$0xff] %v2280_v19   ;;  %v1168_v27 = vadd.f32 %v2543_v20, %v3280_v54  ;;  %v2546_v28 = vadd.f32 %v2545_v26, %v2544_v22  ;;  %v2609_v29 = vpop.f32.mrb[51].mxu1 }
 0x15b   :  { %2368 = vst [vmem:[%s3376_s3 + $0xd8] sm:$0xff] %v2320_v23   ;;  %v1596_v30 = vadd.f32 %v2607_v24, %v3285_v2  ;;  %v2610_v31 = vadd.f32 %v2609_v29, %v2608_v25 }
 0x15c   :  { %v1171_v32 = vadd.f32 %v2546_v28, %v3280_v54  ;;  %v1206_v34 = vmax.f32 %v1168_v27, 0.0 }
 0x15d   :  { %v1599_v33 = vadd.f32 %v2610_v31, %v3285_v2  ;;  %v1634_v37 = vmax.f32 %v1596_v30, 0.0 }
 0x15e   :  { %v1207_v35 = vmax.f32 %v1171_v32, 0.0  ;;  %v2547_v36 = vpop.f32.mrb[52].mxu0 }
 0x15f   :  { %v1635_v38 = vmax.f32 %v1599_v33, 0.0  ;;  %v2611_v39 = vpop.f32.mrb[52].mxu1  ;;  %v2548_v40 = vpop.f32.mrb[53].mxu0 }
 0x160   :  { %v2285_v41 = vpack.c.bf16 %v1207_v35, %v1206_v34  ;;  %v2549_v42 = vadd.f32 %v2548_v40, %v2547_v36  ;;  %v2612_v43 = vpop.f32.mrb[53].mxu1  ;;  %v2550_v44 = vpop.f32.mrb[54].mxu0 }
 0x161   :  { %v2325_v45 = vpack.c.bf16 %v1635_v38, %v1634_v37  ;;  %v2613_v46 = vadd.f32 %v2612_v43, %v2611_v39  ;;  %v2614_v47 = vpop.f32.mrb[54].mxu1  ;;  %v2551_v48 = vpop.f32.mrb[55].mxu0 }
 0x162   :  { %2361 = vst [vmem:[%s3376_s3 + $0xa0] sm:$0xff] %v2285_v41   ;;  %v1176_v49 = vadd.f32 %v2549_v42, %v3280_v54  ;;  %v2552_v50 = vadd.f32 %v2551_v48, %v2550_v44  ;;  %v2615_v51 = vpop.f32.mrb[55].mxu1 }
 0x163   :  { %2369 = vst [vmem:[%s3376_s3 + $0xe0] sm:$0xff] %v2325_v45   ;;  %v1604_v52 = vadd.f32 %v2613_v46, %v3285_v2  ;;  %v2616_v53 = vadd.f32 %v2615_v51, %v2614_v47 }
 0x164   :  { %v1179_v55 = vadd.f32 %v2552_v50, %v3280_v54  ;;  %v1208_v57 = vmax.f32 %v1176_v49, 0.0 }
 0x165   :  { %v1607_v56 = vadd.f32 %v2616_v53, %v3285_v2  ;;  %v1636_v59 = vmax.f32 %v1604_v52, 0.0 }
 0x166   :  { %v1209_v5 = vmax.f32 %v1179_v55, 0.0  ;;  %v2553_v58 = vpop.f32.mrb[56].mxu0 }
 0x167   :  { %v1637_v60 = vmax.f32 %v1607_v56, 0.0  ;;  %v2617_v61 = vpop.f32.mrb[56].mxu1  ;;  %v2554_v62 = vpop.f32.mrb[57].mxu0 }
 0x168   :  { %v2290_v63 = vpack.c.bf16 %v1209_v5, %v1208_v57  ;;  %v2555_v0 = vadd.f32 %v2554_v62, %v2553_v58  ;;  %v2618_v1 = vpop.f32.mrb[57].mxu1  ;;  %v2556_v3 = vpop.f32.mrb[58].mxu0 }
 0x169   :  { %v2330_v4 = vpack.c.bf16 %v1637_v60, %v1636_v59  ;;  %v2619_v6 = vadd.f32 %v2618_v1, %v2617_v61  ;;  %v2620_v7 = vpop.f32.mrb[58].mxu1  ;;  %v2557_v8 = vpop.f32.mrb[59].mxu0 }
 0x16a   :  { %2362 = vst [vmem:[%s3376_s3 + $0xa8] sm:$0xff] %v2290_v63   ;;  %v1184_v9 = vadd.f32 %v2555_v0, %v3280_v54  ;;  %v2558_v10 = vadd.f32 %v2557_v8, %v2556_v3  ;;  %v2621_v11 = vpop.f32.mrb[59].mxu1 }
 0x16b   :  { %2370 = vst [vmem:[%s3376_s3 + $0xe8] sm:$0xff] %v2330_v4   ;;  %v1612_v12 = vadd.f32 %v2619_v6, %v3285_v2  ;;  %v2622_v13 = vadd.f32 %v2621_v11, %v2620_v7 }
 0x16c   :  { %v1187_v14 = vadd.f32 %v2558_v10, %v3280_v54  ;;  %v1210_v16 = vmax.f32 %v1184_v9, 0.0 }
 0x16d   :  { %v1615_v15 = vadd.f32 %v2622_v13, %v3285_v2  ;;  %v1638_v19 = vmax.f32 %v1612_v12, 0.0 }
 0x16e   :  { %v1211_v17 = vmax.f32 %v1187_v14, 0.0  ;;  %v2559_v18 = vpop.f32.mrb[60].mxu0 }
 0x16f   :  { %v1639_v20 = vmax.f32 %v1615_v15, 0.0  ;;  %v2623_v21 = vpop.f32.mrb[60].mxu1  ;;  %v2560_v22 = vpop.f32.mrb[61].mxu0 }
 0x170   :  { %v2295_v23 = vpack.c.bf16 %v1211_v17, %v1210_v16  ;;  %v2561_v24 = vadd.f32 %v2560_v22, %v2559_v18  ;;  %v2624_v25 = vpop.f32.mrb[61].mxu1  ;;  %v2562_v26 = vpop.f32.mrb[62].mxu0 }
 0x171   :  { %v2335_v27 = vpack.c.bf16 %v1639_v20, %v1638_v19  ;;  %v2625_v28 = vadd.f32 %v2624_v25, %v2623_v21  ;;  %v2626_v29 = vpop.f32.mrb[62].mxu1  ;;  %v2563_v30 = vpop.f32.mrb[63].mxu0 }
 0x172   :  { %2363 = vst [vmem:[%s3376_s3 + $0xb0] sm:$0xff] %v2295_v23   ;;  %v1192_v31 = vadd.f32 %v2561_v24, %v3280_v54  ;;  %v2564_v32 = vadd.f32 %v2563_v30, %v2562_v26  ;;  %v2627_v33 = vpop.f32.mrb[63].mxu1 }
 0x173   :  { %2371 = vst [vmem:[%s3376_s3 + $0xf0] sm:$0xff] %v2335_v27   ;;  %v1620_v34 = vadd.f32 %v2625_v28, %v3285_v2  ;;  %v2628_v35 = vadd.f32 %v2627_v33, %v2626_v29 }
 0x174   :  { %v1195_v36 = vadd.f32 %v2564_v32, %v3280_v54  ;;  %v1212_v38 = vmax.f32 %v1192_v31, 0.0 }
 0x175   :  { %v1623_v37 = vadd.f32 %v2628_v35, %v3285_v2  ;;  %v1640_v40 = vmax.f32 %v1620_v34, 0.0 }
 0x176   :  { %v1213_v39 = vmax.f32 %v1195_v36, 0.0 }
 0x177   :  { %v1641_v41 = vmax.f32 %v1623_v37, 0.0 }
 0x178   :  { %v2300_v42 = vpack.c.bf16 %v1213_v39, %v1212_v38 }
 0x179   :  { %v2340_v43 = vpack.c.bf16 %v1641_v41, %v1640_v40 }
 0x17a   :  { %2364 = vst [vmem:[%s3376_s3 + $0xb8] sm:$0xff] %v2300_v42  }
 0x17b   :  { %2372 = vst [vmem:[%s3376_s3 + $0xf8] sm:$0xff] %v2340_v43  }

// kernel: vae_forward.13
= control target key start
LH: loop header
LB: loop body
LE: loop exit
PB: predicated region body
PF: predicated region fallthrough
CT: control target
= control target key end

     0   :  { %s6282_s12 = smov 0   ;;  %s6284_s13 = smov 0   ;;  %s7347_s0 = inlined_call_operand.vmem [shape: bf16[4,512,128], index: 0, kind: input, shape index: {}]   ;;  %s7348_s1 = inlined_call_operand.vmem [shape: bf16[4,128,128], index: 1, kind: input, shape index: {}]   ;;  %s7349_s2 = inlined_call_operand.vmem [shape: f32[4,1,128], index: 2, kind: input, shape index: {}]   ;;  %s7350_s3 = inlined_call_operand.vmem [shape: bf16[4,512,128], index: 3, kind: output, shape index: {}]  }
   0x1   :  { %s6286_s14 = smov 0  }
   0x2 LB: > { %s4191_s15 = sadd.s32 4294967295, %s6260_s14   ;;  %s6299_s16 = sadd.s32 1, %s6260_s14   ;;  %s6260_s14 = sphi %s6286_s14, %s7392_s14   ;;  %s6256_s13 = sphi %s6284_s13, %s7391_s13   ;;  %s6252_s12 = sphi %s6282_s12, %s7390_s12  }
   0x3   : > { %s17_s17 = ssub.s32 %s6260_s14, %s6299_s16  ;;  %s20_s18 = sadd.s32 1, %s6256_s13 }
   0x4   : > { %p18_p0 = scmp.eq.s32.totalorder %s17_s17, 0  ;;  %p27_p1 = scmp.ne.s32.totalorder %s6256_s13, %s6252_s12 }
   0x5   : > { %p28_p2 = scmp.eq.s32.totalorder %s6260_s14, 0  ;;  %p99_p3 = scmp.eq.s32.totalorder %s4191_s15, 1 }
   0x6   : > { %s6310_s19 = scalar_select %p18_p0, %s6256_s13, %s20_s18  }
   0x7   : > { %p29_p4 = por %p28_p2, %p27_p1  ;;  %p6312_p5 = por %p99_p3, %p27_p1 }
   0x8   : > { %p4194_p6 = scmp.ge.s32.totalorder %s6260_s14, 2 }
   0xa   : > { %127 = sbr.rel (%p4194_p6) target bundleno = 53 (0x35), region = 24 }
  0x11   : > { %130 = sbr.rel (!%p29_p4) target bundleno = 53 (0x35), region = 28  ;;  %s132_s21 = sand.u32 (%p29_p4), 1, %s6256_s13  }
  0x12   : > { %s4805_s22 = sshll.u32 (%p29_p4), %s6260_s14, 7  ;;  %s4195_s23 = sshll.u32 (%p29_p4), %s132_s21, 9 }
  0x13   : > { %s6322_s26 = scalar_lea.vmem (%p29_p4), %s7347_s0, %s4805_s22  ;;  %s6327_s27 = scalar_lea.vmem (%p29_p4), [#allocation2], %s4195_s23 }
  0x14   : > { %v153_v0 = vld [vmem:[%s6322_s26] sm:$0xff] (%p29_p4)   ;;  %v157_v1 = vld [vmem:[%s6322_s26 + $0x8] sm:$0xff] (%p29_p4)   ;;  %v161_v2 = vld [vmem:[%s6322_s26 + $0x10] sm:$0xff] (%p29_p4)  }
  0x15   : > { %154 = vst [vmem:[%s6327_s27] sm:$0xff] (%p29_p4), %v153_v0   ;;  %158 = vst [vmem:[%s6327_s27 + $0x8] sm:$0xff] (%p29_p4), %v157_v1   ;;  %v165_v3 = vld [vmem:[%s6322_s26 + $0x18] sm:$0xff] (%p29_p4)   ;;  %v169_v4 = vld [vmem:[%s6322_s26 + $0x20] sm:$0xff] (%p29_p4)  }
  0x16   : > { %162 = vst [vmem:[%s6327_s27 + $0x10] sm:$0xff] (%p29_p4), %v161_v2   ;;  %v173_v5 = vld [vmem:[%s6322_s26 + $0x28] sm:$0xff] (%p29_p4)   ;;  %166 = vst [vmem:[%s6327_s27 + $0x18] sm:$0xff] (%p29_p4), %v165_v3   ;;  %v177_v6 = vld [vmem:[%s6322_s26 + $0x30] sm:$0xff] (%p29_p4)  }
  0x17   : > { %170 = vst [vmem:[%s6327_s27 + $0x20] sm:$0xff] (%p29_p4), %v169_v4   ;;  %174 = vst [vmem:[%s6327_s27 + $0x28] sm:$0xff] (%p29_p4), %v173_v5   ;;  %v181_v7 = vld [vmem:[%s6322_s26 + $0x38] sm:$0xff] (%p29_p4)   ;;  %v185_v8 = vld [vmem:[%s6322_s26 + $0x40] sm:$0xff] (%p29_p4)  }
  0x18   : > { %178 = vst [vmem:[%s6327_s27 + $0x30] sm:$0xff] %v177_v6   ;;  %182 = vst [vmem:[%s6327_s27 + $0x38] sm:$0xff] %v181_v7   ;;  %v189_v9 = vld [vmem:[%s6322_s26 + $0x48] sm:$0xff]   ;;  %v193_v10 = vld [vmem:[%s6322_s26 + $0x50] sm:$0xff]  }
  0x19   : > { %186 = vst [vmem:[%s6327_s27 + $0x40] sm:$0xff] %v185_v8   ;;  %v197_v11 = vld [vmem:[%s6322_s26 + $0x58] sm:$0xff]   ;;  %190 = vst [vmem:[%s6327_s27 + $0x48] sm:$0xff] %v189_v9   ;;  %v201_v12 = vld [vmem:[%s6322_s26 + $0x60] sm:$0xff]  }
  0x1a   : > { %194 = vst [vmem:[%s6327_s27 + $0x50] sm:$0xff] %v193_v10   ;;  %198 = vst [vmem:[%s6327_s27 + $0x58] sm:$0xff] %v197_v11   ;;  %v205_v13 = vld [vmem:[%s6322_s26 + $0x68] sm:$0xff]   ;;  %v209_v14 = vld [vmem:[%s6322_s26 + $0x70] sm:$0xff]  }
  0x1b   : > { %202 = vst [vmem:[%s6327_s27 + $0x60] sm:$0xff] %v201_v12   ;;  %206 = vst [vmem:[%s6327_s27 + $0x68] sm:$0xff] %v205_v13   ;;  %v213_v15 = vld [vmem:[%s6322_s26 + $0x78] sm:$0xff]   ;;  %v217_v16 = vld [vmem:[%s6322_s26 + $0x100] sm:$0xff]  }
  0x1c   : > { %210 = vst [vmem:[%s6327_s27 + $0x70] sm:$0xff] %v209_v14   ;;  %v221_v17 = vld [vmem:[%s6322_s26 + $0x108] sm:$0xff]   ;;  %214 = vst [vmem:[%s6327_s27 + $0x78] sm:$0xff] %v213_v15   ;;  %v225_v18 = vld [vmem:[%s6322_s26 + $0x110] sm:$0xff]  }
  0x1d   : > { %218 = vst [vmem:[%s6327_s27 + $0x80] sm:$0xff] %v217_v16   ;;  %222 = vst [vmem:[%s6327_s27 + $0x88] sm:$0xff] %v221_v17   ;;  %v229_v19 = vld [vmem:[%s6322_s26 + $0x118] sm:$0xff]   ;;  %v233_v20 = vld [vmem:[%s6322_s26 + $0x120] sm:$0xff]  }
  0x1e   : > { %226 = vst [vmem:[%s6327_s27 + $0x90] sm:$0xff] %v225_v18   ;;  %230 = vst [vmem:[%s6327_s27 + $0x98] sm:$0xff] %v229_v19   ;;  %v237_v21 = vld [vmem:[%s6322_s26 + $0x128] sm:$0xff]   ;;  %v241_v22 = vld [vmem:[%s6322_s26 + $0x130] sm:$0xff]  }
  0x1f   : > { %234 = vst [vmem:[%s6327_s27 + $0xa0] sm:$0xff] %v233_v20   ;;  %v245_v23 = vld [vmem:[%s6322_s26 + $0x138] sm:$0xff]   ;;  %238 = vst [vmem:[%s6327_s27 + $0xa8] sm:$0xff] %v237_v21   ;;  %v249_v24 = vld [vmem:[%s6322_s26 + $0x140] sm:$0xff]  }
  0x20   : > { %242 = vst [vmem:[%s6327_s27 + $0xb0] sm:$0xff] %v241_v22   ;;  %246 = vst [vmem:[%s6327_s27 + $0xb8] sm:$0xff] %v245_v23   ;;  %v253_v25 = vld [vmem:[%s6322_s26 + $0x148] sm:$0xff]   ;;  %v257_v26 = vld [vmem:[%s6322_s26 + $0x150] sm:$0xff]  }
  0x21   : > { %250 = vst [vmem:[%s6327_s27 + $0xc0] sm:$0xff] %v249_v24   ;;  %254 = vst [vmem:[%s6327_s27 + $0xc8] sm:$0xff] %v253_v25   ;;  %v261_v27 = vld [vmem:[%s6322_s26 + $0x158] sm:$0xff]   ;;  %v265_v28 = vld [vmem:[%s6322_s26 + $0x160] sm:$0xff]  }
  0x22   : > { %258 = vst [vmem:[%s6327_s27 + $0xd0] sm:$0xff] %v257_v26   ;;  %v269_v29 = vld [vmem:[%s6322_s26 + $0x168] sm:$0xff]   ;;  %262 = vst [vmem:[%s6327_s27 + $0xd8] sm:$0xff] %v261_v27   ;;  %v273_v30 = vld [vmem:[%s6322_s26 + $0x170] sm:$0xff]  }
  0x23   : > { %266 = vst [vmem:[%s6327_s27 + $0xe0] sm:$0xff] %v265_v28   ;;  %270 = vst [vmem:[%s6327_s27 + $0xe8] sm:$0xff] %v269_v29   ;;  %v277_v31 = vld [vmem:[%s6322_s26 + $0x178] sm:$0xff]   ;;  %v281_v32 = vld [vmem:[%s6322_s26 + $0x200] sm:$0xff]  }
  0x24   : > { %274 = vst [vmem:[%s6327_s27 + $0xf0] sm:$0xff] %v273_v30   ;;  %278 = vst [vmem:[%s6327_s27 + $0xf8] sm:$0xff] %v277_v31   ;;  %v285_v33 = vld [vmem:[%s6322_s26 + $0x208] sm:$0xff]   ;;  %v289_v34 = vld [vmem:[%s6322_s26 + $0x210] sm:$0xff]  }
  0x25   : > { %282 = vst [vmem:[%s6327_s27 + $0x100] sm:$0xff] %v281_v32   ;;  %v293_v35 = vld [vmem:[%s6322_s26 + $0x218] sm:$0xff]   ;;  %286 = vst [vmem:[%s6327_s27 + $0x108] sm:$0xff] %v285_v33   ;;  %v297_v36 = vld [vmem:[%s6322_s26 + $0x220] sm:$0xff]  }
  0x26   : > { %290 = vst [vmem:[%s6327_s27 + $0x110] sm:$0xff] %v289_v34   ;;  %294 = vst [vmem:[%s6327_s27 + $0x118] sm:$0xff] %v293_v35   ;;  %v301_v37 = vld [vmem:[%s6322_s26 + $0x228] sm:$0xff]   ;;  %v305_v38 = vld [vmem:[%s6322_s26 + $0x230] sm:$0xff]  }
  0x27   : > { %298 = vst [vmem:[%s6327_s27 + $0x120] sm:$0xff] %v297_v36   ;;  %302 = vst [vmem:[%s6327_s27 + $0x128] sm:$0xff] %v301_v37   ;;  %v309_v39 = vld [vmem:[%s6322_s26 + $0x238] sm:$0xff]   ;;  %v313_v40 = vld [vmem:[%s6322_s26 + $0x240] sm:$0xff]  }
  0x28   : > { %306 = vst [vmem:[%s6327_s27 + $0x130] sm:$0xff] %v305_v38   ;;  %v317_v41 = vld [vmem:[%s6322_s26 + $0x248] sm:$0xff]   ;;  %310 = vst [vmem:[%s6327_s27 + $0x138] sm:$0xff] %v309_v39   ;;  %v321_v42 = vld [vmem:[%s6322_s26 + $0x250] sm:$0xff]  }
  0x29   : > { %314 = vst [vmem:[%s6327_s27 + $0x140] sm:$0xff] %v313_v40   ;;  %318 = vst [vmem:[%s6327_s27 + $0x148] sm:$0xff] %v317_v41   ;;  %v325_v43 = vld [vmem:[%s6322_s26 + $0x258] sm:$0xff]   ;;  %v329_v44 = vld [vmem:[%s6322_s26 + $0x260] sm:$0xff]  }
  0x2a   : > { %322 = vst [vmem:[%s6327_s27 + $0x150] sm:$0xff] %v321_v42   ;;  %326 = vst [vmem:[%s6327_s27 + $0x158] sm:$0xff] %v325_v43   ;;  %v333_v45 = vld [vmem:[%s6322_s26 + $0x268] sm:$0xff]   ;;  %v337_v46 = vld [vmem:[%s6322_s26 + $0x270] sm:$0xff]  }
  0x2b   : > { %330 = vst [vmem:[%s6327_s27 + $0x160] sm:$0xff] %v329_v44   ;;  %v341_v47 = vld [vmem:[%s6322_s26 + $0x278] sm:$0xff]   ;;  %334 = vst [vmem:[%s6327_s27 + $0x168] sm:$0xff] %v333_v45   ;;  %v345_v48 = vld [vmem:[%s6322_s26 + $0x300] sm:$0xff]  }
  0x2c   : > { %338 = vst [vmem:[%s6327_s27 + $0x170] sm:$0xff] %v337_v46   ;;  %342 = vst [vmem:[%s6327_s27 + $0x178] sm:$0xff] %v341_v47   ;;  %v349_v49 = vld [vmem:[%s6322_s26 + $0x308] sm:$0xff]   ;;  %v353_v50 = vld [vmem:[%s6322_s26 + $0x310] sm:$0xff]  }
  0x2d   : > { %346 = vst [vmem:[%s6327_s27 + $0x180] sm:$0xff] %v345_v48   ;;  %350 = vst [vmem:[%s6327_s27 + $0x188] sm:$0xff] %v349_v49   ;;  %v357_v51 = vld [vmem:[%s6322_s26 + $0x318] sm:$0xff]   ;;  %v361_v52 = vld [vmem:[%s6322_s26 + $0x320] sm:$0xff]  }
  0x2e   : > { %354 = vst [vmem:[%s6327_s27 + $0x190] sm:$0xff] %v353_v50   ;;  %v365_v53 = vld [vmem:[%s6322_s26 + $0x328] sm:$0xff]   ;;  %358 = vst [vmem:[%s6327_s27 + $0x198] sm:$0xff] %v357_v51   ;;  %v369_v54 = vld [vmem:[%s6322_s26 + $0x330] sm:$0xff]  }
  0x2f   : > { %362 = vst [vmem:[%s6327_s27 + $0x1a0] sm:$0xff] %v361_v52   ;;  %366 = vst [vmem:[%s6327_s27 + $0x1a8] sm:$0xff] %v365_v53   ;;  %v373_v55 = vld [vmem:[%s6322_s26 + $0x338] sm:$0xff]   ;;  %v377_v56 = vld [vmem:[%s6322_s26 + $0x340] sm:$0xff]  }
  0x30   : > { %370 = vst [vmem:[%s6327_s27 + $0x1b0] sm:$0xff] %v369_v54   ;;  %374 = vst [vmem:[%s6327_s27 + $0x1b8] sm:$0xff] %v373_v55   ;;  %v381_v57 = vld [vmem:[%s6322_s26 + $0x348] sm:$0xff]   ;;  %v385_v58 = vld [vmem:[%s6322_s26 + $0x350] sm:$0xff]  }
  0x31   : > { %378 = vst [vmem:[%s6327_s27 + $0x1c0] sm:$0xff] %v377_v56   ;;  %v389_v59 = vld [vmem:[%s6322_s26 + $0x358] sm:$0xff]   ;;  %382 = vst [vmem:[%s6327_s27 + $0x1c8] sm:$0xff] %v381_v57   ;;  %v393_v60 = vld [vmem:[%s6322_s26 + $0x360] sm:$0xff]  }
  0x32   : > { %386 = vst [vmem:[%s6327_s27 + $0x1d0] sm:$0xff] %v385_v58   ;;  %390 = vst [vmem:[%s6327_s27 + $0x1d8] sm:$0xff] %v389_v59   ;;  %v397_v61 = vld [vmem:[%s6322_s26 + $0x368] sm:$0xff]   ;;  %v401_v62 = vld [vmem:[%s6322_s26 + $0x370] sm:$0xff]  }
  0x33   : > { %394 = vst [vmem:[%s6327_s27 + $0x1e0] sm:$0xff] %v393_v60   ;;  %398 = vst [vmem:[%s6327_s27 + $0x1e8] sm:$0xff] %v397_v61   ;;  %v405_v63 = vld [vmem:[%s6322_s26 + $0x378] sm:$0xff]  }
  0x34   : > { %402 = vst [vmem:[%s6327_s27 + $0x1f0] sm:$0xff] %v401_v62   ;;  %406 = vst [vmem:[%s6327_s27 + $0x1f8] sm:$0xff] %v405_v63  }
  0x35 PF: > { %p4198_p7 = scmp.ge.s32.totalorder %s6260_s14, 1  ;;  %p686_p8 = scmp.lt.s32.totalorder %s6260_s14, 3 }
  0x37   : > { %p687_p9 = pnand %p4198_p7, %p686_p8 }
  0x39   : > { %690 = sbr.rel (%p687_p9) target bundleno = 593 (0x251), region = 69 }
  0x40   : > { %v5630_v0 = vld [vmem:[%s7348_s1] sm:$0xff]   ;;  %v5632_v2 = vld [vmem:[%s7348_s1 + $0x8] sm:$0xff]   ;;  %v5634_v4 = vld [vmem:[%s7348_s1 + $0x10] sm:$0xff]   ;;  %s693_s18 = sand.u32 1, %s6252_s12   ;;  %s4934_s23 = sshll.u32 (%p6312_p5), %s4191_s15, 7 }
  0x41   : > { %v5631_v1 = vld [vmem:[%s7348_s1 + $0x40] sm:$0xff]   ;;  %5414 = vmatprep.subr.bf16.mxu0 %v5630_v0  ;;  %v5633_v3 = vld [vmem:[%s7348_s1 + $0x48] sm:$0xff]   ;;  %v5635_v5 = vld [vmem:[%s7348_s1 + $0x50] sm:$0xff]   ;;  %s6481_s25 = sshll.u32 %s693_s18, 9  ;;  %s7210_s20 = scalar_lea.vmem (%p6312_p5), %s7350_s3, %s4934_s23 }
  0x42   : > { %5462 = vmatprep.subr.bf16.mxu1 %v5631_v1  ;;  %5415 = vmatpush3.bf16.msra.mxu0 %v5630_v0  ;;  %v5636_v6 = vld [vmem:[%s7348_s1 + $0x18] sm:$0xff]   ;;  %v5638_v8 = vld [vmem:[%s7348_s1 + $0x20] sm:$0xff]   ;;  %v5640_v10 = vld [vmem:[%s7348_s1 + $0x28] sm:$0xff]   ;;  %s6496_s6 = scalar_lea.vmem [#allocation2], %s6481_s25 }
  0x43   : > { %5463 = vmatpush3.bf16.msra.mxu1 %v5631_v1  ;;  %5416 = vmatprep.subr.bf16.mxu0 %v5632_v2  ;;  %v5637_v7 = vld [vmem:[%s7348_s1 + $0x58] sm:$0xff]   ;;  %v5639_v9 = vld [vmem:[%s7348_s1 + $0x60] sm:$0xff]   ;;  %v5641_v11 = vld [vmem:[%s7348_s1 + $0x68] sm:$0xff]  }
  0x44   : > { %5464 = vmatprep.subr.bf16.mxu1 %v5633_v3  ;;  %v5646_v12 = vld [vmem:[%s6496_s6] sm:$0xff]   ;;  %v5642_v14 = vld [vmem:[%s7348_s1 + $0x30] sm:$0xff]   ;;  %v5644_v16 = vld [vmem:[%s7348_s1 + $0x38] sm:$0xff]  }
  0x45   : > { %v5647_v13 = vld [vmem:[%s6496_s6 + $0x80] sm:$0xff]   ;;  %5430 = vmatprep.mubr.bf16.mxu0 %v5646_v12  ;;  %v5643_v15 = vld [vmem:[%s7348_s1 + $0x70] sm:$0xff]   ;;  %v5645_v17 = vld [vmem:[%s7348_s1 + $0x78] sm:$0xff]  }
  0x46   : > { %5417 = vmatpush3.bf16.msra.mxu0 %v5632_v2  ;;  %5478 = vmatprep.mubr.bf16.mxu1 %v5647_v13  ;;  %v5648_v18 = vld [vmem:[%s6496_s6 + $0x8] sm:$0xff]   ;;  %v5650_v19 = vld [vmem:[%s7348_s1 + $0x80] sm:$0xff]   ;;  %v5652_v22 = vld [vmem:[%s6496_s6 + $0x10] sm:$0xff]  }
  0x47   : > { %5465 = vmatpush3.bf16.msra.mxu1 %v5633_v3  ;;  %5418 = vmatprep.subr.bf16.mxu0 %v5634_v4  ;;  %v5651_v20 = vld [vmem:[%s7348_s1 + $0xc0] sm:$0xff]   ;;  %v5649_v21 = vld [vmem:[%s6496_s6 + $0x88] sm:$0xff]   ;;  %v5653_v23 = vld [vmem:[%s6496_s6 + $0x90] sm:$0xff]  }
  0x48   : > { %5466 = vmatprep.subr.bf16.mxu1 %v5635_v5  ;;  %v5656_v24 = vld [vmem:[%s7348_s1 + $0x88] sm:$0xff]   ;;  %v5654_v26 = vld [vmem:[%s6496_s6 + $0x18] sm:$0xff]   ;;  %v5662_v27 = vld [vmem:[%s7348_s1 + $0x90] sm:$0xff]  }
  0x49   : > { %v5657_v25 = vld [vmem:[%s7348_s1 + $0xc8] sm:$0xff]   ;;  %v5663_v28 = vld [vmem:[%s7348_s1 + $0xd0] sm:$0xff]   ;;  %v5655_v29 = vld [vmem:[%s6496_s6 + $0x98] sm:$0xff]  }
  0x4a   : > { %5419 = vmatpush3.bf16.msra.mxu0 %v5634_v4  ;;  %v5658_v30 = vld [vmem:[%s6496_s6 + $0x20] sm:$0xff]   ;;  %v5668_v32 = vld [vmem:[%s7348_s1 + $0x98] sm:$0xff]   ;;  %v5660_v34 = vld [vmem:[%s6496_s6 + $0x28] sm:$0xff]  }
  0x4b   : > { %5467 = vmatpush3.bf16.msra.mxu1 %v5635_v5  ;;  %5420 = vmatprep.subr.bf16.mxu0 %v5636_v6  ;;  %v5659_v31 = vld [vmem:[%s6496_s6 + $0xa0] sm:$0xff]   ;;  %v5669_v33 = vld [vmem:[%s7348_s1 + $0xd8] sm:$0xff]   ;;  %v5661_v35 = vld [vmem:[%s6496_s6 + $0xa8] sm:$0xff]  }
  0x4c   : > { %5468 = vmatprep.subr.bf16.mxu1 %v5637_v7  ;;  %v5674_v36 = vld [vmem:[%s7348_s1 + $0xa0] sm:$0xff]   ;;  %v5664_v38 = vld [vmem:[%s6496_s6 + $0x30] sm:$0xff]   ;;  %v5680_v40 = vld [vmem:[%s7348_s1 + $0xa8] sm:$0xff]  }
  0x4d   : > { %v5675_v37 = vld [vmem:[%s7348_s1 + $0xe0] sm:$0xff]   ;;  %v5665_v39 = vld [vmem:[%s6496_s6 + $0xb0] sm:$0xff]   ;;  %v5681_v41 = vld [vmem:[%s7348_s1 + $0xe8] sm:$0xff]  }
  0x4e   : > { %5421 = vmatpush3.bf16.msra.mxu0 %v5636_v6  ;;  %v5666_v42 = vld [vmem:[%s6496_s6 + $0x38] sm:$0xff]   ;;  %v5670_v44 = vld [vmem:[%s6496_s6 + $0x40] sm:$0xff]   ;;  %v5686_v46 = vld [vmem:[%s7348_s1 + $0xb0] sm:$0xff]  }
  0x4f   : > { %5469 = vmatpush3.bf16.msra.mxu1 %v5637_v7  ;;  %5422 = vmatprep.subr.bf16.mxu0 %v5638_v8  ;;  %v5667_v43 = vld [vmem:[%s6496_s6 + $0xb8] sm:$0xff]   ;;  %v5671_v45 = vld [vmem:[%s6496_s6 + $0xc0] sm:$0xff]   ;;  %v5687_v47 = vld [vmem:[%s7348_s1 + $0xf0] sm:$0xff]  }
  0x50   : > { %5470 = vmatprep.subr.bf16.mxu1 %v5639_v9  ;;  %v5672_v48 = vld [vmem:[%s6496_s6 + $0x48] sm:$0xff]   ;;  %v5676_v50 = vld [vmem:[%s6496_s6 + $0x50] sm:$0xff]   ;;  %v5692_v51 = vld [vmem:[%s7348_s1 + $0xb8] sm:$0xff]  }
  0x51   : > { %v5673_v49 = vld [vmem:[%s6496_s6 + $0xc8] sm:$0xff]   ;;  %v5693_v52 = vld [vmem:[%s7348_s1 + $0xf8] sm:$0xff]   ;;  %v5677_v53 = vld [vmem:[%s6496_s6 + $0xd0] sm:$0xff]  }
  0x52   : > { %5423 = vmatpush3.bf16.msra.mxu0 %v5638_v8  ;;  %v5678_v54 = vld [vmem:[%s6496_s6 + $0x58] sm:$0xff]   ;;  %v5682_v56 = vld [vmem:[%s6496_s6 + $0x60] sm:$0xff]   ;;  %v5684_v58 = vld [vmem:[%s6496_s6 + $0x68] sm:$0xff]  }
  0x53   : > { %5471 = vmatpush3.bf16.msra.mxu1 %v5639_v9  ;;  %5424 = vmatprep.subr.bf16.mxu0 %v5640_v10  ;;  %v5679_v55 = vld [vmem:[%s6496_s6 + $0xd8] sm:$0xff]   ;;  %v5683_v57 = vld [vmem:[%s6496_s6 + $0xe0] sm:$0xff]   ;;  %v5685_v59 = vld [vmem:[%s6496_s6 + $0xe8] sm:$0xff]  }
  0x54   : > { %5472 = vmatprep.subr.bf16.mxu1 %v5641_v11  ;;  %v5688_v60 = vld [vmem:[%s6496_s6 + $0x70] sm:$0xff]   ;;  %v5690_v62 = vld [vmem:[%s6496_s6 + $0x78] sm:$0xff]   ;;  %v5694_v0 = vld [vmem:[%s6496_s6 + $0x100] sm:$0xff]  }
  0x55   : > { %v5689_v61 = vld [vmem:[%s6496_s6 + $0xf0] sm:$0xff]   ;;  %v5691_v63 = vld [vmem:[%s6496_s6 + $0xf8] sm:$0xff]   ;;  %v5695_v1 = vld [vmem:[%s6496_s6 + $0x180] sm:$0xff]  }
  0x56   : > { %5425 = vmatpush3.bf16.msra.mxu0 %v5640_v10  ;;  %v5696_v2 = vld [vmem:[%s6496_s6 + $0x108] sm:$0xff]   ;;  %v5698_v4 = vld [vmem:[%s6496_s6 + $0x110] sm:$0xff]   ;;  %v5700_v6 = vld [vmem:[%s6496_s6 + $0x118] sm:$0xff]  }
  0x57   : > { %5473 = vmatpush3.bf16.msra.mxu1 %v5641_v11  ;;  %5426 = vmatprep.subr.bf16.mxu0 %v5642_v14  ;;  %v5697_v3 = vld [vmem:[%s6496_s6 + $0x188] sm:$0xff]   ;;  %v5699_v5 = vld [vmem:[%s6496_s6 + $0x190] sm:$0xff]   ;;  %v5701_v7 = vld [vmem:[%s6496_s6 + $0x198] sm:$0xff]  }
  0x58   : > { %5474 = vmatprep.subr.bf16.mxu1 %v5643_v15  ;;  %v5702_v8 = vld [vmem:[%s6496_s6 + $0x120] sm:$0xff]   ;;  %v5704_v10 = vld [vmem:[%s6496_s6 + $0x128] sm:$0xff]   ;;  %v5706_v12 = vld [vmem:[%s6496_s6 + $0x130] sm:$0xff]  }
  0x59   : > { %v5703_v9 = vld [vmem:[%s6496_s6 + $0x1a0] sm:$0xff]   ;;  %v5705_v11 = vld [vmem:[%s6496_s6 + $0x1a8] sm:$0xff]   ;;  %v5707_v13 = vld [vmem:[%s6496_s6 + $0x1b0] sm:$0xff]  }
  0x5a   : > { %5427 = vmatpush3.bf16.msra.mxu0 %v5642_v14  ;;  %v5708_v14 = vld [vmem:[%s6496_s6 + $0x138] sm:$0xff]  }
  0x5b   : > { %5475 = vmatpush3.bf16.msra.mxu1 %v5643_v15  ;;  %5428 = vmatprep.subr.bf16.mxu0 %v5644_v16  ;;  %v5709_v15 = vld [vmem:[%s6496_s6 + $0x1b8] sm:$0xff]  }
  0x5c   : > { %5476 = vmatprep.subr.bf16.mxu1 %v5645_v17 }
  0x5e   : > { %5429 = vmatpush3.bf16.msra.mxu0 %v5644_v16  ;;  %v5710_v16 = vld [vmem:[%s6496_s6 + $0x140] sm:$0xff]  }
  0x5f   : > { %5477 = vmatpush3.bf16.msra.mxu1 %v5645_v17  ;;  %5510 = vmatprep.subr.bf16.mxu0 %v5650_v19  ;;  %v5711_v17 = vld [vmem:[%s6496_s6 + $0x1c0] sm:$0xff]  }
  0x60   : > { %5558 = vmatprep.subr.bf16.mxu1 %v5651_v20 }
  0x61   : > { %5431 = vmatmul.mubr.bf16.vlgmr.msra.gmra.mrb[0].mxu0 %v5648_v18  ;;  %v5712_v18 = vld [vmem:[%s6496_s6 + $0x148] sm:$0xff]  }
  0x62   : > { %5479 = vmatmul.mubr.bf16.vlgmr.msra.gmra.mrb[0].mxu1 %v5649_v21  ;;  %5511 = vmatpush3.bf16.msra.mxu0 %v5650_v19  ;;  %v5713_v19 = vld [vmem:[%s6496_s6 + $0x1c8] sm:$0xff]   ;;  %v5715_v21 = vld [vmem:[%s6496_s6 + $0x1d0] sm:$0xff]  }
  0x63   : > { %5559 = vmatpush3.bf16.msra.mxu1 %v5651_v20  ;;  %5434 = vmatprep.mubr.bf16.mxu0 %v5652_v22  ;;  %v5714_v20 = vld [vmem:[%s6496_s6 + $0x150] sm:$0xff]   ;;  %v5716_v22 = vld [vmem:[%s6496_s6 + $0x158] sm:$0xff]  }
  0x64   : > { %5482 = vmatprep.mubr.bf16.mxu1 %v5653_v23  ;;  %5512 = vmatprep.subr.bf16.mxu0 %v5656_v24  ;;  %v5717_v23 = vld [vmem:[%s6496_s6 + $0x1d8] sm:$0xff]  }
  0x65   : > { %5560 = vmatprep.subr.bf16.mxu1 %v5657_v25 }
  0x66   : > { %5513 = vmatpush3.bf16.msra.mxu0 %v5656_v24  ;;  %v5718_v24 = vld [vmem:[%s6496_s6 + $0x160] sm:$0xff]  }
  0x67   : > { %5561 = vmatpush3.bf16.msra.mxu1 %v5657_v25  ;;  %5514 = vmatprep.subr.bf16.mxu0 %v5662_v27  ;;  %v5719_v25 = vld [vmem:[%s6496_s6 + $0x1e0] sm:$0xff]  }
  0x68   : > { %5562 = vmatprep.subr.bf16.mxu1 %v5663_v28 }
  0x69   : > { %5435 = vmatmul.mubr.bf16.gmra.mrb[4].mxu0 %v5654_v26  ;;  %v5720_v26 = vld [vmem:[%s6496_s6 + $0x168] sm:$0xff]  }
  0x6a   : > { %5483 = vmatmul.mubr.bf16.gmra.mrb[4].mxu1 %v5655_v29  ;;  %5438 = vmatprep.mubr.bf16.mxu0 %v5658_v30  ;;  %v5723_v29 = vld [vmem:[%s6496_s6 + $0x1f0] sm:$0xff]   ;;  %v5724_v30 = vld [vmem:[%s6496_s6 + $0x178] sm:$0xff]  }
  0x6b   : > { %5486 = vmatprep.mubr.bf16.mxu1 %v5659_v31  ;;  %5515 = vmatpush3.bf16.msra.mxu0 %v5662_v27  ;;  %v5721_v27 = vld [vmem:[%s6496_s6 + $0x1e8] sm:$0xff]   ;;  %v5725_v31 = vld [vmem:[%s6496_s6 + $0x1f8] sm:$0xff]  }
  0x6c   : > { %5563 = vmatpush3.bf16.msra.mxu1 %v5663_v28  ;;  %5516 = vmatprep.subr.bf16.mxu0 %v5668_v32  ;;  %v5722_v28 = vld [vmem:[%s6496_s6 + $0x170] sm:$0xff]   ;;  %s6681_s6 = scalar_lea.vmem [#allocation3], %s6481_s25 }
  0x6d   : > { %5564 = vmatprep.subr.bf16.mxu1 %v5669_v33 }
  0x6f   : > { %5517 = vmatpush3.bf16.msra.mxu0 %v5668_v32  ;;  %v6625_v32 = vld [vmem:[%s7349_s2] ss:$0 sm:$0xff] }
  0x70   : > { %5565 = vmatpush3.bf16.msra.mxu1 %v5669_v33  ;;  %5518 = vmatprep.subr.bf16.mxu0 %v5674_v36  ;;  %v6630_v33 = vld [vmem:[%s7349_s2 + $0x1] ss:$0 sm:$0xff] }
  0x71   : > { %5439 = vmatmul.mubr.bf16.gmra.mrb[8].mxu0 %v5660_v34  ;;  %5566 = vmatprep.subr.bf16.mxu1 %v5675_v37 }
  0x72   : > { %5487 = vmatmul.mubr.bf16.gmra.mrb[8].mxu1 %v5661_v35  ;;  %5442 = vmatprep.mubr.bf16.mxu0 %v5664_v38 }
  0x73   : > { %5490 = vmatprep.mubr.bf16.mxu1 %v5665_v39  ;;  %5519 = vmatpush3.bf16.msra.mxu0 %v5674_v36 }
  0x74   : > { %5567 = vmatpush3.bf16.msra.mxu1 %v5675_v37  ;;  %5520 = vmatprep.subr.bf16.mxu0 %v5680_v40 }
  0x75   : > { %5568 = vmatprep.subr.bf16.mxu1 %v5681_v41 }
  0x77   : > { %5521 = vmatpush3.bf16.msra.mxu0 %v5680_v40 }
  0x78   : > { %5569 = vmatpush3.bf16.msra.mxu1 %v5681_v41  ;;  %5522 = vmatprep.subr.bf16.mxu0 %v5686_v46 }
  0x79   : > { %5443 = vmatmul.mubr.bf16.gmra.mrb[12].mxu0 %v5666_v42  ;;  %5570 = vmatprep.subr.bf16.mxu1 %v5687_v47 }
  0x7a   : > { %5491 = vmatmul.mubr.bf16.gmra.mrb[12].mxu1 %v5667_v43  ;;  %5446 = vmatprep.mubr.bf16.mxu0 %v5670_v44 }
  0x7b   : > { %5494 = vmatprep.mubr.bf16.mxu1 %v5671_v45  ;;  %5523 = vmatpush3.bf16.msra.mxu0 %v5686_v46 }
  0x7c   : > { %5571 = vmatpush3.bf16.msra.mxu1 %v5687_v47  ;;  %5524 = vmatprep.subr.bf16.mxu0 %v5692_v51 }
  0x7d   : > { %5572 = vmatprep.subr.bf16.mxu1 %v5693_v52 }
  0x7f   : > { %5525 = vmatpush3.bf16.msra.mxu0 %v5692_v51 }
  0x80   : > { %5573 = vmatpush3.bf16.msra.mxu1 %v5693_v52 }
  0x81   : > { %5447 = vmatmul.mubr.bf16.gmra.mrb[16].mxu0 %v5672_v48 }
  0x82   : > { %5495 = vmatmul.mubr.bf16.gmra.mrb[16].mxu1 %v5673_v49  ;;  %5450 = vmatprep.mubr.bf16.mxu0 %v5676_v50 }
  0x83   : > { %5498 = vmatprep.mubr.bf16.mxu1 %v5677_v53 }
  0x89   : > { %5451 = vmatmul.mubr.bf16.gmra.mrb[20].mxu0 %v5678_v54 }
  0x8a   : > { %5499 = vmatmul.mubr.bf16.gmra.mrb[20].mxu1 %v5679_v55  ;;  %5454 = vmatprep.mubr.bf16.mxu0 %v5682_v56 }
  0x8b   : > { %5502 = vmatprep.mubr.bf16.mxu1 %v5683_v57 }
  0x91   : > { %5455 = vmatmul.mubr.bf16.gmra.mrb[24].mxu0 %v5684_v58 }
  0x92   : > { %5503 = vmatmul.mubr.bf16.gmra.mrb[24].mxu1 %v5685_v59  ;;  %5458 = vmatprep.mubr.bf16.mxu0 %v5688_v60 }
  0x93   : > { %5506 = vmatprep.mubr.bf16.mxu1 %v5689_v61 }
  0x99   : > { %5459 = vmatmul.mubr.bf16.gmra.mrb[28].mxu0 %v5690_v62 }
  0x9a   : > { %5507 = vmatmul.mubr.bf16.gmra.mrb[28].mxu1 %v5691_v63  ;;  %5526 = vmatprep.mubr.bf16.mxu0 %v5694_v0 }
  0x9b   : > { %5574 = vmatprep.mubr.bf16.mxu1 %v5695_v1 }
  0xa1   : > { %5527 = vmatmul.mubr.bf16.vlgmr.msra.gmra.mrb[32].mxu0 %v5696_v2 }
  0xa2   : > { %5575 = vmatmul.mubr.bf16.vlgmr.msra.gmra.mrb[32].mxu1 %v5697_v3  ;;  %5530 = vmatprep.mubr.bf16.mxu0 %v5698_v4 }
  0xa3   : > { %5578 = vmatprep.mubr.bf16.mxu1 %v5699_v5 }
  0xa9   : > { %5531 = vmatmul.mubr.bf16.gmra.mrb[36].mxu0 %v5700_v6 }
  0xaa   : > { %5579 = vmatmul.mubr.bf16.gmra.mrb[36].mxu1 %v5701_v7  ;;  %5534 = vmatprep.mubr.bf16.mxu0 %v5702_v8 }
  0xab   : > { %5582 = vmatprep.mubr.bf16.mxu1 %v5703_v9 }
  0xb1   : > { %5535 = vmatmul.mubr.bf16.gmra.mrb[40].mxu0 %v5704_v10 }
  0xb2   : > { %5583 = vmatmul.mubr.bf16.gmra.mrb[40].mxu1 %v5705_v11  ;;  %5538 = vmatprep.mubr.bf16.mxu0 %v5706_v12 }
  0xb3   : > { %5586 = vmatprep.mubr.bf16.mxu1 %v5707_v13 }
  0xb9   : > { %5539 = vmatmul.mubr.bf16.gmra.mrb[44].mxu0 %v5708_v14 }
  0xba   : > { %5587 = vmatmul.mubr.bf16.gmra.mrb[44].mxu1 %v5709_v15  ;;  %5542 = vmatprep.mubr.bf16.mxu0 %v5710_v16 }
  0xbb   : > { %5590 = vmatprep.mubr.bf16.mxu1 %v5711_v17 }
  0xc1   : > { %5543 = vmatmul.mubr.bf16.gmra.mrb[48].mxu0 %v5712_v18 }
  0xc2   : > { %5591 = vmatmul.mubr.bf16.gmra.mrb[48].mxu1 %v5713_v19  ;;  %5546 = vmatprep.mubr.bf16.mxu0 %v5714_v20 }
  0xc3   : > { %5594 = vmatprep.mubr.bf16.mxu1 %v5715_v21 }
  0xc9   : > { %5547 = vmatmul.mubr.bf16.gmra.mrb[52].mxu0 %v5716_v22 }
  0xca   : > { %5595 = vmatmul.mubr.bf16.gmra.mrb[52].mxu1 %v5717_v23  ;;  %5550 = vmatprep.mubr.bf16.mxu0 %v5718_v24 }
  0xcb   : > { %5598 = vmatprep.mubr.bf16.mxu1 %v5719_v25 }
  0xd1   : > { %5551 = vmatmul.mubr.bf16.gmra.mrb[56].mxu0 %v5720_v26 }
  0xd2   : > { %5599 = vmatmul.mubr.bf16.gmra.mrb[56].mxu1 %v5721_v27  ;;  %5554 = vmatprep.mubr.bf16.mxu0 %v5722_v28 }
  0xd3   : > { %5602 = vmatprep.mubr.bf16.mxu1 %v5723_v29 }
  0xd9   : > { %5555 = vmatmul.mubr.bf16.gmra.mrb[60].mxu0 %v5724_v30 }
  0xda   : > { %5603 = vmatmul.mubr.bf16.gmra.mrb[60].mxu1 %v5725_v31 }
 0x134   : > { %v5432_v34 = vpop.f32.mrb[0].mxu0 }
 0x135   : > { %v960_v35 = vadd.f32 %v5432_v34, %v6625_v32  ;;  %v5480_v36 = vpop.f32.mrb[0].mxu1  ;;  %v951_v37 = vpop.f32.mrb[1].mxu0 }
 0x136   : > { %v1675_v38 = vadd.f32 %v5480_v36, %v6630_v33  ;;  %v952_v39 = vadd.f32 %v6625_v32, %v951_v37  ;;  %v1666_v40 = vpop.f32.mrb[1].mxu1  ;;  %v5433_v41 = vpop.f32.mrb[2].mxu0 }
 0x137   : > { %v4228_v42 = vmul.f32 -1.442695, %v960_v35  ;;  %v1667_v43 = vadd.f32 %v6630_v33, %v1666_v40  ;;  %v963_v44 = vadd.f32 %v5433_v41, %v6625_v32  ;;  %v5481_v45 = vpop.f32.mrb[2].mxu1  ;;  %v954_v46 = vpop.f32.mrb[3].mxu0 }
 0x138   : > { %v4366_v47 = vmul.f32 -1.442695, %v1675_v38  ;;  %v4226_v48 = vmul.f32 -1.442695, %v952_v39  ;;  %v1678_v49 = vadd.f32 %v5481_v45, %v6630_v33  ;;  %v955_v50 = vadd.f32 %v6625_v32, %v954_v46  ;;  %v1669_v51 = vpop.f32.mrb[3].mxu1 }
 0x139   : > { %5726 = vpow2.f32 %v4228_v42  ;;  %v4364_v52 = vmul.f32 -1.442695, %v1667_v43  ;;  %v4229_v53 = vmul.f32 -1.442695, %v963_v44  ;;  %v1670_v54 = vadd.f32 %v6630_v33, %v1669_v51 }
 0x13a   : > { %5728 = vpow2.f32 %v4366_v47  ;;  %v4367_v55 = vmul.f32 -1.442695, %v1678_v49  ;;  %v4227_v56 = vmul.f32 -1.442695, %v955_v50 }
 0x13b   : > { %5730 = vpow2.f32 %v4226_v48  ;;  %v4365_v57 = vmul.f32 -1.442695, %v1670_v54 }
 0x13c   : > { %5732 = vpow2.f32 %v4364_v52  ;;  %v5436_v58 = vpop.f32.mrb[4].mxu0 }
 0x13d   : > { %5734 = vpow2.f32 %v4229_v53  ;;  %v976_v59 = vadd.f32 %v5436_v58, %v6625_v32  ;;  %v5484_v60 = vpop.f32.mrb[4].mxu1  ;;  %v967_v61 = vpop.f32.mrb[5].mxu0 }
 0x13e   : > { %5736 = vpow2.f32 %v4367_v55  ;;  %v1691_v62 = vadd.f32 %v5484_v60, %v6630_v33  ;;  %v968_v63 = vadd.f32 %v6625_v32, %v967_v61  ;;  %v1682_v0 = vpop.f32.mrb[5].mxu1  ;;  %v5437_v1 = vpop.f32.mrb[6].mxu0 }
 0x13f   : > { %5738 = vpow2.f32 %v4227_v56  ;;  %v4232_v2 = vmul.f32 -1.442695, %v976_v59  ;;  %v1683_v3 = vadd.f32 %v6630_v33, %v1682_v0  ;;  %v979_v4 = vadd.f32 %v5437_v1, %v6625_v32  ;;  %v5485_v5 = vpop.f32.mrb[6].mxu1  ;;  %v970_v6 = vpop.f32.mrb[7].mxu0 }
 0x140   : > { %5740 = vpow2.f32 %v4365_v57  ;;  %v4370_v7 = vmul.f32 -1.442695, %v1691_v62  ;;  %v4230_v8 = vmul.f32 -1.442695, %v968_v63  ;;  %v1685_v9 = vpop.f32.mrb[7].mxu1  ;;  %v1694_v37 = vadd.f32 %v5485_v5, %v6630_v33 }
 0x141   : > { %5742 = vpow2.f32 %v4232_v2  ;;  %v4368_v10 = vmul.f32 -1.442695, %v1683_v3  ;;  %v4233_v11 = vmul.f32 -1.442695, %v979_v4  ;;  %v971_v40 = vadd.f32 %v6625_v32, %v970_v6 }
 0x142   : > { %5744 = vpow2.f32 %v4370_v7  ;;  %v1686_v46 = vadd.f32 %v6630_v33, %v1685_v9  ;;  %v4371_v51 = vmul.f32 -1.442695, %v1694_v37 }
 0x143   : > { %v5727_v12 = vpop.eup %5726  ;;  %5746 = vpow2.f32 %v4230_v8  ;;  %v4231_v57 = vmul.f32 -1.442695, %v971_v40 }
 0x144   : > { %v5729_v13 = vpop.eup %5728  ;;  %v1176_v14 = vadd.f32 1.0, %v5727_v12  ;;  %5748 = vpow2.f32 %v4368_v10  ;;  %v5440_v15 = vpop.f32.mrb[8].mxu0  ;;  %v4369_v3 = vmul.f32 -1.442695, %v1686_v46 }
 0x145   : > { %v5731_v16 = vpop.eup %5730  ;;  %v1891_v17 = vadd.f32 1.0, %v5729_v13  ;;  %5750 = vpow2.f32 %v4233_v11  ;;  %v5488_v18 = vpop.f32.mrb[8].mxu1  ;;  %v992_v52 = vadd.f32 %v5440_v15, %v6625_v32 }
 0x146   : > { %v983_v19 = vpop.f32.mrb[9].mxu0  ;;  %v5733_v20 = vpop.eup %5732  ;;  %5752 = vrcp.f32 %v1176_v14  ;;  %v1174_v21 = vadd.f32 1.0, %v5731_v16  ;;  %v1707_v58 = vadd.f32 %v5488_v18, %v6630_v33 }
 0x147   : > { %v1698_v22 = vpop.f32.mrb[9].mxu1  ;;  %v5441_v23 = vpop.f32.mrb[10].mxu0  ;;  %5754 = vrcp.f32 %v1891_v17  ;;  %v1889_v25 = vadd.f32 1.0, %v5733_v20  ;;  %v984_v63 = vadd.f32 %v6625_v32, %v983_v19  ;;  %v4236_v6 = vmul.f32 -1.442695, %v992_v52 }
 0x148   : > { %v5735_v24 = vpop.eup %5734  ;;  %v5489_v26 = vpop.f32.mrb[10].mxu1  ;;  %5756 = vrcp.f32 %v1174_v21  ;;  %v1699_v0 = vadd.f32 %v6630_v33, %v1698_v22  ;;  %v995_v4 = vadd.f32 %v5441_v23, %v6625_v32  ;;  %v4374_v9 = vmul.f32 -1.442695, %v1707_v58 }
 0x149   : > { %v986_v27 = vpop.f32.mrb[11].mxu0  ;;  %v5737_v28 = vpop.eup %5736  ;;  %v1177_v29 = vadd.f32 1.0, %v5735_v24  ;;  %5758 = vrcp.f32 %v1889_v25  ;;  %v1710_v7 = vadd.f32 %v5489_v26, %v6630_v33  ;;  %v4234_v11 = vmul.f32 -1.442695, %v984_v63 }
 0x14a   : > { %v6645_v30 = vpop.f32.mrb[11].mxu1  ;;  %v5739_v31 = vpop.eup %5738  ;;  %v1892_v34 = vadd.f32 1.0, %v5737_v28  ;;  %v4372_v12 = vmul.f32 -1.442695, %v1699_v0  ;;  %v987_v13 = vadd.f32 %v6625_v32, %v986_v27  ;;  %v4237_v17 = vmul.f32 -1.442695, %v995_v4 }
 0x14b   : > { %v5741_v35 = vpop.eup %5740  ;;  %5760 = vrcp.f32 %v1177_v29  ;;  %v1175_v36 = vadd.f32 1.0, %v5739_v31  ;;  %v1702_v18 = vadd.f32 %v6630_v33, %v6645_v30  ;;  %v4375_v23 = vmul.f32 -1.442695, %v1710_v7 }
 0x14c   : > { %v5743_v38 = vpop.eup %5742  ;;  %5762 = vrcp.f32 %v1892_v34  ;;  %v1890_v39 = vadd.f32 1.0, %v5741_v35  ;;  %v5444_v43 = vpop.f32.mrb[12].mxu0  ;;  %v4235_v37 = vmul.f32 -1.442695, %v987_v13 }
 0x14d   : > { %v5745_v41 = vpop.eup %5744  ;;  %5764 = vrcp.f32 %v1175_v36  ;;  %v1180_v42 = vadd.f32 1.0, %v5743_v38  ;;  %v5492_v47 = vpop.f32.mrb[12].mxu1  ;;  %v1008_v24 = vadd.f32 %v5444_v43, %v6625_v32  ;;  %v4373_v40 = vmul.f32 -1.442695, %v1702_v18 }
 0x14e   : > { %v5747_v44 = vpop.eup %5746  ;;  %5766 = vrcp.f32 %v1890_v39  ;;  %v1895_v45 = vadd.f32 1.0, %v5745_v41  ;;  %v6650_v48 = vpop.f32.mrb[13].mxu0  ;;  %v1723_v29 = vadd.f32 %v5492_v47, %v6630_v33 }
 0x14f   : > { %v5749_v49 = vpop.eup %5748  ;;  %5768 = vrcp.f32 %v1180_v42  ;;  %v1178_v50 = vadd.f32 1.0, %v5747_v44  ;;  %v6653_v53 = vpop.f32.mrb[13].mxu1  ;;  %v4240_v42 = vmul.f32 -1.442695, %v1008_v24 }
 0x150   : > { %v6655_v54 = vpop.f32.mrb[14].mxu0  ;;  %v5751_v55 = vpop.eup %5750  ;;  %5770 = vrcp.f32 %v1895_v45  ;;  %v1893_v56 = vadd.f32 1.0, %v5749_v49  ;;  %v4378_v45 = vmul.f32 -1.442695, %v1723_v29 }
 0x151   : > { %v6658_v59 = vpop.f32.mrb[14].mxu1  ;;  %v6660_v60 = vpop.f32.mrb[15].mxu0  ;;  %5772 = vrcp.f32 %v1178_v50  ;;  %v1181_v62 = vadd.f32 1.0, %v5751_v55 }
 0x152   : > { %v5753_v61 = vpop.eup %5752  ;;  %v6664_v1 = vpop.f32.mrb[15].mxu1  ;;  %5774 = vrcp.f32 %v1893_v56 }
 0x153   : > { %v5755_v2 = vpop.eup %5754  ;;  %5776 = vrcp.f32 %v1181_v62 }
 0x154   : > { %v5757_v5 = vpop.eup %5756  ;;  %5778 = vpow2.f32 %v4371_v51  ;;  %v6669_v14 = vpop.f32.mrb[16].mxu0  ;;  %v1000_v51 = vadd.f32 %v6625_v32, %v6650_v48  ;;  %v1715_v48 = vadd.f32 %v6630_v33, %v6653_v53 }
 0x155   : > { %v5759_v8 = vpop.eup %5758  ;;  %5780 = vpow2.f32 %v4231_v57  ;;  %v6673_v19 = vpop.f32.mrb[16].mxu1 }
 0x156   : > { %v5761_v10 = vpop.eup %5760  ;;  %5782 = vpow2.f32 %v4369_v3  ;;  %v6675_v20 = vpop.f32.mrb[17].mxu0 }
 0x157   : > { %v5763_v15 = vpop.eup %5762  ;;  %v4943_v16 = vpack.c.bf16 %v5761_v10, %v5753_v61  ;;  %5784 = vpow2.f32 %v4236_v6  ;;  %v1730_v25 = vpop.f32.mrb[17].mxu1 }
 0x158   : > { %v5765_v21 = vpop.eup %5764  ;;  %v5023_v22 = vpack.c.bf16 %v5763_v15, %v5755_v2  ;;  %v6678_v26 = vpop.f32.mrb[18].mxu0  ;;  %5786 = vpow2.f32 %v4374_v9  ;;  %v6686_v30 = vadd.f32 %v6630_v33, %v1730_v25 }
 0x159   : > { %v5767_v27 = vpop.eup %5766  ;;  %5255 = vst [vmem:[%s6681_s6 + $0x8] sm:$0xff] %v4943_v16   ;;  %v4938_v28 = vpack.c.bf16 %v5765_v21, %v5757_v5  ;;  %v6688_v31 = vpop.f32.mrb[18].mxu1  ;;  %5788 = vpow2.f32 %v4234_v11 }
 0x15a   : > { %v6690_v34 = vpop.f32.mrb[19].mxu0  ;;  %v5769_v35 = vpop.eup %5768  ;;  %5271 = vst [vmem:[%s6681_s6 + $0x88] sm:$0xff] %v5023_v22   ;;  %v5018_v36 = vpack.c.bf16 %v5767_v27, %v5759_v8  ;;  %5790 = vpow2.f32 %v4372_v12  ;;  %v6721_v12 = vmul.f32 -1.442695, %v1000_v51  ;;  %v6732_v22 = vmul.f32 -1.442695, %v1715_v48 }
 0x15b   : > { %v1733_v38 = vpop.f32.mrb[19].mxu1  ;;  %v6693_v39 = vpop.eup %5770  ;;  %4939 = vst [vmem:[%s6681_s6] sm:$0xff] %v4938_v28   ;;  %5792 = vpow2.f32 %v4237_v17  ;;  %v1011_v27 = vadd.f32 %v6655_v54, %v6625_v32  ;;  %v1726_v28 = vadd.f32 %v6658_v59, %v6630_v33 }
 0x15c   : > { %v6696_v41 = vpop.eup %5772  ;;  %5270 = vst [vmem:[%s6681_s6 + $0x80] sm:$0xff] %v5018_v36   ;;  %v6700_v43 = vadd.f32 %v6630_v33, %v1733_v38  ;;  %5794 = vpow2.f32 %v4375_v23  ;;  %v5452_v47 = vpop.f32.mrb[20].mxu0 }
 0x15d   : > { %v6702_v44 = vpop.eup %5774  ;;  %5796 = vpow2.f32 %v4235_v37  ;;  %v6707_v52 = vadd.f32 %v5452_v47, %v6625_v32  ;;  %v5500_v55 = vpop.f32.mrb[20].mxu1  ;;  %v1003_v37 = vadd.f32 %v6625_v32, %v6660_v60  ;;  %v1718_v60 = vadd.f32 %v6630_v33, %v6664_v1 }
 0x15e   : > { %v5777_v46 = vpop.eup %5776  ;;  %5798 = vpow2.f32 %v4373_v40  ;;  %v1031_v56 = vpop.f32.mrb[21].mxu0  ;;  %v6710_v61 = vadd.f32 %v5500_v55, %v6630_v33 }
 0x15f   : > { %v5779_v49 = vpop.eup %5778  ;;  %v4953_v50 = vpack.c.bf16 %v5777_v46, %v5769_v35  ;;  %5800 = vpow2.f32 %v4240_v42  ;;  %v6713_v62 = vadd.f32 %v6625_v32, %v1031_v56  ;;  %v1746_v63 = vpop.f32.mrb[21].mxu1 }
 0x160   : > { %v5781_v57 = vpop.eup %5780  ;;  %v1896_v58 = vadd.f32 1.0, %v5779_v49  ;;  %v5453_v0 = vpop.f32.mrb[22].mxu0  ;;  %5802 = vpow2.f32 %v4378_v45  ;;  %v6719_v4 = vadd.f32 %v6630_v33, %v1746_v63 }
 0x161   : > { %v5783_v2 = vpop.eup %5782  ;;  %5257 = vst [vmem:[%s6681_s6 + $0x18] sm:$0xff] %v4953_v50   ;;  %v1179_v3 = vadd.f32 1.0, %v5781_v57  ;;  %v5501_v5 = vpop.f32.mrb[22].mxu1  ;;  %v6724_v13 = vadd.f32 %v5453_v0, %v6625_v32  ;;  %v4241_v0 = vmul.f32 -1.442695, %v1011_v27 }
 0x162   : > { %v1034_v6 = vpop.f32.mrb[23].mxu0  ;;  %v5785_v7 = vpop.eup %5784  ;;  %5804 = vrcp.f32 %v1896_v58  ;;  %v1894_v8 = vadd.f32 1.0, %v5783_v2  ;;  %v6727_v16 = vadd.f32 %v5501_v5, %v6630_v33  ;;  %v4379_v2 = vmul.f32 -1.442695, %v1726_v28 }
 0x163   : > { %v1749_v9 = vpop.f32.mrb[23].mxu1  ;;  %v5787_v10 = vpop.eup %5786  ;;  %5806 = vrcp.f32 %v1179_v3  ;;  %v1184_v11 = vadd.f32 1.0, %v5785_v7  ;;  %v6730_v17 = vadd.f32 %v6625_v32, %v1034_v6  ;;  %v1024_v6 = vadd.f32 %v6669_v14, %v6625_v32 }
 0x164   : > { %v5789_v15 = vpop.eup %5788  ;;  %5808 = vrcp.f32 %v1894_v8  ;;  %v1899_v53 = vadd.f32 1.0, %v5787_v10  ;;  %v6735_v23 = vadd.f32 %v6630_v33, %v1749_v9  ;;  %v5456_v29 = vpop.f32.mrb[24].mxu0 }
 0x165   : > { %v5791_v18 = vpop.eup %5790  ;;  %5810 = vrcp.f32 %v1184_v11  ;;  %v1182_v21 = vadd.f32 1.0, %v5789_v15  ;;  %v6744_v38 = vadd.f32 %v5456_v29, %v6625_v32  ;;  %v5504_v40 = vpop.f32.mrb[24].mxu1  ;;  %v1016_v29 = vadd.f32 %v6625_v32, %v6675_v20 }
 0x166   : > { %v5793_v24 = vpop.eup %5792  ;;  %5812 = vrcp.f32 %v1899_v53  ;;  %v1897_v25 = vadd.f32 1.0, %v5791_v18  ;;  %v1047_v42 = vpop.f32.mrb[25].mxu0  ;;  %v6747_v54 = vadd.f32 %v5504_v40, %v6630_v33  ;;  %v4239_v53 = vmul.f32 -1.442695, %v1003_v37 }
 0x167   : > { %v5795_v35 = vpop.eup %5794  ;;  %5814 = vrcp.f32 %v1182_v21  ;;  %v1185_v36 = vadd.f32 1.0, %v5793_v24  ;;  %v6750_v59 = vadd.f32 %v6625_v32, %v1047_v42  ;;  %v1762_v47 = vpop.f32.mrb[25].mxu1  ;;  %v4377_v24 = vmul.f32 -1.442695, %v1718_v60 }
 0x168   : > { %v5797_v45 = vpop.eup %5796  ;;  %5816 = vrcp.f32 %v1897_v25  ;;  %v1900_v46 = vadd.f32 1.0, %v5795_v35  ;;  %v5457_v49 = vpop.f32.mrb[26].mxu0  ;;  %v6755_v55 = vadd.f32 %v6630_v33, %v1762_v47  ;;  %v1739_v25 = vadd.f32 %v6673_v19, %v6630_v33 }
 0x169   : > { %v5799_v50 = vpop.eup %5798  ;;  %5818 = vrcp.f32 %v1185_v36  ;;  %v1183_v51 = vadd.f32 1.0, %v5797_v45  ;;  %v5505_v56 = vpop.f32.mrb[26].mxu1  ;;  %v6760_v7 = vadd.f32 %v5457_v49, %v6625_v32  ;;  %v4244_v19 = vmul.f32 -1.442695, %v1024_v6 }
 0x16a   : > { %v1050_v57 = vpop.f32.mrb[27].mxu0  ;;  %v5801_v58 = vpop.eup %5800  ;;  %5820 = vrcp.f32 %v1900_v46  ;;  %v1898_v63 = vadd.f32 1.0, %v5799_v50  ;;  %v6763_v9 = vadd.f32 %v5505_v56, %v6630_v33  ;;  %v1027_v20 = vadd.f32 %v6678_v26, %v6625_v32 }
 0x16b   : > { %v1765_v3 = vpop.f32.mrb[27].mxu1  ;;  %v5803_v48 = vpop.eup %5802  ;;  %5822 = vrcp.f32 %v1183_v51  ;;  %v1188_v5 = vadd.f32 1.0, %v5801_v58  ;;  %v6766_v10 = vadd.f32 %v6625_v32, %v1050_v57  ;;  %v4382_v51 = vmul.f32 -1.442695, %v1739_v25 }
 0x16c   : > { %v5805_v1 = vpop.eup %5804  ;;  %5824 = vrcp.f32 %v1898_v63  ;;  %v1903_v8 = vadd.f32 1.0, %v5803_v48  ;;  %v6770_v14 = vadd.f32 %v6630_v33, %v1765_v3  ;;  %v5460_v27 = vpop.f32.mrb[28].mxu0  ;;  %v1742_v60 = vadd.f32 %v6688_v31, %v6630_v33 }
 0x16d   : > { %v5807_v11 = vpop.eup %5806  ;;  %v5033_v15 = vpack.c.bf16 %v5805_v1, %v6693_v39  ;;  %5826 = vrcp.f32 %v1188_v5  ;;  %v6781_v35 = vadd.f32 %v5460_v27, %v6625_v32  ;;  %v1063_v36 = vpop.f32.mrb[29].mxu0  ;;  %v4242_v58 = vmul.f32 -1.442695, %v1016_v29 }
 0x16e   : > { %v5809_v18 = vpop.eup %5808  ;;  %v4948_v21 = vpack.c.bf16 %v5807_v11, %v6696_v41  ;;  %5828 = vrcp.f32 %v1903_v8  ;;  %v5508_v41 = vpop.f32.mrb[28].mxu1  ;;  %v1019_v63 = vadd.f32 %v6625_v32, %v6690_v34  ;;  %v4380_v31 = vmul.f32 -1.442695, %v6686_v30 }
 0x16f   : > { %v5811_v28 = vpop.eup %5810  ;;  %5273 = vst [vmem:[%s6681_s6 + $0x98] sm:$0xff] %v5033_v15   ;;  %v5028_v39 = vpack.c.bf16 %v5809_v18, %v6702_v44  ;;  %5830 = vpow2.f32 %v6721_v12  ;;  %v6786_v40 = vadd.f32 %v5508_v41, %v6630_v33  ;;  %v6789_v44 = vadd.f32 %v6625_v32, %v1063_v36  ;;  %v1778_v12 = vpop.f32.mrb[29].mxu1 }
 0x170   : > { %v5813_v37 = vpop.eup %5812  ;;  %5256 = vst [vmem:[%s6681_s6 + $0x10] sm:$0xff] %v4948_v21   ;;  %5832 = vpow2.f32 %v6732_v22  ;;  %v5461_v42 = vpop.f32.mrb[30].mxu0  ;;  %v6795_v46 = vadd.f32 %v6630_v33, %v1778_v12  ;;  %v4245_v1 = vmul.f32 -1.442695, %v1027_v20 }
 0x171   : > { %v5815_v45 = vpop.eup %5814  ;;  %5272 = vst [vmem:[%s6681_s6 + $0x90] sm:$0xff] %v5028_v39   ;;  %5834 = vpow2.f32 %v4241_v0  ;;  %v6798_v22 = vadd.f32 %v5461_v42, %v6625_v32  ;;  %v5509_v47 = vpop.f32.mrb[30].mxu1 }
 0x172   : > { %v1066_v49 = vpop.f32.mrb[31].mxu0  ;;  %v5817_v50 = vpop.eup %5816  ;;  %5836 = vpow2.f32 %v4379_v2  ;;  %v6803_v56 = vadd.f32 %v5509_v47, %v6630_v33 }
 0x173   : > { %v1781_v57 = vpop.f32.mrb[31].mxu1  ;;  %v5819_v26 = vpop.eup %5818  ;;  %5838 = vpow2.f32 %v4239_v53  ;;  %v6808_v0 = vadd.f32 %v6625_v32, %v1066_v49  ;;  %v4383_v32 = vmul.f32 -1.442695, %v1742_v60 }
 0x174   : > { %v5821_v3 = vpop.eup %5820  ;;  %v4963_v2 = vpack.c.bf16 %v5819_v26, %v5811_v28  ;;  %5840 = vpow2.f32 %v4377_v24  ;;  %v6812_v48 = vadd.f32 %v6630_v33, %v1781_v57  ;;  %v6815_v11 = vpop.f32.mrb[32].mxu0  ;;  %v4243_v33 = vmul.f32 -1.442695, %v1019_v63 }
 0x175   : > { %v5823_v5 = vpop.eup %5822  ;;  %v5043_v6 = vpack.c.bf16 %v5821_v3, %v5813_v37  ;;  %5842 = vpow2.f32 %v4244_v19  ;;  %v6820_v53 = vpop.f32.mrb[32].mxu1 }
 0x176   : > { %v5825_v8 = vpop.eup %5824  ;;  %5259 = vst [vmem:[%s6681_s6 + $0x28] sm:$0xff] %v4963_v2   ;;  %v4958_v34 = vpack.c.bf16 %v5823_v5, %v5815_v45  ;;  %5844 = vpow2.f32 %v4382_v51  ;;  %v6822_v18 = vpop.f32.mrb[33].mxu0 }
 0x177   : > { %v6817_v15 = vpop.eup %5826  ;;  %5275 = vst [vmem:[%s6681_s6 + $0xa8] sm:$0xff] %v5043_v6   ;;  %v5038_v30 = vpack.c.bf16 %v5825_v8, %v5817_v50  ;;  %5846 = vpow2.f32 %v4242_v58  ;;  %v6827_v24 = vpop.f32.mrb[33].mxu1 }
 0x178   : > { %v6824_v21 = vpop.eup %5828  ;;  %5258 = vst [vmem:[%s6681_s6 + $0x20] sm:$0xff] %v4958_v34   ;;  %5848 = vpow2.f32 %v4380_v31  ;;  %v6829_v25 = vpop.f32.mrb[34].mxu0 }
 0x179   : > { %v5831_v27 = vpop.eup %5830  ;;  %5274 = vst [vmem:[%s6681_s6 + $0xa0] sm:$0xff] %v5038_v30   ;;  %5850 = vpow2.f32 %v4245_v1  ;;  %v6832_v28 = vpop.f32.mrb[34].mxu1 }
 0x17a   : > { %v6834_v39 = vpop.f32.mrb[35].mxu0  ;;  %v5833_v29 = vpop.eup %5832  ;;  %v1186_v41 = vadd.f32 1.0, %v5831_v27  ;;  %5852 = vpow2.f32 %v4383_v32 }
 0x17b   : > { %v6836_v36 = vpop.f32.mrb[35].mxu1  ;;  %v5835_v37 = vpop.eup %5834  ;;  %v1901_v19 = vadd.f32 1.0, %v5833_v29  ;;  %5854 = vpow2.f32 %v4243_v33 }
 0x17c   : > { %v5837_v12 = vpop.eup %5836  ;;  %5856 = vrcp.f32 %v1186_v41  ;;  %v1189_v42 = vadd.f32 1.0, %v5835_v37  ;;  %v6838_v50 = vpop.f32.mrb[36].mxu0 }
 0x17d   : > { %v5839_v45 = vpop.eup %5838  ;;  %5858 = vrcp.f32 %v1901_v19  ;;  %v1904_v20 = vadd.f32 1.0, %v5837_v12  ;;  %v6840_v57 = vpop.f32.mrb[36].mxu1  ;;  %v4381_v19 = vmul.f32 -1.442695, %v6700_v43  ;;  %v4246_v43 = vmul.f32 -1.442695, %v6713_v62 }
 0x17e   : > { %v5841_v47 = vpop.eup %5840  ;;  %5860 = vrcp.f32 %v1189_v42  ;;  %v1187_v49 = vadd.f32 1.0, %v5839_v45  ;;  %v6842_v26 = vpop.f32.mrb[37].mxu0  ;;  %v4248_v45 = vmul.f32 -1.442695, %v6707_v52  ;;  %v4249_v62 = vmul.f32 -1.442695, %v6724_v13 }
 0x17f   : > { %v5843_v51 = vpop.eup %5842  ;;  %5862 = vrcp.f32 %v1904_v20  ;;  %v1902_v60 = vadd.f32 1.0, %v5841_v47  ;;  %v6844_v3 = vpop.f32.mrb[37].mxu1  ;;  %v4385_v13 = vmul.f32 -1.442695, %v6735_v23  ;;  %v4250_v23 = vmul.f32 -1.442695, %v6750_v59 }
 0x180   : > { %v5845_v58 = vpop.eup %5844  ;;  %5864 = vrcp.f32 %v1187_v49  ;;  %v1192_v63 = vadd.f32 1.0, %v5843_v51  ;;  %v6846_v2 = vpop.f32.mrb[38].mxu0  ;;  %v4386_v49 = vmul.f32 -1.442695, %v6710_v61  ;;  %v4384_v61 = vmul.f32 -1.442695, %v6719_v4 }
 0x181   : > { %v5847_v31 = vpop.eup %5846  ;;  %5866 = vrcp.f32 %v1902_v60  ;;  %v1907_v5 = vadd.f32 1.0, %v5845_v58  ;;  %v6848_v6 = vpop.f32.mrb[38].mxu1  ;;  %v4387_v4 = vmul.f32 -1.442695, %v6727_v16  ;;  %v4390_v16 = vmul.f32 -1.442695, %v6747_v54 }
 0x182   : > { %v6850_v1 = vpop.f32.mrb[39].mxu0  ;;  %v5849_v8 = vpop.eup %5848  ;;  %5868 = vrcp.f32 %v1192_v63  ;;  %v1190_v34 = vadd.f32 1.0, %v5847_v31 }
 0x183   : > { %v6852_v32 = vpop.f32.mrb[39].mxu1  ;;  %v5851_v30 = vpop.eup %5850  ;;  %5870 = vrcp.f32 %v1907_v5  ;;  %v1905_v33 = vadd.f32 1.0, %v5849_v8 }
 0x184   : > { %v5853_v27 = vpop.eup %5852  ;;  %5872 = vrcp.f32 %v1190_v34  ;;  %v1193_v29 = vadd.f32 1.0, %v5851_v30  ;;  %v6856_v20 = vpop.f32.mrb[40].mxu0 }
 0x185   : > { %v5855_v41 = vpop.eup %5854  ;;  %5874 = vrcp.f32 %v1905_v33  ;;  %v1908_v37 = vadd.f32 1.0, %v5853_v27  ;;  %v6859_v51 = vpop.f32.mrb[40].mxu1 }
 0x186   : > { %v5857_v12 = vpop.eup %5856  ;;  %5876 = vrcp.f32 %v1193_v29  ;;  %v1191_v42 = vadd.f32 1.0, %v5855_v41  ;;  %v6861_v60 = vpop.f32.mrb[41].mxu0 }
 0x187   : > { %v5859_v47 = vpop.eup %5858  ;;  %5878 = vrcp.f32 %v1908_v37  ;;  %v6864_v63 = vpop.f32.mrb[41].mxu1 }
 0x188   : > { %v5861_v58 = vpop.eup %5860  ;;  %5880 = vrcp.f32 %v1191_v42  ;;  %v6866_v31 = vpop.f32.mrb[42].mxu0 }
 0x189   : > { %v5863_v52 = vpop.eup %5862  ;;  %v4973_v5 = vpack.c.bf16 %v5861_v58, %v6817_v15  ;;  %5882 = vpow2.f32 %v4381_v19  ;;  %v6870_v8 = vpop.f32.mrb[42].mxu1  ;;  %v4247_v19 = vmul.f32 -1.442695, %v6730_v17 }
 0x18a   : > { %v6872_v34 = vpop.f32.mrb[43].mxu0  ;;  %v5865_v30 = vpop.eup %5864  ;;  %v5053_v33 = vpack.c.bf16 %v5863_v52, %v6824_v21  ;;  %5884 = vpow2.f32 %v4248_v45  ;;  %v4252_v45 = vmul.f32 -1.442695, %v6744_v38 }
 0x18b   : > { %v6876_v27 = vpop.f32.mrb[43].mxu1  ;;  %v5867_v29 = vpop.eup %5866  ;;  %5261 = vst [vmem:[%s6681_s6 + $0x38] sm:$0xff] %v4973_v5   ;;  %v4968_v15 = vpack.c.bf16 %v5865_v30, %v5857_v12  ;;  %5886 = vpow2.f32 %v4386_v49 }
 0x18c   : > { %v5869_v41 = vpop.eup %5868  ;;  %5277 = vst [vmem:[%s6681_s6 + $0xb8] sm:$0xff] %v5053_v33   ;;  %v5048_v37 = vpack.c.bf16 %v5867_v29, %v5859_v47  ;;  %5888 = vpow2.f32 %v4246_v43  ;;  %v6886_v12 = vpop.f32.mrb[44].mxu0 }
 0x18d   : > { %v5871_v42 = vpop.eup %5870  ;;  %5260 = vst [vmem:[%s6681_s6 + $0x30] sm:$0xff] %v4968_v15   ;;  %5890 = vpow2.f32 %v4384_v61  ;;  %v6891_v47 = vpop.f32.mrb[44].mxu1  ;;  %v4388_v61 = vmul.f32 -1.442695, %v6755_v55 }
 0x18e   : > { %v5873_v21 = vpop.eup %5872  ;;  %5276 = vst [vmem:[%s6681_s6 + $0xb0] sm:$0xff] %v5048_v37   ;;  %5892 = vpow2.f32 %v4249_v62  ;;  %v6893_v17 = vpop.f32.mrb[45].mxu0 }
 0x18f   : > { %v6888_v49 = vpop.eup %5874  ;;  %5894 = vpow2.f32 %v4387_v4  ;;  %v6896_v43 = vpop.f32.mrb[45].mxu1 }
 0x190   : > { %v5877_v58 = vpop.eup %5876  ;;  %5896 = vpow2.f32 %v4247_v19  ;;  %v6898_v52 = vpop.f32.mrb[46].mxu0 }
 0x191   : > { %v5879_v38 = vpop.eup %5878  ;;  %v4983_v5 = vpack.c.bf16 %v5877_v58, %v5869_v41  ;;  %5898 = vpow2.f32 %v4385_v13  ;;  %v6901_v54 = vpop.f32.mrb[46].mxu1 }
 0x192   : > { %v6903_v30 = vpop.f32.mrb[47].mxu0  ;;  %v5881_v33 = vpop.eup %5880  ;;  %v5063_v62 = vpack.c.bf16 %v5879_v38, %v5871_v42  ;;  %5900 = vpow2.f32 %v4252_v45 }
 0x193   : > { %v6905_v29 = vpop.f32.mrb[47].mxu1  ;;  %v5883_v59 = vpop.eup %5882  ;;  %5263 = vst [vmem:[%s6681_s6 + $0x48] sm:$0xff] %v4983_v5   ;;  %v4978_v15 = vpack.c.bf16 %v5881_v33, %v5873_v21  ;;  %5902 = vpow2.f32 %v4390_v16 }
 0x194   : > { %v5885_v4 = vpop.eup %5884  ;;  %5279 = vst [vmem:[%s6681_s6 + $0xc8] sm:$0xff] %v5063_v62   ;;  %v1906_v41 = vadd.f32 1.0, %v5883_v59  ;;  %5904 = vpow2.f32 %v4250_v23  ;;  %v6910_v58 = vpop.f32.mrb[48].mxu0 }
 0x195   : > { %v5887_v37 = vpop.eup %5886  ;;  %5262 = vst [vmem:[%s6681_s6 + $0x40] sm:$0xff] %v4978_v15   ;;  %v1196_v55 = vadd.f32 1.0, %v5885_v4  ;;  %5906 = vpow2.f32 %v4388_v61  ;;  %v6912_v38 = vpop.f32.mrb[48].mxu1 }
 0x196   : > { %v5889_v19 = vpop.eup %5888  ;;  %5908 = vrcp.f32 %v1906_v41  ;;  %v1911_v13 = vadd.f32 1.0, %v5887_v37  ;;  %7352 = vst [vmem:[#allocation4_spill] sm:$0xff] %v6912_v38  ;;  %v6914_v21 = vpop.f32.mrb[49].mxu0 }
 0x197   : > { %v5891_v42 = vpop.eup %5890  ;;  %5910 = vrcp.f32 %v1196_v55  ;;  %v1194_v45 = vadd.f32 1.0, %v5889_v19  ;;  %7353 = vst [vmem:[#allocation5_spill] sm:$0xff] %v6914_v21  ;;  %v6916_v23 = vpop.f32.mrb[49].mxu1 }
 0x198   : > { %v5893_v16 = vpop.eup %5892  ;;  %5912 = vrcp.f32 %v1911_v13  ;;  %v1909_v5 = vadd.f32 1.0, %v5891_v42  ;;  %7354 = vst [vmem:[#allocation6_spill] sm:$0xff] %v6916_v23  ;;  %v6918_v33 = vpop.f32.mrb[50].mxu0 }
 0x199   : > { %7355 = vst [vmem:[#allocation7_spill] sm:$0xff] %v6918_v33  ;;  %v5895_v61 = vpop.eup %5894  ;;  %5914 = vrcp.f32 %v1194_v45  ;;  %v1197_v62 = vadd.f32 1.0, %v5893_v16  ;;  %v6920_v59 = vpop.f32.mrb[50].mxu1  ;;  %v6929_v45 = vld [vmem:[%s7349_s2 + $0x2] ss:$0 sm:$0xff] }
 0x19a   : > { %7356 = vst [vmem:[#allocation8_spill] sm:$0xff] %v6920_v59  ;;  %v6922_v15 = vpop.f32.mrb[51].mxu0  ;;  %v5897_v4 = vpop.eup %5896  ;;  %5916 = vrcp.f32 %v1909_v5  ;;  %v1912_v41 = vadd.f32 1.0, %v5895_v61  ;;  %v4253_v61 = vmul.f32 -1.442695, %v6760_v7 }
 0x19b   : > { %7357 = vst [vmem:[#allocation9_spill] sm:$0xff] %v6922_v15  ;;  %v6924_v37 = vpop.f32.mrb[51].mxu1  ;;  %v5899_v55 = vpop.eup %5898  ;;  %5918 = vrcp.f32 %v1197_v62  ;;  %v1195_v19 = vadd.f32 1.0, %v5897_v4  ;;  %v6935_v62 = vld [vmem:[%s7349_s2 + $0x3] ss:$0 sm:$0xff] }
 0x19c   : > { %7358 = vst [vmem:[#allocation10_spill] sm:$0xff] %v6924_v37  ;;  %v5901_v13 = vpop.eup %5900  ;;  %5920 = vrcp.f32 %v1912_v41  ;;  %v1910_v42 = vadd.f32 1.0, %v5899_v55  ;;  %v5548_v4 = vpop.f32.mrb[52].mxu0 }
 0x19d   : > { %v5903_v23 = vpop.eup %5902  ;;  %5922 = vrcp.f32 %v1195_v19  ;;  %v1200_v33 = vadd.f32 1.0, %v5901_v13  ;;  %v4391_v19 = vmul.f32 -1.442695, %v6763_v9  ;;  %v6939_v13 = vadd.f32 %v5548_v4, %v6929_v45  ;;  %v5596_v37 = vpop.f32.mrb[52].mxu1 }
 0x19e   : > { %v5905_v16 = vpop.eup %5904  ;;  %5924 = vrcp.f32 %v1910_v42  ;;  %v1915_v5 = vadd.f32 1.0, %v5903_v23  ;;  %v2462_v15 = vpop.f32.mrb[53].mxu0  ;;  %v6942_v7 = vadd.f32 %v5596_v37, %v6935_v62  ;;  %v4251_v4 = vmul.f32 -1.442695, %v6766_v10 }
 0x19f   : > { %v5907_v41 = vpop.eup %5906  ;;  %5926 = vrcp.f32 %v1200_v33  ;;  %v1198_v55 = vadd.f32 1.0, %v5905_v16  ;;  %7359 = vst [vmem:[#allocation11_spill] sm:$0xff] %v6939_v13  ;;  %v6945_v59 = vadd.f32 %v6929_v45, %v2462_v15  ;;  %v3178_v21 = vpop.f32.mrb[53].mxu1  ;;  %v4389_v37 = vmul.f32 -1.442695, %v6770_v14 }
 0x1a0   : > { %v5909_v42 = vpop.eup %5908  ;;  %5928 = vrcp.f32 %v1915_v5  ;;  %v1913_v23 = vadd.f32 1.0, %v5907_v41  ;;  %7360 = vst [vmem:[#allocation12_spill] sm:$0xff] %v6942_v7  ;;  %v5549_v33 = vpop.f32.mrb[54].mxu0  ;;  %v6950_v13 = vadd.f32 %v6935_v62, %v3178_v21 }
 0x1a1   : > { %7361 = vst [vmem:[#allocation13_spill] sm:$0xff] %v6945_v59  ;;  %v5911_v16 = vpop.eup %5910  ;;  %v5058_v9 = vpack.c.bf16 %v5909_v42, %v6888_v49  ;;  %5930 = vrcp.f32 %v1198_v55  ;;  %v5597_v5 = vpop.f32.mrb[54].mxu1  ;;  %v6954_v15 = vadd.f32 %v5549_v33, %v6929_v45  ;;  %v4256_v49 = vmul.f32 -1.442695, %v6781_v35 }
 0x1a2   : > { %v2465_v41 = vpop.f32.mrb[55].mxu0  ;;  %v5913_v38 = vpop.eup %5912  ;;  %5932 = vrcp.f32 %v1913_v23  ;;  %v6959_v10 = vadd.f32 %v5597_v5, %v6935_v62  ;;  %v4394_v42 = vmul.f32 -1.442695, %v6786_v40  ;;  %v4254_v33 = vmul.f32 -1.442695, %v6789_v44 }
 0x1a3   : > { %v3181_v59 = vpop.f32.mrb[55].mxu1  ;;  %v5915_v7 = vpop.eup %5914  ;;  %5278 = vst [vmem:[%s6681_s6 + $0xc0] sm:$0xff] %v5058_v9   ;;  %5934 = vpow2.f32 %v4253_v61  ;;  %v6962_v21 = vadd.f32 %v6929_v45, %v2465_v41  ;;  %v4392_v35 = vmul.f32 -1.442695, %v6795_v46  ;;  %v4257_v5 = vmul.f32 -1.442695, %v6798_v22 }
 0x1a4   : > { %v5917_v55 = vpop.eup %5916  ;;  %5936 = vpow2.f32 %v4391_v19  ;;  %v6966_v14 = vadd.f32 %v6935_v62, %v3181_v59  ;;  %v4395_v41 = vmul.f32 -1.442695, %v6803_v56  ;;  %v5552_v19 = vpop.f32.mrb[56].mxu0  ;;  %v2391_v59 = vadd.f32 %v6815_v11, %v6929_v45 }
 0x1a5   : > { %7362 = vst [vmem:[#allocation14_spill] sm:$0xff] %v6962_v21  ;;  %v5919_v23 = vpop.eup %5918  ;;  %5938 = vpow2.f32 %v4251_v4  ;;  %v6975_v44 = vadd.f32 %v5552_v19, %v6929_v45  ;;  %v5600_v4 = vpop.f32.mrb[56].mxu1 }
 0x1a6   : > { %7363 = vst [vmem:[#allocation15_spill] sm:$0xff] %v6966_v14  ;;  %v5921_v61 = vpop.eup %5920  ;;  %v4993_v9 = vpack.c.bf16 %v5919_v23, %v5911_v16  ;;  %5940 = vpow2.f32 %v4389_v37  ;;  %v2478_v46 = vpop.f32.mrb[57].mxu0  ;;  %v6979_v22 = vadd.f32 %v5600_v4, %v6935_v62  ;;  %v4255_v23 = vmul.f32 -1.442695, %v6808_v0 }
 0x1a7   : > { %v5923_v21 = vpop.eup %5922  ;;  %v5073_v40 = vpack.c.bf16 %v5921_v61, %v5913_v38  ;;  %5942 = vpow2.f32 %v4256_v49  ;;  %v6982_v56 = vadd.f32 %v6929_v45, %v2478_v46  ;;  %v3194_v38 = vpop.f32.mrb[57].mxu1  ;;  %v4536_v0 = vmul.f32 -1.442695, %v2391_v59 }
 0x1a8   : > { %v5925_v14 = vpop.eup %5924  ;;  %5265 = vst [vmem:[%s6681_s6 + $0x58] sm:$0xff] %v4993_v9   ;;  %v4988_v16 = vpack.c.bf16 %v5923_v21, %v5915_v7  ;;  %5944 = vpow2.f32 %v4394_v42  ;;  %v5553_v37 = vpop.f32.mrb[58].mxu0  ;;  %v6989_v61 = vadd.f32 %v6935_v62, %v3194_v38  ;;  %v4393_v9 = vmul.f32 -1.442695, %v6812_v48 }
 0x1a9   : > { %v6984_v11 = vpop.eup %5926  ;;  %5281 = vst [vmem:[%s6681_s6 + $0xd8] sm:$0xff] %v5073_v40   ;;  %v5068_v49 = vpack.c.bf16 %v5925_v14, %v5917_v55  ;;  %5946 = vpow2.f32 %v4254_v33  ;;  %v5601_v7 = vpop.f32.mrb[58].mxu1  ;;  %v6996_v19 = vadd.f32 %v5553_v37, %v6929_v45 }
 0x1aa   : > { %v2481_v21 = vpop.f32.mrb[59].mxu0  ;;  %v6991_v42 = vpop.eup %5928  ;;  %5264 = vst [vmem:[%s6681_s6 + $0x50] sm:$0xff] %v4988_v16   ;;  %5948 = vpow2.f32 %v4392_v35  ;;  %v7002_v55 = vadd.f32 %v5601_v7, %v6935_v62 }
 0x1ab   : > { %v3197_v4 = vpop.f32.mrb[59].mxu1  ;;  %v6998_v40 = vpop.eup %5930  ;;  %5280 = vst [vmem:[%s6681_s6 + $0xd0] sm:$0xff] %v5068_v49   ;;  %5950 = vpow2.f32 %v4257_v5  ;;  %v7005_v14 = vadd.f32 %v6929_v45, %v2481_v21 }
 0x1ac   : > { %7364 = vst [vmem:[#allocation16_spill] sm:$0xff] %v7002_v55  ;;  %v7007_v33 = vpop.eup %5932  ;;  %5952 = vpow2.f32 %v4395_v41  ;;  %v7010_v48 = vadd.f32 %v6935_v62, %v3197_v4  ;;  %v5556_v38 = vpop.f32.mrb[60].mxu0 }
 0x1ad   : > { %7365 = vst [vmem:[#allocation17_spill] sm:$0xff] %v7005_v14  ;;  %v5935_v35 = vpop.eup %5934  ;;  %5954 = vpow2.f32 %v4255_v23  ;;  %v7013_v37 = vadd.f32 %v5556_v38, %v6929_v45  ;;  %v5604_v49 = vpop.f32.mrb[60].mxu1 }
 0x1ae   : > { %7366 = vst [vmem:[#allocation18_spill] sm:$0xff] %v7010_v48  ;;  %v5937_v46 = vpop.eup %5936  ;;  %v1201_v16 = vadd.f32 1.0, %v5935_v35  ;;  %5956 = vpow2.f32 %v4393_v9  ;;  %v2494_v7 = vpop.f32.mrb[61].mxu0  ;;  %v7016_v4 = vadd.f32 %v5604_v49, %v6935_v62 }
 0x1af   : > { %v5939_v5 = vpop.eup %5938  ;;  %v1916_v59 = vadd.f32 1.0, %v5937_v46  ;;  %5958 = vpow2.f32 %v4536_v0  ;;  %7367 = vst [vmem:[#allocation19_spill] sm:$0xff] %v7013_v37  ;;  %v7019_v23 = vadd.f32 %v6929_v45, %v2494_v7  ;;  %v3210_v35 = vpop.f32.mrb[61].mxu1 }
 0x1b0   : > { %v5941_v21 = vpop.eup %5940  ;;  %5960 = vrcp.f32 %v1201_v16  ;;  %v1199_v41 = vadd.f32 1.0, %v5939_v5  ;;  %7368 = vst [vmem:[#allocation20_spill] sm:$0xff] %v7016_v4  ;;  %v5557_v9 = vpop.f32.mrb[62].mxu0  ;;  %v7022_v0 = vadd.f32 %v6935_v62, %v3210_v35 }
 0x1b1   : > { %7369 = vst [vmem:[#allocation21_spill] sm:$0xff] %v7019_v23  ;;  %v5943_v48 = vpop.eup %5942  ;;  %5962 = vrcp.f32 %v1916_v59  ;;  %v1914_v46 = vadd.f32 1.0, %v5941_v21  ;;  %v5605_v38 = vpop.f32.mrb[62].mxu1  ;;  %v7025_v7 = vadd.f32 %v5557_v9, %v6929_v45 }
 0x1b2   : > { %v2497_v37 = vpop.f32.mrb[63].mxu0  ;;  %v5945_v14 = vpop.eup %5944  ;;  %5964 = vrcp.f32 %v1199_v41  ;;  %v1204_v16 = vadd.f32 1.0, %v5943_v48  ;;  %v7028_v59 = vadd.f32 %v5605_v38, %v6935_v62  ;;  %v3107_v48 = vadd.f32 %v6820_v53, %v6935_v62 }
 0x1b3   : > { %v3213_v5 = vpop.f32.mrb[63].mxu1  ;;  %v5947_v55 = vpop.eup %5946  ;;  %5966 = vrcp.f32 %v1914_v46  ;;  %v1919_v49 = vadd.f32 1.0, %v5945_v14  ;;  %v7031_v21 = vadd.f32 %v6929_v45, %v2497_v37  ;;  %v3099_v37 = vadd.f32 %v6935_v62, %v6827_v24 }
 0x1b4   : > { %v5949_v23 = vpop.eup %5948  ;;  %5968 = vrcp.f32 %v1204_v16  ;;  %v1202_v4 = vadd.f32 1.0, %v5947_v55  ;;  %v7036_v14 = vadd.f32 %v6935_v62, %v3213_v5  ;;  %v2383_v55 = vadd.f32 %v6929_v45, %v6822_v18 }
 0x1b5   : > { %v5951_v35 = vpop.eup %5950  ;;  %5970 = vrcp.f32 %v1919_v49  ;;  %v1917_v41 = vadd.f32 1.0, %v5949_v23  ;;  %v2394_v53 = vadd.f32 %v6829_v25, %v6929_v45  ;;  %v2386_v24 = vadd.f32 %v6929_v45, %v6834_v39 }
 0x1b6   : > { %7370 = vst [vmem:[#allocation22_spill] sm:$0xff] %v7036_v14  ;;  %v5953_v9 = vpop.eup %5952  ;;  %5972 = vrcp.f32 %v1202_v4  ;;  %v1205_v46 = vadd.f32 1.0, %v5951_v35  ;;  %v4706_v4 = vmul.f32 -1.442695, %v3107_v48  ;;  %v3110_v35 = vadd.f32 %v6832_v28, %v6935_v62 }
 0x1b7   : > { %v5955_v38 = vpop.eup %5954  ;;  %5974 = vrcp.f32 %v1917_v41  ;;  %v1920_v16 = vadd.f32 1.0, %v5953_v9  ;;  %v4534_v9 = vmul.f32 -1.442695, %v2383_v55  ;;  %v4704_v25 = vmul.f32 -1.442695, %v3099_v37 }
 0x1b8   : > { %v5957_v49 = vpop.eup %5956  ;;  %5976 = vrcp.f32 %v1205_v46  ;;  %v1203_v23 = vadd.f32 1.0, %v5955_v38  ;;  %v3102_v48 = vadd.f32 %v6935_v62, %v6836_v36  ;;  %v2407_v55 = vadd.f32 %v6838_v50, %v6929_v45 }
 0x1b9   : > { %v5959_v5 = vpop.eup %5958  ;;  %5978 = vrcp.f32 %v1920_v16  ;;  %v1918_v14 = vadd.f32 1.0, %v5957_v49  ;;  %v4537_v49 = vmul.f32 -1.442695, %v2394_v53  ;;  %v4535_v37 = vmul.f32 -1.442695, %v2386_v24 }
 0x1ba   : > { %v5961_v18 = vpop.eup %5960  ;;  %5980 = vrcp.f32 %v1203_v23  ;;  %v2607_v41 = vadd.f32 1.0, %v5959_v5  ;;  %v2399_v53 = vadd.f32 %v6929_v45, %v6842_v26  ;;  %v4705_v5 = vmul.f32 -1.442695, %v3102_v48 }
 0x1bb   : > { %v5963_v46 = vpop.eup %5962  ;;  %v5003_v38 = vpack.c.bf16 %v5961_v18, %v6984_v11  ;;  %5982 = vrcp.f32 %v1918_v14  ;;  %v4707_v11 = vmul.f32 -1.442695, %v3110_v35  ;;  %v3123_v14 = vadd.f32 %v6840_v57, %v6935_v62 }
 0x1bc   : > { %v5965_v16 = vpop.eup %5964  ;;  %v5083_v28 = vpack.c.bf16 %v5963_v46, %v6991_v42  ;;  %5984 = vrcp.f32 %v2607_v41  ;;  %v4540_v57 = vmul.f32 -1.442695, %v2407_v55  ;;  %v2410_v35 = vadd.f32 %v6846_v2, %v6929_v45 }
 0x1bd   : > { %v5967_v23 = vpop.eup %5966  ;;  %5267 = vst [vmem:[%s6681_s6 + $0x68] sm:$0xff] %v5003_v38   ;;  %v4998_v39 = vpack.c.bf16 %v5965_v16, %v6998_v40  ;;  %5986 = vpow2.f32 %v4706_v4  ;;  %v3115_v40 = vadd.f32 %v6935_v62, %v6844_v3  ;;  %v4710_v18 = vmul.f32 -1.442695, %v3123_v14 }
 0x1be   : > { %v5969_v36 = vpop.eup %5968  ;;  %5283 = vst [vmem:[%s6681_s6 + $0xe8] sm:$0xff] %v5083_v28   ;;  %v5078_v42 = vpack.c.bf16 %v5967_v23, %v7007_v33  ;;  %5988 = vpow2.f32 %v4534_v9  ;;  %v3126_v26 = vadd.f32 %v6848_v6, %v6935_v62  ;;  %v4538_v9 = vmul.f32 -1.442695, %v2399_v53 }
 0x1bf   : > { %v5971_v50 = vpop.eup %5970  ;;  %5266 = vst [vmem:[%s6681_s6 + $0x60] sm:$0xff] %v4998_v39   ;;  %5990 = vpow2.f32 %v4704_v25  ;;  %v4708_v46 = vmul.f32 -1.442695, %v3115_v40  ;;  %v4541_v2 = vmul.f32 -1.442695, %v2410_v35 }
 0x1c0   : > { %v5973_v4 = vpop.eup %5972  ;;  %5282 = vst [vmem:[%s6681_s6 + $0xe0] sm:$0xff] %v5078_v42   ;;  %5992 = vpow2.f32 %v4537_v49  ;;  %v4711_v28 = vmul.f32 -1.442695, %v3126_v26  ;;  %v2402_v26 = vadd.f32 %v6929_v45, %v6850_v1 }
 0x1c1   : > { %v5975_v33 = vpop.eup %5974  ;;  %5994 = vpow2.f32 %v4707_v11 }
 0x1c2   : > { %v5977_v41 = vpop.eup %5976  ;;  %5996 = vpow2.f32 %v4535_v37 }
 0x1c3   : > { %v5979_v24 = vpop.eup %5978  ;;  %v5013_v3 = vpack.c.bf16 %v5977_v41, %v5969_v36  ;;  %5998 = vpow2.f32 %v4705_v5 }
 0x1c4   : > { %v5981_v38 = vpop.eup %5980  ;;  %v5093_v25 = vpack.c.bf16 %v5979_v24, %v5971_v50  ;;  %6000 = vpow2.f32 %v4540_v57  ;;  %v3118_v24 = vadd.f32 %v6935_v62, %v6852_v32 }
 0x1c5   : > { %v5983_v48 = vpop.eup %5982  ;;  %5269 = vst [vmem:[%s6681_s6 + $0x78] sm:$0xff] %v5013_v3   ;;  %v5008_v16 = vpack.c.bf16 %v5981_v38, %v5973_v4  ;;  %6002 = vpow2.f32 %v4710_v18  ;;  %v2423_v38 = vadd.f32 %v6856_v20, %v6929_v45  ;;  %v3131_v20 = vadd.f32 %v6935_v62, %v6864_v63 }
 0x1c6   : > { %v7071_v6 = vpop.eup %5984  ;;  %5285 = vst [vmem:[%s6681_s6 + $0xf8] sm:$0xff] %v5093_v25   ;;  %v5088_v49 = vpack.c.bf16 %v5983_v48, %v5975_v33  ;;  %6004 = vpow2.f32 %v4538_v9  ;;  %v3139_v48 = vadd.f32 %v6859_v51, %v6935_v62  ;;  %v2426_v51 = vadd.f32 %v6866_v31, %v6929_v45 }
 0x1c7   : > { %v5987_v55 = vpop.eup %5986  ;;  %5268 = vst [vmem:[%s6681_s6 + $0x70] sm:$0xff] %v5008_v16   ;;  %6006 = vpow2.f32 %v4708_v46  ;;  %v3134_v31 = vadd.f32 %v6935_v62, %v6876_v27 }
 0x1c8   : > { %v5989_v23 = vpop.eup %5988  ;;  %5284 = vst [vmem:[%s6681_s6 + $0xf0] sm:$0xff] %v5088_v49   ;;  %v3323_v39 = vadd.f32 1.0, %v5987_v55  ;;  %6008 = vpow2.f32 %v4541_v2  ;;  %v2415_v49 = vadd.f32 %v6929_v45, %v6861_v60 }
 0x1c9   : > { %v5991_v11 = vpop.eup %5990  ;;  %v2605_v14 = vadd.f32 1.0, %v5989_v23  ;;  %6010 = vpow2.f32 %v4711_v28  ;;  %v4539_v28 = vmul.f32 -1.442695, %v2402_v26  ;;  %v4709_v23 = vmul.f32 -1.442695, %v3118_v24 }
 0x1ca   : > { %v5993_v36 = vpop.eup %5992  ;;  %6012 = vrcp.f32 %v3323_v39  ;;  %v3321_v42 = vadd.f32 1.0, %v5991_v11  ;;  %v4544_v11 = vmul.f32 -1.442695, %v2423_v38 }
 0x1cb   : > { %v5995_v37 = vpop.eup %5994  ;;  %6014 = vrcp.f32 %v2605_v14  ;;  %v2608_v53 = vadd.f32 1.0, %v5993_v36  ;;  %v4714_v36 = vmul.f32 -1.442695, %v3139_v48 }
 0x1cc   : > { %v5997_v50 = vpop.eup %5996  ;;  %6016 = vrcp.f32 %v3321_v42  ;;  %v3324_v5 = vadd.f32 1.0, %v5995_v37  ;;  %v3142_v42 = vadd.f32 %v6870_v8, %v6935_v62  ;;  %v4542_v37 = vmul.f32 -1.442695, %v2415_v49 }
 0x1cd   : > { %v5999_v40 = vpop.eup %5998  ;;  %6018 = vrcp.f32 %v2608_v53  ;;  %v2606_v4 = vadd.f32 1.0, %v5997_v50  ;;  %v2418_v53 = vadd.f32 %v6929_v45, %v6872_v34  ;;  %v4545_v8 = vmul.f32 -1.442695, %v2426_v51 }
 0x1ce   : > { %v6001_v57 = vpop.eup %6000  ;;  %6020 = vrcp.f32 %v3324_v5  ;;  %v3322_v35 = vadd.f32 1.0, %v5999_v40  ;;  %v4712_v5 = vmul.f32 -1.442695, %v3131_v20 }
 0x1cf   : > { %v6003_v33 = vpop.eup %6002  ;;  %6022 = vrcp.f32 %v2606_v4  ;;  %v2611_v18 = vadd.f32 1.0, %v6001_v57  ;;  %v2439_v57 = vadd.f32 %v6886_v12, %v6929_v45  ;;  %v4543_v26 = vmul.f32 -1.442695, %v2418_v53 }
 0x1d0   : > { %v6005_v41 = vpop.eup %6004  ;;  %6024 = vrcp.f32 %v3322_v35  ;;  %v3327_v9 = vadd.f32 1.0, %v6003_v33  ;;  %v3155_v33 = vadd.f32 %v6891_v47, %v6935_v62  ;;  %v4713_v12 = vmul.f32 -1.442695, %v3134_v31 }
 0x1d1   : > { %v6007_v3 = vpop.eup %6006  ;;  %6026 = vrcp.f32 %v2611_v18  ;;  %v2609_v46 = vadd.f32 1.0, %v6005_v41  ;;  %v2431_v41 = vadd.f32 %v6929_v45, %v6893_v17  ;;  %v2442_v31 = vadd.f32 %v6898_v52, %v6929_v45 }
 0x1d2   : > { %v6009_v25 = vpop.eup %6008  ;;  %6028 = vrcp.f32 %v3327_v9  ;;  %v3325_v2 = vadd.f32 1.0, %v6007_v3  ;;  %v4548_v3 = vmul.f32 -1.442695, %v2439_v57  ;;  %v4718_v47 = vmul.f32 -1.442695, %v3155_v33 }
 0x1d3   : > { %v6011_v16 = vpop.eup %6010  ;;  %6030 = vrcp.f32 %v2609_v46  ;;  %v2612_v1 = vadd.f32 1.0, %v6009_v25  ;;  %v4546_v25 = vmul.f32 -1.442695, %v2431_v41 }
 0x1d4   : > { %v6013_v32 = vpop.eup %6012  ;;  %6032 = vrcp.f32 %v3325_v2  ;;  %v3328_v55 = vadd.f32 1.0, %v6011_v16 }
 0x1d5   : > { %v6015_v39 = vpop.eup %6014  ;;  %6034 = vrcp.f32 %v2612_v1 }
 0x1d6   : > { %v6017_v14 = vpop.eup %6016  ;;  %6036 = vrcp.f32 %v3328_v55 }
 0x1d7   : > { %v6019_v60 = vpop.eup %6018  ;;  %6038 = vpow2.f32 %v4539_v28 }
 0x1d8   : > { %v6021_v63 = vpop.eup %6020  ;;  %v5103_v50 = vpack.c.bf16 %v6019_v60, %v7071_v6  ;;  %6040 = vpow2.f32 %v4709_v23  ;;  %v4715_v6 = vmul.f32 -1.442695, %v3142_v42 }
 0x1d9   : > { %v6023_v40 = vpop.eup %6022  ;;  %v5183_v4 = vpack.c.bf16 %v6021_v63, %v6013_v32  ;;  %6042 = vpow2.f32 %v4544_v11  ;;  %v3147_v63 = vadd.f32 %v6935_v62, %v6896_v43 }
 0x1da   : > { %v6025_v35 = vpop.eup %6024  ;;  %5287 = vst [vmem:[%s6681_s6 + $0x108] sm:$0xff] %v5103_v50   ;;  %v5098_v34 = vpack.c.bf16 %v6023_v40, %v6015_v39  ;;  %6044 = vpow2.f32 %v4714_v36 }
 0x1db   : > { %v6027_v18 = vpop.eup %6026  ;;  %5303 = vst [vmem:[%s6681_s6 + $0x188] sm:$0xff] %v5183_v4   ;;  %v5178_v27 = vpack.c.bf16 %v6025_v35, %v6017_v14  ;;  %6046 = vpow2.f32 %v4542_v37  ;;  %v4716_v33 = vmul.f32 -1.442695, %v3147_v63 }
 0x1dc   : > { %v6029_v9 = vpop.eup %6028  ;;  %5286 = vst [vmem:[%s6681_s6 + $0x100] sm:$0xff] %v5098_v34   ;;  %6048 = vpow2.f32 %v4712_v5  ;;  %v2434_v34 = vadd.f32 %v6929_v45, %v6903_v30 }
 0x1dd   : > { %v7106_v24 = vpop.eup %6030  ;;  %5302 = vst [vmem:[%s6681_s6 + $0x180] sm:$0xff] %v5178_v27   ;;  %6050 = vpow2.f32 %v4545_v8  ;;  %v3158_v8 = vadd.f32 %v6901_v54, %v6935_v62  ;;  %v2455_v54 = vadd.f32 %v6910_v58, %v6929_v45 }
 0x1de   : > { %v7109_v46 = vpop.eup %6032  ;;  %6052 = vpow2.f32 %v4715_v6 }
 0x1df   : > { %v6035_v38 = vpop.eup %6034  ;;  %6054 = vpow2.f32 %v4543_v26  ;;  %v4549_v26 = vmul.f32 -1.442695, %v2442_v31  ;;  %v4719_v30 = vmul.f32 -1.442695, %v3158_v8 }
 0x1e0   : > { %v6037_v2 = vpop.eup %6036  ;;  %v5113_v17 = vpack.c.bf16 %v6035_v38, %v6027_v18  ;;  %6056 = vpow2.f32 %v4713_v12  ;;  %v3150_v18 = vadd.f32 %v6935_v62, %v6905_v29  ;;  %v7371_v12 = vld [vmem:[#allocation4_spill] sm:$0xff]  ;;  %v4547_v38 = vmul.f32 -1.442695, %v2434_v34 }
 0x1e1   : > { %v6039_v48 = vpop.eup %6038  ;;  %v5193_v16 = vpack.c.bf16 %v6037_v2, %v6029_v9  ;;  %6058 = vpow2.f32 %v4548_v3  ;;  %v3171_v3 = vadd.f32 %v7371_v12, %v6935_v62 }
 0x1e2   : > { %v6041_v1 = vpop.eup %6040  ;;  %5289 = vst [vmem:[%s6681_s6 + $0x118] sm:$0xff] %v5113_v17   ;;  %v2610_v28 = vadd.f32 1.0, %v6039_v48  ;;  %6060 = vpow2.f32 %v4718_v47  ;;  %v4717_v58 = vmul.f32 -1.442695, %v3150_v18  ;;  %v7373_v48 = vld [vmem:[#allocation6_spill] sm:$0xff] }
 0x1e3   : > { %v6043_v49 = vpop.eup %6042  ;;  %5305 = vst [vmem:[%s6681_s6 + $0x198] sm:$0xff] %v5193_v16   ;;  %v3326_v32 = vadd.f32 1.0, %v6041_v1  ;;  %6062 = vpow2.f32 %v4546_v25  ;;  %v7372_v25 = vld [vmem:[#allocation5_spill] sm:$0xff]  ;;  %v4552_v1 = vmul.f32 -1.442695, %v2455_v54 }
 0x1e4   : > { %v6045_v55 = vpop.eup %6044  ;;  %6064 = vrcp.f32 %v2610_v28  ;;  %v2615_v23 = vadd.f32 1.0, %v6043_v49  ;;  %v2447_v2 = vadd.f32 %v6929_v45, %v7372_v25  ;;  %v7374_v28 = vld [vmem:[#allocation7_spill] sm:$0xff] }
 0x1e5   : > { %v6047_v20 = vpop.eup %6046  ;;  %6066 = vrcp.f32 %v3326_v32  ;;  %v3331_v39 = vadd.f32 1.0, %v6045_v55  ;;  %v2458_v49 = vadd.f32 %v7374_v28, %v6929_v45  ;;  %v4722_v32 = vmul.f32 -1.442695, %v3171_v3  ;;  %v7375_v55 = vld [vmem:[#allocation8_spill] sm:$0xff]  ;;  %v7378_v28 = vld [vmem:[#allocation11_spill] sm:$0xff] }
 0x1e6   : > { %v6049_v11 = vpop.eup %6048  ;;  %6068 = vrcp.f32 %v2615_v23  ;;  %v2613_v51 = vadd.f32 1.0, %v6047_v20  ;;  %v3174_v23 = vadd.f32 %v7375_v55, %v6935_v62  ;;  %v7379_v55 = vld [vmem:[#allocation12_spill] sm:$0xff] }
 0x1e7   : > { %v6051_v14 = vpop.eup %6050  ;;  %6070 = vrcp.f32 %v3331_v39  ;;  %v3329_v36 = vadd.f32 1.0, %v6049_v11  ;;  %v4550_v39 = vmul.f32 -1.442695, %v2447_v2  ;;  %v7376_v11 = vld [vmem:[#allocation9_spill] sm:$0xff] }
 0x1e8   : > { %v6053_v42 = vpop.eup %6052  ;;  %6072 = vrcp.f32 %v2613_v51  ;;  %v2616_v60 = vadd.f32 1.0, %v6051_v14  ;;  %v2450_v51 = vadd.f32 %v6929_v45, %v7376_v11 }
 0x1e9   : > { %v6055_v37 = vpop.eup %6054  ;;  %6074 = vrcp.f32 %v3329_v36  ;;  %v3332_v53 = vadd.f32 1.0, %v6053_v42 }
 0x1ea   : > { %v6057_v50 = vpop.eup %6056  ;;  %6076 = vrcp.f32 %v2616_v60  ;;  %v2614_v5 = vadd.f32 1.0, %v6055_v37  ;;  %v7377_v60 = vld [vmem:[#allocation10_spill] sm:$0xff]  ;;  %v4551_v8 = vmul.f32 -1.442695, %v2450_v51 }
 0x1eb   : > { %v6059_v40 = vpop.eup %6058  ;;  %6078 = vrcp.f32 %v3332_v53  ;;  %v3330_v4 = vadd.f32 1.0, %v6057_v50  ;;  %v3166_v37 = vadd.f32 %v6935_v62, %v7377_v60  ;;  %v4553_v50 = vmul.f32 -1.442695, %v2458_v49 }
 0x1ec   : > { %v6061_v57 = vpop.eup %6060  ;;  %6080 = vrcp.f32 %v2614_v5  ;;  %v2619_v35 = vadd.f32 1.0, %v6059_v40  ;;  %v4723_v40 = vmul.f32 -1.442695, %v3174_v23  ;;  %v4556_v49 = vmul.f32 -1.442695, %v7378_v28 }
 0x1ed   : > { %v6063_v6 = vpop.eup %6062  ;;  %6082 = vrcp.f32 %v3330_v4  ;;  %v3335_v43 = vadd.f32 1.0, %v6061_v57  ;;  %v4726_v23 = vmul.f32 -1.442695, %v7379_v55 }
 0x1ee   : > { %v6065_v52 = vpop.eup %6064  ;;  %6084 = vrcp.f32 %v2619_v35  ;;  %v2617_v27 = vadd.f32 1.0, %v6063_v6 }
 0x1ef   : > { %v6067_v41 = vpop.eup %6066  ;;  %v5108_v9 = vpack.c.bf16 %v6065_v52, %v7106_v24  ;;  %6086 = vrcp.f32 %v3335_v43  ;;  %v3163_v24 = vadd.f32 %v6935_v62, %v7373_v48  ;;  %v4721_v62 = vmul.f32 -1.442695, %v3166_v37 }
 0x1f0   : > { %v6069_v47 = vpop.eup %6068  ;;  %v5188_v29 = vpack.c.bf16 %v6067_v41, %v7109_v46  ;;  %6088 = vrcp.f32 %v2617_v27  ;;  %v4557_v37 = vmul.f32 -1.442695, %v6954_v15 }
 0x1f1   : > { %v6071_v17 = vpop.eup %6070  ;;  %5288 = vst [vmem:[%s6681_s6 + $0x110] sm:$0xff] %v5108_v9   ;;  %6090 = vpow2.f32 %v4716_v33  ;;  %v4720_v42 = vmul.f32 -1.442695, %v3163_v24 }
 0x1f2   : > { %v6073_v16 = vpop.eup %6072  ;;  %5304 = vst [vmem:[%s6681_s6 + $0x190] sm:$0xff] %v5188_v29   ;;  %6092 = vpow2.f32 %v4549_v26 }
 0x1f3   : > { %v6075_v46 = vpop.eup %6074  ;;  %6094 = vpow2.f32 %v4719_v30 }
 0x1f4   : > { %v6077_v20 = vpop.eup %6076  ;;  %6096 = vpow2.f32 %v4547_v38 }
 0x1f5   : > { %v6079_v14 = vpop.eup %6078  ;;  %v5123_v36 = vpack.c.bf16 %v6077_v20, %v6069_v47  ;;  %6098 = vpow2.f32 %v4717_v58 }
 0x1f6   : > { %v6081_v53 = vpop.eup %6080  ;;  %v5203_v63 = vpack.c.bf16 %v6079_v14, %v6071_v17  ;;  %6100 = vpow2.f32 %v4552_v1 }
 0x1f7   : > { %v6083_v5 = vpop.eup %6082  ;;  %5291 = vst [vmem:[%s6681_s6 + $0x128] sm:$0xff] %v5123_v36   ;;  %v5118_v31 = vpack.c.bf16 %v6081_v53, %v6073_v16  ;;  %6102 = vpow2.f32 %v4722_v32  ;;  %v4724_v36 = vmul.f32 -1.442695, %v6950_v13  ;;  %v7381_v13 = vld [vmem:[#allocation14_spill] sm:$0xff] }
 0x1f8   : > { %v7144_v45 = vpop.eup %6084  ;;  %5307 = vst [vmem:[%s6681_s6 + $0x1a8] sm:$0xff] %v5203_v63   ;;  %v5198_v4 = vpack.c.bf16 %v6083_v5, %v6075_v46  ;;  %6104 = vpow2.f32 %v4550_v39  ;;  %v7380_v39 = vld [vmem:[#allocation13_spill] sm:$0xff] }
 0x1f9   : > { %v7147_v57 = vpop.eup %6086  ;;  %5290 = vst [vmem:[%s6681_s6 + $0x120] sm:$0xff] %v5118_v31   ;;  %6106 = vpow2.f32 %v4720_v42  ;;  %v4554_v11 = vmul.f32 -1.442695, %v7380_v39  ;;  %v7384_v39 = vld [vmem:[#allocation17_spill] sm:$0xff] }
 0x1fa   : > { %v7150_v35 = vpop.eup %6088  ;;  %5306 = vst [vmem:[%s6681_s6 + $0x1a0] sm:$0xff] %v5198_v4   ;;  %6108 = vpow2.f32 %v4553_v50  ;;  %v4727_v50 = vmul.f32 -1.442695, %v6959_v10  ;;  %v7382_v4 = vld [vmem:[#allocation15_spill] sm:$0xff]  ;;  %v4730_v10 = vmul.f32 -1.442695, %v6979_v22 }
 0x1fb   : > { %v6091_v34 = vpop.eup %6090  ;;  %6110 = vpow2.f32 %v4723_v40  ;;  %v4555_v40 = vmul.f32 -1.442695, %v7381_v13 }
 0x1fc   : > { %v6093_v6 = vpop.eup %6092  ;;  %v3333_v43 = vadd.f32 1.0, %v6091_v34  ;;  %6112 = vpow2.f32 %v4551_v8  ;;  %v4725_v8 = vmul.f32 -1.442695, %v7382_v4 }
 0x1fd   : > { %v6095_v33 = vpop.eup %6094  ;;  %v2620_v18 = vadd.f32 1.0, %v6093_v6  ;;  %6114 = vpow2.f32 %v4721_v62 }
 0x1fe   : > { %v6097_v52 = vpop.eup %6096  ;;  %6116 = vrcp.f32 %v3333_v43  ;;  %v3336_v27 = vadd.f32 1.0, %v6095_v33  ;;  %v4558_v43 = vmul.f32 -1.442695, %v6982_v56 }
 0x1ff   : > { %v6099_v26 = vpop.eup %6098  ;;  %6118 = vrcp.f32 %v2620_v18  ;;  %v2618_v54 = vadd.f32 1.0, %v6097_v52  ;;  %v4561_v52 = vmul.f32 -1.442695, %v6996_v19 }
 0x200   : > { %v6101_v41 = vpop.eup %6100  ;;  %6120 = vrcp.f32 %v3336_v27  ;;  %v3334_v9 = vadd.f32 1.0, %v6099_v26 }
 0x201   : > { %v6103_v30 = vpop.eup %6102  ;;  %6122 = vrcp.f32 %v2618_v54  ;;  %v2623_v12 = vadd.f32 1.0, %v6101_v41 }
 0x202   : > { %v6105_v3 = vpop.eup %6104  ;;  %6124 = vrcp.f32 %v3334_v9  ;;  %v3339_v47 = vadd.f32 1.0, %v6103_v30 }
 0x203   : > { %v6107_v29 = vpop.eup %6106  ;;  %6126 = vrcp.f32 %v2623_v12  ;;  %v2621_v38 = vadd.f32 1.0, %v6105_v3 }
 0x204   : > { %v6109_v25 = vpop.eup %6108  ;;  %6128 = vrcp.f32 %v3339_v47  ;;  %v3337_v2 = vadd.f32 1.0, %v6107_v29 }
 0x205   : > { %v6111_v17 = vpop.eup %6110  ;;  %6130 = vrcp.f32 %v2621_v38  ;;  %v2624_v58 = vadd.f32 1.0, %v6109_v25 }
 0x206   : > { %v6113_v48 = vpop.eup %6112  ;;  %6132 = vrcp.f32 %v3337_v2  ;;  %v3340_v24 = vadd.f32 1.0, %v6111_v17 }
 0x207   : > { %v6115_v16 = vpop.eup %6114  ;;  %6134 = vrcp.f32 %v2624_v58  ;;  %v2622_v1 = vadd.f32 1.0, %v6113_v48  ;;  %v4728_v58 = vmul.f32 -1.442695, %v6989_v61  ;;  %v7385_v61 = vld [vmem:[#allocation18_spill] sm:$0xff] }
 0x208   : > { %v6117_v46 = vpop.eup %6116  ;;  %6136 = vrcp.f32 %v3340_v24  ;;  %v3338_v32 = vadd.f32 1.0, %v6115_v16 }
 0x209   : > { %v6119_v20 = vpop.eup %6118  ;;  %6138 = vrcp.f32 %v2622_v1 }
 0x20a   : > { %v6121_v51 = vpop.eup %6120  ;;  %v5133_v14 = vpack.c.bf16 %v6119_v20, %v7144_v45  ;;  %6140 = vrcp.f32 %v3338_v32  ;;  %v7383_v32 = vld [vmem:[#allocation16_spill] sm:$0xff] }
 0x20b   : > { %v6123_v42 = vpop.eup %6122  ;;  %v5213_v60 = vpack.c.bf16 %v6121_v51, %v7147_v57  ;;  %6142 = vpow2.f32 %v4556_v49  ;;  %v4560_v57 = vmul.f32 -1.442695, %v6975_v44  ;;  %v4731_v55 = vmul.f32 -1.442695, %v7383_v32 }
 0x20c   : > { %v6125_v53 = vpop.eup %6124  ;;  %5293 = vst [vmem:[%s6681_s6 + $0x138] sm:$0xff] %v5133_v14   ;;  %v5128_v63 = vpack.c.bf16 %v6123_v42, %v7150_v35  ;;  %6144 = vpow2.f32 %v4726_v23  ;;  %v4729_v14 = vmul.f32 -1.442695, %v7385_v61  ;;  %v7386_v42 = vld [vmem:[#allocation19_spill] sm:$0xff] }
 0x20d   : > { %v6127_v5 = vpop.eup %6126  ;;  %5309 = vst [vmem:[%s6681_s6 + $0x1b8] sm:$0xff] %v5213_v60   ;;  %v5208_v31 = vpack.c.bf16 %v6125_v53, %v6117_v46  ;;  %6146 = vpow2.f32 %v4554_v11  ;;  %v4559_v11 = vmul.f32 -1.442695, %v7384_v39  ;;  %v4564_v60 = vmul.f32 -1.442695, %v7386_v42  ;;  %v7387_v53 = vld [vmem:[#allocation20_spill] sm:$0xff] }
 0x20e   : > { %v6129_v45 = vpop.eup %6128  ;;  %5292 = vst [vmem:[%s6681_s6 + $0x130] sm:$0xff] %v5128_v63   ;;  %6148 = vpow2.f32 %v4724_v36  ;;  %v4734_v63 = vmul.f32 -1.442695, %v7387_v53 }
 0x20f   : > { %v6131_v15 = vpop.eup %6130  ;;  %5308 = vst [vmem:[%s6681_s6 + $0x1b0] sm:$0xff] %v5208_v31   ;;  %6150 = vpow2.f32 %v4557_v37 }
 0x210   : > { %v6133_v62 = vpop.eup %6132  ;;  %6152 = vpow2.f32 %v4727_v50 }
 0x211   : > { %v6135_v35 = vpop.eup %6134  ;;  %6154 = vpow2.f32 %v4555_v40 }
 0x212   : > { %v6137_v34 = vpop.eup %6136  ;;  %v5143_v6 = vpack.c.bf16 %v6135_v35, %v6127_v5  ;;  %6156 = vpow2.f32 %v4725_v8  ;;  %v7388_v5 = vld [vmem:[#allocation21_spill] sm:$0xff] }
 0x213   : > { %v6139_v33 = vpop.eup %6138  ;;  %v5223_v18 = vpack.c.bf16 %v6137_v34, %v6129_v45  ;;  %6158 = vpow2.f32 %v4560_v57  ;;  %v4562_v31 = vmul.f32 -1.442695, %v7388_v5  ;;  %v4732_v45 = vmul.f32 -1.442695, %v7022_v0  ;;  %v7389_v0 = vld [vmem:[#allocation22_spill] sm:$0xff]  ;;  %v3603_v5 = vld [vmem:[%s6681_s6] sm:$0xff] (%p6312_p5)  }
 0x214   : > { %v6141_v44 = vpop.eup %6140  ;;  %5295 = vst [vmem:[%s6681_s6 + $0x148] sm:$0xff] %v5143_v6   ;;  %v5138_v27 = vpack.c.bf16 %v6139_v33, %v6131_v15  ;;  %6160 = vpow2.f32 %v4730_v10  ;;  %v4565_v15 = vmul.f32 -1.442695, %v7025_v7  ;;  %v4735_v10 = vmul.f32 -1.442695, %v7028_v59  ;;  %3604 = vst [vmem:[%s7210_s20] sm:$0xff] (%p6312_p5), %v3603_v5  }
 0x215   : > { %v6143_v22 = vpop.eup %6142  ;;  %5311 = vst [vmem:[%s6681_s6 + $0x1c8] sm:$0xff] %v5223_v18   ;;  %v5218_v26 = vpack.c.bf16 %v6141_v44, %v6133_v62  ;;  %6162 = vpow2.f32 %v4558_v43  ;;  %v4563_v6 = vmul.f32 -1.442695, %v7031_v21  ;;  %v4733_v43 = vmul.f32 -1.442695, %v7389_v0  ;;  %v3659_v0 = vld [vmem:[%s6681_s6 + $0x70] sm:$0xff] (%p6312_p5)  }
 0x216   : > { %v6145_v54 = vpop.eup %6144  ;;  %5294 = vst [vmem:[%s6681_s6 + $0x140] sm:$0xff] %v5138_v27   ;;  %v2627_v41 = vadd.f32 1.0, %v6143_v22  ;;  %6164 = vpow2.f32 %v4561_v52  ;;  %3660 = vst [vmem:[%s7210_s20 + $0x70] sm:$0xff] (%p6312_p5), %v3659_v0  }
 0x217   : > { %v6147_v9 = vpop.eup %6146  ;;  %5310 = vst [vmem:[%s6681_s6 + $0x1c0] sm:$0xff] %v5218_v26   ;;  %v3343_v56 = vadd.f32 1.0, %v6145_v54 }
 0x218   : > { %v6149_v30 = vpop.eup %6148  ;;  %6166 = vrcp.f32 %v2627_v41  ;;  %v2625_v12 = vadd.f32 1.0, %v6147_v9 }
 0x219   : > { %v6151_v3 = vpop.eup %6150  ;;  %6168 = vrcp.f32 %v3343_v56  ;;  %v3341_v19 = vadd.f32 1.0, %v6149_v30 }
 0x21a   : > { %v6153_v47 = vpop.eup %6152  ;;  %6170 = vrcp.f32 %v2625_v12  ;;  %v2628_v29 = vadd.f32 1.0, %v6151_v3 }
 0x21b   : > { %v6155_v38 = vpop.eup %6154  ;;  %6172 = vrcp.f32 %v3341_v19  ;;  %v3344_v25 = vadd.f32 1.0, %v6153_v47 }
 0x21c   : > { %v6157_v2 = vpop.eup %6156  ;;  %6174 = vrcp.f32 %v2628_v29  ;;  %v2626_v17 = vadd.f32 1.0, %v6155_v38 }
 0x21d   : > { %v6159_v48 = vpop.eup %6158  ;;  %6176 = vrcp.f32 %v3344_v25  ;;  %v3342_v24 = vadd.f32 1.0, %v6157_v2 }
 0x21e   : > { %v6161_v16 = vpop.eup %6160  ;;  %6178 = vrcp.f32 %v2626_v17  ;;  %v2631_v1 = vadd.f32 1.0, %v6159_v48 }
 0x21f   : > { %6180 = vrcp.f32 %v3342_v24  ;;  %v3347_v28 = vadd.f32 1.0, %v6161_v16  ;;  %v6163_v49 = vpop.eup %6162 }
 0x220   : > { %6182 = vpow2.f32 %v4728_v58  ;;  %v6165_v46 = vpop.eup %6164  ;;  %v2629_v7 = vadd.f32 1.0, %v6163_v49 }
 0x221   : > { %6184 = vrcp.f32 %v2631_v1  ;;  %v2632_v20 = vadd.f32 1.0, %v6165_v46 }
 0x222   : > { %v6167_v23 = vpop.eup %6166  ;;  %6186 = vrcp.f32 %v3347_v28 }
 0x223   : > { %v6169_v51 = vpop.eup %6168  ;;  %6188 = vrcp.f32 %v2632_v20 }
 0x224   : > { %v6171_v36 = vpop.eup %6170  ;;  %6190 = vpow2.f32 %v4731_v55 }
 0x225   : > { %v6173_v37 = vpop.eup %6172  ;;  %6192 = vpow2.f32 %v4559_v11 }
 0x226   : > { %v6175_v50 = vpop.eup %6174  ;;  %6194 = vpow2.f32 %v4729_v14 }
 0x227   : > { %v6177_v13 = vpop.eup %6176  ;;  %v5153_v40 = vpack.c.bf16 %v6175_v50, %v6167_v23  ;;  %6196 = vpow2.f32 %v4564_v60 }
 0x228   : > { %v6179_v4 = vpop.eup %6178  ;;  %v5233_v8 = vpack.c.bf16 %v6177_v13, %v6169_v51  ;;  %6198 = vpow2.f32 %v4734_v63  ;;  %v3611_v13 = vld [vmem:[%s6681_s6 + $0x10] sm:$0xff] (%p6312_p5)  }
 0x229   : > { %v6181_v57 = vpop.eup %6180  ;;  %5297 = vst [vmem:[%s6681_s6 + $0x158] sm:$0xff] %v5153_v40   ;;  %v5148_v62 = vpack.c.bf16 %v6179_v4, %v6171_v36  ;;  %6200 = vpow2.f32 %v4562_v31  ;;  %v3607_v31 = vld [vmem:[%s6681_s6 + $0x8] sm:$0xff] (%p6312_p5)   ;;  %v3615_v40 = vld [vmem:[%s6681_s6 + $0x18] sm:$0xff] (%p6312_p5)   ;;  %3612 = vst [vmem:[%s7210_s20 + $0x10] sm:$0xff] (%p6312_p5), %v3611_v13  }
 0x22a   : > { %v6183_v35 = vpop.eup %6182  ;;  %5313 = vst [vmem:[%s6681_s6 + $0x1d8] sm:$0xff] %v5233_v8   ;;  %v5228_v34 = vpack.c.bf16 %v6181_v57, %v6173_v37  ;;  %6202 = vpow2.f32 %v4732_v45  ;;  %v3619_v45 = vld [vmem:[%s6681_s6 + $0x20] sm:$0xff] (%p6312_p5)   ;;  %v3623_v4 = vld [vmem:[%s6681_s6 + $0x28] sm:$0xff] (%p6312_p5)   ;;  %3608 = vst [vmem:[%s7210_s20 + $0x8] sm:$0xff] (%p6312_p5), %v3607_v31  }
 0x22b   : > { %5296 = vst [vmem:[%s6681_s6 + $0x150] sm:$0xff] %v5148_v62   ;;  %v6185_v33 = vpop.eup %6184  ;;  %6204 = vpow2.f32 %v4565_v15  ;;  %v3345_v52 = vadd.f32 1.0, %v6183_v35  ;;  %3616 = vst [vmem:[%s7210_s20 + $0x18] sm:$0xff] (%p6312_p5), %v3615_v40   ;;  %v3627_v8 = vld [vmem:[%s6681_s6 + $0x30] sm:$0xff] (%p6312_p5)   ;;  %v3631_v15 = vld [vmem:[%s6681_s6 + $0x38] sm:$0xff] (%p6312_p5)  }
 0x22c   : > { %5312 = vst [vmem:[%s6681_s6 + $0x1d0] sm:$0xff] %v5228_v34   ;;  %v6187_v18 = vpop.eup %6186  ;;  %6206 = vpow2.f32 %v4735_v10  ;;  %3620 = vst [vmem:[%s7210_s20 + $0x20] sm:$0xff] (%p6312_p5), %v3619_v45   ;;  %v3635_v57 = vld [vmem:[%s6681_s6 + $0x40] sm:$0xff] (%p6312_p5)   ;;  %v3639_v62 = vld [vmem:[%s6681_s6 + $0x48] sm:$0xff] (%p6312_p5)  }
 0x22d   : > { %v6189_v44 = vpop.eup %6188  ;;  %6208 = vpow2.f32 %v4563_v6  ;;  %3624 = vst [vmem:[%s7210_s20 + $0x28] sm:$0xff] (%p6312_p5), %v3623_v4   ;;  %3628 = vst [vmem:[%s7210_s20 + $0x30] sm:$0xff] (%p6312_p5), %v3627_v8   ;;  %v3643_v10 = vld [vmem:[%s6681_s6 + $0x50] sm:$0xff] (%p6312_p5)   ;;  %v3647_v35 = vld [vmem:[%s6681_s6 + $0x58] sm:$0xff] (%p6312_p5)  }
 0x22e   : > { %v6191_v59 = vpop.eup %6190  ;;  %v5163_v27 = vpack.c.bf16 %v6189_v44, %v6185_v33  ;;  %6210 = vpow2.f32 %v4733_v43  ;;  %3632 = vst [vmem:[%s7210_s20 + $0x38] sm:$0xff] (%p6312_p5), %v3631_v15   ;;  %3636 = vst [vmem:[%s7210_s20 + $0x40] sm:$0xff] (%p6312_p5), %v3635_v57   ;;  %v3651_v34 = vld [vmem:[%s6681_s6 + $0x60] sm:$0xff] (%p6312_p5)   ;;  %v3655_v6 = vld [vmem:[%s6681_s6 + $0x68] sm:$0xff] (%p6312_p5)  }
 0x22f   : > { %v6193_v22 = vpop.eup %6192  ;;  %6212 = vrcp.f32 %v2629_v7  ;;  %v3348_v21 = vadd.f32 1.0, %v6191_v59  ;;  %3640 = vst [vmem:[%s7210_s20 + $0x48] sm:$0xff] (%p6312_p5), %v3639_v62   ;;  %3644 = vst [vmem:[%s7210_s20 + $0x50] sm:$0xff] (%p6312_p5), %v3643_v10   ;;  %v3663_v43 = vld [vmem:[%s6681_s6 + $0x78] sm:$0xff] (%p6312_p5)   ;;  %v3667_v33 = vld [vmem:[%s6681_s6 + $0x80] sm:$0xff] (%p6312_p5)  }
 0x230   : > { %v6195_v26 = vpop.eup %6194  ;;  %6214 = vrcp.f32 %v3345_v52  ;;  %5299 = vst [vmem:[%s6681_s6 + $0x168] sm:$0xff] %v5163_v27   ;;  %v2630_v54 = vadd.f32 1.0, %v6193_v22  ;;  %3648 = vst [vmem:[%s7210_s20 + $0x58] sm:$0xff] (%p6312_p5), %v3647_v35   ;;  %v3671_v7 = vld [vmem:[%s6681_s6 + $0x88] sm:$0xff] (%p6312_p5)   ;;  %v3679_v52 = vld [vmem:[%s6681_s6 + $0x98] sm:$0xff] (%p6312_p5)  }
 0x231   : > { %v6197_v41 = vpop.eup %6196  ;;  %6216 = vrcp.f32 %v3348_v21  ;;  %v3346_v9 = vadd.f32 1.0, %v6195_v26  ;;  %3652 = vst [vmem:[%s7210_s20 + $0x60] sm:$0xff] (%p6312_p5), %v3651_v34   ;;  %3656 = vst [vmem:[%s7210_s20 + $0x68] sm:$0xff] (%p6312_p5), %v3655_v6   ;;  %v3683_v44 = vld [vmem:[%s6681_s6 + $0xa0] sm:$0xff] (%p6312_p5)   ;;  %v3687_v59 = vld [vmem:[%s6681_s6 + $0xa8] sm:$0xff] (%p6312_p5)  }
 0x232   : > { %v6199_v56 = vpop.eup %6198  ;;  %6218 = vrcp.f32 %v2630_v54  ;;  %v2635_v30 = vadd.f32 1.0, %v6197_v41  ;;  %3664 = vst [vmem:[%s7210_s20 + $0x78] sm:$0xff] (%p6312_p5), %v3663_v43   ;;  %3668 = vst [vmem:[%s7210_s20 + $0x100] sm:$0xff] (%p6312_p5), %v3667_v33   ;;  %v3691_v27 = vld [vmem:[%s6681_s6 + $0xb0] sm:$0xff] (%p6312_p5)   ;;  %v3695_v22 = vld [vmem:[%s6681_s6 + $0xb8] sm:$0xff] (%p6312_p5)  }
 0x233   : > { %v6201_v12 = vpop.eup %6200  ;;  %6220 = vrcp.f32 %v3346_v9  ;;  %v3351_v3 = vadd.f32 1.0, %v6199_v56  ;;  %3672 = vst [vmem:[%s7210_s20 + $0x108] sm:$0xff] (%p6312_p5), %v3671_v7   ;;  %3680 = vst [vmem:[%s7210_s20 + $0x118] sm:$0xff] (%p6312_p5), %v3679_v52   ;;  %v3699_v21 = vld [vmem:[%s6681_s6 + $0xc0] sm:$0xff] (%p6312_p5)   ;;  %v3703_v26 = vld [vmem:[%s6681_s6 + $0xc8] sm:$0xff] (%p6312_p5)  }
 0x234   : > { %v6203_v19 = vpop.eup %6202  ;;  %6222 = vrcp.f32 %v2635_v30  ;;  %v2633_v47 = vadd.f32 1.0, %v6201_v12  ;;  %3684 = vst [vmem:[%s7210_s20 + $0x120] sm:$0xff] (%p6312_p5), %v3683_v44   ;;  %3688 = vst [vmem:[%s7210_s20 + $0x128] sm:$0xff] (%p6312_p5), %v3687_v59   ;;  %v3707_v54 = vld [vmem:[%s6681_s6 + $0xd0] sm:$0xff] (%p6312_p5)   ;;  %v3711_v41 = vld [vmem:[%s6681_s6 + $0xd8] sm:$0xff] (%p6312_p5)  }
 0x235   : > { %v6205_v29 = vpop.eup %6204  ;;  %6224 = vrcp.f32 %v3351_v3  ;;  %v3349_v38 = vadd.f32 1.0, %v6203_v19  ;;  %3692 = vst [vmem:[%s7210_s20 + $0x130] sm:$0xff] (%p6312_p5), %v3691_v27   ;;  %3696 = vst [vmem:[%s7210_s20 + $0x138] sm:$0xff] (%p6312_p5), %v3695_v22   ;;  %v3715_v9 = vld [vmem:[%s6681_s6 + $0xe0] sm:$0xff] (%p6312_p5)   ;;  %v3719_v56 = vld [vmem:[%s6681_s6 + $0xe8] sm:$0xff] (%p6312_p5)  }
 0x236   : > { %v6207_v25 = vpop.eup %6206  ;;  %6226 = vrcp.f32 %v2633_v47  ;;  %v2636_v2 = vadd.f32 1.0, %v6205_v29  ;;  %3700 = vst [vmem:[%s7210_s20 + $0x140] sm:$0xff] (%p6312_p5), %v3699_v21   ;;  %3704 = vst [vmem:[%s7210_s20 + $0x148] sm:$0xff] (%p6312_p5), %v3703_v26   ;;  %v3723_v30 = vld [vmem:[%s6681_s6 + $0xf0] sm:$0xff] (%p6312_p5)   ;;  %v3727_v12 = vld [vmem:[%s6681_s6 + $0xf8] sm:$0xff] (%p6312_p5)  }
 0x237   : > { %v6209_v17 = vpop.eup %6208  ;;  %6228 = vrcp.f32 %v3349_v38  ;;  %v3352_v58 = vadd.f32 1.0, %v6207_v25  ;;  %3708 = vst [vmem:[%s7210_s20 + $0x150] sm:$0xff] (%p6312_p5), %v3707_v54   ;;  %3712 = vst [vmem:[%s7210_s20 + $0x158] sm:$0xff] (%p6312_p5), %v3711_v41   ;;  %v3731_v3 = vld [vmem:[%s6681_s6 + $0x100] sm:$0xff] (%p6312_p5)   ;;  %v3735_v19 = vld [vmem:[%s6681_s6 + $0x108] sm:$0xff] (%p6312_p5)  }
 0x238   : > { %v6211_v48 = vpop.eup %6210  ;;  %6230 = vrcp.f32 %v2636_v2  ;;  %v2634_v24 = vadd.f32 1.0, %v6209_v17  ;;  %3716 = vst [vmem:[%s7210_s20 + $0x160] sm:$0xff] (%p6312_p5), %v3715_v9   ;;  %3720 = vst [vmem:[%s7210_s20 + $0x168] sm:$0xff] (%p6312_p5), %v3719_v56   ;;  %v3739_v47 = vld [vmem:[%s6681_s6 + $0x110] sm:$0xff] (%p6312_p5)   ;;  %v3743_v29 = vld [vmem:[%s6681_s6 + $0x118] sm:$0xff] (%p6312_p5)  }
 0x239   : > { %v6213_v16 = vpop.eup %6212  ;;  %6232 = vrcp.f32 %v3352_v58  ;;  %v3350_v1 = vadd.f32 1.0, %v6211_v48  ;;  %3724 = vst [vmem:[%s7210_s20 + $0x170] sm:$0xff] (%p6312_p5), %v3723_v30   ;;  %3728 = vst [vmem:[%s7210_s20 + $0x178] sm:$0xff] (%p6312_p5), %v3727_v12   ;;  %v3747_v38 = vld [vmem:[%s6681_s6 + $0x120] sm:$0xff] (%p6312_p5)   ;;  %v3751_v25 = vld [vmem:[%s6681_s6 + $0x128] sm:$0xff] (%p6312_p5)  }
 0x23a   : > { %v6215_v28 = vpop.eup %6214  ;;  %6234 = vrcp.f32 %v2634_v24  ;;  %3732 = vst [vmem:[%s7210_s20 + $0x200] sm:$0xff] (%p6312_p5), %v3731_v3   ;;  %3736 = vst [vmem:[%s7210_s20 + $0x208] sm:$0xff] (%p6312_p5), %v3735_v19   ;;  %v3755_v2 = vld [vmem:[%s6681_s6 + $0x130] sm:$0xff] (%p6312_p5)   ;;  %v3759_v17 = vld [vmem:[%s6681_s6 + $0x138] sm:$0xff] (%p6312_p5)  }
 0x23b   : > { %v6217_v49 = vpop.eup %6216  ;;  %6236 = vrcp.f32 %v3350_v1  ;;  %3740 = vst [vmem:[%s7210_s20 + $0x210] sm:$0xff] (%p6312_p5), %v3739_v47   ;;  %3744 = vst [vmem:[%s7210_s20 + $0x218] sm:$0xff] (%p6312_p5), %v3743_v29   ;;  %v3763_v58 = vld [vmem:[%s6681_s6 + $0x140] sm:$0xff] (%p6312_p5)   ;;  %v3767_v48 = vld [vmem:[%s6681_s6 + $0x148] sm:$0xff] (%p6312_p5)  }
 0x23c   : > { %v6219_v46 = vpop.eup %6218  ;;  %v5243_v32 = vpack.c.bf16 %v6217_v49, %v6187_v18  ;;  %v3675_v18 = vld [vmem:[%s6681_s6 + $0x90] sm:$0xff] (%p6312_p5)   ;;  %3748 = vst [vmem:[%s7210_s20 + $0x220] sm:$0xff] (%p6312_p5), %v3747_v38   ;;  %3752 = vst [vmem:[%s7210_s20 + $0x228] sm:$0xff] (%p6312_p5), %v3751_v25  }
 0x23d   : > { %v6221_v55 = vpop.eup %6220  ;;  %v5158_v23 = vpack.c.bf16 %v6219_v46, %v6213_v16  ;;  %3676 = vst [vmem:[%s7210_s20 + $0x110] sm:$0xff] (%p6312_p5), %v3675_v18   ;;  %3756 = vst [vmem:[%s7210_s20 + $0x230] sm:$0xff] (%p6312_p5), %v3755_v2   ;;  %v3771_v24 = vld [vmem:[%s6681_s6 + $0x150] sm:$0xff] (%p6312_p5)   ;;  %v3775_v16 = vld [vmem:[%s6681_s6 + $0x158] sm:$0xff] (%p6312_p5)  }
 0x23e   : > { %v6223_v20 = vpop.eup %6222  ;;  %5315 = vst [vmem:[%s6681_s6 + $0x1e8] sm:$0xff] %v5243_v32   ;;  %v5238_v39 = vpack.c.bf16 %v6221_v55, %v6215_v28  ;;  %3760 = vst [vmem:[%s7210_s20 + $0x238] sm:$0xff] (%p6312_p5), %v3759_v17   ;;  %v3783_v28 = vld [vmem:[%s6681_s6 + $0x168] sm:$0xff] (%p6312_p5)   ;;  %v3795_v32 = vld [vmem:[%s6681_s6 + $0x180] sm:$0xff] (%p6312_p5)  }
 0x23f   : > { %v6225_v11 = vpop.eup %6224  ;;  %5298 = vst [vmem:[%s6681_s6 + $0x160] sm:$0xff] %v5158_v23   ;;  %3764 = vst [vmem:[%s7210_s20 + $0x240] sm:$0xff] (%p6312_p5), %v3763_v58   ;;  %v3799_v55 = vld [vmem:[%s6681_s6 + $0x188] sm:$0xff] (%p6312_p5)   ;;  %v3803_v23 = vld [vmem:[%s6681_s6 + $0x190] sm:$0xff] (%p6312_p5)  }
 0x240   : > { %v6227_v51 = vpop.eup %6226  ;;  %5314 = vst [vmem:[%s6681_s6 + $0x1e0] sm:$0xff] %v5238_v39   ;;  %3768 = vst [vmem:[%s7210_s20 + $0x248] sm:$0xff] (%p6312_p5), %v3767_v48   ;;  %v3811_v39 = vld [vmem:[%s6681_s6 + $0x1a0] sm:$0xff] (%p6312_p5)  }
 0x241   : > { %v6229_v61 = vpop.eup %6228  ;;  %3772 = vst [vmem:[%s7210_s20 + $0x250] sm:$0xff] (%p6312_p5), %v3771_v24   ;;  %3776 = vst [vmem:[%s7210_s20 + $0x258] sm:$0xff] (%p6312_p5), %v3775_v16  }
 0x242   : > { %v6231_v14 = vpop.eup %6230  ;;  %3584 = sbr.rel (!%p6312_p5) target bundleno = 593 (0x251), region = 77  ;;  %3784 = vst [vmem:[%s7210_s20 + $0x268] sm:$0xff] (%p6312_p5), %v3783_v28   ;;  %3796 = vst [vmem:[%s7210_s20 + $0x300] sm:$0xff] (%p6312_p5), %v3795_v32  }
 0x243   : > { %v6233_v36 = vpop.eup %6232  ;;  %v5173_v42 = vpack.c.bf16 %v6231_v14, %v6223_v20  ;;  %3800 = vst [vmem:[%s7210_s20 + $0x308] sm:$0xff] (%p6312_p5), %v3799_v55   ;;  %3804 = vst [vmem:[%s7210_s20 + $0x310] sm:$0xff] (%p6312_p5), %v3803_v23   ;;  %v3807_v20 = vld [vmem:[%s6681_s6 + $0x198] sm:$0xff] (%p6312_p5)   ;;  %v3827_v14 = vld [vmem:[%s6681_s6 + $0x1c0] sm:$0xff] (%p6312_p5)  }
 0x244   : > { %v6235_v60 = vpop.eup %6234  ;;  %v5253_v37 = vpack.c.bf16 %v6233_v36, %v6225_v11  ;;  %v3815_v11 = vld [vmem:[%s6681_s6 + $0x1a8] sm:$0xff] (%p6312_p5)   ;;  %3808 = vst [vmem:[%s7210_s20 + $0x318] sm:$0xff] (%p6312_p5), %v3807_v20   ;;  %3812 = vst [vmem:[%s7210_s20 + $0x320] sm:$0xff] (%p6312_p5), %v3811_v39  }
 0x245   : > { %v6237_v53 = vpop.eup %6236  ;;  %5301 = vst [vmem:[%s6681_s6 + $0x178] sm:$0xff] %v5173_v42   ;;  %v5168_v63 = vpack.c.bf16 %v6235_v60, %v6227_v51  ;;  %3816 = vst [vmem:[%s7210_s20 + $0x328] sm:$0xff] (%p6312_p5), %v3815_v11   ;;  %v3819_v51 = vld [vmem:[%s6681_s6 + $0x1b0] sm:$0xff] (%p6312_p5)   ;;  %v3831_v36 = vld [vmem:[%s6681_s6 + $0x1c8] sm:$0xff] (%p6312_p5)  }
 0x246   : > { %5317 = vst [vmem:[%s6681_s6 + $0x1f8] sm:$0xff] %v5253_v37   ;;  %v5248_v50 = vpack.c.bf16 %v6237_v53, %v6229_v61  ;;  %v3779_v1 = vld [vmem:[%s6681_s6 + $0x160] sm:$0xff] (%p6312_p5)   ;;  %v3823_v61 = vld [vmem:[%s6681_s6 + $0x1b8] sm:$0xff] (%p6312_p5)   ;;  %3820 = vst [vmem:[%s7210_s20 + $0x330] sm:$0xff] (%p6312_p5), %v3819_v51  }
 0x247   : > { %5300 = vst [vmem:[%s6681_s6 + $0x170] sm:$0xff] %v5168_v63   ;;  %3780 = vst [vmem:[%s7210_s20 + $0x260] sm:$0xff] (%p6312_p5), %v3779_v1   ;;  %v3835_v42 = vld [vmem:[%s6681_s6 + $0x1d0] sm:$0xff] (%p6312_p5)   ;;  %v3839_v60 = vld [vmem:[%s6681_s6 + $0x1d8] sm:$0xff] (%p6312_p5)  }
 0x248   : > { %5316 = vst [vmem:[%s6681_s6 + $0x1f0] sm:$0xff] %v5248_v50   ;;  %3824 = vst [vmem:[%s7210_s20 + $0x338] sm:$0xff] (%p6312_p5), %v3823_v61   ;;  %v3843_v37 = vld [vmem:[%s6681_s6 + $0x1e0] sm:$0xff] (%p6312_p5)   ;;  %v3847_v53 = vld [vmem:[%s6681_s6 + $0x1e8] sm:$0xff] (%p6312_p5)  }
 0x249   : > { %3828 = vst [vmem:[%s7210_s20 + $0x340] sm:$0xff] %v3827_v14   ;;  %3832 = vst [vmem:[%s7210_s20 + $0x348] sm:$0xff] %v3831_v36  }
 0x24a   : > { %3836 = vst [vmem:[%s7210_s20 + $0x350] sm:$0xff] %v3835_v42   ;;  %3840 = vst [vmem:[%s7210_s20 + $0x358] sm:$0xff] %v3839_v60  }
 0x24b   : > { %3844 = vst [vmem:[%s7210_s20 + $0x360] sm:$0xff] %v3843_v37   ;;  %3848 = vst [vmem:[%s7210_s20 + $0x368] sm:$0xff] %v3847_v53  }
 0x24c   : > { %v3791_v46 = vld [vmem:[%s6681_s6 + $0x178] sm:$0xff]  }
 0x24d   : > { %3792 = vst [vmem:[%s7210_s20 + $0x278] sm:$0xff] %v3791_v46   ;;  %v3855_v50 = vld [vmem:[%s6681_s6 + $0x1f8] sm:$0xff]  }
 0x24e   : > { %v3787_v49 = vld [vmem:[%s6681_s6 + $0x170] sm:$0xff]   ;;  %3856 = vst [vmem:[%s7210_s20 + $0x378] sm:$0xff] %v3855_v50  }
 0x24f   : > { %3788 = vst [vmem:[%s7210_s20 + $0x270] sm:$0xff] %v3787_v49   ;;  %v3851_v63 = vld [vmem:[%s6681_s6 + $0x1f0] sm:$0xff]  }
 0x250   : > { %3852 = vst [vmem:[%s7210_s20 + $0x370] sm:$0xff] %v3851_v63  }
 0x251 PF: > { %p10_p10 = scmp.ge.s32.totalorder %s6299_s16, 4   ;;  %s7390_s12 = smov %s6256_s13 }
 0x252   : > { %s7391_s13 = smov %s6310_s19  ;;  %s7392_s14 = smov %s6299_s16 }
 0x253   :  { %12 = sbr.rel (!%p10_p10) target bundleno = 2 (0x2), region = 161 }

</bundles_post_ra>
